<compile_context>
chip_gen: v7x
topology: tpu7x:2x2x1
jax: 0.10.0
libtpu: 0.0.40
codegen_flags: <defaults>
</compile_context>

<pallas_src>
import functools
import math

import jax
import jax.numpy as jnp
from jax import lax
from jax.experimental import pallas as pl
from jax.experimental.pallas import tpu as pltpu

HP = lax.Precision.HIGHEST  # identical f32 matmul precision in kernels and reference


def _layernorm(x, w, b, eps=1e-5):
    mu = jnp.mean(x, axis=-1, keepdims=True)
    var = jnp.mean((x - mu) ** 2, axis=-1, keepdims=True)
    return (x - mu) * lax.rsqrt(var + eps) * w + b


# ---------------------------------------------------------------------------
# Kernel 1: fused TransformerEncoderLayer, B images per grid step
# ---------------------------------------------------------------------------
def _encoder_block_kernel(x_ref, wqkv_ref, bqkv_ref, wo_ref, w1_ref, w2_ref, vec_ref,
                          o_ref, *, nhead):
    Bimg, S, H = x_ref.shape
    dh = H // nhead
    scale = 1.0 / math.sqrt(dh)
    R = Bimg * S

    x2d = x_ref[...].reshape(R, H)                                       # (B*S, H)

    # Fused QKV projection: one (B*S, H) x (H, 3H) matmul.
    qkv = jnp.dot(x2d, wqkv_ref[...], precision=HP,
                  preferred_element_type=jnp.float32) + bqkv_ref[...]    # (B*S, 3H)

    def split_heads(base):
        # -> (nhead*B, S, dh), head-major / image-minor batch ordering.
        parts = [qkv[:, base + h * dh: base + (h + 1) * dh] for h in range(nhead)]
        return jnp.concatenate(parts, axis=0).reshape(nhead * Bimg, S, dh)

    qh = split_heads(0) * scale
    kh = split_heads(H)
    vh = split_heads(2 * H)

    # Single batched attention (batch = nhead*B) instead of a per-head Python loop.
    s = jnp.einsum("bqd,bkd->bqk", qh, kh, precision=HP,
                   preferred_element_type=jnp.float32)                   # (nhead*B, S, S)
    s = s - jnp.max(s, axis=-1, keepdims=True)
    p = jnp.exp(s)
    p = p / jnp.sum(p, axis=-1, keepdims=True)
    ctx = jnp.einsum("bqk,bkd->bqd", p, vh, precision=HP,
                     preferred_element_type=jnp.float32)                 # (nhead*B, S, dh)
    ctx = ctx.reshape(nhead, R, dh)
    attn = jnp.concatenate([ctx[h] for h in range(nhead)], axis=-1)      # (B*S, H)

    bo = vec_ref[0:1]
    ln1w = vec_ref[1:2]
    ln1b = vec_ref[2:3]
    b1 = vec_ref[3:4]
    b2 = vec_ref[4:5]
    ln2w = vec_ref[5:6]
    ln2b = vec_ref[6:7]

    attn = jnp.dot(attn, wo_ref[...], precision=HP,
                   preferred_element_type=jnp.float32) + bo
    x1 = _layernorm(x2d + attn, ln1w, ln1b)
    ff = jnp.dot(x1, w1_ref[...], precision=HP, preferred_element_type=jnp.float32) + b1
    ff = jnp.maximum(ff, 0.0)
    ff = jnp.dot(ff, w2_ref[...], precision=HP, preferred_element_type=jnp.float32) + b2
    x2 = _layernorm(x1 + ff, ln2w, ln2b)
    o_ref[...] = x2.reshape(Bimg, S, H).astype(o_ref.dtype)


def encoder_layer(xb, kp, *, nhead, block_images=32):
    N, S, H = xb.shape
    # Images per grid step: big enough to fill the MXU sublane dim, but keep >= 2
    # grid steps when N allows it so v7x's two TensorCores both get work.
    B = max(1, min(block_images, pl.cdiv(N, 2)))
    nblk = pl.cdiv(N, B)
    Npad = nblk * B
    if Npad != N:
        xb = jnp.concatenate([xb, jnp.zeros((Npad - N, S, H), xb.dtype)], axis=0)

    # Packed kernel-side weight layouts (built once under jit, outside the kernel).
    wqkv = jnp.concatenate([kp["wq"], kp["wk"], kp["wv"]], axis=1)        # (H, 3H)
    bqkv = jnp.concatenate([kp["bq"], kp["bk"], kp["bv"]], axis=1)        # (1, 3H)
    vecs = jnp.concatenate([kp["bo"], kp["ln1w"], kp["ln1b"], kp["b1"], kp["b2"],
                            kp["ln2w"], kp["ln2b"],
                            jnp.zeros((1, H), jnp.float32)], axis=0)      # (8, H)

    weights = [wqkv, bqkv, kp["wo"], kp["w1"], kp["w2"], vecs]
    # All weights are 2-D with constant index_maps => DMA'd once, resident in VMEM.
    w_specs = [pl.BlockSpec(w.shape, lambda i: (0, 0)) for w in weights]

    F = kp["w1"].shape[1]
    flops = 2 * Npad * (3 * S * H * H + 2 * nhead * S * S * (H // nhead)
                        + S * H * H + 2 * S * H * F)
    cost = pl.CostEstimate(
        flops=int(flops),
        transcendentals=int(Npad * nhead * S * S),
        bytes_accessed=int(4 * (2 * Npad * S * H + sum(int(w.size) for w in weights))),
    )
    out = pl.pallas_call(
        functools.partial(_encoder_block_kernel, nhead=nhead),
        out_shape=jax.ShapeDtypeStruct((Npad, S, H), xb.dtype),
        grid=(nblk,),
        in_specs=[pl.BlockSpec((B, S, H), lambda i: (i, 0, 0))] + w_specs,
        out_specs=pl.BlockSpec((B, S, H), lambda i: (i, 0, 0)),
        compiler_params=pltpu.CompilerParams(dimension_semantics=("parallel",)),
        cost_estimate=cost,
    )(xb, *weights)
    return out[:N]


# ---------------------------------------------------------------------------
# Kernel 2: fused SinkhornScorer 'eval' path, P (support, query) pairs per step
# ---------------------------------------------------------------------------
def _sinkhorn_block_kernel(s_ref, q_ref, dvec_ref, o_ref, *, iters, reg, temperature):
    s = s_ref[0]                        # (m+1, H): support slots, last row = zero pad
    q = q_ref[...]                      # (P, n+1, H): query slots, last row = zero pad
    mp1 = s.shape[0]
    P, np1, H = q.shape
    m = mp1 - 1
    n = np1 - 1

    # CosineScorer(temperature=1).score(..., get_diag=False); zero pad row -> zero cos.
    sn = s / jnp.maximum(jnp.sqrt(jnp.sum(s * s, axis=-1, keepdims=True)), 1e-12)
    qn = q / jnp.maximum(jnp.sqrt(jnp.sum(q * q, axis=-1, keepdims=True)), 1e-12)

    # scores_t[p, y, x] = cos(query_p_y, support_x): transposed layout (query on
    # sublanes, support on lanes); the Sinkhorn below keeps the support/query update
    # order of the reference, so results are identical.
    snb = jnp.broadcast_to(sn, (P, mp1, H))
    scores_t = jnp.einsum("pyh,pxh->pyx", qn, snb, precision=HP,
                          preferred_element_type=jnp.float32)             # (P, n+1, m+1)

    # Dustbin scores: tanh(Linear(LayerNorm(.))) — shared scorer (im_blocks=None).
    lnw = dvec_ref[0:1]
    lnb = dvec_ref[1:2]
    dw = dvec_ref[2:3]                  # (1, H)
    db = dvec_ref[3:4, 0:1]             # (1, 1)

    ln_s = _layernorm(s, lnw, lnb)                                        # (m+1, H)
    ln_q = _layernorm(q, lnw, lnb)                                        # (P, n+1, H)
    alpha_s = jnp.tanh(
        lax.dot_general(dw, ln_s, (((1,), (1,)), ((), ())), precision=HP,
                        preferred_element_type=jnp.float32) + db)         # (1, m+1)
    alpha_s = alpha_s.reshape(1, 1, mp1)
    alpha_q = jnp.tanh(jnp.sum(ln_q * dw, axis=-1, keepdims=True) + db)   # (P, n+1, 1)

    # couplings_T[p, y, x]: y<n,x<m -> cos; x==m col -> query alpha; y==n row ->
    # support alpha; corner -> -100.  Built with iota masks (no concatenations).
    x_idx = lax.broadcasted_iota(jnp.int32, (1, np1, mp1), 2)
    y_idx = lax.broadcasted_iota(jnp.int32, (1, np1, mp1), 1)
    dust_x = x_idx == m
    dust_y = y_idx == n
    couplings = jnp.where(dust_x, alpha_q, scores_t)
    couplings = jnp.where(dust_y, alpha_s, couplings)
    couplings = jnp.where(jnp.logical_and(dust_x, dust_y), -100.0, couplings)

    norm_c = -math.log(m + n)
    log_mu = jnp.where(lax.broadcasted_iota(jnp.int32, (1, 1, mp1), 2) == m,
                       math.log(n) + norm_c, norm_c).astype(jnp.float32)  # (1, 1, m+1)
    log_nu = jnp.where(lax.broadcasted_iota(jnp.int32, (1, np1, 1), 1) == n,
                       math.log(m) + norm_c, norm_c).astype(jnp.float32)  # (1, n+1, 1)

    def _lse(mat, axis):
        mx = jnp.max(mat, axis=axis, keepdims=True)
        return mx + jnp.log(jnp.sum(jnp.exp(mat - mx), axis=axis, keepdims=True))

    u = jnp.zeros((P, 1, mp1), jnp.float32)     # support-side potential
    v = jnp.zeros((P, np1, 1), jnp.float32)     # query-side potential
    for _ in range(iters):                      # log-space Sinkhorn (reg-damped updates)
        Mm = (couplings + u + v) / reg
        u = u + reg * (log_mu - _lse(Mm, axis=1))   # LSE over query axis
        Mm = (couplings + u + v) / reg
        v = v + reg * (log_nu - _lse(Mm, axis=2))   # LSE over support axis

    Z = jnp.exp((couplings + u + v) / reg)
    # Padded cos entries are exactly zero, so a full sum equals sum over [:n, :m].
    W = scores_t * Z                                                       # (P, n+1, m+1)
    Wy = jnp.sum(W, axis=1, keepdims=True).reshape(P, mp1)                 # (P, m+1)
    ones_row = jnp.ones((1, mp1), jnp.float32)
    tot = lax.dot_general(ones_row, Wy, (((1,), (1,)), ((), ())), precision=HP,
                          preferred_element_type=jnp.float32)              # (1, P) lane-dense
    o_ref[0, 0] = (tot / temperature).astype(o_ref.dtype)


def sinkhorn_scores(support, query, kp, *, iters, reg, temperature, pair_block=64):
    Ns, m, H = support.shape
    Nq, n, _ = query.shape
    P = max(1, min(pair_block, Nq))
    nqb = pl.cdiv(Nq, P)
    Nqpad = nqb * P

    # Append a zero "dustbin" slot so the cosine matmul directly yields the padded
    # (m+1, n+1) coupling canvas; pad the query axis to a multiple of P.
    support_p = jnp.pad(support, ((0, 0), (0, 1), (0, 0)))
    query_p = jnp.pad(query, ((0, Nqpad - Nq), (0, 1), (0, 0)))

    dvecs = jnp.concatenate(
        [kp["dlnw"], kp["dlnb"], kp["dw"],
         jnp.pad(kp["db"], ((0, 0), (0, H - 1))),
         jnp.zeros((4, H), jnp.float32)], axis=0)                          # (8, H)

    flops = 2 * Ns * Nqpad * ((m + 1) * (n + 1) * H + (m + n + 2) * H
                              + 4 * iters * (m + 1) * (n + 1))
    cost = pl.CostEstimate(
        flops=int(flops),
        transcendentals=int(Ns * Nqpad * (2 * iters + 2) * (m + 1) * (n + 1)),
        bytes_accessed=int(4 * (Ns * (m + 1) * H + Ns * Nqpad * (n + 1) * H
                                + Ns * Nqpad + dvecs.size)),
    )
    out = pl.pallas_call(
        functools.partial(_sinkhorn_block_kernel, iters=iters, reg=reg,
                          temperature=temperature),
        out_shape=jax.ShapeDtypeStruct((Ns, nqb, 1, P), jnp.float32),
        grid=(Ns, nqb),
        in_specs=[pl.BlockSpec((1, m + 1, H), lambda i, j: (i, 0, 0)),   # support[i]
                  pl.BlockSpec((P, n + 1, H), lambda i, j: (j, 0, 0)),   # query block j
                  pl.BlockSpec((8, H), lambda i, j: (0, 0))],            # packed params
        out_specs=pl.BlockSpec((1, 1, 1, P), lambda i, j: (i, j, 0, 0)),
        compiler_params=pltpu.CompilerParams(dimension_semantics=("parallel", "parallel")),
        cost_estimate=cost,
    )(support_p, query_p, dvecs)
    return out.reshape(Ns, Nqpad)[:, :Nq]                                  # (Ns, Nq)


# ---------------------------------------------------------------------------
# Full TransformerAgg.forward
# ---------------------------------------------------------------------------
def transformer_agg_forward(x, params, *, n_shot, nhead=4, iters=10, reg=0.1,
                            temperature=0.1, block_images=32, pair_block=64):
    n_way, n_total, S, H = x.shape
    N = n_way * n_total
    xb = x.reshape(N, S, H)                 # batch-first == flatten(0,1).transpose(0,1)
    enc = encoder_layer(xb, params, nhead=nhead, block_images=block_images)
    enc = enc.reshape(n_way, n_total, S, H)
    Ns = n_way * n_shot
    Nq = n_way * (n_total - n_shot)
    support = enc[:, :n_shot].reshape(Ns, S, H)
    query = enc[:, n_shot:].reshape(Nq, S, H)
    # TODO(synk): index support/query straight from `enc` via BlockSpec index_maps to
    # skip this (tiny) intermediate HBM round-trip.
    pair = sinkhorn_scores(support, query, params, iters=iters, reg=reg,
                           temperature=temperature, pair_block=pair_block)
    return pair.reshape(n_way, n_shot, Nq).mean(axis=1).T                  # (Nq, n_way)


# ---------------------------------------------------------------------------
# Deterministic parameters (kernel-ready layouts: pre-transposed, biases 2-D)
# ---------------------------------------------------------------------------
def init_params(key, hidden):
    H = hidden
    ks = jax.random.split(key, 16)

    def nrm(k, shape, scale):
        return scale * jax.random.normal(k, shape, dtype=jnp.float32)

    w_in = nrm(ks[0], (3 * H, H), 0.2)
    b_in = nrm(ks[1], (3 * H,), 0.1)
    w_out = nrm(ks[2], (H, H), 0.2)
    b_out = nrm(ks[3], (H,), 0.1)
    ln1w = 1.0 + nrm(ks[4], (H,), 0.05)
    ln1b = nrm(ks[5], (H,), 0.05)
    w1 = nrm(ks[6], (H, H), 0.2)                 # dim_feedforward == hidden_size
    b1 = nrm(ks[7], (H,), 0.1)
    w2 = nrm(ks[8], (H, H), 0.2)
    b2 = nrm(ks[9], (H,), 0.1)
    ln2w = 1.0 + nrm(ks[10], (H,), 0.05)
    ln2b = nrm(ks[11], (H,), 0.05)
    dlnw = 1.0 + nrm(ks[12], (H,), 0.05)
    dlnb = nrm(ks[13], (H,), 0.05)
    dw = nrm(ks[14], (1, H), 0.3)                # nn.Linear(H, 1).weight
    db = nrm(ks[15], (1,), 0.1)

    return dict(
        wq=w_in[:H].T, wk=w_in[H:2 * H].T, wv=w_in[2 * H:].T,
        bq=b_in[:H].reshape(1, H), bk=b_in[H:2 * H].reshape(1, H), bv=b_in[2 * H:].reshape(1, H),
        wo=w_out.T, bo=b_out.reshape(1, H),
        ln1w=ln1w.reshape(1, H), ln1b=ln1b.reshape(1, H),
        w1=w1.T, b1=b1.reshape(1, H),
        w2=w2.T, b2=b2.reshape(1, H),
        ln2w=ln2w.reshape(1, H), ln2b=ln2b.reshape(1, H),
        dlnw=dlnw.reshape(1, H), dlnb=dlnb.reshape(1, H),
        dw=dw, db=db.reshape(1, 1),
    )


# ---------------------------------------------------------------------------
# Pure-JAX reference of the full forward (mirrors the PyTorch code)
# ---------------------------------------------------------------------------
def reference_forward(x, p, *, n_shot, nhead=4, iters=10, reg=0.1, temperature=0.1):
    n_way, n_total, S, H = x.shape
    N = n_way * n_total
    dh = H // nhead
    xb = x.reshape(N, S, H).astype(jnp.float32)

    def lin(t, w, b):
        return jnp.einsum("nsh,hk->nsk", t, w, precision=HP) + b

    q = lin(xb, p["wq"], p["bq"]).reshape(N, S, nhead, dh)
    k = lin(xb, p["wk"], p["bk"]).reshape(N, S, nhead, dh)
    v = lin(xb, p["wv"], p["bv"]).reshape(N, S, nhead, dh)
    logits = jnp.einsum("nqhd,nkhd->nhqk", q, k, precision=HP) / math.sqrt(dh)
    attn = jax.nn.softmax(logits, axis=-1)
    ctx = jnp.einsum("nhqk,nkhd->nqhd", attn, v, precision=HP).reshape(N, S, H)
    ctx = lin(ctx, p["wo"], p["bo"])
    x1 = _layernorm(xb + ctx, p["ln1w"], p["ln1b"])
    ff = jax.nn.relu(lin(x1, p["w1"], p["b1"]))
    ff = lin(ff, p["w2"], p["b2"])
    enc = _layernorm(x1 + ff, p["ln2w"], p["ln2b"]).reshape(n_way, n_total, S, H)

    Ns = n_way * n_shot
    Nq = n_way * (n_total - n_shot)
    support = enc[:, :n_shot].reshape(Ns, S, H)
    query = enc[:, n_shot:].reshape(Nq, S, H)
    xs = jnp.repeat(support, Nq, axis=0)          # (b, m, H), b = Ns*Nq
    ys = jnp.tile(query, (Ns, 1, 1))              # (b, n, H)
    b, m, n = Ns * Nq, S, S
    xn = xs / jnp.maximum(jnp.linalg.norm(xs, axis=-1, keepdims=True), 1e-12)
    yn = ys / jnp.maximum(jnp.linalg.norm(ys, axis=-1, keepdims=True), 1e-12)
    scores = jnp.einsum("bmh,bnh->bmn", xn, yn, precision=HP)

    def dust(t):
        tl = _layernorm(t, p["dlnw"], p["dlnb"])
        return jnp.tanh(jnp.einsum("bmh,oh->bmo", tl, p["dw"], precision=HP) + p["db"])

    ax = dust(xs)                                 # (b, m, 1)
    ay = dust(ys)                                 # (b, n, 1)
    couplings = jnp.concatenate(
        [jnp.concatenate([scores, ax], axis=2),
         jnp.concatenate([jnp.swapaxes(ay, 1, 2), jnp.full((b, 1, 1), -100.0)], axis=2)],
        axis=1)
    norm_c = -math.log(m + n)
    log_mu = jnp.concatenate([jnp.full((b, m), norm_c),
                              jnp.full((b, 1), math.log(n) + norm_c)], axis=1)
    log_nu = jnp.concatenate([jnp.full((b, n), norm_c),
                              jnp.full((b, 1), math.log(m) + norm_c)], axis=1)
    u = jnp.zeros_like(log_mu)
    v = jnp.zeros_like(log_nu)
    for _ in range(iters):
        M = (couplings + u[:, :, None] + v[:, None, :]) / reg
        u = u + reg * (log_mu - jax.scipy.special.logsumexp(M, axis=2))
        M = (couplings + u[:, :, None] + v[:, None, :]) / reg
        v = v + reg * (log_nu - jax.scipy.special.logsumexp(M, axis=1))
    Z = jnp.exp((couplings + u[:, :, None] + v[:, None, :]) / reg)
    final = jnp.sum(scores * Z[:, :m, :n], axis=(1, 2)) / temperature
    return final.reshape(n_way, n_shot, Nq).mean(axis=1).T


# ---------------------------------------------------------------------------
if __name__ == "__main__":
    N_WAY, N_TOTAL, N_SHOT = 2, 3, 1
    NUM_SLOT, HIDDEN = 8, 32                       # hidden_size=32, nhead=4 (divides evenly)

    root = jax.random.PRNGKey(0)
    kx, kp = jax.random.split(root)
    x = jax.random.normal(kx, (N_WAY, N_TOTAL, NUM_SLOT, HIDDEN), dtype=jnp.float32)
    params = init_params(kp, HIDDEN)

    fwd = jax.jit(functools.partial(transformer_agg_forward, n_shot=N_SHOT))
    out = jax.block_until_ready(fwd(x, params))

    ref = reference_forward(x, params, n_shot=N_SHOT)
    assert out.shape == (N_WAY * (N_TOTAL - N_SHOT), N_WAY), out.shape
    assert jnp.allclose(out, ref, rtol=2e-3, atol=2e-3), (out, ref)

    print("KERNEL_OK")
</pallas_src>

<mosaic_0001>
module attributes {stable_mosaic.version = 11 : i64} {
  func.func @_encoder_block_kernel(%arg0: i32, %arg1: memref<3x8x32xf32, #tpu.memory_space<vmem>>, %arg2: memref<32x96xf32, #tpu.memory_space<vmem>>, %arg3: memref<1x96xf32, #tpu.memory_space<vmem>>, %arg4: memref<32x32xf32, #tpu.memory_space<vmem>>, %arg5: memref<32x32xf32, #tpu.memory_space<vmem>>, %arg6: memref<32x32xf32, #tpu.memory_space<vmem>>, %arg7: memref<8x32xf32, #tpu.memory_space<vmem>>, %arg8: memref<3x8x32xf32, #tpu.memory_space<vmem>>) attributes {dimension_semantics = [#tpu.dimension_semantics<parallel>], iteration_bounds = array<i64: 2>, scalar_prefetch = 0 : i64, scratch_operands = 0 : i64, tpu.core_type = #tpu.core_type<tc>, window_params = [{transform_indices = @transform_0, window_bounds = array<i64: 3, 8, 32>}, {pipeline_mode = #tpu.pipeline_mode<synchronous>, transform_indices = @transform_1, window_bounds = array<i64: 32, 96>}, {pipeline_mode = #tpu.pipeline_mode<synchronous>, transform_indices = @transform_2, window_bounds = array<i64: 1, 96>}, {pipeline_mode = #tpu.pipeline_mode<synchronous>, transform_indices = @transform_3, window_bounds = array<i64: 32, 32>}, {pipeline_mode = #tpu.pipeline_mode<synchronous>, transform_indices = @transform_4, window_bounds = array<i64: 32, 32>}, {pipeline_mode = #tpu.pipeline_mode<synchronous>, transform_indices = @transform_5, window_bounds = array<i64: 32, 32>}, {pipeline_mode = #tpu.pipeline_mode<synchronous>, transform_indices = @transform_6, window_bounds = array<i64: 8, 32>}, {transform_indices = @transform_7, window_bounds = array<i64: 3, 8, 32>}]} {
    %c0 = arith.constant 0 : index
    %c0_0 = arith.constant 0 : index
    %c0_1 = arith.constant 0 : index
    %0 = vector.load %arg1[%c0, %c0_0, %c0_1] : memref<3x8x32xf32, #tpu.memory_space<vmem>>, vector<3x8x32xf32>
    %1 = vector.shape_cast %0 : vector<3x8x32xf32> to vector<24x32xf32>
    %c0_2 = arith.constant 0 : index
    %c0_3 = arith.constant 0 : index
    %2 = vector.load %arg2[%c0_2, %c0_3] : memref<32x96xf32, #tpu.memory_space<vmem>>, vector<32x96xf32>
    %cst = arith.constant dense<0.000000e+00> : vector<24x96xf32>
    %3 = tpu.matmul %1, %2, %cst {dimension_numbers = #tpu.dot_dimension_numbers<[1], [0], [0], [1], [0, 0, 1, 1], [], []>, precision = #tpu.contract_precision<fp32>} : vector<24x32xf32>, vector<32x96xf32>, vector<24x96xf32> -> vector<24x96xf32>
    %c0_4 = arith.constant 0 : index
    %c0_5 = arith.constant 0 : index
    %4 = vector.load %arg3[%c0_4, %c0_5] : memref<1x96xf32, #tpu.memory_space<vmem>>, vector<1x96xf32>
    %5 = vector.broadcast %4 : vector<1x96xf32> to vector<24x96xf32>
    %6 = arith.addf %3, %5 : vector<24x96xf32>
    %7 = vector.extract_strided_slice %6 {offsets = [0, 0], sizes = [24, 8], strides = [1, 1]} : vector<24x96xf32> to vector<24x8xf32>
    %8 = vector.extract_strided_slice %6 {offsets = [0, 8], sizes = [24, 8], strides = [1, 1]} : vector<24x96xf32> to vector<24x8xf32>
    %9 = vector.extract_strided_slice %6 {offsets = [0, 16], sizes = [24, 8], strides = [1, 1]} : vector<24x96xf32> to vector<24x8xf32>
    %10 = vector.extract_strided_slice %6 {offsets = [0, 24], sizes = [24, 8], strides = [1, 1]} : vector<24x96xf32> to vector<24x8xf32>
    %11 = tpu.concatenate %7, %8, %9, %10 in 0 : vector<24x8xf32>, vector<24x8xf32>, vector<24x8xf32>, vector<24x8xf32> -> vector<96x8xf32>
    %12 = vector.shape_cast %11 : vector<96x8xf32> to vector<12x8x8xf32>
    %cst_6 = arith.constant 0.353553385 : f32
    %13 = vector.broadcast %cst_6 : f32 to vector<12x8x8xf32>
    %14 = arith.mulf %12, %13 : vector<12x8x8xf32>
    %15 = vector.extract_strided_slice %6 {offsets = [0, 32], sizes = [24, 8], strides = [1, 1]} : vector<24x96xf32> to vector<24x8xf32>
    %16 = vector.extract_strided_slice %6 {offsets = [0, 40], sizes = [24, 8], strides = [1, 1]} : vector<24x96xf32> to vector<24x8xf32>
    %17 = vector.extract_strided_slice %6 {offsets = [0, 48], sizes = [24, 8], strides = [1, 1]} : vector<24x96xf32> to vector<24x8xf32>
    %18 = vector.extract_strided_slice %6 {offsets = [0, 56], sizes = [24, 8], strides = [1, 1]} : vector<24x96xf32> to vector<24x8xf32>
    %19 = tpu.concatenate %15, %16, %17, %18 in 0 : vector<24x8xf32>, vector<24x8xf32>, vector<24x8xf32>, vector<24x8xf32> -> vector<96x8xf32>
    %20 = vector.shape_cast %19 : vector<96x8xf32> to vector<12x8x8xf32>
    %21 = vector.extract_strided_slice %6 {offsets = [0, 64], sizes = [24, 8], strides = [1, 1]} : vector<24x96xf32> to vector<24x8xf32>
    %22 = vector.extract_strided_slice %6 {offsets = [0, 72], sizes = [24, 8], strides = [1, 1]} : vector<24x96xf32> to vector<24x8xf32>
    %23 = vector.extract_strided_slice %6 {offsets = [0, 80], sizes = [24, 8], strides = [1, 1]} : vector<24x96xf32> to vector<24x8xf32>
    %24 = vector.extract_strided_slice %6 {offsets = [0, 88], sizes = [24, 8], strides = [1, 1]} : vector<24x96xf32> to vector<24x8xf32>
    %25 = tpu.concatenate %21, %22, %23, %24 in 0 : vector<24x8xf32>, vector<24x8xf32>, vector<24x8xf32>, vector<24x8xf32> -> vector<96x8xf32>
    %26 = vector.shape_cast %25 : vector<96x8xf32> to vector<12x8x8xf32>
    "tpu.trace_start"() <{level = 10 : i32, message = "bqd,bkd->bqk"}> : () -> ()
    %cst_7 = arith.constant dense<0.000000e+00> : vector<12x8x8xf32>
    %27 = tpu.matmul %14, %20, %cst_7 {dimension_numbers = #tpu.dot_dimension_numbers<[2], [2], [1], [1], [0, 0, 0, 1, 1, 1], [0], [0]>, precision = #tpu.contract_precision<fp32>} : vector<12x8x8xf32>, vector<12x8x8xf32>, vector<12x8x8xf32> -> vector<12x8x8xf32>
    "tpu.trace_stop"() : () -> ()
    %cst_8 = arith.constant dense<0xFF800000> : vector<12x8xf32>
    %28 = vector.multi_reduction <maximumf>, %27, %cst_8 [2] : vector<12x8x8xf32> to vector<12x8xf32>
    %29 = vector.shape_cast %28 : vector<12x8xf32> to vector<12x8x1xf32>
    %30 = vector.broadcast %29 : vector<12x8x1xf32> to vector<12x8x8xf32>
    %31 = arith.subf %27, %30 : vector<12x8x8xf32>
    %32 = math.exp %31 : vector<12x8x8xf32>
    %cst_9 = arith.constant dense<0.000000e+00> : vector<12x8xf32>
    %33 = vector.multi_reduction <add>, %32, %cst_9 [2] : vector<12x8x8xf32> to vector<12x8xf32>
    %34 = vector.shape_cast %33 : vector<12x8xf32> to vector<12x8x1xf32>
    %35 = vector.broadcast %34 : vector<12x8x1xf32> to vector<12x8x8xf32>
    %36 = arith.divf %32, %35 : vector<12x8x8xf32>
    "tpu.trace_start"() <{level = 10 : i32, message = "bqk,bkd->bqd"}> : () -> ()
    %cst_10 = arith.constant dense<0.000000e+00> : vector<12x8x8xf32>
    %37 = tpu.matmul %36, %26, %cst_10 {dimension_numbers = #tpu.dot_dimension_numbers<[2], [1], [1], [2], [0, 0, 0, 1, 1, 2], [0], [0]>, precision = #tpu.contract_precision<fp32>} : vector<12x8x8xf32>, vector<12x8x8xf32>, vector<12x8x8xf32> -> vector<12x8x8xf32>
    "tpu.trace_stop"() : () -> ()
    %38 = vector.shape_cast %37 : vector<12x8x8xf32> to vector<4x24x8xf32>
    %39 = vector.extract_strided_slice %38 {offsets = [0, 0, 0], sizes = [1, 24, 8], strides = [1, 1, 1]} : vector<4x24x8xf32> to vector<1x24x8xf32>
    %40 = vector.shape_cast %39 : vector<1x24x8xf32> to vector<24x8xf32>
    %41 = vector.extract_strided_slice %38 {offsets = [1, 0, 0], sizes = [1, 24, 8], strides = [1, 1, 1]} : vector<4x24x8xf32> to vector<1x24x8xf32>
    %42 = vector.shape_cast %41 : vector<1x24x8xf32> to vector<24x8xf32>
    %43 = vector.extract_strided_slice %38 {offsets = [2, 0, 0], sizes = [1, 24, 8], strides = [1, 1, 1]} : vector<4x24x8xf32> to vector<1x24x8xf32>
    %44 = vector.shape_cast %43 : vector<1x24x8xf32> to vector<24x8xf32>
    %45 = vector.extract_strided_slice %38 {offsets = [3, 0, 0], sizes = [1, 24, 8], strides = [1, 1, 1]} : vector<4x24x8xf32> to vector<1x24x8xf32>
    %46 = vector.shape_cast %45 : vector<1x24x8xf32> to vector<24x8xf32>
    %47 = tpu.concatenate %40, %42, %44, %46 in 1 : vector<24x8xf32>, vector<24x8xf32>, vector<24x8xf32>, vector<24x8xf32> -> vector<24x32xf32>
    %c0_11 = arith.constant 0 : index
    %c0_12 = arith.constant 0 : index
    %48 = vector.load %arg7[%c0_11, %c0_12] : memref<8x32xf32, #tpu.memory_space<vmem>>, vector<1x32xf32>
    %c1 = arith.constant 1 : index
    %c0_13 = arith.constant 0 : index
    %49 = vector.load %arg7[%c1, %c0_13] : memref<8x32xf32, #tpu.memory_space<vmem>>, vector<1x32xf32>
    %c2 = arith.constant 2 : index
    %c0_14 = arith.constant 0 : index
    %50 = vector.load %arg7[%c2, %c0_14] : memref<8x32xf32, #tpu.memory_space<vmem>>, vector<1x32xf32>
    %c3 = arith.constant 3 : index
    %c0_15 = arith.constant 0 : index
    %51 = vector.load %arg7[%c3, %c0_15] : memref<8x32xf32, #tpu.memory_space<vmem>>, vector<1x32xf32>
    %c4 = arith.constant 4 : index
    %c0_16 = arith.constant 0 : index
    %52 = vector.load %arg7[%c4, %c0_16] : memref<8x32xf32, #tpu.memory_space<vmem>>, vector<1x32xf32>
    %c5 = arith.constant 5 : index
    %c0_17 = arith.constant 0 : index
    %53 = vector.load %arg7[%c5, %c0_17] : memref<8x32xf32, #tpu.memory_space<vmem>>, vector<1x32xf32>
    %c6 = arith.constant 6 : index
    %c0_18 = arith.constant 0 : index
    %54 = vector.load %arg7[%c6, %c0_18] : memref<8x32xf32, #tpu.memory_space<vmem>>, vector<1x32xf32>
    %c0_19 = arith.constant 0 : index
    %c0_20 = arith.constant 0 : index
    %55 = vector.load %arg4[%c0_19, %c0_20] : memref<32x32xf32, #tpu.memory_space<vmem>>, vector<32x32xf32>
    %cst_21 = arith.constant dense<0.000000e+00> : vector<24x32xf32>
    %56 = tpu.matmul %47, %55, %cst_21 {dimension_numbers = #tpu.dot_dimension_numbers<[1], [0], [0], [1], [0, 0, 1, 1], [], []>, precision = #tpu.contract_precision<fp32>} : vector<24x32xf32>, vector<32x32xf32>, vector<24x32xf32> -> vector<24x32xf32>
    %57 = vector.broadcast %48 : vector<1x32xf32> to vector<24x32xf32>
    %58 = arith.addf %56, %57 : vector<24x32xf32>
    %59 = arith.addf %1, %58 : vector<24x32xf32>
    %cst_22 = arith.constant dense<0.000000e+00> : vector<24xf32>
    %60 = vector.multi_reduction <add>, %59, %cst_22 [1] : vector<24x32xf32> to vector<24xf32>
    %61 = vector.shape_cast %60 : vector<24xf32> to vector<24x1xf32>
    %cst_23 = arith.constant 3.200000e+01 : f32
    %62 = vector.broadcast %cst_23 : f32 to vector<24x1xf32>
    %63 = arith.divf %61, %62 : vector<24x1xf32>
    %64 = vector.broadcast %63 : vector<24x1xf32> to vector<24x32xf32>
    %65 = arith.subf %59, %64 : vector<24x32xf32>
    %66 = arith.mulf %65, %65 : vector<24x32xf32>
    %cst_24 = arith.constant dense<0.000000e+00> : vector<24xf32>
    %67 = vector.multi_reduction <add>, %66, %cst_24 [1] : vector<24x32xf32> to vector<24xf32>
    %68 = vector.shape_cast %67 : vector<24xf32> to vector<24x1xf32>
    %cst_25 = arith.constant 3.200000e+01 : f32
    %69 = vector.broadcast %cst_25 : f32 to vector<24x1xf32>
    %70 = arith.divf %68, %69 : vector<24x1xf32>
    %71 = vector.broadcast %63 : vector<24x1xf32> to vector<24x32xf32>
    %72 = arith.subf %59, %71 : vector<24x32xf32>
    %cst_26 = arith.constant 9.99999974E-6 : f32
    %73 = vector.broadcast %cst_26 : f32 to vector<24x1xf32>
    %74 = arith.addf %70, %73 : vector<24x1xf32>
    %75 = math.rsqrt %74 : vector<24x1xf32>
    %76 = vector.broadcast %75 : vector<24x1xf32> to vector<24x32xf32>
    %77 = arith.mulf %72, %76 : vector<24x32xf32>
    %78 = vector.broadcast %49 : vector<1x32xf32> to vector<24x32xf32>
    %79 = arith.mulf %77, %78 : vector<24x32xf32>
    %80 = vector.broadcast %50 : vector<1x32xf32> to vector<24x32xf32>
    %81 = arith.addf %79, %80 : vector<24x32xf32>
    %c0_27 = arith.constant 0 : index
    %c0_28 = arith.constant 0 : index
    %82 = vector.load %arg5[%c0_27, %c0_28] : memref<32x32xf32, #tpu.memory_space<vmem>>, vector<32x32xf32>
    %cst_29 = arith.constant dense<0.000000e+00> : vector<24x32xf32>
    %83 = tpu.matmul %81, %82, %cst_29 {dimension_numbers = #tpu.dot_dimension_numbers<[1], [0], [0], [1], [0, 0, 1, 1], [], []>, precision = #tpu.contract_precision<fp32>} : vector<24x32xf32>, vector<32x32xf32>, vector<24x32xf32> -> vector<24x32xf32>
    %84 = vector.broadcast %51 : vector<1x32xf32> to vector<24x32xf32>
    %85 = arith.addf %83, %84 : vector<24x32xf32>
    %cst_30 = arith.constant 0.000000e+00 : f32
    %86 = vector.broadcast %cst_30 : f32 to vector<24x32xf32>
    %87 = arith.maximumf %85, %86 : vector<24x32xf32>
    %c0_31 = arith.constant 0 : index
    %c0_32 = arith.constant 0 : index
    %88 = vector.load %arg6[%c0_31, %c0_32] : memref<32x32xf32, #tpu.memory_space<vmem>>, vector<32x32xf32>
    %cst_33 = arith.constant dense<0.000000e+00> : vector<24x32xf32>
    %89 = tpu.matmul %87, %88, %cst_33 {dimension_numbers = #tpu.dot_dimension_numbers<[1], [0], [0], [1], [0, 0, 1, 1], [], []>, precision = #tpu.contract_precision<fp32>} : vector<24x32xf32>, vector<32x32xf32>, vector<24x32xf32> -> vector<24x32xf32>
    %90 = vector.broadcast %52 : vector<1x32xf32> to vector<24x32xf32>
    %91 = arith.addf %89, %90 : vector<24x32xf32>
    %92 = arith.addf %81, %91 : vector<24x32xf32>
    %cst_34 = arith.constant dense<0.000000e+00> : vector<24xf32>
    %93 = vector.multi_reduction <add>, %92, %cst_34 [1] : vector<24x32xf32> to vector<24xf32>
    %94 = vector.shape_cast %93 : vector<24xf32> to vector<24x1xf32>
    %cst_35 = arith.constant 3.200000e+01 : f32
    %95 = vector.broadcast %cst_35 : f32 to vector<24x1xf32>
    %96 = arith.divf %94, %95 : vector<24x1xf32>
    %97 = vector.broadcast %96 : vector<24x1xf32> to vector<24x32xf32>
    %98 = arith.subf %92, %97 : vector<24x32xf32>
    %99 = arith.mulf %98, %98 : vector<24x32xf32>
    %cst_36 = arith.constant dense<0.000000e+00> : vector<24xf32>
    %100 = vector.multi_reduction <add>, %99, %cst_36 [1] : vector<24x32xf32> to vector<24xf32>
    %101 = vector.shape_cast %100 : vector<24xf32> to vector<24x1xf32>
    %cst_37 = arith.constant 3.200000e+01 : f32
    %102 = vector.broadcast %cst_37 : f32 to vector<24x1xf32>
    %103 = arith.divf %101, %102 : vector<24x1xf32>
    %104 = vector.broadcast %96 : vector<24x1xf32> to vector<24x32xf32>
    %105 = arith.subf %92, %104 : vector<24x32xf32>
    %cst_38 = arith.constant 9.99999974E-6 : f32
    %106 = vector.broadcast %cst_38 : f32 to vector<24x1xf32>
    %107 = arith.addf %103, %106 : vector<24x1xf32>
    %108 = math.rsqrt %107 : vector<24x1xf32>
    %109 = vector.broadcast %108 : vector<24x1xf32> to vector<24x32xf32>
    %110 = arith.mulf %105, %109 : vector<24x32xf32>
    %111 = vector.broadcast %53 : vector<1x32xf32> to vector<24x32xf32>
    %112 = arith.mulf %110, %111 : vector<24x32xf32>
    %113 = vector.broadcast %54 : vector<1x32xf32> to vector<24x32xf32>
    %114 = arith.addf %112, %113 : vector<24x32xf32>
    %115 = vector.shape_cast %114 : vector<24x32xf32> to vector<3x8x32xf32>
    %c0_39 = arith.constant 0 : index
    %c0_40 = arith.constant 0 : index
    %c0_41 = arith.constant 0 : index
    %116 = vector.load %arg8[%c0_39, %c0_40, %c0_41] : memref<3x8x32xf32, #tpu.memory_space<vmem>>, vector<3x8x32xf32>
    tpu.vector_store %arg8[%c0_39, %c0_40, %c0_41], %115 {strides = array<i32>} : memref<3x8x32xf32, #tpu.memory_space<vmem>>, vector<3x8x32xf32>,
    return
  }
  func.func @transform_0(%arg0: i32) -> (i32, i32, i32) {
    %c0_i32 = arith.constant 0 : i32
    %c0_i32_0 = arith.constant 0 : i32
    %c0_i32_1 = arith.constant 0 : i32
    return %arg0, %c0_i32, %c0_i32_0 : i32, i32, i32
  }
  func.func @transform_1(%arg0: i32) -> (i32, i32) {
    %c0_i32 = arith.constant 0 : i32
    %c0_i32_0 = arith.constant 0 : i32
    %c0_i32_1 = arith.constant 0 : i32
    return %c0_i32, %c0_i32_0 : i32, i32
  }
  func.func @transform_2(%arg0: i32) -> (i32, i32) {
    %c0_i32 = arith.constant 0 : i32
    %c0_i32_0 = arith.constant 0 : i32
    %c0_i32_1 = arith.constant 0 : i32
    return %c0_i32, %c0_i32_0 : i32, i32
  }
  func.func @transform_3(%arg0: i32) -> (i32, i32) {
    %c0_i32 = arith.constant 0 : i32
    %c0_i32_0 = arith.constant 0 : i32
    %c0_i32_1 = arith.constant 0 : i32
    return %c0_i32, %c0_i32_0 : i32, i32
  }
  func.func @transform_4(%arg0: i32) -> (i32, i32) {
    %c0_i32 = arith.constant 0 : i32
    %c0_i32_0 = arith.constant 0 : i32
    %c0_i32_1 = arith.constant 0 : i32
    return %c0_i32, %c0_i32_0 : i32, i32
  }
  func.func @transform_5(%arg0: i32) -> (i32, i32) {
    %c0_i32 = arith.constant 0 : i32
    %c0_i32_0 = arith.constant 0 : i32
    %c0_i32_1 = arith.constant 0 : i32
    return %c0_i32, %c0_i32_0 : i32, i32
  }
  func.func @transform_6(%arg0: i32) -> (i32, i32) {
    %c0_i32 = arith.constant 0 : i32
    %c0_i32_0 = arith.constant 0 : i32
    %c0_i32_1 = arith.constant 0 : i32
    return %c0_i32, %c0_i32_0 : i32, i32
  }
  func.func @transform_7(%arg0: i32) -> (i32, i32, i32) {
    %c0_i32 = arith.constant 0 : i32
    %c0_i32_0 = arith.constant 0 : i32
    %c0_i32_1 = arith.constant 0 : i32
    return %arg0, %c0_i32, %c0_i32_0 : i32, i32, i32
  }
}

module attributes {stable_mosaic.version = 11 : i64} {
  func.func @_sinkhorn_block_kernel(%arg0: i32, %arg1: i32, %arg2: memref<1x9x32xf32, #tpu.memory_space<vmem>>, %arg3: memref<4x9x32xf32, #tpu.memory_space<vmem>>, %arg4: memref<8x32xf32, #tpu.memory_space<vmem>>, %arg5: memref<1x1x1x4xf32, #tpu.memory_space<vmem>>) attributes {dimension_semantics = [#tpu.dimension_semantics<parallel>, #tpu.dimension_semantics<parallel>], iteration_bounds = array<i64: 2, 1>, scalar_prefetch = 0 : i64, scratch_operands = 0 : i64, tpu.core_type = #tpu.core_type<tc>, window_params = [{transform_indices = @transform_0, window_bounds = array<i64: 1, 9, 32>}, {transform_indices = @transform_1, window_bounds = array<i64: 4, 9, 32>}, {pipeline_mode = #tpu.pipeline_mode<synchronous>, transform_indices = @transform_2, window_bounds = array<i64: 8, 32>}, {transform_indices = @transform_3, window_bounds = array<i64: 1, 1, 1, 4>}]} {
    %c0 = arith.constant 0 : index
    %c0_0 = arith.constant 0 : index
    %c0_1 = arith.constant 0 : index
    %0 = vector.load %arg2[%c0, %c0_0, %c0_1] : memref<1x9x32xf32, #tpu.memory_space<vmem>>, vector<1x9x32xf32>
    %1 = vector.shape_cast %0 : vector<1x9x32xf32> to vector<9x32xf32>
    %c0_2 = arith.constant 0 : index
    %c0_3 = arith.constant 0 : index
    %c0_4 = arith.constant 0 : index
    %2 = vector.load %arg3[%c0_2, %c0_3, %c0_4] : memref<4x9x32xf32, #tpu.memory_space<vmem>>, vector<4x9x32xf32>
    %3 = arith.mulf %1, %1 : vector<9x32xf32>
    %cst = arith.constant dense<0.000000e+00> : vector<9xf32>
    %4 = vector.multi_reduction <add>, %3, %cst [1] : vector<9x32xf32> to vector<9xf32>
    %5 = vector.shape_cast %4 : vector<9xf32> to vector<9x1xf32>
    %6 = math.sqrt %5 : vector<9x1xf32>
    %cst_5 = arith.constant 9.99999996E-13 : f32
    %7 = vector.broadcast %cst_5 : f32 to vector<9x1xf32>
    %8 = arith.maximumf %6, %7 : vector<9x1xf32>
    %9 = vector.broadcast %8 : vector<9x1xf32> to vector<9x32xf32>
    %10 = arith.divf %1, %9 : vector<9x32xf32>
    %11 = arith.mulf %2, %2 : vector<4x9x32xf32>
    %cst_6 = arith.constant dense<0.000000e+00> : vector<4x9xf32>
    %12 = vector.multi_reduction <add>, %11, %cst_6 [2] : vector<4x9x32xf32> to vector<4x9xf32>
    %13 = vector.shape_cast %12 : vector<4x9xf32> to vector<4x9x1xf32>
    %14 = math.sqrt %13 : vector<4x9x1xf32>
    %cst_7 = arith.constant 9.99999996E-13 : f32
    %15 = vector.broadcast %cst_7 : f32 to vector<4x9x1xf32>
    %16 = arith.maximumf %14, %15 : vector<4x9x1xf32>
    %17 = vector.broadcast %16 : vector<4x9x1xf32> to vector<4x9x32xf32>
    %18 = arith.divf %2, %17 : vector<4x9x32xf32>
    %19 = vector.shape_cast %10 : vector<9x32xf32> to vector<1x9x32xf32>
    %20 = vector.broadcast %19 : vector<1x9x32xf32> to vector<4x9x32xf32>
    "tpu.trace_start"() <{level = 10 : i32, message = "pyh,pxh->pyx"}> : () -> ()
    %cst_8 = arith.constant dense<0.000000e+00> : vector<4x9x9xf32>
    %21 = tpu.matmul %18, %20, %cst_8 {dimension_numbers = #tpu.dot_dimension_numbers<[2], [2], [1], [1], [0, 0, 0, 1, 1, 1], [0], [0]>, precision = #tpu.contract_precision<fp32>} : vector<4x9x32xf32>, vector<4x9x32xf32>, vector<4x9x9xf32> -> vector<4x9x9xf32>
    "tpu.trace_stop"() : () -> ()
    %c0_9 = arith.constant 0 : index
    %c0_10 = arith.constant 0 : index
    %22 = vector.load %arg4[%c0_9, %c0_10] : memref<8x32xf32, #tpu.memory_space<vmem>>, vector<1x32xf32>
    %c1 = arith.constant 1 : index
    %c0_11 = arith.constant 0 : index
    %23 = vector.load %arg4[%c1, %c0_11] : memref<8x32xf32, #tpu.memory_space<vmem>>, vector<1x32xf32>
    %c2 = arith.constant 2 : index
    %c0_12 = arith.constant 0 : index
    %24 = vector.load %arg4[%c2, %c0_12] : memref<8x32xf32, #tpu.memory_space<vmem>>, vector<1x32xf32>
    %c3 = arith.constant 3 : index
    %c0_13 = arith.constant 0 : index
    %25 = vector.load %arg4[%c3, %c0_13] : memref<8x32xf32, #tpu.memory_space<vmem>>, vector<1x1xf32>
    %cst_14 = arith.constant dense<0.000000e+00> : vector<9xf32>
    %26 = vector.multi_reduction <add>, %1, %cst_14 [1] : vector<9x32xf32> to vector<9xf32>
    %27 = vector.shape_cast %26 : vector<9xf32> to vector<9x1xf32>
    %cst_15 = arith.constant 3.200000e+01 : f32
    %28 = vector.broadcast %cst_15 : f32 to vector<9x1xf32>
    %29 = arith.divf %27, %28 : vector<9x1xf32>
    %30 = vector.broadcast %29 : vector<9x1xf32> to vector<9x32xf32>
    %31 = arith.subf %1, %30 : vector<9x32xf32>
    %32 = arith.mulf %31, %31 : vector<9x32xf32>
    %cst_16 = arith.constant dense<0.000000e+00> : vector<9xf32>
    %33 = vector.multi_reduction <add>, %32, %cst_16 [1] : vector<9x32xf32> to vector<9xf32>
    %34 = vector.shape_cast %33 : vector<9xf32> to vector<9x1xf32>
    %cst_17 = arith.constant 3.200000e+01 : f32
    %35 = vector.broadcast %cst_17 : f32 to vector<9x1xf32>
    %36 = arith.divf %34, %35 : vector<9x1xf32>
    %37 = vector.broadcast %29 : vector<9x1xf32> to vector<9x32xf32>
    %38 = arith.subf %1, %37 : vector<9x32xf32>
    %cst_18 = arith.constant 9.99999974E-6 : f32
    %39 = vector.broadcast %cst_18 : f32 to vector<9x1xf32>
    %40 = arith.addf %36, %39 : vector<9x1xf32>
    %41 = math.rsqrt %40 : vector<9x1xf32>
    %42 = vector.broadcast %41 : vector<9x1xf32> to vector<9x32xf32>
    %43 = arith.mulf %38, %42 : vector<9x32xf32>
    %44 = vector.broadcast %22 : vector<1x32xf32> to vector<9x32xf32>
    %45 = arith.mulf %43, %44 : vector<9x32xf32>
    %46 = vector.broadcast %23 : vector<1x32xf32> to vector<9x32xf32>
    %47 = arith.addf %45, %46 : vector<9x32xf32>
    %cst_19 = arith.constant dense<0.000000e+00> : vector<4x9xf32>
    %48 = vector.multi_reduction <add>, %2, %cst_19 [2] : vector<4x9x32xf32> to vector<4x9xf32>
    %49 = vector.shape_cast %48 : vector<4x9xf32> to vector<4x9x1xf32>
    %cst_20 = arith.constant 3.200000e+01 : f32
    %50 = vector.broadcast %cst_20 : f32 to vector<4x9x1xf32>
    %51 = arith.divf %49, %50 : vector<4x9x1xf32>
    %52 = vector.broadcast %51 : vector<4x9x1xf32> to vector<4x9x32xf32>
    %53 = arith.subf %2, %52 : vector<4x9x32xf32>
    %54 = arith.mulf %53, %53 : vector<4x9x32xf32>
    %cst_21 = arith.constant dense<0.000000e+00> : vector<4x9xf32>
    %55 = vector.multi_reduction <add>, %54, %cst_21 [2] : vector<4x9x32xf32> to vector<4x9xf32>
    %56 = vector.shape_cast %55 : vector<4x9xf32> to vector<4x9x1xf32>
    %cst_22 = arith.constant 3.200000e+01 : f32
    %57 = vector.broadcast %cst_22 : f32 to vector<4x9x1xf32>
    %58 = arith.divf %56, %57 : vector<4x9x1xf32>
    %59 = vector.broadcast %51 : vector<4x9x1xf32> to vector<4x9x32xf32>
    %60 = arith.subf %2, %59 : vector<4x9x32xf32>
    %cst_23 = arith.constant 9.99999974E-6 : f32
    %61 = vector.broadcast %cst_23 : f32 to vector<4x9x1xf32>
    %62 = arith.addf %58, %61 : vector<4x9x1xf32>
    %63 = math.rsqrt %62 : vector<4x9x1xf32>
    %64 = vector.broadcast %63 : vector<4x9x1xf32> to vector<4x9x32xf32>
    %65 = arith.mulf %60, %64 : vector<4x9x32xf32>
    %66 = vector.shape_cast %22 : vector<1x32xf32> to vector<1x1x32xf32>
    %67 = vector.broadcast %66 : vector<1x1x32xf32> to vector<4x9x32xf32>
    %68 = arith.mulf %65, %67 : vector<4x9x32xf32>
    %69 = vector.shape_cast %23 : vector<1x32xf32> to vector<1x1x32xf32>
    %70 = vector.broadcast %69 : vector<1x1x32xf32> to vector<4x9x32xf32>
    %71 = arith.addf %68, %70 : vector<4x9x32xf32>
    %cst_24 = arith.constant dense<0.000000e+00> : vector<1x9xf32>
    %72 = tpu.matmul %24, %47, %cst_24 {dimension_numbers = #tpu.dot_dimension_numbers<[1], [1], [0], [0], [0, 0, 1, 0], [], []>, precision = #tpu.contract_precision<fp32>} : vector<1x32xf32>, vector<9x32xf32>, vector<1x9xf32> -> vector<1x9xf32>
    %73 = vector.broadcast %25 : vector<1x1xf32> to vector<1x9xf32>
    %74 = arith.addf %72, %73 : vector<1x9xf32>
    %75 = math.tanh %74 : vector<1x9xf32>
    %76 = vector.shape_cast %75 : vector<1x9xf32> to vector<1x1x9xf32>
    %77 = vector.shape_cast %24 : vector<1x32xf32> to vector<1x1x32xf32>
    %78 = vector.broadcast %77 : vector<1x1x32xf32> to vector<4x9x32xf32>
    %79 = arith.mulf %71, %78 : vector<4x9x32xf32>
    %cst_25 = arith.constant dense<0.000000e+00> : vector<4x9xf32>
    %80 = vector.multi_reduction <add>, %79, %cst_25 [2] : vector<4x9x32xf32> to vector<4x9xf32>
    %81 = vector.shape_cast %80 : vector<4x9xf32> to vector<4x9x1xf32>
    %82 = vector.shape_cast %25 : vector<1x1xf32> to vector<1x1x1xf32>
    %83 = vector.broadcast %82 : vector<1x1x1xf32> to vector<4x9x1xf32>
    %84 = arith.addf %81, %83 : vector<4x9x1xf32>
    %85 = math.tanh %84 : vector<4x9x1xf32>
    %86 = tpu.iota {dimensions = array<i32: 2>} : vector<1x9x9xi32>
    %87 = tpu.iota {dimensions = array<i32: 1>} : vector<1x9x9xi32>
    %c8_i32 = arith.constant 8 : i32
    %88 = vector.broadcast %c8_i32 : i32 to vector<1x9x9xi32>
    %89 = arith.cmpi eq, %86, %88 : vector<1x9x9xi32>
    %c8_i32_26 = arith.constant 8 : i32
    %90 = vector.broadcast %c8_i32_26 : i32 to vector<1x9x9xi32>
    %91 = arith.cmpi eq, %87, %90 : vector<1x9x9xi32>
    %92 = vector.shape_cast %89 : vector<1x9x9xi1> to vector<1x9x9xi1>
    %93 = vector.broadcast %92 : vector<1x9x9xi1> to vector<4x9x9xi1>
    %94 = vector.shape_cast %85 : vector<4x9x1xf32> to vector<4x9x1xf32>
    %95 = vector.broadcast %94 : vector<4x9x1xf32> to vector<4x9x9xf32>
    %96 = arith.select %93, %95, %21 : vector<4x9x9xi1>, vector<4x9x9xf32>
    %97 = vector.shape_cast %91 : vector<1x9x9xi1> to vector<1x9x9xi1>
    %98 = vector.broadcast %97 : vector<1x9x9xi1> to vector<4x9x9xi1>
    %99 = vector.shape_cast %76 : vector<1x1x9xf32> to vector<1x1x9xf32>
    %100 = vector.broadcast %99 : vector<1x1x9xf32> to vector<4x9x9xf32>
    %101 = arith.select %98, %100, %96 : vector<4x9x9xi1>, vector<4x9x9xf32>
    %102 = arith.andi %89, %91 : vector<1x9x9xi1>
    %cst_27 = arith.constant -1.000000e+02 : f32
    %103 = vector.shape_cast %102 : vector<1x9x9xi1> to vector<1x9x9xi1>
    %104 = vector.broadcast %103 : vector<1x9x9xi1> to vector<4x9x9xi1>
    %105 = vector.broadcast %cst_27 : f32 to vector<4x9x9xf32>
    %106 = arith.select %104, %105, %101 : vector<4x9x9xi1>, vector<4x9x9xf32>
    %107 = tpu.iota {dimensions = array<i32: 2>} : vector<1x1x9xi32>
    %c8_i32_28 = arith.constant 8 : i32
    %108 = vector.broadcast %c8_i32_28 : i32 to vector<1x1x9xi32>
    %109 = arith.cmpi eq, %107, %108 : vector<1x1x9xi32>
    %cst_29 = arith.constant -0.693147182 : f32
    %cst_30 = arith.constant -2.77258873 : f32
    %110 = vector.broadcast %cst_29 : f32 to vector<1x1x9xf32>
    %111 = vector.broadcast %cst_30 : f32 to vector<1x1x9xf32>
    %112 = arith.select %109, %110, %111 : vector<1x1x9xi1>, vector<1x1x9xf32>
    %113 = tpu.iota {dimensions = array<i32: 1>} : vector<1x9x1xi32>
    %c8_i32_31 = arith.constant 8 : i32
    %114 = vector.broadcast %c8_i32_31 : i32 to vector<1x9x1xi32>
    %115 = arith.cmpi eq, %113, %114 : vector<1x9x1xi32>
    %cst_32 = arith.constant -0.693147182 : f32
    %cst_33 = arith.constant -2.77258873 : f32
    %116 = vector.broadcast %cst_32 : f32 to vector<1x9x1xf32>
    %117 = vector.broadcast %cst_33 : f32 to vector<1x9x1xf32>
    %118 = arith.select %115, %116, %117 : vector<1x9x1xi1>, vector<1x9x1xf32>
    %cst_34 = arith.constant 0.000000e+00 : f32
    %119 = vector.broadcast %cst_34 : f32 to vector<4x1x9xf32>
    %cst_35 = arith.constant 0.000000e+00 : f32
    %120 = vector.broadcast %cst_35 : f32 to vector<4x9x1xf32>
    %121 = vector.broadcast %119 : vector<4x1x9xf32> to vector<4x9x9xf32>
    %122 = arith.addf %106, %121 : vector<4x9x9xf32>
    %123 = vector.broadcast %120 : vector<4x9x1xf32> to vector<4x9x9xf32>
    %124 = arith.addf %122, %123 : vector<4x9x9xf32>
    %cst_36 = arith.constant 1.000000e-01 : f32
    %125 = vector.broadcast %cst_36 : f32 to vector<4x9x9xf32>
    %126 = arith.divf %124, %125 : vector<4x9x9xf32>
    %cst_37 = arith.constant dense<0xFF800000> : vector<4x9xf32>
    %127 = vector.multi_reduction <maximumf>, %126, %cst_37 [1] : vector<4x9x9xf32> to vector<4x9xf32>
    %128 = vector.shape_cast %127 : vector<4x9xf32> to vector<4x1x9xf32>
    %129 = vector.broadcast %128 : vector<4x1x9xf32> to vector<4x9x9xf32>
    %130 = arith.subf %126, %129 : vector<4x9x9xf32>
    %131 = math.exp %130 : vector<4x9x9xf32>
    %cst_38 = arith.constant dense<0.000000e+00> : vector<4x9xf32>
    %132 = vector.multi_reduction <add>, %131, %cst_38 [1] : vector<4x9x9xf32> to vector<4x9xf32>
    %133 = vector.shape_cast %132 : vector<4x9xf32> to vector<4x1x9xf32>
    %134 = math.log %133 : vector<4x1x9xf32>
    %135 = arith.addf %128, %134 : vector<4x1x9xf32>
    %136 = vector.broadcast %112 : vector<1x1x9xf32> to vector<4x1x9xf32>
    %137 = arith.subf %136, %135 : vector<4x1x9xf32>
    %cst_39 = arith.constant 1.000000e-01 : f32
    %138 = vector.broadcast %cst_39 : f32 to vector<4x1x9xf32>
    %139 = arith.mulf %138, %137 : vector<4x1x9xf32>
    %140 = arith.addf %119, %139 : vector<4x1x9xf32>
    %141 = vector.broadcast %140 : vector<4x1x9xf32> to vector<4x9x9xf32>
    %142 = arith.addf %106, %141 : vector<4x9x9xf32>
    %143 = vector.broadcast %120 : vector<4x9x1xf32> to vector<4x9x9xf32>
    %144 = arith.addf %142, %143 : vector<4x9x9xf32>
    %cst_40 = arith.constant 1.000000e-01 : f32
    %145 = vector.broadcast %cst_40 : f32 to vector<4x9x9xf32>
    %146 = arith.divf %144, %145 : vector<4x9x9xf32>
    %cst_41 = arith.constant dense<0xFF800000> : vector<4x9xf32>
    %147 = vector.multi_reduction <maximumf>, %146, %cst_41 [2] : vector<4x9x9xf32> to vector<4x9xf32>
    %148 = vector.shape_cast %147 : vector<4x9xf32> to vector<4x9x1xf32>
    %149 = vector.broadcast %148 : vector<4x9x1xf32> to vector<4x9x9xf32>
    %150 = arith.subf %146, %149 : vector<4x9x9xf32>
    %151 = math.exp %150 : vector<4x9x9xf32>
    %cst_42 = arith.constant dense<0.000000e+00> : vector<4x9xf32>
    %152 = vector.multi_reduction <add>, %151, %cst_42 [2] : vector<4x9x9xf32> to vector<4x9xf32>
    %153 = vector.shape_cast %152 : vector<4x9xf32> to vector<4x9x1xf32>
    %154 = math.log %153 : vector<4x9x1xf32>
    %155 = arith.addf %148, %154 : vector<4x9x1xf32>
    %156 = vector.broadcast %118 : vector<1x9x1xf32> to vector<4x9x1xf32>
    %157 = arith.subf %156, %155 : vector<4x9x1xf32>
    %cst_43 = arith.constant 1.000000e-01 : f32
    %158 = vector.broadcast %cst_43 : f32 to vector<4x9x1xf32>
    %159 = arith.mulf %158, %157 : vector<4x9x1xf32>
    %160 = arith.addf %120, %159 : vector<4x9x1xf32>
    %161 = vector.broadcast %140 : vector<4x1x9xf32> to vector<4x9x9xf32>
    %162 = arith.addf %106, %161 : vector<4x9x9xf32>
    %163 = vector.broadcast %160 : vector<4x9x1xf32> to vector<4x9x9xf32>
    %164 = arith.addf %162, %163 : vector<4x9x9xf32>
    %cst_44 = arith.constant 1.000000e-01 : f32
    %165 = vector.broadcast %cst_44 : f32 to vector<4x9x9xf32>
    %166 = arith.divf %164, %165 : vector<4x9x9xf32>
    %cst_45 = arith.constant dense<0xFF800000> : vector<4x9xf32>
    %167 = vector.multi_reduction <maximumf>, %166, %cst_45 [1] : vector<4x9x9xf32> to vector<4x9xf32>
    %168 = vector.shape_cast %167 : vector<4x9xf32> to vector<4x1x9xf32>
    %169 = vector.broadcast %168 : vector<4x1x9xf32> to vector<4x9x9xf32>
    %170 = arith.subf %166, %169 : vector<4x9x9xf32>
    %171 = math.exp %170 : vector<4x9x9xf32>
    %cst_46 = arith.constant dense<0.000000e+00> : vector<4x9xf32>
    %172 = vector.multi_reduction <add>, %171, %cst_46 [1] : vector<4x9x9xf32> to vector<4x9xf32>
    %173 = vector.shape_cast %172 : vector<4x9xf32> to vector<4x1x9xf32>
    %174 = math.log %173 : vector<4x1x9xf32>
    %175 = arith.addf %168, %174 : vector<4x1x9xf32>
    %176 = vector.broadcast %112 : vector<1x1x9xf32> to vector<4x1x9xf32>
    %177 = arith.subf %176, %175 : vector<4x1x9xf32>
    %cst_47 = arith.constant 1.000000e-01 : f32
    %178 = vector.broadcast %cst_47 : f32 to vector<4x1x9xf32>
    %179 = arith.mulf %178, %177 : vector<4x1x9xf32>
    %180 = arith.addf %140, %179 : vector<4x1x9xf32>
    %181 = vector.broadcast %180 : vector<4x1x9xf32> to vector<4x9x9xf32>
    %182 = arith.addf %106, %181 : vector<4x9x9xf32>
    %183 = vector.broadcast %160 : vector<4x9x1xf32> to vector<4x9x9xf32>
    %184 = arith.addf %182, %183 : vector<4x9x9xf32>
    %cst_48 = arith.constant 1.000000e-01 : f32
    %185 = vector.broadcast %cst_48 : f32 to vector<4x9x9xf32>
    %186 = arith.divf %184, %185 : vector<4x9x9xf32>
    %cst_49 = arith.constant dense<0xFF800000> : vector<4x9xf32>
    %187 = vector.multi_reduction <maximumf>, %186, %cst_49 [2] : vector<4x9x9xf32> to vector<4x9xf32>
    %188 = vector.shape_cast %187 : vector<4x9xf32> to vector<4x9x1xf32>
    %189 = vector.broadcast %188 : vector<4x9x1xf32> to vector<4x9x9xf32>
    %190 = arith.subf %186, %189 : vector<4x9x9xf32>
    %191 = math.exp %190 : vector<4x9x9xf32>
    %cst_50 = arith.constant dense<0.000000e+00> : vector<4x9xf32>
    %192 = vector.multi_reduction <add>, %191, %cst_50 [2] : vector<4x9x9xf32> to vector<4x9xf32>
    %193 = vector.shape_cast %192 : vector<4x9xf32> to vector<4x9x1xf32>
    %194 = math.log %193 : vector<4x9x1xf32>
    %195 = arith.addf %188, %194 : vector<4x9x1xf32>
    %196 = vector.broadcast %118 : vector<1x9x1xf32> to vector<4x9x1xf32>
    %197 = arith.subf %196, %195 : vector<4x9x1xf32>
    %cst_51 = arith.constant 1.000000e-01 : f32
    %198 = vector.broadcast %cst_51 : f32 to vector<4x9x1xf32>
    %199 = arith.mulf %198, %197 : vector<4x9x1xf32>
    %200 = arith.addf %160, %199 : vector<4x9x1xf32>
    %201 = vector.broadcast %180 : vector<4x1x9xf32> to vector<4x9x9xf32>
    %202 = arith.addf %106, %201 : vector<4x9x9xf32>
    %203 = vector.broadcast %200 : vector<4x9x1xf32> to vector<4x9x9xf32>
    %204 = arith.addf %202, %203 : vector<4x9x9xf32>
    %cst_52 = arith.constant 1.000000e-01 : f32
    %205 = vector.broadcast %cst_52 : f32 to vector<4x9x9xf32>
    %206 = arith.divf %204, %205 : vector<4x9x9xf32>
    %cst_53 = arith.constant dense<0xFF800000> : vector<4x9xf32>
    %207 = vector.multi_reduction <maximumf>, %206, %cst_53 [1] : vector<4x9x9xf32> to vector<4x9xf32>
    %208 = vector.shape_cast %207 : vector<4x9xf32> to vector<4x1x9xf32>
    %209 = vector.broadcast %208 : vector<4x1x9xf32> to vector<4x9x9xf32>
    %210 = arith.subf %206, %209 : vector<4x9x9xf32>
    %211 = math.exp %210 : vector<4x9x9xf32>
    %cst_54 = arith.constant dense<0.000000e+00> : vector<4x9xf32>
    %212 = vector.multi_reduction <add>, %211, %cst_54 [1] : vector<4x9x9xf32> to vector<4x9xf32>
    %213 = vector.shape_cast %212 : vector<4x9xf32> to vector<4x1x9xf32>
    %214 = math.log %213 : vector<4x1x9xf32>
    %215 = arith.addf %208, %214 : vector<4x1x9xf32>
    %216 = vector.broadcast %112 : vector<1x1x9xf32> to vector<4x1x9xf32>
    %217 = arith.subf %216, %215 : vector<4x1x9xf32>
    %cst_55 = arith.constant 1.000000e-01 : f32
    %218 = vector.broadcast %cst_55 : f32 to vector<4x1x9xf32>
    %219 = arith.mulf %218, %217 : vector<4x1x9xf32>
    %220 = arith.addf %180, %219 : vector<4x1x9xf32>
    %221 = vector.broadcast %220 : vector<4x1x9xf32> to vector<4x9x9xf32>
    %222 = arith.addf %106, %221 : vector<4x9x9xf32>
    %223 = vector.broadcast %200 : vector<4x9x1xf32> to vector<4x9x9xf32>
    %224 = arith.addf %222, %223 : vector<4x9x9xf32>
    %cst_56 = arith.constant 1.000000e-01 : f32
    %225 = vector.broadcast %cst_56 : f32 to vector<4x9x9xf32>
    %226 = arith.divf %224, %225 : vector<4x9x9xf32>
    %cst_57 = arith.constant dense<0xFF800000> : vector<4x9xf32>
    %227 = vector.multi_reduction <maximumf>, %226, %cst_57 [2] : vector<4x9x9xf32> to vector<4x9xf32>
    %228 = vector.shape_cast %227 : vector<4x9xf32> to vector<4x9x1xf32>
    %229 = vector.broadcast %228 : vector<4x9x1xf32> to vector<4x9x9xf32>
    %230 = arith.subf %226, %229 : vector<4x9x9xf32>
    %231 = math.exp %230 : vector<4x9x9xf32>
    %cst_58 = arith.constant dense<0.000000e+00> : vector<4x9xf32>
    %232 = vector.multi_reduction <add>, %231, %cst_58 [2] : vector<4x9x9xf32> to vector<4x9xf32>
    %233 = vector.shape_cast %232 : vector<4x9xf32> to vector<4x9x1xf32>
    %234 = math.log %233 : vector<4x9x1xf32>
    %235 = arith.addf %228, %234 : vector<4x9x1xf32>
    %236 = vector.broadcast %118 : vector<1x9x1xf32> to vector<4x9x1xf32>
    %237 = arith.subf %236, %235 : vector<4x9x1xf32>
    %cst_59 = arith.constant 1.000000e-01 : f32
    %238 = vector.broadcast %cst_59 : f32 to vector<4x9x1xf32>
    %239 = arith.mulf %238, %237 : vector<4x9x1xf32>
    %240 = arith.addf %200, %239 : vector<4x9x1xf32>
    %241 = vector.broadcast %220 : vector<4x1x9xf32> to vector<4x9x9xf32>
    %242 = arith.addf %106, %241 : vector<4x9x9xf32>
    %243 = vector.broadcast %240 : vector<4x9x1xf32> to vector<4x9x9xf32>
    %244 = arith.addf %242, %243 : vector<4x9x9xf32>
    %cst_60 = arith.constant 1.000000e-01 : f32
    %245 = vector.broadcast %cst_60 : f32 to vector<4x9x9xf32>
    %246 = arith.divf %244, %245 : vector<4x9x9xf32>
    %cst_61 = arith.constant dense<0xFF800000> : vector<4x9xf32>
    %247 = vector.multi_reduction <maximumf>, %246, %cst_61 [1] : vector<4x9x9xf32> to vector<4x9xf32>
    %248 = vector.shape_cast %247 : vector<4x9xf32> to vector<4x1x9xf32>
    %249 = vector.broadcast %248 : vector<4x1x9xf32> to vector<4x9x9xf32>
    %250 = arith.subf %246, %249 : vector<4x9x9xf32>
    %251 = math.exp %250 : vector<4x9x9xf32>
    %cst_62 = arith.constant dense<0.000000e+00> : vector<4x9xf32>
    %252 = vector.multi_reduction <add>, %251, %cst_62 [1] : vector<4x9x9xf32> to vector<4x9xf32>
    %253 = vector.shape_cast %252 : vector<4x9xf32> to vector<4x1x9xf32>
    %254 = math.log %253 : vector<4x1x9xf32>
    %255 = arith.addf %248, %254 : vector<4x1x9xf32>
    %256 = vector.broadcast %112 : vector<1x1x9xf32> to vector<4x1x9xf32>
    %257 = arith.subf %256, %255 : vector<4x1x9xf32>
    %cst_63 = arith.constant 1.000000e-01 : f32
    %258 = vector.broadcast %cst_63 : f32 to vector<4x1x9xf32>
    %259 = arith.mulf %258, %257 : vector<4x1x9xf32>
    %260 = arith.addf %220, %259 : vector<4x1x9xf32>
    %261 = vector.broadcast %260 : vector<4x1x9xf32> to vector<4x9x9xf32>
    %262 = arith.addf %106, %261 : vector<4x9x9xf32>
    %263 = vector.broadcast %240 : vector<4x9x1xf32> to vector<4x9x9xf32>
    %264 = arith.addf %262, %263 : vector<4x9x9xf32>
    %cst_64 = arith.constant 1.000000e-01 : f32
    %265 = vector.broadcast %cst_64 : f32 to vector<4x9x9xf32>
    %266 = arith.divf %264, %265 : vector<4x9x9xf32>
    %cst_65 = arith.constant dense<0xFF800000> : vector<4x9xf32>
    %267 = vector.multi_reduction <maximumf>, %266, %cst_65 [2] : vector<4x9x9xf32> to vector<4x9xf32>
    %268 = vector.shape_cast %267 : vector<4x9xf32> to vector<4x9x1xf32>
    %269 = vector.broadcast %268 : vector<4x9x1xf32> to vector<4x9x9xf32>
    %270 = arith.subf %266, %269 : vector<4x9x9xf32>
    %271 = math.exp %270 : vector<4x9x9xf32>
    %cst_66 = arith.constant dense<0.000000e+00> : vector<4x9xf32>
    %272 = vector.multi_reduction <add>, %271, %cst_66 [2] : vector<4x9x9xf32> to vector<4x9xf32>
    %273 = vector.shape_cast %272 : vector<4x9xf32> to vector<4x9x1xf32>
    %274 = math.log %273 : vector<4x9x1xf32>
    %275 = arith.addf %268, %274 : vector<4x9x1xf32>
    %276 = vector.broadcast %118 : vector<1x9x1xf32> to vector<4x9x1xf32>
    %277 = arith.subf %276, %275 : vector<4x9x1xf32>
    %cst_67 = arith.constant 1.000000e-01 : f32
    %278 = vector.broadcast %cst_67 : f32 to vector<4x9x1xf32>
    %279 = arith.mulf %278, %277 : vector<4x9x1xf32>
    %280 = arith.addf %240, %279 : vector<4x9x1xf32>
    %281 = vector.broadcast %260 : vector<4x1x9xf32> to vector<4x9x9xf32>
    %282 = arith.addf %106, %281 : vector<4x9x9xf32>
    %283 = vector.broadcast %280 : vector<4x9x1xf32> to vector<4x9x9xf32>
    %284 = arith.addf %282, %283 : vector<4x9x9xf32>
    %cst_68 = arith.constant 1.000000e-01 : f32
    %285 = vector.broadcast %cst_68 : f32 to vector<4x9x9xf32>
    %286 = arith.divf %284, %285 : vector<4x9x9xf32>
    %cst_69 = arith.constant dense<0xFF800000> : vector<4x9xf32>
    %287 = vector.multi_reduction <maximumf>, %286, %cst_69 [1] : vector<4x9x9xf32> to vector<4x9xf32>
    %288 = vector.shape_cast %287 : vector<4x9xf32> to vector<4x1x9xf32>
    %289 = vector.broadcast %288 : vector<4x1x9xf32> to vector<4x9x9xf32>
    %290 = arith.subf %286, %289 : vector<4x9x9xf32>
    %291 = math.exp %290 : vector<4x9x9xf32>
    %cst_70 = arith.constant dense<0.000000e+00> : vector<4x9xf32>
    %292 = vector.multi_reduction <add>, %291, %cst_70 [1] : vector<4x9x9xf32> to vector<4x9xf32>
    %293 = vector.shape_cast %292 : vector<4x9xf32> to vector<4x1x9xf32>
    %294 = math.log %293 : vector<4x1x9xf32>
    %295 = arith.addf %288, %294 : vector<4x1x9xf32>
    %296 = vector.broadcast %112 : vector<1x1x9xf32> to vector<4x1x9xf32>
    %297 = arith.subf %296, %295 : vector<4x1x9xf32>
    %cst_71 = arith.constant 1.000000e-01 : f32
    %298 = vector.broadcast %cst_71 : f32 to vector<4x1x9xf32>
    %299 = arith.mulf %298, %297 : vector<4x1x9xf32>
    %300 = arith.addf %260, %299 : vector<4x1x9xf32>
    %301 = vector.broadcast %300 : vector<4x1x9xf32> to vector<4x9x9xf32>
    %302 = arith.addf %106, %301 : vector<4x9x9xf32>
    %303 = vector.broadcast %280 : vector<4x9x1xf32> to vector<4x9x9xf32>
    %304 = arith.addf %302, %303 : vector<4x9x9xf32>
    %cst_72 = arith.constant 1.000000e-01 : f32
    %305 = vector.broadcast %cst_72 : f32 to vector<4x9x9xf32>
    %306 = arith.divf %304, %305 : vector<4x9x9xf32>
    %cst_73 = arith.constant dense<0xFF800000> : vector<4x9xf32>
    %307 = vector.multi_reduction <maximumf>, %306, %cst_73 [2] : vector<4x9x9xf32> to vector<4x9xf32>
    %308 = vector.shape_cast %307 : vector<4x9xf32> to vector<4x9x1xf32>
    %309 = vector.broadcast %308 : vector<4x9x1xf32> to vector<4x9x9xf32>
    %310 = arith.subf %306, %309 : vector<4x9x9xf32>
    %311 = math.exp %310 : vector<4x9x9xf32>
    %cst_74 = arith.constant dense<0.000000e+00> : vector<4x9xf32>
    %312 = vector.multi_reduction <add>, %311, %cst_74 [2] : vector<4x9x9xf32> to vector<4x9xf32>
    %313 = vector.shape_cast %312 : vector<4x9xf32> to vector<4x9x1xf32>
    %314 = math.log %313 : vector<4x9x1xf32>
    %315 = arith.addf %308, %314 : vector<4x9x1xf32>
    %316 = vector.broadcast %118 : vector<1x9x1xf32> to vector<4x9x1xf32>
    %317 = arith.subf %316, %315 : vector<4x9x1xf32>
    %cst_75 = arith.constant 1.000000e-01 : f32
    %318 = vector.broadcast %cst_75 : f32 to vector<4x9x1xf32>
    %319 = arith.mulf %318, %317 : vector<4x9x1xf32>
    %320 = arith.addf %280, %319 : vector<4x9x1xf32>
    %321 = vector.broadcast %300 : vector<4x1x9xf32> to vector<4x9x9xf32>
    %322 = arith.addf %106, %321 : vector<4x9x9xf32>
    %323 = vector.broadcast %320 : vector<4x9x1xf32> to vector<4x9x9xf32>
    %324 = arith.addf %322, %323 : vector<4x9x9xf32>
    %cst_76 = arith.constant 1.000000e-01 : f32
    %325 = vector.broadcast %cst_76 : f32 to vector<4x9x9xf32>
    %326 = arith.divf %324, %325 : vector<4x9x9xf32>
    %cst_77 = arith.constant dense<0xFF800000> : vector<4x9xf32>
    %327 = vector.multi_reduction <maximumf>, %326, %cst_77 [1] : vector<4x9x9xf32> to vector<4x9xf32>
    %328 = vector.shape_cast %327 : vector<4x9xf32> to vector<4x1x9xf32>
    %329 = vector.broadcast %328 : vector<4x1x9xf32> to vector<4x9x9xf32>
    %330 = arith.subf %326, %329 : vector<4x9x9xf32>
    %331 = math.exp %330 : vector<4x9x9xf32>
    %cst_78 = arith.constant dense<0.000000e+00> : vector<4x9xf32>
    %332 = vector.multi_reduction <add>, %331, %cst_78 [1] : vector<4x9x9xf32> to vector<4x9xf32>
    %333 = vector.shape_cast %332 : vector<4x9xf32> to vector<4x1x9xf32>
    %334 = math.log %333 : vector<4x1x9xf32>
    %335 = arith.addf %328, %334 : vector<4x1x9xf32>
    %336 = vector.broadcast %112 : vector<1x1x9xf32> to vector<4x1x9xf32>
    %337 = arith.subf %336, %335 : vector<4x1x9xf32>
    %cst_79 = arith.constant 1.000000e-01 : f32
    %338 = vector.broadcast %cst_79 : f32 to vector<4x1x9xf32>
    %339 = arith.mulf %338, %337 : vector<4x1x9xf32>
    %340 = arith.addf %300, %339 : vector<4x1x9xf32>
    %341 = vector.broadcast %340 : vector<4x1x9xf32> to vector<4x9x9xf32>
    %342 = arith.addf %106, %341 : vector<4x9x9xf32>
    %343 = vector.broadcast %320 : vector<4x9x1xf32> to vector<4x9x9xf32>
    %344 = arith.addf %342, %343 : vector<4x9x9xf32>
    %cst_80 = arith.constant 1.000000e-01 : f32
    %345 = vector.broadcast %cst_80 : f32 to vector<4x9x9xf32>
    %346 = arith.divf %344, %345 : vector<4x9x9xf32>
    %cst_81 = arith.constant dense<0xFF800000> : vector<4x9xf32>
    %347 = vector.multi_reduction <maximumf>, %346, %cst_81 [2] : vector<4x9x9xf32> to vector<4x9xf32>
    %348 = vector.shape_cast %347 : vector<4x9xf32> to vector<4x9x1xf32>
    %349 = vector.broadcast %348 : vector<4x9x1xf32> to vector<4x9x9xf32>
    %350 = arith.subf %346, %349 : vector<4x9x9xf32>
    %351 = math.exp %350 : vector<4x9x9xf32>
    %cst_82 = arith.constant dense<0.000000e+00> : vector<4x9xf32>
    %352 = vector.multi_reduction <add>, %351, %cst_82 [2] : vector<4x9x9xf32> to vector<4x9xf32>
    %353 = vector.shape_cast %352 : vector<4x9xf32> to vector<4x9x1xf32>
    %354 = math.log %353 : vector<4x9x1xf32>
    %355 = arith.addf %348, %354 : vector<4x9x1xf32>
    %356 = vector.broadcast %118 : vector<1x9x1xf32> to vector<4x9x1xf32>
    %357 = arith.subf %356, %355 : vector<4x9x1xf32>
    %cst_83 = arith.constant 1.000000e-01 : f32
    %358 = vector.broadcast %cst_83 : f32 to vector<4x9x1xf32>
    %359 = arith.mulf %358, %357 : vector<4x9x1xf32>
    %360 = arith.addf %320, %359 : vector<4x9x1xf32>
    %361 = vector.broadcast %340 : vector<4x1x9xf32> to vector<4x9x9xf32>
    %362 = arith.addf %106, %361 : vector<4x9x9xf32>
    %363 = vector.broadcast %360 : vector<4x9x1xf32> to vector<4x9x9xf32>
    %364 = arith.addf %362, %363 : vector<4x9x9xf32>
    %cst_84 = arith.constant 1.000000e-01 : f32
    %365 = vector.broadcast %cst_84 : f32 to vector<4x9x9xf32>
    %366 = arith.divf %364, %365 : vector<4x9x9xf32>
    %cst_85 = arith.constant dense<0xFF800000> : vector<4x9xf32>
    %367 = vector.multi_reduction <maximumf>, %366, %cst_85 [1] : vector<4x9x9xf32> to vector<4x9xf32>
    %368 = vector.shape_cast %367 : vector<4x9xf32> to vector<4x1x9xf32>
    %369 = vector.broadcast %368 : vector<4x1x9xf32> to vector<4x9x9xf32>
    %370 = arith.subf %366, %369 : vector<4x9x9xf32>
    %371 = math.exp %370 : vector<4x9x9xf32>
    %cst_86 = arith.constant dense<0.000000e+00> : vector<4x9xf32>
    %372 = vector.multi_reduction <add>, %371, %cst_86 [1] : vector<4x9x9xf32> to vector<4x9xf32>
    %373 = vector.shape_cast %372 : vector<4x9xf32> to vector<4x1x9xf32>
    %374 = math.log %373 : vector<4x1x9xf32>
    %375 = arith.addf %368, %374 : vector<4x1x9xf32>
    %376 = vector.broadcast %112 : vector<1x1x9xf32> to vector<4x1x9xf32>
    %377 = arith.subf %376, %375 : vector<4x1x9xf32>
    %cst_87 = arith.constant 1.000000e-01 : f32
    %378 = vector.broadcast %cst_87 : f32 to vector<4x1x9xf32>
    %379 = arith.mulf %378, %377 : vector<4x1x9xf32>
    %380 = arith.addf %340, %379 : vector<4x1x9xf32>
    %381 = vector.broadcast %380 : vector<4x1x9xf32> to vector<4x9x9xf32>
    %382 = arith.addf %106, %381 : vector<4x9x9xf32>
    %383 = vector.broadcast %360 : vector<4x9x1xf32> to vector<4x9x9xf32>
    %384 = arith.addf %382, %383 : vector<4x9x9xf32>
    %cst_88 = arith.constant 1.000000e-01 : f32
    %385 = vector.broadcast %cst_88 : f32 to vector<4x9x9xf32>
    %386 = arith.divf %384, %385 : vector<4x9x9xf32>
    %cst_89 = arith.constant dense<0xFF800000> : vector<4x9xf32>
    %387 = vector.multi_reduction <maximumf>, %386, %cst_89 [2] : vector<4x9x9xf32> to vector<4x9xf32>
    %388 = vector.shape_cast %387 : vector<4x9xf32> to vector<4x9x1xf32>
    %389 = vector.broadcast %388 : vector<4x9x1xf32> to vector<4x9x9xf32>
    %390 = arith.subf %386, %389 : vector<4x9x9xf32>
    %391 = math.exp %390 : vector<4x9x9xf32>
    %cst_90 = arith.constant dense<0.000000e+00> : vector<4x9xf32>
    %392 = vector.multi_reduction <add>, %391, %cst_90 [2] : vector<4x9x9xf32> to vector<4x9xf32>
    %393 = vector.shape_cast %392 : vector<4x9xf32> to vector<4x9x1xf32>
    %394 = math.log %393 : vector<4x9x1xf32>
    %395 = arith.addf %388, %394 : vector<4x9x1xf32>
    %396 = vector.broadcast %118 : vector<1x9x1xf32> to vector<4x9x1xf32>
    %397 = arith.subf %396, %395 : vector<4x9x1xf32>
    %cst_91 = arith.constant 1.000000e-01 : f32
    %398 = vector.broadcast %cst_91 : f32 to vector<4x9x1xf32>
    %399 = arith.mulf %398, %397 : vector<4x9x1xf32>
    %400 = arith.addf %360, %399 : vector<4x9x1xf32>
    %401 = vector.broadcast %380 : vector<4x1x9xf32> to vector<4x9x9xf32>
    %402 = arith.addf %106, %401 : vector<4x9x9xf32>
    %403 = vector.broadcast %400 : vector<4x9x1xf32> to vector<4x9x9xf32>
    %404 = arith.addf %402, %403 : vector<4x9x9xf32>
    %cst_92 = arith.constant 1.000000e-01 : f32
    %405 = vector.broadcast %cst_92 : f32 to vector<4x9x9xf32>
    %406 = arith.divf %404, %405 : vector<4x9x9xf32>
    %cst_93 = arith.constant dense<0xFF800000> : vector<4x9xf32>
    %407 = vector.multi_reduction <maximumf>, %406, %cst_93 [1] : vector<4x9x9xf32> to vector<4x9xf32>
    %408 = vector.shape_cast %407 : vector<4x9xf32> to vector<4x1x9xf32>
    %409 = vector.broadcast %408 : vector<4x1x9xf32> to vector<4x9x9xf32>
    %410 = arith.subf %406, %409 : vector<4x9x9xf32>
    %411 = math.exp %410 : vector<4x9x9xf32>
    %cst_94 = arith.constant dense<0.000000e+00> : vector<4x9xf32>
    %412 = vector.multi_reduction <add>, %411, %cst_94 [1] : vector<4x9x9xf32> to vector<4x9xf32>
    %413 = vector.shape_cast %412 : vector<4x9xf32> to vector<4x1x9xf32>
    %414 = math.log %413 : vector<4x1x9xf32>
    %415 = arith.addf %408, %414 : vector<4x1x9xf32>
    %416 = vector.broadcast %112 : vector<1x1x9xf32> to vector<4x1x9xf32>
    %417 = arith.subf %416, %415 : vector<4x1x9xf32>
    %cst_95 = arith.constant 1.000000e-01 : f32
    %418 = vector.broadcast %cst_95 : f32 to vector<4x1x9xf32>
    %419 = arith.mulf %418, %417 : vector<4x1x9xf32>
    %420 = arith.addf %380, %419 : vector<4x1x9xf32>
    %421 = vector.broadcast %420 : vector<4x1x9xf32> to vector<4x9x9xf32>
    %422 = arith.addf %106, %421 : vector<4x9x9xf32>
    %423 = vector.broadcast %400 : vector<4x9x1xf32> to vector<4x9x9xf32>
    %424 = arith.addf %422, %423 : vector<4x9x9xf32>
    %cst_96 = arith.constant 1.000000e-01 : f32
    %425 = vector.broadcast %cst_96 : f32 to vector<4x9x9xf32>
    %426 = arith.divf %424, %425 : vector<4x9x9xf32>
    %cst_97 = arith.constant dense<0xFF800000> : vector<4x9xf32>
    %427 = vector.multi_reduction <maximumf>, %426, %cst_97 [2] : vector<4x9x9xf32> to vector<4x9xf32>
    %428 = vector.shape_cast %427 : vector<4x9xf32> to vector<4x9x1xf32>
    %429 = vector.broadcast %428 : vector<4x9x1xf32> to vector<4x9x9xf32>
    %430 = arith.subf %426, %429 : vector<4x9x9xf32>
    %431 = math.exp %430 : vector<4x9x9xf32>
    %cst_98 = arith.constant dense<0.000000e+00> : vector<4x9xf32>
    %432 = vector.multi_reduction <add>, %431, %cst_98 [2] : vector<4x9x9xf32> to vector<4x9xf32>
    %433 = vector.shape_cast %432 : vector<4x9xf32> to vector<4x9x1xf32>
    %434 = math.log %433 : vector<4x9x1xf32>
    %435 = arith.addf %428, %434 : vector<4x9x1xf32>
    %436 = vector.broadcast %118 : vector<1x9x1xf32> to vector<4x9x1xf32>
    %437 = arith.subf %436, %435 : vector<4x9x1xf32>
    %cst_99 = arith.constant 1.000000e-01 : f32
    %438 = vector.broadcast %cst_99 : f32 to vector<4x9x1xf32>
    %439 = arith.mulf %438, %437 : vector<4x9x1xf32>
    %440 = arith.addf %400, %439 : vector<4x9x1xf32>
    %441 = vector.broadcast %420 : vector<4x1x9xf32> to vector<4x9x9xf32>
    %442 = arith.addf %106, %441 : vector<4x9x9xf32>
    %443 = vector.broadcast %440 : vector<4x9x1xf32> to vector<4x9x9xf32>
    %444 = arith.addf %442, %443 : vector<4x9x9xf32>
    %cst_100 = arith.constant 1.000000e-01 : f32
    %445 = vector.broadcast %cst_100 : f32 to vector<4x9x9xf32>
    %446 = arith.divf %444, %445 : vector<4x9x9xf32>
    %cst_101 = arith.constant dense<0xFF800000> : vector<4x9xf32>
    %447 = vector.multi_reduction <maximumf>, %446, %cst_101 [1] : vector<4x9x9xf32> to vector<4x9xf32>
    %448 = vector.shape_cast %447 : vector<4x9xf32> to vector<4x1x9xf32>
    %449 = vector.broadcast %448 : vector<4x1x9xf32> to vector<4x9x9xf32>
    %450 = arith.subf %446, %449 : vector<4x9x9xf32>
    %451 = math.exp %450 : vector<4x9x9xf32>
    %cst_102 = arith.constant dense<0.000000e+00> : vector<4x9xf32>
    %452 = vector.multi_reduction <add>, %451, %cst_102 [1] : vector<4x9x9xf32> to vector<4x9xf32>
    %453 = vector.shape_cast %452 : vector<4x9xf32> to vector<4x1x9xf32>
    %454 = math.log %453 : vector<4x1x9xf32>
    %455 = arith.addf %448, %454 : vector<4x1x9xf32>
    %456 = vector.broadcast %112 : vector<1x1x9xf32> to vector<4x1x9xf32>
    %457 = arith.subf %456, %455 : vector<4x1x9xf32>
    %cst_103 = arith.constant 1.000000e-01 : f32
    %458 = vector.broadcast %cst_103 : f32 to vector<4x1x9xf32>
    %459 = arith.mulf %458, %457 : vector<4x1x9xf32>
    %460 = arith.addf %420, %459 : vector<4x1x9xf32>
    %461 = vector.broadcast %460 : vector<4x1x9xf32> to vector<4x9x9xf32>
    %462 = arith.addf %106, %461 : vector<4x9x9xf32>
    %463 = vector.broadcast %440 : vector<4x9x1xf32> to vector<4x9x9xf32>
    %464 = arith.addf %462, %463 : vector<4x9x9xf32>
    %cst_104 = arith.constant 1.000000e-01 : f32
    %465 = vector.broadcast %cst_104 : f32 to vector<4x9x9xf32>
    %466 = arith.divf %464, %465 : vector<4x9x9xf32>
    %cst_105 = arith.constant dense<0xFF800000> : vector<4x9xf32>
    %467 = vector.multi_reduction <maximumf>, %466, %cst_105 [2] : vector<4x9x9xf32> to vector<4x9xf32>
    %468 = vector.shape_cast %467 : vector<4x9xf32> to vector<4x9x1xf32>
    %469 = vector.broadcast %468 : vector<4x9x1xf32> to vector<4x9x9xf32>
    %470 = arith.subf %466, %469 : vector<4x9x9xf32>
    %471 = math.exp %470 : vector<4x9x9xf32>
    %cst_106 = arith.constant dense<0.000000e+00> : vector<4x9xf32>
    %472 = vector.multi_reduction <add>, %471, %cst_106 [2] : vector<4x9x9xf32> to vector<4x9xf32>
    %473 = vector.shape_cast %472 : vector<4x9xf32> to vector<4x9x1xf32>
    %474 = math.log %473 : vector<4x9x1xf32>
    %475 = arith.addf %468, %474 : vector<4x9x1xf32>
    %476 = vector.broadcast %118 : vector<1x9x1xf32> to vector<4x9x1xf32>
    %477 = arith.subf %476, %475 : vector<4x9x1xf32>
    %cst_107 = arith.constant 1.000000e-01 : f32
    %478 = vector.broadcast %cst_107 : f32 to vector<4x9x1xf32>
    %479 = arith.mulf %478, %477 : vector<4x9x1xf32>
    %480 = arith.addf %440, %479 : vector<4x9x1xf32>
    %481 = vector.broadcast %460 : vector<4x1x9xf32> to vector<4x9x9xf32>
    %482 = arith.addf %106, %481 : vector<4x9x9xf32>
    %483 = vector.broadcast %480 : vector<4x9x1xf32> to vector<4x9x9xf32>
    %484 = arith.addf %482, %483 : vector<4x9x9xf32>
    %cst_108 = arith.constant 1.000000e-01 : f32
    %485 = vector.broadcast %cst_108 : f32 to vector<4x9x9xf32>
    %486 = arith.divf %484, %485 : vector<4x9x9xf32>
    %cst_109 = arith.constant dense<0xFF800000> : vector<4x9xf32>
    %487 = vector.multi_reduction <maximumf>, %486, %cst_109 [1] : vector<4x9x9xf32> to vector<4x9xf32>
    %488 = vector.shape_cast %487 : vector<4x9xf32> to vector<4x1x9xf32>
    %489 = vector.broadcast %488 : vector<4x1x9xf32> to vector<4x9x9xf32>
    %490 = arith.subf %486, %489 : vector<4x9x9xf32>
    %491 = math.exp %490 : vector<4x9x9xf32>
    %cst_110 = arith.constant dense<0.000000e+00> : vector<4x9xf32>
    %492 = vector.multi_reduction <add>, %491, %cst_110 [1] : vector<4x9x9xf32> to vector<4x9xf32>
    %493 = vector.shape_cast %492 : vector<4x9xf32> to vector<4x1x9xf32>
    %494 = math.log %493 : vector<4x1x9xf32>
    %495 = arith.addf %488, %494 : vector<4x1x9xf32>
    %496 = vector.broadcast %112 : vector<1x1x9xf32> to vector<4x1x9xf32>
    %497 = arith.subf %496, %495 : vector<4x1x9xf32>
    %cst_111 = arith.constant 1.000000e-01 : f32
    %498 = vector.broadcast %cst_111 : f32 to vector<4x1x9xf32>
    %499 = arith.mulf %498, %497 : vector<4x1x9xf32>
    %500 = arith.addf %460, %499 : vector<4x1x9xf32>
    %501 = vector.broadcast %500 : vector<4x1x9xf32> to vector<4x9x9xf32>
    %502 = arith.addf %106, %501 : vector<4x9x9xf32>
    %503 = vector.broadcast %480 : vector<4x9x1xf32> to vector<4x9x9xf32>
    %504 = arith.addf %502, %503 : vector<4x9x9xf32>
    %cst_112 = arith.constant 1.000000e-01 : f32
    %505 = vector.broadcast %cst_112 : f32 to vector<4x9x9xf32>
    %506 = arith.divf %504, %505 : vector<4x9x9xf32>
    %cst_113 = arith.constant dense<0xFF800000> : vector<4x9xf32>
    %507 = vector.multi_reduction <maximumf>, %506, %cst_113 [2] : vector<4x9x9xf32> to vector<4x9xf32>
    %508 = vector.shape_cast %507 : vector<4x9xf32> to vector<4x9x1xf32>
    %509 = vector.broadcast %508 : vector<4x9x1xf32> to vector<4x9x9xf32>
    %510 = arith.subf %506, %509 : vector<4x9x9xf32>
    %511 = math.exp %510 : vector<4x9x9xf32>
    %cst_114 = arith.constant dense<0.000000e+00> : vector<4x9xf32>
    %512 = vector.multi_reduction <add>, %511, %cst_114 [2] : vector<4x9x9xf32> to vector<4x9xf32>
    %513 = vector.shape_cast %512 : vector<4x9xf32> to vector<4x9x1xf32>
    %514 = math.log %513 : vector<4x9x1xf32>
    %515 = arith.addf %508, %514 : vector<4x9x1xf32>
    %516 = vector.broadcast %118 : vector<1x9x1xf32> to vector<4x9x1xf32>
    %517 = arith.subf %516, %515 : vector<4x9x1xf32>
    %cst_115 = arith.constant 1.000000e-01 : f32
    %518 = vector.broadcast %cst_115 : f32 to vector<4x9x1xf32>
    %519 = arith.mulf %518, %517 : vector<4x9x1xf32>
    %520 = arith.addf %480, %519 : vector<4x9x1xf32>
    %521 = vector.broadcast %500 : vector<4x1x9xf32> to vector<4x9x9xf32>
    %522 = arith.addf %106, %521 : vector<4x9x9xf32>
    %523 = vector.broadcast %520 : vector<4x9x1xf32> to vector<4x9x9xf32>
    %524 = arith.addf %522, %523 : vector<4x9x9xf32>
    %cst_116 = arith.constant 1.000000e-01 : f32
    %525 = vector.broadcast %cst_116 : f32 to vector<4x9x9xf32>
    %526 = arith.divf %524, %525 : vector<4x9x9xf32>
    %527 = math.exp %526 : vector<4x9x9xf32>
    %528 = arith.mulf %21, %527 : vector<4x9x9xf32>
    %cst_117 = arith.constant dense<0.000000e+00> : vector<4x9xf32>
    %529 = vector.multi_reduction <add>, %528, %cst_117 [1] : vector<4x9x9xf32> to vector<4x9xf32>
    %530 = vector.shape_cast %529 : vector<4x9xf32> to vector<4x1x9xf32>
    %531 = vector.shape_cast %530 : vector<4x1x9xf32> to vector<4x9xf32>
    %cst_118 = arith.constant 1.000000e+00 : f32
    %532 = vector.broadcast %cst_118 : f32 to vector<1x9xf32>
    %cst_119 = arith.constant dense<0.000000e+00> : vector<1x4xf32>
    %533 = tpu.matmul %532, %531, %cst_119 {dimension_numbers = #tpu.dot_dimension_numbers<[1], [1], [0], [0], [0, 0, 1, 0], [], []>, precision = #tpu.contract_precision<fp32>} : vector<1x9xf32>, vector<4x9xf32>, vector<1x4xf32> -> vector<1x4xf32>
    %cst_120 = arith.constant 1.000000e-01 : f32
    %534 = vector.broadcast %cst_120 : f32 to vector<1x4xf32>
    %535 = arith.divf %533, %534 : vector<1x4xf32>
    %c0_121 = arith.constant 0 : index
    %c0_122 = arith.constant 0 : index
    %c0_123 = arith.constant 0 : index
    %c0_124 = arith.constant 0 : index
    %536 = vector.load %arg5[%c0_121, %c0_122, %c0_123, %c0_124] : memref<1x1x1x4xf32, #tpu.memory_space<vmem>>, vector<1x1x1x4xf32>
    %537 = vector.shape_cast %536 : vector<1x1x1x4xf32> to vector<1x4xf32>
    %538 = vector.shape_cast %535 : vector<1x4xf32> to vector<1x1x1x4xf32>
    tpu.vector_store %arg5[%c0_121, %c0_122, %c0_123, %c0_124], %538 {strides = array<i32>} : memref<1x1x1x4xf32, #tpu.memory_space<vmem>>, vector<1x1x1x4xf32>,
    return
  }
  func.func @transform_0(%arg0: i32, %arg1: i32) -> (i32, i32, i32) {
    %c0_i32 = arith.constant 0 : i32
    %c0_i32_0 = arith.constant 0 : i32
    %c0_i32_1 = arith.constant 0 : i32
    return %arg0, %c0_i32, %c0_i32_0 : i32, i32, i32
  }
  func.func @transform_1(%arg0: i32, %arg1: i32) -> (i32, i32, i32) {
    %c0_i32 = arith.constant 0 : i32
    %c0_i32_0 = arith.constant 0 : i32
    %c0_i32_1 = arith.constant 0 : i32
    return %arg1, %c0_i32, %c0_i32_0 : i32, i32, i32
  }
  func.func @transform_2(%arg0: i32, %arg1: i32) -> (i32, i32) {
    %c0_i32 = arith.constant 0 : i32
    %c0_i32_0 = arith.constant 0 : i32
    %c0_i32_1 = arith.constant 0 : i32
    return %c0_i32, %c0_i32_0 : i32, i32
  }
  func.func @transform_3(%arg0: i32, %arg1: i32) -> (i32, i32, i32, i32) {
    %c0_i32 = arith.constant 0 : i32
    %c0_i32_0 = arith.constant 0 : i32
    %c0_i32_1 = arith.constant 0 : i32
    return %arg0, %arg1, %c0_i32, %c0_i32_0 : i32, i32, i32, i32
  }
}

</mosaic_0001>

<bundles_post_ra>
// kernel: transformer_agg_forward.3
= control target key start
LH: loop header
LB: loop body
LE: loop exit
PB: predicated region body
PF: predicated region fallthrough
CT: control target
= control target key end

     0   :  { %8 = vsyncpa [#allocation3], 0  ;;  %s10575_s0 = inlined_call_operand.vmem [shape: f32[2,9,32], index: 0, kind: input, shape index: {}]   ;;  %s10576_s1 = inlined_call_operand.vmem [shape: f32[4,9,32], index: 1, kind: input, shape index: {}]   ;;  %s10577_s2 = inlined_call_operand.vmem [shape: f32[8,32], index: 2, kind: input, shape index: {}]   ;;  %s10578_s3 = inlined_call_operand.hbm [shape: f32[2,1,1,4], index: 3, kind: output, shape index: {}]  }
   0x1   :  { %10 = vsyncpa [#allocation3 + $0x1], 0  ;;  %s8007_s12 = smov 0   ;;  %s8009_s13 = smov 0  }
   0x2   :  { %s8011_s14 = smov 0   ;;  %s8013_s15 = smov 0  }
   0x3   :  { %s8015_s16 = smov 0   ;;  %s8017_s17 = smov 0  }
   0x4 LB: > { %s6625_s18 = sadd.s32 4294967295, %s7978_s17   ;;  %s6626_s19 = sadd.s32 4294967294, %s7978_s17   ;;  %s7978_s17 = sphi %s8017_s17, %s16_s17   ;;  %s7974_s16 = sphi %s8015_s16, %s10587_s16   ;;  %s7970_s15 = sphi %s8013_s15, %s10586_s15   ;;  %s7966_s14 = sphi %s8011_s14, %s10585_s14   ;;  %s7962_s13 = sphi %s8009_s13, %s10584_s13   ;;  %s7958_s12 = sphi %s8007_s12, %s10583_s12  }
   0x5   : > { %s28_s20 = sadd.s32 1, %s7974_s16  ;;  %s110_s21 = sadd.s32 1, %s7966_s14 }
   0x6   : > { %p30_p0 = scmp.ge.s32.totalorder %s28_s20, 2  ;;  %p120_p1 = scmp.ne.s32.totalorder %s7966_s14, %s7962_s13 }
   0x7   : > { %p121_p2 = scmp.eq.s32.totalorder %s6625_s18, 1  ;;  %p126_p3 = scmp.ne.s32.totalorder %s7962_s13, %s7958_s12 }
   0x8   : > { %s10589_s20 = smov (%p30_p0, %s28_s20), 0  ;;  %p127_p5 = scmp.eq.s32.totalorder %s6626_s19, 1 }
   0x9   : > { %p8047_p4 = por %p121_p2, %p120_p1  ;;  %s105_s23 = ssub.s32 %s7974_s16, %s10589_s20 }
   0xa   : > { %p6630_p6 = scmp.ge.s32.totalorder %s7978_s17, 1  ;;  %p108_p7 = scmp.eq.s32.totalorder %s105_s23, 0 }
   0xb   : > { %p8054_p8 = por %p127_p5, %p126_p3  ;;  %p166_p9 = scmp.lt.s32.totalorder %s7978_s17, 3 }
   0xc   : > { %s8060_s25 = scalar_select %p108_p7, %s7966_s14, %s110_s21  }
   0xd   : > { %p167_p10 = pnand %p6630_p6, %p166_p9 }
   0xe   : > { %v8065_v0 = vld [vmem:[%s10576_s1] sm:$0xff] (!%p167_p10)  ;;  %vm219_vm0 = vcmask (!%p167_p10), 261120   ;;  %v8070_v1 = vld [vmem:[%s10576_s1 + $0x8] sm:$0x1] (!%p167_p10)  ;;  %p195_p11 = scmp.lt.s32.totalorder (!%p167_p10), %s7970_s15, 1  ;;  %vm223_vm1 = vcmask (!%p167_p10), 253952  }
   0xf   : > { %170 = sbr.rel (%p167_p10) target bundleno = 5125 (0x1405), region = 32  ;;  %v247_v2 = vmul.f32 (!%p167_p10), %v8065_v0, %v8065_v0  ;;  %v248_v3 = vmul.f32 (!%p167_p10), %v8070_v1, %v8070_v1  ;;  %v8090_v8 = vld [vmem:[%s10576_s1 + $0x28] sm:$0x1] (!%p167_p10)  ;;  %v8104_v14 = vld [vmem:[%s10576_s1 + $0x18] sm:$0x1] (!%p167_p10)  ;;  %v8110_v16 = vld [vmem:[%s10576_s1 + $0x20] sm:$0xff] (!%p167_p10) }
  0x10   : > { %v252_v13 = vmul.f32 (!%p167_p10), %v8090_v8, %v8090_v8  ;;  %v250_v18 = vmul.f32 (!%p167_p10), %v8104_v14, %v8104_v14  ;;  %v251_v20 = vmul.f32 (!%p167_p10), %v8110_v16, %v8110_v16  ;;  %v8122_v21 = vld [vmem:[%s10576_s1 + $0x10] sm:$0xff] (!%p167_p10)  ;;  %v8132_v31 = vld [vmem:[%s10576_s1 + $0x38] sm:$0x1] (!%p167_p10)  ;;  %s193_s11 = sand.u32 (!%p167_p10), 1, %s7962_s13   ;;  %s6638_s18 = sshll.u32 (!%p167_p10), %s7970_s15, 4 }
  0x11   : > { %v255_v4 = vsel (!%p167_p10), %vm219_vm0, %v247_v2, 0.0  ;;  %v258_v5 = vsel (!%p167_p10), %vm223_vm1, %v248_v3, 0.0  ;;  %v249_v24 = vmul.f32 (!%p167_p10), %v8122_v21, %v8122_v21  ;;  %v254_v37 = vmul.f32 (!%p167_p10), %v8132_v31, %v8132_v31  ;;  %v8148_v50 = vld [vmem:[%s10576_s1 + $0x30] sm:$0xff] (!%p167_p10)  ;;  %s194_s19 = scalar_lea.vmem (!%p167_p10), [#allocation2], %s193_s11  ;;  %s10528_s27 = scalar_lea.hbm (!%p167_p10), %s10578_s3, %s6638_s18 }
  0x12   : > { %256 = vadd.xlane.f32.xlu1 (!%p167_p10), %v255_v4  ;;  %v270_v17 = vsel (!%p167_p10), %vm223_vm1, %v252_v13, 0.0  ;;  %v264_v22 = vsel (!%p167_p10), %vm223_vm1, %v250_v18, 0.0  ;;  %v267_v23 = vsel (!%p167_p10), %vm219_vm0, %v251_v20, 0.0  ;;  %v253_v59 = vmul.f32 (!%p167_p10), %v8148_v50, %v8148_v50  ;;  %s6546_s21 = sshll.u32 (!%p167_p10), %s194_s19, 4  ;;  %s6533_s28 = scalar_lea.sflag (!%p167_p10), [#allocation3], %s193_s11  ;;  %s10530_s21 = int_to_ptr.vmem [resolvable:$true] %s6546_s21 }
  0x13   : > { %v261_v25 = vsel (!%p167_p10), %vm219_vm0, %v249_v24, 0.0  ;;  %v276_v48 = vsel (!%p167_p10), %vm223_vm1, %v254_v37, 0.0  ;;  %v2449_v3 = vsel (!%p167_p10), %vm223_vm1, %v8104_v14, 0.0  ;;  %v2443_v24 = vsel (!%p167_p10), %vm223_vm1, %v8070_v1, 0.0  ;;  %s7900_s29 = scalar_lea.vmem (!%p167_p10), %s10530_s21, 16 }
  0x14   : > { %v273_v13 = vsel (!%p167_p10), %vm219_vm0, %v253_v59, 0.0  ;;  %v2458_v37 = vsel (!%p167_p10), %vm219_vm0, %v8148_v50, 0.0  ;;  %p7901_p12 = scmp.ne.s32.totalorder (!%p167_p10), %s10530_s21, %s7900_s29 }
  0x16   : > { %s196_s30 = scalar_select %p195_p11, %s7970_s15, 1  ;;  %259 = vadd.xlane.f32.xlu1 %v258_v5 }
  0x17   : > { %p7902_p13 = pnand %p7901_p12, %p8047_p4  ;;  %s7986_s15 = smov [#allocation2]  }
  0x18   : > { %s6641_s4 = sshll.u32 %s196_s30, 4  ;;  %s7904_s30 = sshll.u32 %s7986_s15, 4  ;;  %s7905_s30 = int_to_ptr.vmem [resolvable:$false] %s7904_s30 }
  0x19   : > { %s199_s7 = scalar_lea.vmem %s10575_s0, %s6641_s4  ;;  %p7903_p0 = pneg %p7902_p13 }
  0x1a   : > { %v8083_v6 = vld [vmem:[%s199_s7] sm:$0xff]  ;;  %v8085_v7 = vld [vmem:[%s199_s7 + $0x8] sm:$0x1]  ;;  %s7906_s4 = scalar_lea.vmem %s7905_s30, 32  ;;  %p7907_p1 = scmp.lt.s32.totalorder %s10530_s21, %s7905_s30 }
  0x1b   : > { %v217_v9 = vmul.f32 %v8083_v6, %v8083_v6  ;;  %v218_v10 = vmul.f32 %v8085_v7, %v8085_v7  ;;  %v2404_v12 = vsel %vm223_vm1, %v8085_v7, 0.0  ;;  %v2401_v19 = vsel %vm219_vm0, %v8083_v6, 0.0  ;;  %p7908_p2 = scmp.lt.s32.totalorder %s7906_s4, %s7900_s29 }
  0x1c   : > { %2405 = vadd.xlane.f32.xlu1 %v2404_v12 }
  0x1d   : > { %v220_v11 = vsel %vm219_vm0, %v217_v9, 0.0  ;;  %v224_v15 = vsel %vm223_vm1, %v218_v10, 0.0  ;;  %p7909_p3 = por %p7908_p2, %p7907_p1 }
  0x1e   : > { %221 = vadd.xlane.f32.xlu0 %v220_v11 }
  0x1f   : > { %p7910_p5 = pnand %p7909_p3, %p7903_p0 }
  0x20   : > { %271 = vadd.xlane.f32.xlu1 %v270_v17  ;;  %v2440_v17 = vsel %vm219_vm0, %v8065_v0, 0.0 }
  0x22   : > { %225 = vadd.xlane.f32.xlu0 %v224_v15 }
  0x24   : > { %265 = vadd.xlane.f32.xlu1 %v264_v22 }
  0x26   : > { %2402 = vadd.xlane.f32.xlu0 %v2401_v19 }
  0x2a   : > { %268 = vadd.xlane.f32.xlu0 %v267_v23 }
  0x2e   : > { %262 = vadd.xlane.f32.xlu0 %v261_v25  ;;  %v2461_v25 = vsel %vm223_vm1, %v8132_v31, 0.0 }
  0x9f   : > { %v257_v26 = vpop.xlane.xlu1 %256 }
  0xa0   : > { %7246 = vrsqrt.f32 %v257_v26  ;;  %vm281_vm2 = vcmp.eq.f32.partialorder %v257_v26, inf  ;;  %v284_v38 = vand.u32 2147483648, %v257_v26  ;;  %vm283_vm3 = vcmp.eq.f32.partialorder %v257_v26, 0.0 }
  0xa3   : > { %v260_v27 = vpop.xlane.xlu1 %259 }
  0xa4   : > { %7248 = vrsqrt.f32 %v260_v27  ;;  %vm288_vm4 = vcmp.eq.f32.partialorder %v260_v27, inf  ;;  %v291_v52 = vand.u32 2147483648, %v260_v27  ;;  %vm290_vm5 = vcmp.eq.f32.partialorder %v260_v27, 0.0 }
  0xa9   : > { %v2406_v29 = vpop.xlane.xlu1 %2405 }
  0xaa   : > { %v2409_v30 = vmul.f32 0.03125, %v2406_v29  ;;  %v7247_v33 = vpop.eup %7246 }
  0xab   : > { %v222_v28 = vpop.xlane.xlu0 %221  ;;  %v280_v35 = vmul.f32 %v7247_v33, %v257_v26 }
  0xac   : > { %7250 = vrsqrt.f32 %v222_v28  ;;  %v8135_v34 = vsub.f32 %v8085_v7, %v2409_v30  ;;  %vm229_vm6 = vcmp.eq.f32.partialorder %v222_v28, inf  ;;  %v232_v58 = vand.u32 2147483648, %v222_v28 }
  0xad   : > { %v8137_v36 = vpop.xlane.xlu1 %271  ;;  %v282_v40 = vsel %vm281_vm2, %v257_v26, %v280_v35  ;;  %vm231_vm7 = vcmp.eq.f32.partialorder %v222_v28, 0.0  ;;  %v2455_v35 = vsel %vm223_vm1, %v8090_v8, 0.0 }
  0xae   : > { %v2413_v39 = vmul.f32 %v8135_v34, %v8135_v34  ;;  %v7249_v42 = vpop.eup %7248  ;;  %v285_v43 = vsel %vm283_vm3, %v284_v38, %v282_v40  ;;  %vm316_vm2 = vcmp.eq.f32.partialorder %v8137_v36, inf  ;;  %vm318_vm3 = vcmp.eq.f32.partialorder %v8137_v36, 0.0 }
  0xaf   : > { %v226_v32 = vpop.xlane.xlu0 %225  ;;  %v335_v46 = vmax.f32 %v285_v43, 1e-12  ;;  %v287_v47 = vmul.f32 %v7249_v42, %v260_v27 }
  0xb0   : > { %7252 = vrsqrt.f32 %v226_v32  ;;  %v2417_v45 = vsel %vm223_vm1, %v2413_v39, 0.0  ;;  %vm236_vm8 = vcmp.eq.f32.partialorder %v226_v32, inf  ;;  %v239_v11 = vand.u32 2147483648, %v226_v32 }
  0xb1   : > { %2418 = vadd.xlane.f32.xlu1 %v2417_v45  ;;  %v266_v49 = vpop.xlane.xlu1 %265  ;;  %v289_v54 = vsel %vm288_vm4, %v260_v27, %v287_v47  ;;  %vm238_vm9 = vcmp.eq.f32.partialorder %v226_v32, 0.0  ;;  %v2446_v47 = vsel %vm219_vm0, %v8122_v21, 0.0  ;;  %vm7981_vm4 = vmmov 0  }
  0xb2   : > { %7254 = vrsqrt.f32 %v266_v49  ;;  %v292_v57 = vsel %vm290_vm5, %v291_v52, %v289_v54  ;;  %vm302_vm10 = vcmp.eq.f32.partialorder %v266_v49, inf  ;;  %v305_v20 = vand.u32 2147483648, %v266_v49 }
  0xb3   : > { %v2403_v41 = vpop.xlane.xlu0 %2402  ;;  %7256 = vrcp.f32 %v335_v46  ;;  %v336_v60 = vmax.f32 %v292_v57, 1e-12  ;;  %vm304_vm11 = vcmp.eq.f32.partialorder %v266_v49, 0.0 }
  0xb4   : > { %v2408_v44 = vmul.f32 0.03125, %v2403_v41 }
  0xb5   : > { %277 = vadd.xlane.f32.xlu1 %v276_v48  ;;  %7258 = vrcp.f32 %v336_v60  ;;  %v2452_v60 = vsel %vm219_vm0, %v8110_v16, 0.0 }
  0xb6   : > { %v7251_v51 = vpop.eup %7250  ;;  %v8151_v53 = vsub.f32 %v8083_v6, %v2408_v44 }
  0xb7   : > { %v228_v55 = vmul.f32 %v7251_v51, %v222_v28  ;;  %v8153_v56 = vpop.xlane.xlu0 %268 }
  0xb8   : > { %v2412_v62 = vmul.f32 %v8151_v53, %v8151_v53  ;;  %vm309_vm14 = vcmp.eq.f32.partialorder %v8153_v56, inf  ;;  %vm311_vm15 = vcmp.eq.f32.partialorder %v8153_v56, 0.0 }
  0xb9   : > { %v230_v61 = vsel %vm229_vm6, %v222_v28, %v228_v55  ;;  %2450 = vadd.xlane.f32.xlu1 %v2449_v3 }
  0xba   : > { %v7253_v63 = vpop.eup %7252  ;;  %v233_v2 = vsel %vm231_vm7, %v232_v58, %v230_v61  ;;  %v2414_v9 = vsel %vm219_vm0, %v2412_v62, 0.0 }
  0xbb   : > { %v241_v4 = vmax.f32 %v233_v2, 1e-12  ;;  %v235_v5 = vmul.f32 %v7253_v63, %v226_v32  ;;  %v263_v10 = vpop.xlane.xlu0 %262  ;;  %2415 = vadd.xlane.f32.xlu0 %v2414_v9 }
  0xbc   : > { %7260 = vrsqrt.f32 %v263_v10  ;;  %v7255_v19 = vpop.eup %7254  ;;  %vm295_vm12 = vcmp.eq.f32.partialorder %v263_v10, inf  ;;  %v298_v39 = vand.u32 2147483648, %v263_v10  ;;  %vm297_vm13 = vcmp.eq.f32.partialorder %v263_v10, 0.0 }
  0xbd   : > { %7262 = vrcp.f32 %v241_v4  ;;  %v237_v12 = vsel %vm236_vm8, %v226_v32, %v235_v5  ;;  %v7257_v22 = vpop.eup %7256  ;;  %v301_v23 = vmul.f32 %v7255_v19, %v266_v49  ;;  %2441 = vadd.xlane.f32.xlu1 %v2440_v17 }
  0xbe   : > { %v240_v15 = vsel %vm238_vm9, %v239_v11, %v237_v12  ;;  %7264 = vrsqrt.f32 %v8153_v56  ;;  %v344_v26 = vmul.f32 %v7257_v22, %v8065_v0  ;;  %v312_v12 = vand.u32 2147483648, %v8153_v56 }
  0xbf   : > { %v242_v18 = vmax.f32 %v240_v15, 1e-12  ;;  %274 = vadd.xlane.f32.xlu0 %v273_v13  ;;  %v303_v27 = vsel %vm302_vm10, %v266_v49, %v301_v23  ;;  %v7259_v30 = vpop.eup %7258  ;;  %vm3206_vm10 = vcmask 72704  }
  0xc0   : > { %v306_v28 = vsel %vm304_vm11, %v305_v20, %v303_v27  ;;  %v360_v29 = vsel %vm219_vm0, %v344_v26, 0  ;;  %v346_v40 = vmul.f32 %v7259_v30, %v8070_v1  ;;  %vm3208_vm11 = vcmask 65536  }
  0xc1   : > { %7266 = vrcp.f32 %v242_v18  ;;  %v338_v32 = vmax.f32 %v306_v28, 1e-12  ;;  %2462 = vadd.xlane.f32.xlu1 %v2461_v25  ;;  %v8172_v33 = vand.u32 4294901760, %v360_v29 }
  0xc2   : > { %7268 = vrsqrt.f32 %v8137_v36  ;;  %v363_v45 = vsel %vm219_vm0, %v346_v40, 0 }
  0xc3   : > { %2444 = vadd.xlane.f32.xlu0 %v2443_v24  ;;  %7270 = vrcp.f32 %v338_v32  ;;  %6779 = vmatprep.mubr.f32.mxu0 %v8172_v33  ;;  %v8182_v43 = vsub.f32 %v360_v29, %v8172_v33  ;;  %v8189_v49 = vand.u32 4294901760, %v363_v45  ;;  %v319_v32 = vand.u32 2147483648, %v8137_v36 }
  0xc5   : > { %2459 = vadd.xlane.f32.xlu1 %v2458_v37  ;;  %v440_v48 = vand.u32 4294901760, %v8182_v43  ;;  %v8201_v63 = vsub.f32 %v363_v45, %v8189_v49 }
  0xc6   : > { %v7261_v38 = vpop.eup %7260 }
  0xc7   : > { %v7263_v41 = vpop.eup %7262  ;;  %v294_v42 = vmul.f32 %v7261_v38, %v263_v10  ;;  %2456 = vadd.xlane.f32.xlu0 %v2455_v35  ;;  %v450_v13 = vand.u32 4294901760, %v8201_v63 }
  0xc8   : > { %v244_v44 = vmul.f32 %v7263_v41, %v8083_v6  ;;  %v7265_v51 = vpop.eup %7264  ;;  %v441_v6 = vsub.f32 %v8182_v43, %v440_v48 }
  0xc9   : > { %v296_v46 = vsel %vm295_vm12, %v263_v10, %v294_v42  ;;  %v308_v3 = vmul.f32 %v7265_v51, %v8153_v56  ;;  %vm6072_vm12 = vcmask 1041409  }
  0xca   : > { %v366_v52 = vsel %vm219_vm0, %v244_v44, 0  ;;  %v299_v54 = vsel %vm297_vm13, %v298_v39, %v296_v46  ;;  %v442_v62 = vand.u32 4294901760, %v441_v6  ;;  %vm6074_vm13 = vcmask 1042434  }
  0xcb   : > { %v7267_v55 = vpop.eup %7266  ;;  %v372_v57 = vand.u32 4294901760, %v366_v52  ;;  %v337_v58 = vmax.f32 %v299_v54, 1e-12  ;;  %2447 = vadd.xlane.f32.xlu0 %v2446_v47  ;;  %v310_v15 = vsel %vm309_vm14, %v8153_v56, %v308_v3  ;;  %v451_v56 = vsub.f32 %v8201_v63, %v450_v13 }
  0xcc   : > { %v246_v59 = vmul.f32 %v7267_v55, %v8085_v7  ;;  %6772 = vmatprep.mubr.f32.mxu1 %v442_v62  ;;  %v7269_v5 = vpop.eup %7268  ;;  %v313_v23 = vsel %vm311_vm15, %v312_v12, %v310_v15  ;;  %vm6076_vm14 = vcmask 1043459   ;;  %vm6530_vm15 = vcmask 24576  }
  0xcd   : > { %v8198_v61 = vsub.f32 %v366_v52, %v372_v57  ;;  %7272 = vrcp.f32 %v337_v58  ;;  %v7271_v9 = vpop.eup %7270  ;;  %v315_v20 = vmul.f32 %v7269_v5, %v8137_v36  ;;  %v339_v30 = vmax.f32 %v313_v23, 1e-12 }
  0xce   : > { %v369_v2 = vsel %vm219_vm0, %v246_v59, 0  ;;  %v350_v17 = vmul.f32 %v7271_v9, %v8104_v14  ;;  %v452_v38 = vand.u32 4294901760, %v451_v56 }
  0xcf   : > { %v375_v4 = vand.u32 4294901760, %v369_v2  ;;  %v461_v7 = vand.u32 4294901760, %v8198_v61  ;;  %2453 = vadd.xlane.f32.xlu0 %v2452_v60  ;;  %v317_v37 = vsel %vm316_vm2, %v8137_v36, %v315_v20  ;;  %7274 = vrcp.f32 %v339_v30 }
  0xd0   : > { %v877_v22 = vsel %vm219_vm0, %v350_v17, 0  ;;  %v320_v45 = vsel %vm318_vm3, %v319_v32, %v317_v37  ;;  %v8333_v37 = vld [vmem:[%s10577_s2] ss:$0 sm:$0xff] }
  0xd1   : > { %v8207_v10 = vpack.c.bf16 %v375_v4, %v372_v57  ;;  %v467_v11 = vsub.f32 %v369_v2, %v375_v4  ;;  %v462_v18 = vsub.f32 %v8198_v61, %v461_v7  ;;  %v8225_v25 = vand.u32 4294901760, %v877_v22 }
  0xd2   : > { %v340_v47 = vmax.f32 %v320_v45, 1e-12 }
  0xd3   : > { %7009 = vmatprep.subr.bf16.mxu1 %v8207_v10  ;;  %v468_v19 = vand.u32 4294901760, %v467_v11  ;;  %v463_v27 = vand.u32 4294901760, %v462_v18  ;;  %v8229_v29 = vsub.f32 %v877_v22, %v8225_v25  ;;  %v8241_v42 = vpack.c.bf16 %v467_v11, %v8198_v61 }
  0xd4   : > { %7011 = vmatpush3.bf16.xpose.msra.mxu1 %v8207_v10  ;;  %7276 = vrcp.f32 %v340_v47 }
  0xd5   : > { %7033 = vmatprep.subr.bf16.mxu1 %v8207_v10  ;;  %v469_v24 = vsub.f32 %v467_v11, %v468_v19  ;;  %v958_v41 = vand.u32 4294901760, %v8229_v29  ;;  %v8262_v6 = vpack.c.bf16 %v468_v19, %v461_v7  ;;  %v7982_v11 = vmov 0.0  }
  0xd7   : > { %v7273_v26 = vpop.eup %7272  ;;  %v470_v28 = vand.u32 4294901760, %v469_v24  ;;  %v959_v46 = vsub.f32 %v8229_v29, %v958_v41 }
  0xd8   : > { %v348_v35 = vmul.f32 %v7273_v26, %v8122_v21 }
  0xd9   : > { %v8235_v39 = vpack.c.bf16 %v470_v28, %v463_v27  ;;  %v960_v54 = vand.u32 4294901760, %v959_v46  ;;  %v7275_v57 = vpop.eup %7274  ;;  %v8341_v46 = vld [vmem:[%s10577_s2 + $0x1] ss:$0 sm:$0xff] }
  0xda   : > { %v874_v40 = vsel %vm219_vm0, %v348_v35, 0  ;;  %v352_v58 = vmul.f32 %v7275_v57, %v8110_v16 }
  0xdb   : > { %6773 = vmatmul.mubr.f32.vlgmr.msra.gmra.mrb[0].mxu1 %v452_v38  ;;  %7013 = vmatprep.subr.bf16.mxu0 %v8235_v39  ;;  %v8243_v44 = vand.u32 4294901760, %v874_v40 }
  0xdc   : > { %7015 = vmatpush3.bf16.xpose.msra.mxu0 %v8235_v39  ;;  %7035 = vmatpush3.bf16.xpose.msra.mxu1 %v8207_v10  ;;  %v1382_v60 = vsel %vm219_vm0, %v352_v58, 0 }
  0xdd   : > { %7017 = vmatprep.subr.bf16.mxu0 %v8241_v42  ;;  %7037 = vmatprep.subr.bf16.mxu1 %v8235_v39  ;;  %v947_v36 = vsub.f32 %v874_v40, %v8243_v44  ;;  %v1454_v61 = vand.u32 4294901760, %v1382_v60 }
  0xde   : > { %v7277_v59 = vpop.eup %7276 }
  0xdf   : > { %v948_v51 = vand.u32 4294901760, %v947_v36  ;;  %v354_v62 = vmul.f32 %v7277_v59, %v8090_v8 }
  0xe1   : > { %v949_v52 = vsub.f32 %v947_v36, %v948_v51 }
  0xe3   : > { %6780 = vmatmul.mubr.f32.vlgmr.msra.gmra.mrb[0].mxu0 %v8189_v49  ;;  %v950_v55 = vand.u32 4294901760, %v949_v52 }
  0xe4   : > { %7019 = vmatpush3.bf16.xpose.msra.mxu0 %v8241_v42  ;;  %6786 = vmatprep.mubr.f32.mxu0 %v8182_v43  ;;  %v1455_v43 = vsub.f32 %v1382_v60, %v1454_v61 }
  0xe5   : > { %7021 = vmatprep.subr.bf16.mxu0 %v8207_v10  ;;  %6814 = vmatprep.mubr.f32.mxu1 %v950_v55 }
  0xe6   : > { %6815 = vmatmul.mubr.f32.vlgmr.msra.gmra.mrb[2].mxu1 %v960_v54  ;;  %v1456_v3 = vand.u32 4294901760, %v1455_v43 }
  0xe7   : > { %7039 = vmatpush3.bf16.xpose.msra.mxu1 %v8235_v39  ;;  %6821 = vmatprep.mubr.f32.mxu1 %v8243_v44 }
  0xe8   : > { %7041 = vmatprep.subr.bf16.mxu1 %v8241_v42  ;;  %v1457_v4 = vsub.f32 %v1455_v43, %v1456_v3 }
  0xea   : > { %v1458_v5 = vand.u32 4294901760, %v1457_v4 }
  0xeb   : > { %6787 = vmatmul.mubr.f32.vlgmr.msra.gmra.mrb[0].mxu0 %v8201_v63 }
  0xec   : > { %7023 = vmatpush3.bf16.xpose.msra.mxu0 %v8207_v10  ;;  %6793 = vmatprep.mubr.f32.mxu0 %v440_v48  ;;  %v1385_v48 = vsel %vm219_vm0, %v354_v62, 0 }
  0xed   : > { %7025 = vmatprep.subr.bf16.mxu0 %v8262_v6  ;;  %v1464_v2 = vand.u32 4294901760, %v1385_v48 }
  0xee   : > { %6822 = vmatmul.mubr.f32.vlgmr.msra.gmra.mrb[2].mxu1 %v8225_v25 }
  0xef   : > { %7043 = vmatpush3.bf16.xpose.msra.mxu1 %v8241_v42  ;;  %6828 = vmatprep.mubr.f32.mxu1 %v947_v36  ;;  %v1465_v63 = vsub.f32 %v1385_v48, %v1464_v2 }
  0xf0   : > { %7045 = vmatprep.subr.bf16.mxu1 %v8207_v10 }
  0xf1   : > { %v1466_v7 = vand.u32 4294901760, %v1465_v63 }
  0xf3   : > { %6794 = vmatmul.mubr.f32.vlgmr.msra.gmra.mrb[0].mxu0 %v450_v13  ;;  %v1467_v9 = vsub.f32 %v1465_v63, %v1466_v7 }
  0xf4   : > { %7027 = vmatpush3.bf16.xpose.msra.mxu0 %v8262_v6  ;;  %6800 = vmatprep.mubr.f32.mxu0 %v8172_v33 }
  0xf5   : > { %7029 = vmatprep.subr.bf16.mxu0 %v8207_v10 }
  0xf6   : > { %6829 = vmatmul.mubr.f32.vlgmr.msra.gmra.mrb[2].mxu1 %v8229_v29 }
  0xf7   : > { %7047 = vmatpush3.bf16.xpose.msra.mxu1 %v8207_v10  ;;  %6835 = vmatprep.mubr.f32.mxu1 %v948_v51 }
  0xf8   : > { %7049 = vmatprep.subr.bf16.mxu1 %v8262_v6 }
  0xfb   : > { %6801 = vmatmul.mubr.f32.vlgmr.msra.gmra.mrb[0].mxu0 %v8189_v49 }
  0xfc   : > { %7031 = vmatpush3.bf16.xpose.msra.mxu0 %v8207_v10  ;;  %6807 = vmatprep.mubr.f32.mxu0 %v8172_v33  ;;  %v1468_v33 = vand.u32 4294901760, %v1467_v9 }
  0xfd   : > { %7057 = vmatprep.subr.bf16.mxu0 %v8207_v10 }
  0xfe   : > { %6836 = vmatmul.mubr.f32.vlgmr.msra.gmra.mrb[2].mxu1 %v958_v41 }
  0xff   : > { %7051 = vmatpush3.bf16.xpose.msra.mxu1 %v8262_v6  ;;  %6842 = vmatprep.mubr.f32.mxu1 %v8243_v44 }
 0x100   : > { %7053 = vmatprep.subr.bf16.mxu1 %v8207_v10 }
 0x103   : > { %6808 = vmatmul.mubr.f32.vlgmr.msra.gmra.mrb[0].mxu0 %v8189_v49  ;;  %v7980_v49 = vmov 0.0|0.0  }
 0x104   : > { %7059 = vmatpush3.bf16.xpose.msra.mxu0 %v8207_v10  ;;  %6856 = vmatprep.mubr.f32.mxu0 %v1458_v5 }
 0x105   : > { %7061 = vmatprep.subr.bf16.mxu0 %v8235_v39 }
 0x106   : > { %6843 = vmatmul.mubr.f32.vlgmr.msra.gmra.mrb[2].mxu1 %v8225_v25 }
 0x107   : > { %7055 = vmatpush3.bf16.xpose.msra.mxu1 %v8207_v10  ;;  %6849 = vmatprep.mubr.f32.mxu1 %v8243_v44 }
 0x108   : > { %7081 = vmatprep.subr.bf16.mxu1 %v8207_v10 }
 0x10b   : > { %6857 = vmatmul.mubr.f32.vlgmr.msra.gmra.mrb[2].mxu0 %v1468_v33 }
 0x10c   : > { %7063 = vmatpush3.bf16.xpose.msra.mxu0 %v8235_v39  ;;  %6863 = vmatprep.mubr.f32.mxu0 %v1454_v61 }
 0x10d   : > { %7065 = vmatprep.subr.bf16.mxu0 %v8241_v42 }
 0x10e   : > { %6850 = vmatmul.mubr.f32.vlgmr.msra.gmra.mrb[2].mxu1 %v8225_v25  ;;  %v8319_v25 = vld [vmem:[%s10577_s2 + $0x2] sm:$0x1] }
 0x10f   : > { %7083 = vmatpush3.bf16.xpose.msra.mxu1 %v8207_v10  ;;  %v2566_v29 = vsel %vm219_vm0, %v8319_v25, 0 }
 0x110   : > { %7085 = vmatprep.subr.bf16.mxu1 %v8235_v39  ;;  %v8343_v47 = vand.u32 4294901760, %v2566_v29 }
 0x113   : > { %6864 = vmatmul.mubr.f32.vlgmr.msra.gmra.mrb[2].mxu0 %v1464_v2 }
 0x114   : > { %7067 = vmatpush3.bf16.xpose.msra.mxu0 %v8241_v42  ;;  %6870 = vmatprep.mubr.f32.mxu0 %v1455_v43 }
 0x115   : > { %7069 = vmatprep.subr.bf16.mxu0 %v8207_v10 }
 0x11b   : > { %6871 = vmatmul.mubr.f32.vlgmr.msra.gmra.mrb[2].mxu0 %v1465_v63 }
 0x11c   : > { %7071 = vmatpush3.bf16.xpose.msra.mxu0 %v8207_v10  ;;  %6877 = vmatprep.mubr.f32.mxu0 %v1456_v3  ;;  %v8359_v3 = vsub.f32 %v2566_v29, %v8343_v47 }
 0x11d   : > { %7073 = vmatprep.subr.bf16.mxu0 %v8262_v6 }
 0x123   : > { %6878 = vmatmul.mubr.f32.vlgmr.msra.gmra.mrb[2].mxu0 %v1466_v7 }
 0x124   : > { %7075 = vmatpush3.bf16.xpose.msra.mxu0 %v8262_v6  ;;  %6884 = vmatprep.mubr.f32.mxu0 %v1454_v61 }
 0x125   : > { %7077 = vmatprep.subr.bf16.mxu0 %v8207_v10 }
 0x12b   : > { %6885 = vmatmul.mubr.f32.vlgmr.msra.gmra.mrb[2].mxu0 %v1464_v2 }
 0x12c   : > { %7079 = vmatpush3.bf16.xpose.msra.mxu0 %v8207_v10  ;;  %6891 = vmatprep.mubr.f32.mxu0 %v1454_v61 }
 0x12d   : > { %7104 = vmatprep.subr.bf16.mxu0 %v7980_v49 }
 0x133   : > { %6892 = vmatmul.mubr.f32.vlgmr.msra.gmra.mrb[2].mxu0 %v1464_v2 }
 0x134   : > { %6940 = vmatprep.mubr.msk.f32.mxu0 %vm7981_vm4, %v7982_v11 }
 0x13e   : > { %v2419_v12 = vpop.xlane.xlu1 %2418 }
 0x13f   : > { %v2421_v13 = vmul.f32 0.03125, %v2419_v12 }
 0x141   : > { %v2423_v15 = vadd.f32 1e-05, %v2421_v13 }
 0x142   : > { %v278_v17 = vpop.xlane.xlu1 %277 }
 0x143   : > { %7278 = vrsqrt.f32 %v2423_v15  ;;  %vm330_vm5 = vcmp.eq.f32.partialorder %v278_v17, inf  ;;  %v333_v51 = vand.u32 2147483648, %v278_v17  ;;  %vm332_vm6 = vcmp.eq.f32.partialorder %v278_v17, 0.0 }
 0x144   : > { %7280 = vrsqrt.f32 %v278_v17 }
 0x146   : > { %v2451_v20 = vpop.xlane.xlu1 %2450 }
 0x147   : > { %v2467_v22 = vmul.f32 0.03125, %v2451_v20 }
 0x148   : > { %v2416_v18 = vpop.xlane.xlu0 %2415 }
 0x149   : > { %v2420_v19 = vmul.f32 0.03125, %v2416_v18  ;;  %v8312_v56 = vsub.f32 %v8104_v14, %v2467_v22 }
 0x14a   : > { %v2442_v26 = vpop.xlane.xlu1 %2441 }
 0x14b   : > { %v2422_v23 = vadd.f32 1e-05, %v2420_v19  ;;  %v2464_v27 = vmul.f32 0.03125, %v2442_v26  ;;  %v2483_v28 = vmul.f32 %v8312_v56, %v8312_v56 }
 0x14c   : > { %v8314_v24 = vpop.xlane.xlu0 %274 }
 0x14d   : > { %7282 = vrsqrt.f32 %v2422_v23  ;;  %v7279_v14 = vpop.eup %7278  ;;  %v8327_v30 = vsub.f32 %v8065_v0, %v2464_v27  ;;  %v2497_v35 = vsel %vm223_vm1, %v2483_v28, 0.0  ;;  %vm323_vm7 = vcmp.eq.f32.partialorder %v8314_v24, inf }
 0x14e   : > { %7284 = vrsqrt.f32 %v8314_v24  ;;  %v7281_v38 = vpop.eup %7280  ;;  %v2427_v40 = vmul.f32 %v7279_v14, %v8135_v34  ;;  %2498 = vadd.xlane.f32.xlu1 %v2497_v35  ;;  %v2463_v44 = vpop.xlane.xlu1 %2462  ;;  %vm325_vm8 = vcmp.eq.f32.partialorder %v8314_v24, 0.0  ;;  %v326_v20 = vand.u32 2147483648, %v8314_v24 }
 0x14f   : > { %v329_v45 = vmul.f32 %v7281_v38, %v278_v17  ;;  %v2471_v36 = vmul.f32 0.03125, %v2463_v44  ;;  %v2480_v0 = vmul.f32 %v8327_v30, %v8327_v30 }
 0x150   : > { %v2445_v32 = vpop.xlane.xlu0 %2444  ;;  %v2433_v34 = vmul.f32 %v8333_v37, %v2427_v40 }
 0x151   : > { %v2465_v41 = vmul.f32 0.03125, %v2445_v32  ;;  %v331_v54 = vsel %vm330_vm5, %v278_v17, %v329_v45  ;;  %v8350_v55 = vsub.f32 %v8132_v31, %v2471_v36  ;;  %v2488_v58 = vsel %vm219_vm0, %v2480_v0, 0.0 }
 0x152   : > { %v334_v59 = vsel %vm332_vm6, %v333_v51, %v331_v54  ;;  %2489 = vadd.xlane.f32.xlu1 %v2488_v58  ;;  %v2460_v61 = vpop.xlane.xlu1 %2459 }
 0x153   : > { %v8346_v52 = vsub.f32 %v8070_v1, %v2465_v41  ;;  %v2439_v1 = vadd.f32 %v8341_v46, %v2433_v34  ;;  %v342_v43 = vmax.f32 %v334_v59, 1e-12  ;;  %v2470_v48 = vmul.f32 0.03125, %v2460_v61 }
 0x154   : > { %v2457_v57 = vpop.xlane.xlu0 %2456  ;;  %v2487_v2 = vmul.f32 %v8350_v55, %v8350_v55  ;;  %v2643_v41 = vand.u32 4294901760, %v8359_v3 }
 0x155   : > { %v2469_v60 = vmul.f32 0.03125, %v2457_v57  ;;  %v2481_v62 = vmul.f32 %v8346_v52, %v8346_v52  ;;  %v2572_v5 = vsel %vm219_vm0, %v2439_v1, 0  ;;  %7286 = vrcp.f32 %v342_v43 }
 0x156   : > { %v8369_v12 = vsub.f32 %v8148_v50, %v2470_v48  ;;  %v2509_v15 = vsel %vm223_vm1, %v2487_v2, 0.0  ;;  %v2578_v19 = vand.u32 4294901760, %v2572_v5  ;;  %v2644_v58 = vsub.f32 %v8359_v3, %v2643_v41 }
 0x157   : > { %v7283_v63 = vpop.eup %7282  ;;  %v8363_v4 = vsub.f32 %v8090_v8, %v2469_v60  ;;  %v2491_v7 = vsel %vm223_vm1, %v2481_v62, 0.0  ;;  %2510 = vadd.xlane.f32.xlu1 %v2509_v15 }
 0x158   : > { %v7285_v9 = vpop.eup %7284  ;;  %v2426_v33 = vmul.f32 %v7283_v63, %v8151_v53  ;;  %2492 = vadd.xlane.f32.xlu0 %v2491_v7  ;;  %v2448_v13 = vpop.xlane.xlu0 %2447  ;;  %v2486_v53 = vmul.f32 %v8369_v12, %v8369_v12  ;;  %v8387_v28 = vsub.f32 %v2572_v5, %v2578_v19  ;;  %v2645_v43 = vand.u32 4294901760, %v2644_v58 }
 0x159   : > { %v322_v17 = vmul.f32 %v7285_v9, %v8314_v24  ;;  %v2466_v18 = vmul.f32 0.03125, %v2448_v13  ;;  %v2485_v8 = vmul.f32 %v8363_v4, %v8363_v4 }
 0x15a   : > { %v2432_v22 = vmul.f32 %v8333_v37, %v2426_v33  ;;  %v2506_v32 = vsel %vm219_vm0, %v2486_v53, 0.0  ;;  %v2661_v44 = vand.u32 4294901760, %v8387_v28 }
 0x15b   : > { %v324_v23 = vsel %vm323_vm7, %v8314_v24, %v322_v17  ;;  %v8384_v26 = vsub.f32 %v8122_v21, %v2466_v18  ;;  %v2503_v27 = vsel %vm223_vm1, %v2485_v8, 0.0  ;;  %2507 = vadd.xlane.f32.xlu1 %v2506_v32 }
 0x15c   : > { %v327_v29 = vsel %vm325_vm8, %v326_v20, %v324_v23  ;;  %2504 = vadd.xlane.f32.xlu0 %v2503_v27  ;;  %v2454_v14 = vpop.xlane.xlu0 %2453  ;;  %v2438_v35 = vadd.f32 %v8341_v46, %v2432_v22  ;;  %v2662_v61 = vsub.f32 %v8387_v28, %v2661_v44 }
 0x15d   : > { %v341_v38 = vmax.f32 %v327_v29, 1e-12  ;;  %v2468_v40 = vmul.f32 0.03125, %v2454_v14  ;;  %v2482_v24 = vmul.f32 %v8384_v26, %v8384_v26 }
 0x15e   : > { %v2569_v21 = vsel %vm219_vm0, %v2438_v35, 0  ;;  %v2663_v63 = vand.u32 4294901760, %v2662_v61 }
 0x15f   : > { %7288 = vrcp.f32 %v341_v38  ;;  %v8397_v45 = vsub.f32 %v8110_v16, %v2468_v40  ;;  %v2494_v36 = vsel %vm219_vm0, %v2482_v24, 0.0  ;;  %v2575_v0 = vand.u32 4294901760, %v2569_v21  ;;  %v7287_v57 = vpop.eup %7286 }
 0x160   : > { %2495 = vadd.xlane.f32.xlu0 %v2494_v36  ;;  %v358_v16 = vmul.f32 %v7287_v57, %v8132_v31  ;;  %v3034_v38 = vlaneseq }
 0x161   : > { %v7105_v51 = vpack.c.bf16 %v2578_v19, %v2575_v0  ;;  %v2653_v34 = vsub.f32 %v2569_v21, %v2575_v0  ;;  %v2484_v54 = vmul.f32 %v8397_v45, %v8397_v45 }
 0x162   : > { %v1893_v1 = vsel %vm219_vm0, %v358_v16, 0  ;;  %v8452_v36 = vshrl.u32 %v3034_v38, 7 }
 0x163   : > { %7106 = vmatpush3.bf16.xpose.msra.mxu0 %v7105_v51  ;;  %v2500_v59 = vsel %vm219_vm0, %v2484_v54, 0.0  ;;  %v2654_v60 = vand.u32 4294901760, %v2653_v34  ;;  %v1972_v48 = vand.u32 4294901760, %v1893_v1  ;;  %v7111_v18 = vpack.c.bf16 %v8387_v28, %v2653_v34 }
 0x164   : > { %2501 = vadd.xlane.f32.xlu0 %v2500_v59  ;;  %7107 = vmatprep.subr.bf16.mxu0 %v7980_v49  ;;  %v8455_v59 = vsub.s32 0, %v8452_v36 }
 0x165   : > { %v2655_v62 = vsub.f32 %v2653_v34, %v2654_v60  ;;  %v1973_v33 = vsub.f32 %v1893_v1, %v1972_v48  ;;  %v7117_v22 = vpack.c.bf16 %v2661_v44, %v2654_v60 }
 0x167   : > { %v2656_v2 = vand.u32 4294901760, %v2655_v62  ;;  %v1974_v15 = vand.u32 4294901760, %v1973_v33 }
 0x169   : > { %v7289_v7 = vpop.eup %7288  ;;  %v7108_v5 = vpack.c.bf16 %v2663_v63, %v2656_v2  ;;  %v1975_v19 = vsub.f32 %v1973_v33, %v1974_v15 }
 0x16a   : > { %6941 = vmatmul.mubr.f32.vlgmr.msra.gmra.mrb[4].mxu0 %v2645_v43  ;;  %v356_v9 = vmul.f32 %v7289_v7, %v8148_v50 }
 0x16b   : > { %7109 = vmatpush3.bf16.xpose.msra.mxu0 %v7108_v5  ;;  %6947 = vmatprep.mubr.msk.f32.mxu0 %vm7981_vm4, %v7982_v11  ;;  %v1976_v53 = vand.u32 4294901760, %v1975_v19 }
 0x16c   : > { %7110 = vmatprep.subr.bf16.mxu0 %v7980_v49  ;;  %v1890_v31 = vsel %vm219_vm0, %v356_v9, 0 }
 0x16d   : > { %v1962_v13 = vand.u32 4294901760, %v1890_v31 }
 0x16f   : > { %v1963_v17 = vsub.f32 %v1890_v31, %v1962_v13 }
 0x171   : > { %v1964_v8 = vand.u32 4294901760, %v1963_v17 }
 0x172   : > { %6948 = vmatmul.mubr.f32.vlgmr.msra.gmra.mrb[4].mxu0 %v8343_v47 }
 0x173   : > { %7112 = vmatpush3.bf16.xpose.msra.mxu0 %v7111_v18  ;;  %v1965_v50 = vsub.f32 %v1963_v17, %v1964_v8  ;;  %6954 = vmatprep.mubr.msk.f32.mxu0 %vm7981_vm4, %v7982_v11 }
 0x174   : > { %7113 = vmatprep.subr.bf16.mxu0 %v7980_v49 }
 0x175   : > { %v1966_v20 = vand.u32 4294901760, %v1965_v50 }
 0x177   : > { %6898 = vmatprep.mubr.f32.mxu1 %v1966_v20 }
 0x178   : > { %6899 = vmatmul.mubr.f32.vlgmr.msra.gmra.mrb[4].mxu1 %v1976_v53 }
 0x179   : > { %7087 = vmatpush3.bf16.xpose.msra.mxu1 %v8235_v39  ;;  %6905 = vmatprep.mubr.f32.mxu1 %v1962_v13  ;;  %v7983_v39 = vmov 0  }
 0x17a   : > { %7089 = vmatprep.subr.bf16.mxu1 %v8241_v42  ;;  %6955 = vmatmul.mubr.f32.vlgmr.msra.gmra.mrb[4].mxu0 %v8359_v3 }
 0x17b   : > { %7115 = vmatpush3.bf16.xpose.msra.mxu0 %v7105_v51  ;;  %6961 = vmatprep.mubr.msk.f32.mxu0 %vm7981_vm4, %v7982_v11 }
 0x17c   : > { %7116 = vmatprep.subr.bf16.mxu0 %v7980_v49  ;;  %7244 = vset.pattern.permute.xlu0 %v7983_v39 }
 0x17d   : > { %7245 = vset.pattern.permute.xlu1 %v7983_v39 }
 0x180   : > { %6906 = vmatmul.mubr.f32.vlgmr.msra.gmra.mrb[4].mxu1 %v1972_v48 }
 0x181   : > { %7091 = vmatpush3.bf16.xpose.msra.mxu1 %v8241_v42  ;;  %6912 = vmatprep.mubr.f32.mxu1 %v1963_v17 }
 0x182   : > { %7093 = vmatprep.subr.bf16.mxu1 %v8207_v10  ;;  %6962 = vmatmul.mubr.f32.vlgmr.msra.gmra.mrb[4].mxu0 %v2643_v41 }
 0x183   : > { %7118 = vmatpush3.bf16.xpose.msra.mxu0 %v7117_v22  ;;  %6968 = vmatprep.mubr.msk.f32.mxu0 %vm7981_vm4, %v7982_v11 }
 0x184   : > { %7119 = vmatprep.subr.bf16.mxu0 %v7980_v49 }
 0x188   : > { %6913 = vmatmul.mubr.f32.vlgmr.msra.gmra.mrb[4].mxu1 %v1973_v33 }
 0x189   : > { %7095 = vmatpush3.bf16.xpose.msra.mxu1 %v8207_v10  ;;  %6919 = vmatprep.mubr.f32.mxu1 %v1964_v8 }
 0x18a   : > { %7097 = vmatprep.subr.bf16.mxu1 %v8262_v6  ;;  %6969 = vmatmul.mubr.f32.vlgmr.msra.gmra.mrb[4].mxu0 %v8343_v47 }
 0x18b   : > { %7121 = vmatpush3.bf16.xpose.msra.mxu0 %v7105_v51  ;;  %6975 = vmatprep.mubr.msk.f32.mxu0 %vm7981_vm4, %v7982_v11 }
 0x190   : > { %6920 = vmatmul.mubr.f32.vlgmr.msra.gmra.mrb[4].mxu1 %v1974_v15 }
 0x191   : > { %7099 = vmatpush3.bf16.xpose.msra.mxu1 %v8262_v6  ;;  %6926 = vmatprep.mubr.f32.mxu1 %v1962_v13 }
 0x192   : > { %7101 = vmatprep.subr.bf16.mxu1 %v8207_v10  ;;  %6976 = vmatmul.mubr.f32.vlgmr.msra.gmra.mrb[4].mxu0 %v8343_v47 }
 0x198   : > { %6927 = vmatmul.mubr.f32.vlgmr.msra.gmra.mrb[4].mxu1 %v1972_v48 }
 0x199   : > { %7103 = vmatpush3.bf16.xpose.msra.mxu1 %v8207_v10  ;;  %6933 = vmatprep.mubr.f32.mxu1 %v1962_v13 }
 0x19a   : > { %6978 = vmatprep.subr.mxu1 %v7982_v11 }
 0x1a0   : > { %6934 = vmatmul.mubr.f32.vlgmr.msra.gmra.mrb[4].mxu1 %v1972_v48  ;;  %v3037_v48 = vrot.slane %v8319_v25, %v8455_v59 }
 0x1a1   : > { %6980 = vmatprep.mubr.msk.f32.mxu1 %vm7981_vm4, %v7982_v11 }
 0x1ae   : > { %v6774_v42 = vpop.f32.mrb[0].mxu1 }
 0x1af   : > { %v444_v49 = vpop.f32.mrb[1].mxu1 }
 0x1d6   : > { %v6809_v3 = vpop.f32.mrb[0].mxu0 }
 0x1d7   : > { %v8443_v23 = vadd.f32 %v6809_v3, %v6774_v42  ;;  %v863_v6 = vpop.f32.mrb[1].mxu0 }
 0x1d8   : > { %v8445_v27 = vadd.f32 %v863_v6, %v444_v49 }
 0x1db   : > { %v2499_v28 = vpop.xlane.xlu1 %2498 }
 0x1dc   : > { %v2515_v47 = vmul.f32 0.03125, %v2499_v28 }
 0x1de   : > { %v2523_v10 = vadd.f32 1e-05, %v2515_v47 }
 0x1df   : > { %v2490_v32 = vpop.xlane.xlu1 %2489 }
 0x1e0   : > { %7290 = vrsqrt.f32 %v2523_v10  ;;  %v2512_v35 = vmul.f32 0.03125, %v2490_v32 }
 0x1e1   : > { %v8447_v29 = vpop.f32.mrb[2].mxu1 }
 0x1e2   : > { %v8449_v14 = vpop.f32.mrb[3].mxu1  ;;  %v2520_v40 = vadd.f32 1e-05, %v2512_v35 }
 0x1e4   : > { %v2511_v41 = vpop.xlane.xlu1 %2510  ;;  %7292 = vrsqrt.f32 %v2520_v40 }
 0x1e5   : > { %v2493_v24 = vpop.xlane.xlu0 %2492  ;;  %v2519_v44 = vmul.f32 0.03125, %v2511_v41 }
 0x1e6   : > { %v2513_v21 = vmul.f32 0.03125, %v2493_v24 }
 0x1e7   : > { %v2527_v51 = vadd.f32 1e-05, %v2519_v44 }
 0x1e8   : > { %v2521_v0 = vadd.f32 1e-05, %v2513_v21  ;;  %v2508_v57 = vpop.xlane.xlu1 %2507 }
 0x1e9   : > { %v2505_v34 = vpop.xlane.xlu0 %2504  ;;  %v2518_v58 = vmul.f32 0.03125, %v2508_v57 }
 0x1ea   : > { %7294 = vrsqrt.f32 %v2521_v0  ;;  %v2517_v54 = vmul.f32 0.03125, %v2505_v34  ;;  %v7291_v61 = vpop.eup %7290 }
 0x1eb   : > { %7296 = vrsqrt.f32 %v2527_v51  ;;  %v2526_v16 = vadd.f32 1e-05, %v2518_v58  ;;  %v2539_v43 = vmul.f32 %v7291_v61, %v8312_v56 }
 0x1ec   : > { %v2525_v60 = vadd.f32 1e-05, %v2517_v54 }
 0x1ed   : > { %v2496_v62 = vpop.xlane.xlu0 %2495  ;;  %v2547_v63 = vmul.f32 %v8333_v37, %v2539_v43 }
 0x1ee   : > { %7298 = vrsqrt.f32 %v2525_v60  ;;  %v2514_v1 = vmul.f32 0.03125, %v2496_v62  ;;  %v7293_v7 = vpop.eup %7292 }
 0x1ef   : > { %7300 = vrsqrt.f32 %v2526_v16  ;;  %v2555_v33 = vadd.f32 %v8341_v46, %v2547_v63  ;;  %v2536_v31 = vmul.f32 %v7293_v7, %v8327_v30 }
 0x1f0   : > { %v2522_v2 = vadd.f32 1e-05, %v2514_v1 }
 0x1f1   : > { %v2502_v5 = vpop.xlane.xlu0 %2501  ;;  %v3041_v17 = vmul.f32 %v3037_v48, %v2555_v33  ;;  %v2544_v56 = vmul.f32 %v8333_v37, %v2536_v31 }
 0x1f2   : > { %7302 = vrsqrt.f32 %v2522_v2  ;;  %v2516_v9 = vmul.f32 0.03125, %v2502_v5 }
 0x1f3   : > { %v3055_v25 = vsel %vm223_vm1, %v3041_v17, 0.0  ;;  %v2552_v19 = vadd.f32 %v8341_v46, %v2544_v56 }
 0x1f4   : > { %v7295_v13 = vpop.eup %7294  ;;  %v2524_v15 = vadd.f32 1e-05, %v2516_v9  ;;  %3056 = vadd.xlane.f32.xlu1 %v3055_v25 }
 0x1f5   : > { %v7297_v18 = vpop.eup %7296  ;;  %v2537_v8 = vmul.f32 %v7295_v13, %v8346_v52  ;;  %v3038_v30 = vmul.f32 %v3037_v48, %v2552_v19 }
 0x1f6   : > { %7304 = vrsqrt.f32 %v2524_v15  ;;  %v2543_v50 = vmul.f32 %v7297_v18, %v8350_v55 }
 0x1f7   : > { %v2545_v20 = vmul.f32 %v8333_v37, %v2537_v8  ;;  %v3046_v52 = vsel %vm219_vm0, %v3038_v30, 0.0 }
 0x1f8   : > { %v7299_v53 = vpop.eup %7298  ;;  %v2551_v22 = vmul.f32 %v8333_v37, %v2543_v50  ;;  %3047 = vadd.xlane.f32.xlu1 %v3046_v52 }
 0x1f9   : > { %v7301_v42 = vpop.eup %7300  ;;  %v2553_v49 = vadd.f32 %v8341_v46, %v2545_v20  ;;  %v2541_v3 = vmul.f32 %v7299_v53, %v8363_v4 }
 0x1fa   : > { %v2559_v6 = vadd.f32 %v8341_v46, %v2551_v22  ;;  %v2542_v28 = vmul.f32 %v7301_v42, %v8369_v12 }
 0x1fb   : > { %v3039_v55 = vmul.f32 %v3037_v48, %v2553_v49  ;;  %v2549_v47 = vmul.f32 %v8333_v37, %v2541_v3 }
 0x1fc   : > { %v7303_v10 = vpop.eup %7302  ;;  %v3045_v32 = vmul.f32 %v3037_v48, %v2559_v6  ;;  %v2550_v35 = vmul.f32 %v8333_v37, %v2542_v28 }
 0x1fd   : > { %v3049_v40 = vsel %vm223_vm1, %v3039_v55, 0.0  ;;  %v2557_v24 = vadd.f32 %v8341_v46, %v2549_v47  ;;  %v2538_v4 = vmul.f32 %v7303_v10, %v8384_v26 }
 0x1fe   : > { %3050 = vadd.xlane.f32.xlu0 %v3049_v40  ;;  %v3067_v21 = vsel %vm223_vm1, %v3045_v32, 0.0  ;;  %v2558_v41 = vadd.f32 %v8341_v46, %v2550_v35  ;;  %v8504_v32 = vand.u32 127, %v3034_v38  ;;  %v8507_v35 = vadd.s32 8, %v8452_v36 }
 0x1ff   : > { %3068 = vadd.xlane.f32.xlu1 %v3067_v21  ;;  %v3043_v12 = vmul.f32 %v3037_v48, %v2557_v24  ;;  %v2546_v44 = vmul.f32 %v8333_v37, %v2538_v4 }
 0x200   : > { %v7305_v0 = vpop.eup %7304  ;;  %v3044_v51 = vmul.f32 %v3037_v48, %v2558_v41 }
 0x201   : > { %v3061_v34 = vsel %vm223_vm1, %v3043_v12, 0.0  ;;  %v2554_v54 = vadd.f32 %v8341_v46, %v2546_v44  ;;  %v2540_v57 = vmul.f32 %v7305_v0, %v8397_v45  ;;  %v2400_v45 = vld [vmem:[%s10577_s2 + $0x3] sm:$0x1]  ;;  %vm3097_vm1 = vcmp.eq.s32.totalorder %v8507_v35, 8 }
 0x202   : > { %3062 = vadd.xlane.f32.xlu0 %v3061_v34  ;;  %v3064_v26 = vsel %vm219_vm0, %v3044_v51, 0.0 }
 0x203   : > { %3065 = vadd.xlane.f32.xlu1 %v3064_v26  ;;  %v3040_v58 = vmul.f32 %v3037_v48, %v2554_v54  ;;  %v2548_v60 = vmul.f32 %v8333_v37, %v2540_v57 }
 0x205   : > { %v3052_v61 = vsel %vm219_vm0, %v3040_v58, 0.0  ;;  %v2556_v16 = vadd.f32 %v8341_v46, %v2548_v60  ;;  %v3073_v46 = vrot.slane %v2400_v45, %v8455_v59 }
 0x206   : > { %v8490_v62 = vpop.f32.mrb[2].mxu0  ;;  %3053 = vadd.xlane.f32.xlu0 %v3052_v61 }
 0x207   : > { %v8492_v1 = vpop.f32.mrb[3].mxu0  ;;  %v3042_v43 = vmul.f32 %v3037_v48, %v2556_v16 }
 0x209   : > { %v3058_v2 = vsel %vm219_vm0, %v3042_v43, 0.0  ;;  %vm3095_vm0 = vcmp.eq.s32.totalorder %v8504_v32, 8 }
 0x20a   : > { %3059 = vadd.xlane.f32.xlu0 %v3058_v2  ;;  %vm8515_vm9 = vmand %vm3095_vm0, %vm3097_vm1 }
 0x220   : > { %2562 = vperm.xlu0 %7244, %v2400_v45  }
 0x265   : > { %v3029_v63 = vpop.f32.mrb[4].mxu0 }
 0x266   : > { %v6977_v37 = vpop.f32.mrb[5].mxu0 }
 0x273   : > { %v8498_v7 = vpop.f32.mrb[4].mxu1 }
 0x274   : > { %v8500_v5 = vpop.f32.mrb[5].mxu1 }
 0x281   : > { %v3057_v9 = vpop.xlane.xlu1 %3056 }
 0x282   : > { %v3077_v48 = vadd.f32 %v3073_v46, %v3057_v9 }
 0x285   : > { %v3048_v17 = vpop.xlane.xlu1 %3047 }
 0x286   : > { %v3074_v56 = vadd.f32 %v3073_v46, %v3048_v17 }
 0x28b   : > { %v3051_v33 = vpop.xlane.xlu0 %3050 }
 0x28c   : > { %v3075_v31 = vadd.f32 %v3073_v46, %v3051_v33  ;;  %v3069_v19 = vpop.xlane.xlu1 %3068 }
 0x28d   : > { %v3081_v20 = vadd.f32 %v3073_v46, %v3069_v19 }
 0x28e   : > { %7306 = vtanh.f32 %v3075_v31 }
 0x28f   : > { %v3063_v13 = vpop.xlane.xlu0 %3062  ;;  %7308 = vtanh.f32 %v3077_v48 }
 0x290   : > { %v3079_v15 = vadd.f32 %v3073_v46, %v3063_v13  ;;  %v3066_v42 = vpop.xlane.xlu1 %3065 }
 0x291   : > { %v3080_v3 = vadd.f32 %v3073_v46, %v3066_v42 }
 0x292   : > { %7310 = vtanh.f32 %v3079_v15 }
 0x293   : > { %v3054_v18 = vpop.xlane.xlu0 %3053  ;;  %7312 = vtanh.f32 %v3074_v56 }
 0x294   : > { %v3076_v25 = vadd.f32 %v3073_v46, %v3054_v18 }
 0x296   : > { %7314 = vtanh.f32 %v3076_v25 }
 0x297   : > { %v3060_v53 = vpop.xlane.xlu0 %3059  ;;  %7316 = vtanh.f32 %v3081_v20 }
 0x298   : > { %v7307_v8 = vpop.eup %7306  ;;  %v3078_v22 = vadd.f32 %v3073_v46, %v3060_v53 }
 0x299   : > { %3107 = vperm.xlu1 %7245, %v7307_v8   ;;  %v7309_v50 = vpop.eup %7308 }
 0x29a   : > { %7318 = vtanh.f32 %v3078_v22 }
 0x29b   : > { %7320 = vtanh.f32 %v3080_v3 }
 0x29c   : > { %v7311_v30 = vpop.eup %7310 }
 0x29d   : > { %3117 = vperm.xlu1 %7245, %v7309_v50   ;;  %v7313_v49 = vpop.eup %7312 }
 0x29f   : > { %v2563_v47 = vpop.permute.xlu0 %2562 }
 0x2a0   : > { %v7315_v52 = vpop.eup %7314  ;;  %v7124_v10 = vadd.f32 %v3029_v63, %v2563_v47 }
 0x2a1   : > { %3127 = vperm.xlu1 %7245, %v7311_v30   ;;  %v7317_v6 = vpop.eup %7316 }
 0x2a2   : > { %7322 = vtanh.f32 %v7124_v10 }
 0x2a4   : > { %v7319_v28 = vpop.eup %7318 }
 0x2a5   : > { %3102 = vperm.xlu1 %7245, %v7313_v49   ;;  %v7321_v55 = vpop.eup %7320 }
 0x2a9   : > { %3112 = vperm.xlu1 %7245, %v7315_v52  }
 0x2ac   : > { %v7323_v40 = vpop.eup %7322 }
 0x2ad   : > { %3137 = vperm.xlu1 %7245, %v7317_v6   ;;  %v3155_v38 = vrot.slane %v7323_v40, %v8455_v59 }
 0x2b1   : > { %3122 = vperm.xlu1 %7245, %v7319_v28  }
 0x2b5   : > { %3132 = vperm.xlu1 %7245, %v7321_v55  }
 0x318   : > { %v3108_v4 = vpop.permute.xlu1 %3107 }
 0x319   : > { %v3141_v36 = vsel %vm3095_vm0, %v3108_v4, %v8443_v23 }
 0x31a   : > { %v3157_v21 = vsel %vm3097_vm1, %v3155_v38, %v3141_v36 }
 0x31b   : > { %v8527_v41 = vsel %vm8515_vm9, -100.0, %v3157_v21 }
 0x31c   : > { %v3118_v12 = vpop.permute.xlu1 %3117  ;;  %v3199_v58 = vmul.f32 10.0, %v8527_v41 }
 0x31d   : > { %v3143_v44 = vsel %vm3095_vm0, %v3118_v12, %v8447_v29 }
 0x31e   : > { %v3159_v0 = vsel %vm3097_vm1, %v3155_v38, %v3143_v44  ;;  %v3209_v2 = vsel %vm3208_vm11, %v3199_v58, -inf }
 0x31f   : > { %v8536_v59 = vsel %vm8515_vm9, -100.0, %v3159_v0 }
 0x320   : > { %v3128_v51 = vpop.permute.xlu1 %3127  ;;  %v3201_v45 = vmul.f32 10.0, %v8536_v59 }
 0x321   : > { %v3145_v34 = vsel %vm3095_vm0, %v3128_v51, %v8490_v62 }
 0x322   : > { %v3161_v54 = vsel %vm3097_vm1, %v3155_v38, %v3145_v34  ;;  %v3218_v48 = vsel %vm3208_vm11, %v3201_v45, -inf }
 0x323   : > { %v8545_v57 = vsel %vm8515_vm9, -100.0, %v3161_v54 }
 0x324   : > { %v3103_v26 = vpop.permute.xlu1 %3102  ;;  %v3203_v50 = vmul.f32 10.0, %v8545_v57 }
 0x325   : > { %v8551_v60 = vsel %vm3095_vm0, %v3103_v26, %v8445_v27 }
 0x326   : > { %v3198_v61 = vmul.f32 10.0, %v8551_v60  ;;  %v3227_v6 = vsel %vm3208_vm11, %v3203_v50, -inf }
 0x328   : > { %v3113_v16 = vpop.permute.xlu1 %3112  ;;  %v3207_v43 = vsel %vm3206_vm10, %v3198_v61, -inf }
 0x329   : > { %v8560_v63 = vsel %vm3095_vm0, %v3113_v16, %v8449_v14  ;;  %v3210_v37 = vmax.f32 %v3207_v43, %v3209_v2 }
 0x32a   : > { %v3200_v46 = vmul.f32 10.0, %v8560_v63 }
 0x32b   : > { %v3211_v9 = vrot.slane %v3210_v37, 4 }
 0x32c   : > { %v3138_v33 = vpop.permute.xlu1 %3137  ;;  %v3217_v31 = vsel %vm3206_vm10, %v3200_v46, -inf }
 0x32d   : > { %v3147_v13 = vsel %vm3095_vm0, %v3138_v33, %v8498_v7  ;;  %v3212_v15 = vmax.f32 %v3210_v37, %v3211_v9  ;;  %v3219_v17 = vmax.f32 %v3217_v31, %v3218_v48 }
 0x32e   : > { %v3163_v56 = vsel %vm3097_vm1, %v3155_v38, %v3147_v13 }
 0x32f   : > { %v8572_v18 = vsel %vm8515_vm9, -100.0, %v3163_v56  ;;  %v3213_v8 = vrot.slane %v3212_v15, 2  ;;  %v3220_v25 = vrot.slane %v3219_v17, 4 }
 0x330   : > { %v3123_v19 = vpop.permute.xlu1 %3122  ;;  %v3205_v28 = vmul.f32 10.0, %v8572_v18 }
 0x331   : > { %v8578_v20 = vsel %vm3095_vm0, %v3123_v19, %v8492_v1  ;;  %v3214_v53 = vmax.f32 %v3212_v15, %v3213_v8  ;;  %v3221_v30 = vmax.f32 %v3219_v17, %v3220_v25 }
 0x332   : > { %v3202_v22 = vmul.f32 10.0, %v8578_v20  ;;  %v3236_v44 = vsel %vm3208_vm11, %v3205_v28, -inf }
 0x333   : > { %v3215_v42 = vrot.slane %v3214_v53, 1  ;;  %v3222_v49 = vrot.slane %v3221_v30, 2 }
 0x334   : > { %v3133_v3 = vpop.permute.xlu1 %3132  ;;  %v3226_v52 = vsel %vm3206_vm10, %v3202_v22, -inf }
 0x335   : > { %v8587_v55 = vsel %vm3095_vm0, %v3133_v3, %v8500_v5  ;;  %v8589_v47 = vmax.f32 %v3214_v53, %v3215_v42  ;;  %v3223_v10 = vmax.f32 %v3221_v30, %v3222_v49  ;;  %v3228_v40 = vmax.f32 %v3226_v52, %v3227_v6 }
 0x336   : > { %v3204_v24 = vmul.f32 10.0, %v8587_v55 }
 0x337   : > { %v3244_v4 = vsub.f32 %v3198_v61, %v8589_v47  ;;  %v3245_v38 = vsub.f32 %v3199_v58, %v8589_v47  ;;  %v3224_v36 = vrot.slane %v3223_v10, 1  ;;  %v3229_v21 = vrot.slane %v3228_v40, 4 }
 0x338   : > { %v3235_v12 = vsel %vm3206_vm10, %v3204_v24, -inf }
 0x339   : > { %v3252_v0 = vmul.f32 1.442695, %v3244_v4  ;;  %v3254_v51 = vmul.f32 1.442695, %v3245_v38  ;;  %v8596_v34 = vmax.f32 %v3223_v10, %v3224_v36  ;;  %v3230_v54 = vmax.f32 %v3228_v40, %v3229_v21 }
 0x33a   : > { %v3237_v26 = vmax.f32 %v3235_v12, %v3236_v44 }
 0x33b   : > { %7324 = vpow2.f32 %v3252_v0  ;;  %v3246_v16 = vsub.f32 %v3200_v46, %v8596_v34  ;;  %v3247_v43 = vsub.f32 %v3201_v45, %v8596_v34  ;;  %v3231_v61 = vrot.slane %v3230_v54, 2 }
 0x33c   : > { %7326 = vpow2.f32 %v3254_v51  ;;  %v3238_v58 = vrot.slane %v3237_v26, 4 }
 0x33d   : > { %v3256_v2 = vmul.f32 1.442695, %v3246_v16  ;;  %v3258_v37 = vmul.f32 1.442695, %v3247_v43  ;;  %v3232_v9 = vmax.f32 %v3230_v54, %v3231_v61 }
 0x33e   : > { %v3239_v33 = vmax.f32 %v3237_v26, %v3238_v58 }
 0x33f   : > { %7328 = vpow2.f32 %v3256_v2  ;;  %v3233_v31 = vrot.slane %v3232_v9, 1 }
 0x340   : > { %7330 = vpow2.f32 %v3258_v37  ;;  %v3240_v48 = vrot.slane %v3239_v33, 2 }
 0x341   : > { %v8600_v13 = vmax.f32 %v3232_v9, %v3233_v31 }
 0x342   : > { %v3241_v15 = vmax.f32 %v3239_v33, %v3240_v48 }
 0x343   : > { %v3248_v17 = vsub.f32 %v3202_v22, %v8600_v13  ;;  %v3249_v46 = vsub.f32 %v3203_v50, %v8600_v13 }
 0x344   : > { %v3242_v56 = vrot.slane %v3241_v15, 1 }
 0x345   : > { %v7325_v45 = vpop.eup %7324  ;;  %v3260_v8 = vmul.f32 1.442695, %v3248_v17  ;;  %v3262_v25 = vmul.f32 1.442695, %v3249_v46 }
 0x346   : > { %v7327_v19 = vpop.eup %7326  ;;  %v3268_v53 = vsel %vm3206_vm10, %v7325_v45, 0.0  ;;  %v8605_v30 = vmax.f32 %v3241_v15, %v3242_v56 }
 0x347   : > { %v3269_v42 = vsel %vm3208_vm11, %v7327_v19, 0.0  ;;  %7332 = vpow2.f32 %v3260_v8 }
 0x348   : > { %v3270_v49 = vadd.f32 %v3269_v42, %v3268_v53  ;;  %7334 = vpow2.f32 %v3262_v25  ;;  %v3250_v3 = vsub.f32 %v3204_v24, %v8605_v30  ;;  %v3251_v22 = vsub.f32 %v3205_v28, %v8605_v30 }
 0x349   : > { %v7329_v52 = vpop.eup %7328 }
 0x34a   : > { %v7331_v50 = vpop.eup %7330  ;;  %v3271_v6 = vrot.slane %v3270_v49, 4  ;;  %v3277_v10 = vsel %vm3206_vm10, %v7329_v52, 0.0  ;;  %v3264_v40 = vmul.f32 1.442695, %v3250_v3  ;;  %v3266_v4 = vmul.f32 1.442695, %v3251_v22 }
 0x34b   : > { %v3278_v38 = vsel %vm3208_vm11, %v7331_v50, 0.0  ;;  %v7984_v50 = vmov -2.7725887  }
 0x34c   : > { %v3272_v36 = vadd.f32 %v3271_v6, %v3270_v49  ;;  %v3279_v21 = vadd.f32 %v3278_v38, %v3277_v10  ;;  %7336 = vpow2.f32 %v3264_v40  ;;  %v8619_v6 = vsel %vm3095_vm0, -0.6931472, %v7984_v50 }
 0x34d   : > { %7338 = vpow2.f32 %v3266_v4 }
 0x34e   : > { %v3273_v12 = vrot.slane %v3272_v36, 2  ;;  %v3280_v44 = vrot.slane %v3279_v21, 4 }
 0x350   : > { %v3274_v0 = vadd.f32 %v3273_v12, %v3272_v36  ;;  %v3281_v51 = vadd.f32 %v3280_v44, %v3279_v21 }
 0x351   : > { %v7333_v24 = vpop.eup %7332 }
 0x352   : > { %v7335_v54 = vpop.eup %7334  ;;  %v3275_v28 = vrot.slane %v3274_v0, 1  ;;  %v3282_v26 = vrot.slane %v3281_v51, 2  ;;  %v3286_v16 = vsel %vm3206_vm10, %v7333_v24, 0.0 }
 0x353   : > { %v3287_v43 = vsel %vm3208_vm11, %v7335_v54, 0.0 }
 0x354   : > { %v3276_v61 = vadd.f32 %v3275_v28, %v3274_v0  ;;  %v3283_v58 = vadd.f32 %v3282_v26, %v3281_v51  ;;  %v3288_v2 = vadd.f32 %v3287_v43, %v3286_v16 }
 0x356   : > { %v7337_v37 = vpop.eup %7336  ;;  %7340 = vlog2.f32 %v3276_v61  ;;  %v3284_v9 = vrot.slane %v3283_v58, 1  ;;  %v3289_v33 = vrot.slane %v3288_v2, 4 }
 0x357   : > { %v7339_v31 = vpop.eup %7338  ;;  %v3295_v48 = vsel %vm3206_vm10, %v7337_v37, 0.0 }
 0x358   : > { %v3285_v15 = vadd.f32 %v3284_v9, %v3283_v58  ;;  %v3290_v17 = vadd.f32 %v3289_v33, %v3288_v2  ;;  %v3296_v46 = vsel %vm3208_vm11, %v7339_v31, 0.0 }
 0x359   : > { %v3297_v56 = vadd.f32 %v3296_v46, %v3295_v48 }
 0x35a   : > { %7342 = vlog2.f32 %v3285_v15  ;;  %v3291_v45 = vrot.slane %v3290_v17, 2 }
 0x35b   : > { %v3298_v8 = vrot.slane %v3297_v56, 4 }
 0x35c   : > { %v3292_v25 = vadd.f32 %v3291_v45, %v3290_v17 }
 0x35d   : > { %v3299_v19 = vadd.f32 %v3298_v8, %v3297_v56 }
 0x35e   : > { %v3293_v53 = vrot.slane %v3292_v25, 1 }
 0x35f   : > { %v3300_v42 = vrot.slane %v3299_v19, 2 }
 0x360   : > { %v7341_v49 = vpop.eup %7340  ;;  %v3294_v3 = vadd.f32 %v3293_v53, %v3292_v25 }
 0x361   : > { %v3305_v22 = vmul.f32 0.6931472, %v7341_v49  ;;  %v3301_v52 = vadd.f32 %v3300_v42, %v3299_v19 }
 0x362   : > { %7344 = vlog2.f32 %v3294_v3 }
 0x363   : > { %v3312_v10 = vadd.f32 %v3305_v22, %v8589_v47  ;;  %v3302_v40 = vrot.slane %v3301_v52, 1 }
 0x364   : > { %v7343_v4 = vpop.eup %7342 }
 0x365   : > { %v3316_v38 = vsub.f32 %v8619_v6, %v3312_v10  ;;  %v3307_v36 = vmul.f32 0.6931472, %v7343_v4  ;;  %v3303_v21 = vadd.f32 %v3302_v40, %v3301_v52 }
 0x367   : > { %v8623_v12 = vmul.f32 0.1, %v3316_v38  ;;  %v3313_v44 = vadd.f32 %v3307_v36, %v8596_v34  ;;  %7346 = vlog2.f32 %v3303_v21 }
 0x369   : > { %v8628_v0 = vadd.f32 %v8623_v12, %v8527_v41  ;;  %v8632_v32 = vadd.f32 %v8623_v12, %v8551_v60  ;;  %v3317_v47 = vsub.f32 %v8619_v6, %v3313_v44 }
 0x36b   : > { %v3345_v51 = vmul.f32 10.0, %v8628_v0  ;;  %v3344_v24 = vmul.f32 10.0, %v8632_v32  ;;  %v8637_v54 = vmul.f32 0.1, %v3317_v47 }
 0x36c   : > { %v7345_v28 = vpop.eup %7344 }
 0x36d   : > { %v3355_v34 = vsel %vm3208_vm11, %v3345_v51, -inf  ;;  %v3352_v26 = vsel %vm3206_vm10, %v3344_v24, -inf  ;;  %v8643_v16 = vadd.f32 %v8637_v54, %v8560_v63  ;;  %v8647_v43 = vadd.f32 %v8637_v54, %v8536_v59 }
 0x36e   : > { %3356 = vmax.xlane.f32.xlu1 %v3355_v34  ;;  %3353 = vmax.xlane.f32.xlu0 %v3352_v26  ;;  %v3309_v61 = vmul.f32 0.6931472, %v7345_v28 }
 0x36f   : > { %v3346_v58 = vmul.f32 10.0, %v8643_v16  ;;  %v3347_v33 = vmul.f32 10.0, %v8647_v43 }
 0x370   : > { %v3314_v2 = vadd.f32 %v3309_v61, %v8600_v13 }
 0x371   : > { %v7347_v37 = vpop.eup %7346  ;;  %v3358_v9 = vsel %vm3206_vm10, %v3346_v58, -inf  ;;  %v3361_v46 = vsel %vm3208_vm11, %v3347_v33, -inf }
 0x372   : > { %3359 = vmax.xlane.f32.xlu0 %v3358_v9  ;;  %v3318_v31 = vsub.f32 %v8619_v6, %v3314_v2  ;;  %v3311_v48 = vmul.f32 0.6931472, %v7347_v37 }
 0x374   : > { %v8654_v15 = vmul.f32 0.1, %v3318_v31  ;;  %v3315_v17 = vadd.f32 %v3311_v48, %v8605_v30 }
 0x376   : > { %3362 = vmax.xlane.f32.xlu0 %v3361_v46  ;;  %v8660_v56 = vadd.f32 %v8654_v15, %v8578_v20  ;;  %v8664_v13 = vadd.f32 %v8654_v15, %v8545_v57  ;;  %v3319_v45 = vsub.f32 %v8619_v6, %v3315_v17 }
 0x378   : > { %v3348_v8 = vmul.f32 10.0, %v8660_v56  ;;  %v3349_v25 = vmul.f32 10.0, %v8664_v13  ;;  %v8669_v19 = vmul.f32 0.1, %v3319_v45 }
 0x37a   : > { %v3364_v30 = vsel %vm3206_vm10, %v3348_v8, -inf  ;;  %v3367_v53 = vsel %vm3208_vm11, %v3349_v25, -inf  ;;  %v8675_v42 = vadd.f32 %v8669_v19, %v8587_v55  ;;  %v8679_v49 = vadd.f32 %v8669_v19, %v8572_v18 }
 0x37b   : > { %3365 = vmax.xlane.f32.xlu1 %v3364_v30  ;;  %3368 = vmax.xlane.f32.xlu0 %v3367_v53 }
 0x37c   : > { %v3350_v3 = vmul.f32 10.0, %v8675_v42  ;;  %v3351_v22 = vmul.f32 10.0, %v8679_v49 }
 0x37e   : > { %v3370_v52 = vsel %vm3206_vm10, %v3350_v3, -inf  ;;  %v3373_v10 = vsel %vm3208_vm11, %v3351_v22, -inf }
 0x37f   : > { %3371 = vmax.xlane.f32.xlu1 %v3370_v52  ;;  %3374 = vmax.xlane.f32.xlu0 %v3373_v10 }
 0x3fb   : > { %v8685_v40 = vpop.xlane.xlu1 %3356  ;;  %v8687_v4 = vpop.xlane.xlu0 %3353 }
 0x3fc   : > { %v3377_v38 = vsub.f32 %v3345_v51, %v8685_v40  ;;  %v3376_v36 = vsub.f32 %v3344_v24, %v8687_v4 }
 0x3fe   : > { %v3386_v21 = vmul.f32 1.442695, %v3377_v38  ;;  %v3384_v44 = vmul.f32 1.442695, %v3376_v36 }
 0x3ff   : > { %v8691_v47 = vpop.xlane.xlu0 %3359 }
 0x400   : > { %7348 = vpow2.f32 %v3386_v21  ;;  %v3378_v28 = vsub.f32 %v3346_v58, %v8691_v47 }
 0x401   : > { %7350 = vpow2.f32 %v3384_v44 }
 0x402   : > { %v3388_v34 = vmul.f32 1.442695, %v3378_v28 }
 0x403   : > { %v8694_v26 = vpop.xlane.xlu0 %3362 }
 0x404   : > { %7352 = vpow2.f32 %v3388_v34  ;;  %v3379_v61 = vsub.f32 %v3347_v33, %v8694_v26 }
 0x406   : > { %v3390_v2 = vmul.f32 1.442695, %v3379_v61 }
 0x408   : > { %7354 = vpow2.f32 %v3390_v2  ;;  %v8697_v37 = vpop.xlane.xlu1 %3365  ;;  %v8699_v51 = vpop.xlane.xlu0 %3368 }
 0x409   : > { %v3380_v24 = vsub.f32 %v3348_v8, %v8697_v37  ;;  %v3381_v9 = vsub.f32 %v3349_v25, %v8699_v51 }
 0x40a   : > { %v7349_v31 = vpop.eup %7348 }
 0x40b   : > { %v7351_v48 = vpop.eup %7350  ;;  %v3392_v58 = vmul.f32 1.442695, %v3380_v24  ;;  %v3394_v17 = vmul.f32 1.442695, %v3381_v9  ;;  %v3403_v46 = vsel %vm3208_vm11, %v7349_v31, 0.0 }
 0x40c   : > { %v8704_v45 = vpop.xlane.xlu1 %3371  ;;  %v8706_v30 = vpop.xlane.xlu0 %3374  ;;  %3404 = vadd.xlane.f32.xlu0 %v3403_v46  ;;  %v3400_v33 = vsel %vm3206_vm10, %v7351_v48, 0.0 }
 0x40d   : > { %7356 = vpow2.f32 %v3392_v58  ;;  %v3382_v53 = vsub.f32 %v3350_v3, %v8704_v45  ;;  %v3383_v8 = vsub.f32 %v3351_v22, %v8706_v30  ;;  %3401 = vadd.xlane.f32.xlu1 %v3400_v33 }
 0x40e   : > { %v7353_v25 = vpop.eup %7352  ;;  %7358 = vpow2.f32 %v3394_v17 }
 0x40f   : > { %v3396_v52 = vmul.f32 1.442695, %v3382_v53  ;;  %v3398_v10 = vmul.f32 1.442695, %v3383_v8  ;;  %v3406_v38 = vsel %vm3206_vm10, %v7353_v25, 0.0 }
 0x410   : > { %v8720_v53 = vsel %vm3097_vm1, -0.6931472, %v7984_v50 }
 0x411   : > { %7360 = vpow2.f32 %v3396_v52  ;;  %3407 = vadd.xlane.f32.xlu1 %v3406_v38 }
 0x412   : > { %v7355_v36 = vpop.eup %7354  ;;  %7362 = vpow2.f32 %v3398_v10 }
 0x413   : > { %v3409_v21 = vsel %vm3208_vm11, %v7355_v36, 0.0 }
 0x414   : > { %3410 = vadd.xlane.f32.xlu0 %v3409_v21 }
 0x417   : > { %v7357_v44 = vpop.eup %7356 }
 0x418   : > { %v7359_v28 = vpop.eup %7358  ;;  %v3412_v3 = vsel %vm3206_vm10, %v7357_v44, 0.0 }
 0x419   : > { %3413 = vadd.xlane.f32.xlu1 %v3412_v3  ;;  %v3415_v22 = vsel %vm3208_vm11, %v7359_v28, 0.0 }
 0x41a   : > { %3416 = vadd.xlane.f32.xlu0 %v3415_v22 }
 0x41b   : > { %v7361_v34 = vpop.eup %7360 }
 0x41c   : > { %v7363_v61 = vpop.eup %7362  ;;  %v3418_v2 = vsel %vm3206_vm10, %v7361_v34, 0.0 }
 0x41d   : > { %3419 = vadd.xlane.f32.xlu1 %v3418_v2  ;;  %v3421_v24 = vsel %vm3208_vm11, %v7363_v61, 0.0 }
 0x41e   : > { %3422 = vadd.xlane.f32.xlu0 %v3421_v24 }
 0x499   : > { %v3405_v9 = vpop.xlane.xlu0 %3404 }
 0x49a   : > { %v3402_v31 = vpop.xlane.xlu1 %3401  ;;  %7364 = vlog2.f32 %v3405_v9 }
 0x49b   : > { %7366 = vlog2.f32 %v3402_v31 }
 0x49e   : > { %v3408_v48 = vpop.xlane.xlu1 %3407 }
 0x49f   : > { %7368 = vlog2.f32 %v3408_v48 }
 0x4a1   : > { %v3411_v58 = vpop.xlane.xlu0 %3410 }
 0x4a2   : > { %7370 = vlog2.f32 %v3411_v58 }
 0x4a4   : > { %v7365_v17 = vpop.eup %7364 }
 0x4a5   : > { %v7367_v46 = vpop.eup %7366  ;;  %v3427_v33 = vmul.f32 0.6931472, %v7365_v17 }
 0x4a6   : > { %v3425_v8 = vmul.f32 0.6931472, %v7367_v46  ;;  %v3414_v25 = vpop.xlane.xlu1 %3413 }
 0x4a7   : > { %v3441_v52 = vadd.f32 %v3427_v33, %v8685_v40  ;;  %7372 = vlog2.f32 %v3414_v25  ;;  %v3417_v10 = vpop.xlane.xlu0 %3416 }
 0x4a8   : > { %v3440_v38 = vadd.f32 %v3425_v8, %v8687_v4  ;;  %7374 = vlog2.f32 %v3417_v10 }
 0x4a9   : > { %v7369_v36 = vpop.eup %7368  ;;  %v3449_v21 = vsub.f32 %v8720_v53, %v3441_v52 }
 0x4aa   : > { %v3448_v44 = vsub.f32 -2.7725887, %v3440_v38  ;;  %v3429_v28 = vmul.f32 0.6931472, %v7369_v36  ;;  %v3420_v3 = vpop.xlane.xlu1 %3419 }
 0x4ab   : > { %7376 = vlog2.f32 %v3420_v3  ;;  %v3423_v22 = vpop.xlane.xlu0 %3422  ;;  %v8725_v35 = vmul.f32 0.1, %v3449_v21 }
 0x4ac   : > { %v7371_v50 = vpop.eup %7370  ;;  %v8727_v34 = vmul.f32 0.1, %v3448_v44  ;;  %v3442_v40 = vadd.f32 %v3429_v28, %v8691_v47  ;;  %7378 = vlog2.f32 %v3423_v22 }
 0x4ad   : > { %v3431_v61 = vmul.f32 0.6931472, %v7371_v50  ;;  %v3473_v4 = vadd.f32 %v8725_v35, %v8628_v0 }
 0x4ae   : > { %v3472_v2 = vadd.f32 %v8727_v34, %v8632_v32  ;;  %v3450_v24 = vsub.f32 -2.7725887, %v3442_v40 }
 0x4af   : > { %v3443_v9 = vadd.f32 %v3431_v61, %v8694_v26  ;;  %v3481_v31 = vmul.f32 10.0, %v3473_v4 }
 0x4b0   : > { %v3480_v48 = vmul.f32 10.0, %v3472_v2  ;;  %v8735_v58 = vmul.f32 0.1, %v3450_v24 }
 0x4b1   : > { %v7373_v17 = vpop.eup %7372  ;;  %v3489_v46 = vsel %vm3208_vm11, %v3481_v31, -inf  ;;  %v3451_v47 = vsub.f32 %v8720_v53, %v3443_v9 }
 0x4b2   : > { %v7375_v33 = vpop.eup %7374  ;;  %v3488_v8 = vsel %vm3206_vm10, %v3480_v48, -inf  ;;  %v3474_v0 = vadd.f32 %v8735_v58, %v8643_v16  ;;  %v3433_v25 = vmul.f32 0.6931472, %v7373_v17 }
 0x4b3   : > { %v3435_v32 = vmul.f32 0.6931472, %v7375_v33  ;;  %v3490_v52 = vmax.f32 %v3488_v8, %v3489_v46  ;;  %v8742_v10 = vmul.f32 0.1, %v3451_v47 }
 0x4b4   : > { %v3482_v26 = vmul.f32 10.0, %v3474_v0  ;;  %v3444_v38 = vadd.f32 %v3433_v25, %v8697_v37 }
 0x4b5   : > { %v7377_v36 = vpop.eup %7376  ;;  %v3445_v21 = vadd.f32 %v3435_v32, %v8699_v51  ;;  %v3491_v44 = vrot.slane %v3490_v52, 4  ;;  %v3475_v28 = vadd.f32 %v8742_v10, %v8647_v43 }
 0x4b6   : > { %v7379_v3 = vpop.eup %7378  ;;  %v3452_v22 = vsub.f32 -2.7725887, %v3444_v38  ;;  %v3437_v50 = vmul.f32 0.6931472, %v7377_v36  ;;  %v3497_v2 = vsel %vm3206_vm10, %v3482_v26, -inf }
 0x4b7   : > { %v3439_v40 = vmul.f32 0.6931472, %v7379_v3  ;;  %v3492_v16 = vmax.f32 %v3490_v52, %v3491_v44  ;;  %v3483_v61 = vmul.f32 10.0, %v3475_v28  ;;  %v3453_v4 = vsub.f32 %v8720_v53, %v3445_v21 }
 0x4b8   : > { %v8750_v24 = vmul.f32 0.1, %v3452_v22  ;;  %v3446_v37 = vadd.f32 %v3437_v50, %v8704_v45 }
 0x4b9   : > { %v3447_v51 = vadd.f32 %v3439_v40, %v8706_v30  ;;  %v3493_v9 = vrot.slane %v3492_v16, 2  ;;  %v3498_v17 = vsel %vm3208_vm11, %v3483_v61, -inf  ;;  %v8755_v43 = vmul.f32 0.1, %v3453_v4 }
 0x4ba   : > { %v3476_v46 = vadd.f32 %v8750_v24, %v8660_v56  ;;  %v3454_v47 = vsub.f32 -2.7725887, %v3446_v37  ;;  %v3499_v33 = vmax.f32 %v3497_v2, %v3498_v17 }
 0x4bb   : > { %v3494_v8 = vmax.f32 %v3492_v16, %v3493_v9  ;;  %v3477_v0 = vadd.f32 %v8755_v43, %v8664_v13  ;;  %v3455_v25 = vsub.f32 %v8720_v53, %v3447_v51 }
 0x4bc   : > { %v3484_v32 = vmul.f32 10.0, %v3476_v46  ;;  %v8762_v45 = vmul.f32 0.1, %v3454_v47  ;;  %v3500_v30 = vrot.slane %v3499_v33, 4 }
 0x4bd   : > { %v3495_v52 = vrot.slane %v3494_v8, 1  ;;  %v3485_v38 = vmul.f32 10.0, %v3477_v0  ;;  %v8764_v36 = vmul.f32 0.1, %v3455_v25 }
 0x4be   : > { %v3506_v21 = vsel %vm3206_vm10, %v3484_v32, -inf  ;;  %v3478_v56 = vadd.f32 %v8762_v45, %v8675_v42  ;;  %v3501_v44 = vmax.f32 %v3499_v33, %v3500_v30 }
 0x4bf   : > { %v8769_v28 = vmax.f32 %v3494_v8, %v3495_v52  ;;  %v3507_v13 = vsel %vm3208_vm11, %v3485_v38, -inf  ;;  %v3479_v3 = vadd.f32 %v8764_v36, %v8679_v49 }
 0x4c0   : > { %v3486_v22 = vmul.f32 10.0, %v3478_v56  ;;  %v3502_v50 = vrot.slane %v3501_v44, 2  ;;  %v3508_v40 = vmax.f32 %v3506_v21, %v3507_v13 }
 0x4c1   : > { %v3524_v16 = vsub.f32 %v3480_v48, %v8769_v28  ;;  %v3525_v4 = vsub.f32 %v3481_v31, %v8769_v28  ;;  %v3487_v2 = vmul.f32 10.0, %v3479_v3 }
 0x4c2   : > { %v3515_v37 = vsel %vm3206_vm10, %v3486_v22, -inf  ;;  %v3503_v51 = vmax.f32 %v3501_v44, %v3502_v50  ;;  %v3509_v42 = vrot.slane %v3508_v40, 4 }
 0x4c3   : > { %v3532_v9 = vmul.f32 1.442695, %v3524_v16  ;;  %v3534_v17 = vmul.f32 1.442695, %v3525_v4  ;;  %v3516_v46 = vsel %vm3208_vm11, %v3487_v2, -inf }
 0x4c4   : > { %v3504_v47 = vrot.slane %v3503_v51, 1  ;;  %v3510_v33 = vmax.f32 %v3508_v40, %v3509_v42  ;;  %v3517_v8 = vmax.f32 %v3515_v37, %v3516_v46 }
 0x4c5   : > { %7380 = vpow2.f32 %v3532_v9 }
 0x4c6   : > { %7382 = vpow2.f32 %v3534_v17  ;;  %v8778_v49 = vmax.f32 %v3503_v51, %v3504_v47  ;;  %v3511_v0 = vrot.slane %v3510_v33, 2  ;;  %v3518_v48 = vrot.slane %v3517_v8, 4 }
 0x4c8   : > { %v3526_v31 = vsub.f32 %v3482_v26, %v8778_v49  ;;  %v3527_v25 = vsub.f32 %v3483_v61, %v8778_v49  ;;  %v3512_v30 = vmax.f32 %v3510_v33, %v3511_v0  ;;  %v3519_v52 = vmax.f32 %v3517_v8, %v3518_v48 }
 0x4ca   : > { %v3536_v21 = vmul.f32 1.442695, %v3526_v31  ;;  %v3538_v56 = vmul.f32 1.442695, %v3527_v25  ;;  %v3513_v44 = vrot.slane %v3512_v30, 1  ;;  %v3520_v13 = vrot.slane %v3519_v52, 2 }
 0x4cc   : > { %7384 = vpow2.f32 %v3536_v21  ;;  %v8782_v3 = vmax.f32 %v3512_v30, %v3513_v44  ;;  %v3521_v50 = vmax.f32 %v3519_v52, %v3520_v13 }
 0x4cd   : > { %7386 = vpow2.f32 %v3538_v56 }
 0x4ce   : > { %v3528_v40 = vsub.f32 %v3484_v32, %v8782_v3  ;;  %v3529_v16 = vsub.f32 %v3485_v38, %v8782_v3  ;;  %v3522_v4 = vrot.slane %v3521_v50, 1 }
 0x4cf   : > { %v7381_v37 = vpop.eup %7380 }
 0x4d0   : > { %v7383_v26 = vpop.eup %7382  ;;  %v3548_v61 = vsel %vm3206_vm10, %v7381_v37, 0.0  ;;  %v3540_v51 = vmul.f32 1.442695, %v3528_v40  ;;  %v3542_v42 = vmul.f32 1.442695, %v3529_v16  ;;  %v8787_v9 = vmax.f32 %v3521_v50, %v3522_v4 }
 0x4d1   : > { %v3549_v17 = vsel %vm3208_vm11, %v7383_v26, 0.0 }
 0x4d2   : > { %v3550_v46 = vadd.f32 %v3549_v17, %v3548_v61  ;;  %7388 = vpow2.f32 %v3540_v51  ;;  %v3530_v47 = vsub.f32 %v3486_v22, %v8787_v9  ;;  %v3531_v33 = vsub.f32 %v3487_v2, %v8787_v9 }
 0x4d3   : > { %7390 = vpow2.f32 %v3542_v42 }
 0x4d4   : > { %v3551_v32 = vrot.slane %v3550_v46, 4  ;;  %v3544_v38 = vmul.f32 1.442695, %v3530_v47  ;;  %v3546_v8 = vmul.f32 1.442695, %v3531_v33 }
 0x4d6   : > { %v7385_v0 = vpop.eup %7384  ;;  %v3552_v48 = vadd.f32 %v3551_v32, %v3550_v46  ;;  %7392 = vpow2.f32 %v3544_v38 }
 0x4d7   : > { %v7387_v31 = vpop.eup %7386  ;;  %v3557_v25 = vsel %vm3206_vm10, %v7385_v0, 0.0  ;;  %7394 = vpow2.f32 %v3546_v8 }
 0x4d8   : > { %v3553_v30 = vrot.slane %v3552_v48, 2  ;;  %v3558_v52 = vsel %vm3208_vm11, %v7387_v31, 0.0 }
 0x4d9   : > { %v3559_v21 = vadd.f32 %v3558_v52, %v3557_v25 }
 0x4da   : > { %v3554_v56 = vadd.f32 %v3553_v30, %v3552_v48 }
 0x4db   : > { %v3560_v44 = vrot.slane %v3559_v21, 4 }
 0x4dc   : > { %v7389_v22 = vpop.eup %7388  ;;  %v3555_v13 = vrot.slane %v3554_v56, 1 }
 0x4dd   : > { %v7391_v2 = vpop.eup %7390  ;;  %v3561_v50 = vadd.f32 %v3560_v44, %v3559_v21  ;;  %v3566_v40 = vsel %vm3206_vm10, %v7389_v22, 0.0 }
 0x4de   : > { %v3556_v16 = vadd.f32 %v3555_v13, %v3554_v56  ;;  %v3567_v4 = vsel %vm3208_vm11, %v7391_v2, 0.0 }
 0x4df   : > { %v3562_v37 = vrot.slane %v3561_v50, 2  ;;  %v3568_v26 = vadd.f32 %v3567_v4, %v3566_v40 }
 0x4e0   : > { %v7393_v61 = vpop.eup %7392  ;;  %7396 = vlog2.f32 %v3556_v16 }
 0x4e1   : > { %v7395_v51 = vpop.eup %7394  ;;  %v3563_v42 = vadd.f32 %v3562_v37, %v3561_v50  ;;  %v3569_v17 = vrot.slane %v3568_v26, 4  ;;  %v3575_v46 = vsel %vm3206_vm10, %v7393_v61, 0.0 }
 0x4e2   : > { %v3576_v47 = vsel %vm3208_vm11, %v7395_v51, 0.0 }
 0x4e3   : > { %v3564_v33 = vrot.slane %v3563_v42, 1  ;;  %v3570_v32 = vadd.f32 %v3569_v17, %v3568_v26  ;;  %v3577_v38 = vadd.f32 %v3576_v47, %v3575_v46 }
 0x4e5   : > { %v3565_v8 = vadd.f32 %v3564_v33, %v3563_v42  ;;  %v3571_v0 = vrot.slane %v3570_v32, 2  ;;  %v3578_v48 = vrot.slane %v3577_v38, 4 }
 0x4e7   : > { %7398 = vlog2.f32 %v3565_v8  ;;  %v3572_v31 = vadd.f32 %v3571_v0, %v3570_v32  ;;  %v3579_v25 = vadd.f32 %v3578_v48, %v3577_v38 }
 0x4e9   : > { %v3573_v30 = vrot.slane %v3572_v31, 1  ;;  %v3580_v52 = vrot.slane %v3579_v25, 2 }
 0x4ea   : > { %v7397_v21 = vpop.eup %7396 }
 0x4eb   : > { %v3585_v56 = vmul.f32 0.6931472, %v7397_v21  ;;  %v3574_v44 = vadd.f32 %v3573_v30, %v3572_v31  ;;  %v3581_v22 = vadd.f32 %v3580_v52, %v3579_v25 }
 0x4ed   : > { %v3592_v13 = vadd.f32 %v3585_v56, %v8769_v28  ;;  %7400 = vlog2.f32 %v3574_v44  ;;  %v3582_v2 = vrot.slane %v3581_v22, 1 }
 0x4ef   : > { %v3596_v50 = vsub.f32 %v8619_v6, %v3592_v13  ;;  %v3583_v40 = vadd.f32 %v3582_v2, %v3581_v22 }
 0x4f1   : > { %v7399_v16 = vpop.eup %7398  ;;  %v3600_v4 = vmul.f32 0.1, %v3596_v50  ;;  %7402 = vlog2.f32 %v3583_v40 }
 0x4f2   : > { %v3587_v37 = vmul.f32 0.6931472, %v7399_v16 }
 0x4f3   : > { %v8801_v26 = vadd.f32 %v3600_v4, %v8623_v12 }
 0x4f4   : > { %v3593_v61 = vadd.f32 %v3587_v37, %v8778_v49 }
 0x4f5   : > { %v8806_v51 = vadd.f32 %v8801_v26, %v8527_v41  ;;  %v8810_v28 = vadd.f32 %v8801_v26, %v8551_v60 }
 0x4f6   : > { %v3597_v42 = vsub.f32 %v8619_v6, %v3593_v61 }
 0x4f7   : > { %v7401_v17 = vpop.eup %7400  ;;  %v3617_v46 = vadd.f32 %v8806_v51, %v8725_v35  ;;  %v3616_v12 = vadd.f32 %v8810_v28, %v8727_v34 }
 0x4f8   : > { %v3601_v47 = vmul.f32 0.1, %v3597_v42  ;;  %v3589_v33 = vmul.f32 0.6931472, %v7401_v17 }
 0x4f9   : > { %v3625_v49 = vmul.f32 10.0, %v3617_v46  ;;  %v3624_v32 = vmul.f32 10.0, %v3616_v12 }
 0x4fa   : > { %v8818_v38 = vadd.f32 %v3601_v47, %v8637_v54  ;;  %v3594_v8 = vadd.f32 %v3589_v33, %v8782_v3 }
 0x4fb   : > { %v7403_v0 = vpop.eup %7402  ;;  %v3635_v48 = vsel %vm3208_vm11, %v3625_v49, -inf  ;;  %v3632_v31 = vsel %vm3206_vm10, %v3624_v32, -inf }
 0x4fc   : > { %3636 = vmax.xlane.f32.xlu0 %v3635_v48  ;;  %3633 = vmax.xlane.f32.xlu1 %v3632_v31  ;;  %v8825_v25 = vadd.f32 %v8818_v38, %v8536_v59  ;;  %v8829_v30 = vadd.f32 %v8818_v38, %v8560_v63  ;;  %v3598_v54 = vsub.f32 %v8619_v6, %v3594_v8  ;;  %v3591_v52 = vmul.f32 0.6931472, %v7403_v0 }
 0x4fe   : > { %v3619_v3 = vadd.f32 %v8825_v25, %v8742_v10  ;;  %v3618_v21 = vadd.f32 %v8829_v30, %v8735_v58  ;;  %v3602_v56 = vmul.f32 0.1, %v3598_v54  ;;  %v3595_v44 = vadd.f32 %v3591_v52, %v8787_v9 }
 0x500   : > { %v3627_v22 = vmul.f32 10.0, %v3619_v3  ;;  %v3626_v13 = vmul.f32 10.0, %v3618_v21  ;;  %v8838_v2 = vadd.f32 %v3602_v56, %v8654_v15  ;;  %v3599_v50 = vsub.f32 %v8619_v6, %v3595_v44 }
 0x502   : > { %v3641_v40 = vsel %vm3208_vm11, %v3627_v22, -inf  ;;  %v3638_v16 = vsel %vm3206_vm10, %v3626_v13, -inf  ;;  %v8845_v4 = vadd.f32 %v8838_v2, %v8545_v57  ;;  %v8849_v37 = vadd.f32 %v8838_v2, %v8578_v20 }
 0x503   : > { %3642 = vmax.xlane.f32.xlu0 %v3641_v40  ;;  %3639 = vmax.xlane.f32.xlu1 %v3638_v16  ;;  %v3603_v9 = vmul.f32 0.1, %v3599_v50 }
 0x504   : > { %v3621_v15 = vadd.f32 %v8845_v4, %v8755_v43  ;;  %v3620_v61 = vadd.f32 %v8849_v37, %v8750_v24 }
 0x505   : > { %v8856_v42 = vadd.f32 %v3603_v9, %v8669_v19 }
 0x506   : > { %v3629_v17 = vmul.f32 10.0, %v3621_v15  ;;  %v3628_v46 = vmul.f32 10.0, %v3620_v61 }
 0x507   : > { %v8860_v12 = vadd.f32 %v8856_v42, %v8572_v18  ;;  %v8864_v47 = vadd.f32 %v8856_v42, %v8587_v55 }
 0x508   : > { %v3647_v33 = vsel %vm3208_vm11, %v3629_v17, -inf  ;;  %v3644_v8 = vsel %vm3206_vm10, %v3628_v46, -inf }
 0x509   : > { %3648 = vmax.xlane.f32.xlu0 %v3647_v33  ;;  %3645 = vmax.xlane.f32.xlu1 %v3644_v8  ;;  %v3623_v19 = vadd.f32 %v8860_v12, %v8764_v36  ;;  %v3622_v0 = vadd.f32 %v8864_v47, %v8762_v45 }
 0x50b   : > { %v3631_v48 = vmul.f32 10.0, %v3623_v19  ;;  %v3630_v31 = vmul.f32 10.0, %v3622_v0 }
 0x50d   : > { %v3653_v54 = vsel %vm3208_vm11, %v3631_v48, -inf  ;;  %v3650_v52 = vsel %vm3206_vm10, %v3630_v31, -inf }
 0x50e   : > { %3654 = vmax.xlane.f32.xlu0 %v3653_v54  ;;  %3651 = vmax.xlane.f32.xlu1 %v3650_v52 }
 0x589   : > { %v8874_v3 = vpop.xlane.xlu1 %3633  ;;  %v8876_v21 = vpop.xlane.xlu0 %3636 }
 0x58a   : > { %v3656_v56 = vsub.f32 %v3624_v32, %v8874_v3  ;;  %v3657_v44 = vsub.f32 %v3625_v49, %v8876_v21 }
 0x58c   : > { %v3664_v50 = vmul.f32 1.442695, %v3656_v56  ;;  %v3666_v40 = vmul.f32 1.442695, %v3657_v44 }
 0x58e   : > { %7404 = vpow2.f32 %v3664_v50 }
 0x58f   : > { %7406 = vpow2.f32 %v3666_v40 }
 0x590   : > { %v8880_v16 = vpop.xlane.xlu1 %3639  ;;  %v8882_v9 = vpop.xlane.xlu0 %3642 }
 0x591   : > { %v3658_v15 = vsub.f32 %v3626_v13, %v8880_v16  ;;  %v3659_v61 = vsub.f32 %v3627_v22, %v8882_v9 }
 0x593   : > { %v3668_v33 = vmul.f32 1.442695, %v3658_v15  ;;  %v3670_v8 = vmul.f32 1.442695, %v3659_v61 }
 0x595   : > { %7408 = vpow2.f32 %v3668_v33 }
 0x596   : > { %7410 = vpow2.f32 %v3670_v8  ;;  %v8886_v19 = vpop.xlane.xlu1 %3645  ;;  %v8888_v32 = vpop.xlane.xlu0 %3648 }
 0x597   : > { %v3660_v49 = vsub.f32 %v3628_v46, %v8886_v19  ;;  %v3661_v0 = vsub.f32 %v3629_v17, %v8888_v32 }
 0x598   : > { %v7405_v54 = vpop.eup %7404 }
 0x599   : > { %v7407_v52 = vpop.eup %7406  ;;  %v3672_v56 = vmul.f32 1.442695, %v3660_v49  ;;  %v3674_v44 = vmul.f32 1.442695, %v3661_v0  ;;  %v3680_v13 = vsel %vm3206_vm10, %v7405_v54, 0.0 }
 0x59a   : > { %3681 = vadd.xlane.f32.xlu1 %v3680_v13  ;;  %v3683_v22 = vsel %vm3208_vm11, %v7407_v52, 0.0 }
 0x59b   : > { %7412 = vpow2.f32 %v3672_v56  ;;  %v8894_v50 = vpop.xlane.xlu1 %3651  ;;  %v8896_v40 = vpop.xlane.xlu0 %3654  ;;  %3684 = vadd.xlane.f32.xlu0 %v3683_v22 }
 0x59c   : > { %7414 = vpow2.f32 %v3674_v44  ;;  %v3662_v46 = vsub.f32 %v3630_v31, %v8894_v50  ;;  %v3663_v17 = vsub.f32 %v3631_v48, %v8896_v40 }
 0x59e   : > { %v3676_v15 = vmul.f32 1.442695, %v3662_v46  ;;  %v3678_v61 = vmul.f32 1.442695, %v3663_v17 }
 0x59f   : > { %v7409_v33 = vpop.eup %7408 }
 0x5a0   : > { %v7411_v8 = vpop.eup %7410  ;;  %7416 = vpow2.f32 %v3676_v15  ;;  %v3686_v49 = vsel %vm3206_vm10, %v7409_v33, 0.0 }
 0x5a1   : > { %7418 = vpow2.f32 %v3678_v61  ;;  %3687 = vadd.xlane.f32.xlu1 %v3686_v49  ;;  %v3689_v0 = vsel %vm3208_vm11, %v7411_v8, 0.0 }
 0x5a2   : > { %3690 = vadd.xlane.f32.xlu0 %v3689_v0 }
 0x5a5   : > { %v7413_v54 = vpop.eup %7412 }
 0x5a6   : > { %v7415_v52 = vpop.eup %7414  ;;  %v3692_v56 = vsel %vm3206_vm10, %v7413_v54, 0.0 }
 0x5a7   : > { %3693 = vadd.xlane.f32.xlu1 %v3692_v56  ;;  %v3695_v31 = vsel %vm3208_vm11, %v7415_v52, 0.0 }
 0x5a8   : > { %3696 = vadd.xlane.f32.xlu0 %v3695_v31 }
 0x5aa   : > { %v7417_v48 = vpop.eup %7416 }
 0x5ab   : > { %v7419_v44 = vpop.eup %7418  ;;  %v3698_v13 = vsel %vm3206_vm10, %v7417_v48, 0.0 }
 0x5ac   : > { %3699 = vadd.xlane.f32.xlu1 %v3698_v13  ;;  %v3701_v22 = vsel %vm3208_vm11, %v7419_v44, 0.0 }
 0x5ad   : > { %3702 = vadd.xlane.f32.xlu0 %v3701_v22 }
 0x627   : > { %v3682_v46 = vpop.xlane.xlu1 %3681 }
 0x628   : > { %7420 = vlog2.f32 %v3682_v46  ;;  %v3685_v17 = vpop.xlane.xlu0 %3684 }
 0x629   : > { %7422 = vlog2.f32 %v3685_v17 }
 0x62e   : > { %v3688_v15 = vpop.xlane.xlu1 %3687 }
 0x62f   : > { %7424 = vlog2.f32 %v3688_v15  ;;  %v3691_v61 = vpop.xlane.xlu0 %3690 }
 0x630   : > { %7426 = vlog2.f32 %v3691_v61 }
 0x632   : > { %v7421_v33 = vpop.eup %7420 }
 0x633   : > { %v7423_v8 = vpop.eup %7422  ;;  %v3705_v49 = vmul.f32 0.6931472, %v7421_v33 }
 0x634   : > { %v3707_v0 = vmul.f32 0.6931472, %v7423_v8  ;;  %v3694_v54 = vpop.xlane.xlu1 %3693 }
 0x635   : > { %v3720_v52 = vadd.f32 %v3705_v49, %v8874_v3  ;;  %7428 = vlog2.f32 %v3694_v54  ;;  %v3697_v56 = vpop.xlane.xlu0 %3696 }
 0x636   : > { %v3721_v31 = vadd.f32 %v3707_v0, %v8876_v21  ;;  %7430 = vlog2.f32 %v3697_v56 }
 0x637   : > { %v3728_v48 = vsub.f32 -2.7725887, %v3720_v52 }
 0x638   : > { %v3729_v44 = vsub.f32 %v8720_v53, %v3721_v31 }
 0x639   : > { %v7425_v13 = vpop.eup %7424  ;;  %v3736_v22 = vmul.f32 0.1, %v3728_v48  ;;  %v3700_v46 = vpop.xlane.xlu1 %3699 }
 0x63a   : > { %v7427_v17 = vpop.eup %7426  ;;  %v3737_v15 = vmul.f32 0.1, %v3729_v44  ;;  %v3709_v61 = vmul.f32 0.6931472, %v7425_v13  ;;  %7432 = vlog2.f32 %v3700_v46  ;;  %v3703_v33 = vpop.xlane.xlu0 %3702 }
 0x63b   : > { %v8910_v8 = vadd.f32 %v3736_v22, %v8727_v34  ;;  %v3711_v3 = vmul.f32 0.6931472, %v7427_v17  ;;  %7434 = vlog2.f32 %v3703_v33 }
 0x63c   : > { %v3722_v49 = vadd.f32 %v3709_v61, %v8880_v16  ;;  %v8914_v21 = vadd.f32 %v3737_v15, %v8725_v35 }
 0x63d   : > { %v3752_v0 = vadd.f32 %v8910_v8, %v8810_v28  ;;  %v3723_v54 = vadd.f32 %v3711_v3, %v8882_v9 }
 0x63e   : > { %v3730_v52 = vsub.f32 -2.7725887, %v3722_v49  ;;  %v3753_v56 = vadd.f32 %v8914_v21, %v8806_v51 }
 0x63f   : > { %v7429_v31 = vpop.eup %7428  ;;  %v8921_v48 = vmul.f32 10.0, %v3752_v0  ;;  %v3731_v34 = vsub.f32 %v8720_v53, %v3723_v54 }
 0x640   : > { %v7431_v44 = vpop.eup %7430  ;;  %v3738_v13 = vmul.f32 0.1, %v3730_v52  ;;  %v3713_v16 = vmul.f32 0.6931472, %v7429_v31  ;;  %v3761_v22 = vmul.f32 10.0, %v3753_v56 }
 0x641   : > { %v3739_v35 = vmul.f32 0.1, %v3731_v34  ;;  %v3715_v46 = vmul.f32 0.6931472, %v7431_v44  ;;  %v3768_v28 = vsel %vm3206_vm10, %v8921_v48, -inf }
 0x642   : > { %v8927_v9 = vadd.f32 %v3738_v13, %v8735_v58  ;;  %v3724_v17 = vadd.f32 %v3713_v16, %v8886_v19  ;;  %v3769_v51 = vsel %vm3208_vm11, %v3761_v22, -inf }
 0x643   : > { %v3725_v15 = vadd.f32 %v3715_v46, %v8888_v32  ;;  %v3770_v61 = vmax.f32 %v3768_v28, %v3769_v51  ;;  %v8933_v33 = vadd.f32 %v3739_v35, %v8742_v10 }
 0x644   : > { %v7433_v3 = vpop.eup %7432  ;;  %v3754_v49 = vadd.f32 %v8927_v9, %v8829_v30  ;;  %v3732_v0 = vsub.f32 -2.7725887, %v3724_v17 }
 0x645   : > { %v7435_v54 = vpop.eup %7434  ;;  %v3733_v52 = vsub.f32 %v8720_v53, %v3725_v15  ;;  %v3717_v58 = vmul.f32 0.6931472, %v7433_v3  ;;  %v3771_v56 = vrot.slane %v3770_v61, 4  ;;  %v3755_v19 = vadd.f32 %v8933_v33, %v8825_v25 }
 0x646   : > { %v3762_v31 = vmul.f32 10.0, %v3754_v49  ;;  %v3740_v34 = vmul.f32 0.1, %v3732_v0  ;;  %v3719_v32 = vmul.f32 0.6931472, %v7435_v54 }
 0x647   : > { %v3741_v44 = vmul.f32 0.1, %v3733_v52  ;;  %v3726_v10 = vadd.f32 %v3717_v58, %v8894_v50  ;;  %v3772_v13 = vmax.f32 %v3770_v61, %v3771_v56  ;;  %v3763_v16 = vmul.f32 10.0, %v3755_v19 }
 0x648   : > { %v8942_v35 = vadd.f32 %v3740_v34, %v8750_v24  ;;  %v3727_v30 = vadd.f32 %v3719_v32, %v8896_v40  ;;  %v3777_v46 = vsel %vm3206_vm10, %v3762_v31, -inf }
 0x649   : > { %v3734_v28 = vsub.f32 -2.7725887, %v3726_v10  ;;  %v3773_v17 = vrot.slane %v3772_v13, 2  ;;  %v3778_v51 = vsel %vm3208_vm11, %v3763_v16, -inf  ;;  %v8948_v25 = vadd.f32 %v3741_v44, %v8755_v43 }
 0x64a   : > { %v3756_v15 = vadd.f32 %v8942_v35, %v8849_v37  ;;  %v3735_v50 = vsub.f32 %v8720_v53, %v3727_v30  ;;  %v3779_v61 = vmax.f32 %v3777_v46, %v3778_v51 }
 0x64b   : > { %v3742_v3 = vmul.f32 0.1, %v3734_v28  ;;  %v3774_v24 = vmax.f32 %v3772_v13, %v3773_v17  ;;  %v3757_v40 = vadd.f32 %v8948_v25, %v8845_v4 }
 0x64c   : > { %v3764_v49 = vmul.f32 10.0, %v3756_v15  ;;  %v3743_v0 = vmul.f32 0.1, %v3735_v50  ;;  %v3780_v54 = vrot.slane %v3779_v61, 4 }
 0x64d   : > { %v8956_v52 = vadd.f32 %v3742_v3, %v8762_v45  ;;  %v3775_v58 = vrot.slane %v3774_v24, 1  ;;  %v3765_v43 = vmul.f32 10.0, %v3757_v40 }
 0x64e   : > { %v3781_v56 = vmax.f32 %v3779_v61, %v3780_v54  ;;  %v3786_v19 = vsel %vm3206_vm10, %v3764_v49, -inf  ;;  %v8960_v37 = vadd.f32 %v3743_v0, %v8764_v36 }
 0x64f   : > { %v3758_v34 = vadd.f32 %v8956_v52, %v8864_v47  ;;  %v8964_v32 = vmax.f32 %v3774_v24, %v3775_v58  ;;  %v3787_v4 = vsel %vm3208_vm11, %v3765_v43, -inf }
 0x650   : > { %v3782_v44 = vrot.slane %v3781_v56, 2  ;;  %v3788_v10 = vmax.f32 %v3786_v19, %v3787_v4  ;;  %v3759_v45 = vadd.f32 %v8960_v37, %v8860_v12 }
 0x651   : > { %v3766_v13 = vmul.f32 10.0, %v3758_v34  ;;  %v3804_v30 = vsub.f32 %v8921_v48, %v8964_v32  ;;  %v3805_v46 = vsub.f32 %v3761_v22, %v8964_v32 }
 0x652   : > { %v3783_v36 = vmax.f32 %v3781_v56, %v3782_v44  ;;  %v3789_v28 = vrot.slane %v3788_v10, 4  ;;  %v3767_v17 = vmul.f32 10.0, %v3759_v45 }
 0x653   : > { %v3812_v51 = vmul.f32 1.442695, %v3804_v30  ;;  %v3814_v47 = vmul.f32 1.442695, %v3805_v46  ;;  %v3795_v15 = vsel %vm3206_vm10, %v3766_v13, -inf }
 0x654   : > { %v3784_v50 = vrot.slane %v3783_v36, 1  ;;  %v3790_v61 = vmax.f32 %v3788_v10, %v3789_v28  ;;  %v3796_v3 = vsel %vm3208_vm11, %v3767_v17, -inf }
 0x655   : > { %7436 = vpow2.f32 %v3812_v51  ;;  %v3797_v24 = vmax.f32 %v3795_v15, %v3796_v3 }
 0x656   : > { %7438 = vpow2.f32 %v3814_v47  ;;  %v8974_v12 = vmax.f32 %v3783_v36, %v3784_v50  ;;  %v3791_v40 = vrot.slane %v3790_v61, 2 }
 0x657   : > { %v3798_v48 = vrot.slane %v3797_v24, 4 }
 0x658   : > { %v3806_v22 = vsub.f32 %v3762_v31, %v8974_v12  ;;  %v3807_v0 = vsub.f32 %v3763_v16, %v8974_v12  ;;  %v3792_v54 = vmax.f32 %v3790_v61, %v3791_v40 }
 0x659   : > { %v3799_v58 = vmax.f32 %v3797_v24, %v3798_v48 }
 0x65a   : > { %v3816_v56 = vmul.f32 1.442695, %v3806_v22  ;;  %v3818_v19 = vmul.f32 1.442695, %v3807_v0  ;;  %v3793_v34 = vrot.slane %v3792_v54, 1 }
 0x65b   : > { %v3800_v4 = vrot.slane %v3799_v58, 2 }
 0x65c   : > { %7440 = vpow2.f32 %v3816_v56  ;;  %v8978_v44 = vmax.f32 %v3792_v54, %v3793_v34 }
 0x65d   : > { %7442 = vpow2.f32 %v3818_v19  ;;  %v3801_v10 = vmax.f32 %v3799_v58, %v3800_v4 }
 0x65e   : > { %v3808_v45 = vsub.f32 %v3764_v49, %v8978_v44  ;;  %v3809_v30 = vsub.f32 %v3765_v43, %v8978_v44 }
 0x65f   : > { %v7437_v46 = vpop.eup %7436  ;;  %v3802_v36 = vrot.slane %v3801_v10, 1 }
 0x660   : > { %v7439_v31 = vpop.eup %7438  ;;  %v3828_v16 = vsel %vm3206_vm10, %v7437_v46, 0.0  ;;  %v3820_v28 = vmul.f32 1.442695, %v3808_v45  ;;  %v3822_v51 = vmul.f32 1.442695, %v3809_v30 }
 0x661   : > { %v3829_v47 = vsel %vm3208_vm11, %v7439_v31, 0.0  ;;  %v8984_v15 = vmax.f32 %v3801_v10, %v3802_v36 }
 0x662   : > { %v3830_v50 = vadd.f32 %v3829_v47, %v3828_v16  ;;  %7444 = vpow2.f32 %v3820_v28 }
 0x663   : > { %7446 = vpow2.f32 %v3822_v51  ;;  %v3810_v61 = vsub.f32 %v3766_v13, %v8984_v15  ;;  %v3811_v49 = vsub.f32 %v3767_v17, %v8984_v15 }
 0x664   : > { %v3831_v3 = vrot.slane %v3830_v50, 4 }
 0x665   : > { %v3824_v43 = vmul.f32 1.442695, %v3810_v61  ;;  %v3826_v24 = vmul.f32 1.442695, %v3811_v49 }
 0x666   : > { %v7441_v40 = vpop.eup %7440  ;;  %v3832_v48 = vadd.f32 %v3831_v3, %v3830_v50 }
 0x667   : > { %v7443_v22 = vpop.eup %7442  ;;  %v3837_v0 = vsel %vm3206_vm10, %v7441_v40, 0.0  ;;  %7448 = vpow2.f32 %v3824_v43 }
 0x668   : > { %v3833_v54 = vrot.slane %v3832_v48, 2  ;;  %v3838_v58 = vsel %vm3208_vm11, %v7443_v22, 0.0  ;;  %7450 = vpow2.f32 %v3826_v24 }
 0x669   : > { %v3839_v56 = vadd.f32 %v3838_v58, %v3837_v0 }
 0x66a   : > { %v3834_v19 = vadd.f32 %v3833_v54, %v3832_v48 }
 0x66b   : > { %v3840_v34 = vrot.slane %v3839_v56, 4 }
 0x66c   : > { %v7445_v4 = vpop.eup %7444  ;;  %v3835_v13 = vrot.slane %v3834_v19, 1 }
 0x66d   : > { %v7447_v10 = vpop.eup %7446  ;;  %v3841_v17 = vadd.f32 %v3840_v34, %v3839_v56  ;;  %v3846_v45 = vsel %vm3206_vm10, %v7445_v4, 0.0 }
 0x66e   : > { %v3836_v30 = vadd.f32 %v3835_v13, %v3834_v19  ;;  %v3847_v46 = vsel %vm3208_vm11, %v7447_v10, 0.0 }
 0x66f   : > { %v3842_v36 = vrot.slane %v3841_v17, 2  ;;  %v3848_v31 = vadd.f32 %v3847_v46, %v3846_v45 }
 0x670   : > { %7452 = vlog2.f32 %v3836_v30 }
 0x671   : > { %v7449_v16 = vpop.eup %7448  ;;  %v3843_v28 = vadd.f32 %v3842_v36, %v3841_v17  ;;  %v3849_v51 = vrot.slane %v3848_v31, 4 }
 0x672   : > { %v7451_v47 = vpop.eup %7450  ;;  %v3855_v50 = vsel %vm3206_vm10, %v7449_v16, 0.0 }
 0x673   : > { %v3844_v61 = vrot.slane %v3843_v28, 1  ;;  %v3850_v49 = vadd.f32 %v3849_v51, %v3848_v31  ;;  %v3856_v3 = vsel %vm3208_vm11, %v7451_v47, 0.0 }
 0x674   : > { %v3857_v43 = vadd.f32 %v3856_v3, %v3855_v50 }
 0x675   : > { %v3845_v24 = vadd.f32 %v3844_v61, %v3843_v28  ;;  %v3851_v40 = vrot.slane %v3850_v49, 2 }
 0x676   : > { %v3858_v48 = vrot.slane %v3857_v43, 4 }
 0x677   : > { %7454 = vlog2.f32 %v3845_v24  ;;  %v3852_v22 = vadd.f32 %v3851_v40, %v3850_v49 }
 0x678   : > { %v3859_v0 = vadd.f32 %v3858_v48, %v3857_v43 }
 0x679   : > { %v3853_v54 = vrot.slane %v3852_v22, 1 }
 0x67a   : > { %v7453_v58 = vpop.eup %7452  ;;  %v3860_v56 = vrot.slane %v3859_v0, 2 }
 0x67b   : > { %v3865_v19 = vmul.f32 0.6931472, %v7453_v58  ;;  %v3854_v34 = vadd.f32 %v3853_v54, %v3852_v22 }
 0x67c   : > { %v3861_v4 = vadd.f32 %v3860_v56, %v3859_v0 }
 0x67d   : > { %v3872_v13 = vadd.f32 %v3865_v19, %v8964_v32  ;;  %7456 = vlog2.f32 %v3854_v34 }
 0x67e   : > { %v3862_v10 = vrot.slane %v3861_v4, 1 }
 0x67f   : > { %v3876_v17 = vsub.f32 %v8619_v6, %v3872_v13 }
 0x680   : > { %v3863_v45 = vadd.f32 %v3862_v10, %v3861_v4 }
 0x681   : > { %v7455_v30 = vpop.eup %7454  ;;  %v3880_v46 = vmul.f32 0.1, %v3876_v17 }
 0x682   : > { %v3867_v36 = vmul.f32 0.6931472, %v7455_v30  ;;  %7458 = vlog2.f32 %v3863_v45 }
 0x683   : > { %v8997_v31 = vadd.f32 %v3880_v46, %v8801_v26 }
 0x684   : > { %v3873_v16 = vadd.f32 %v3867_v36, %v8974_v12 }
 0x685   : > { %v9002_v28 = vadd.f32 %v8997_v31, %v8527_v41  ;;  %v9006_v32 = vadd.f32 %v8997_v31, %v8551_v60 }
 0x686   : > { %v3877_v51 = vsub.f32 %v8619_v6, %v3873_v16 }
 0x687   : > { %v7457_v47 = vpop.eup %7456  ;;  %v3897_v50 = vadd.f32 %v9002_v28, %v8914_v21  ;;  %v3896_v26 = vadd.f32 %v9006_v32, %v8910_v8 }
 0x688   : > { %v3881_v61 = vmul.f32 0.1, %v3877_v51  ;;  %v3869_v49 = vmul.f32 0.6931472, %v7457_v47 }
 0x689   : > { %v3905_v12 = vmul.f32 10.0, %v3897_v50  ;;  %v3904_v3 = vmul.f32 10.0, %v3896_v26 }
 0x68a   : > { %v9014_v43 = vadd.f32 %v3881_v61, %v8818_v38  ;;  %v3874_v24 = vadd.f32 %v3869_v49, %v8978_v44 }
 0x68b   : > { %v3915_v40 = vsel %vm3208_vm11, %v3905_v12, -inf  ;;  %v3912_v48 = vsel %vm3206_vm10, %v3904_v3, -inf }
 0x68c   : > { %v7459_v22 = vpop.eup %7458  ;;  %3916 = vmax.xlane.f32.xlu0 %v3915_v40  ;;  %3913 = vmax.xlane.f32.xlu1 %v3912_v48  ;;  %v9021_v0 = vadd.f32 %v9014_v43, %v8536_v59  ;;  %v9025_v54 = vadd.f32 %v9014_v43, %v8560_v63  ;;  %v3878_v38 = vsub.f32 %v8619_v6, %v3874_v24 }
 0x68d   : > { %v3871_v58 = vmul.f32 0.6931472, %v7459_v22 }
 0x68e   : > { %v3899_v44 = vadd.f32 %v9021_v0, %v8933_v33  ;;  %v3898_v56 = vadd.f32 %v9025_v54, %v8927_v9  ;;  %v3882_v19 = vmul.f32 0.1, %v3878_v38 }
 0x68f   : > { %v3875_v34 = vadd.f32 %v3871_v58, %v8984_v15 }
 0x690   : > { %v3907_v4 = vmul.f32 10.0, %v3899_v44  ;;  %v3906_v13 = vmul.f32 10.0, %v3898_v56  ;;  %v9034_v10 = vadd.f32 %v3882_v19, %v8838_v2 }
 0x691   : > { %v3879_v17 = vsub.f32 %v8619_v6, %v3875_v34 }
 0x692   : > { %v3921_v45 = vsel %vm3208_vm11, %v3907_v4, -inf  ;;  %v3918_v30 = vsel %vm3206_vm10, %v3906_v13, -inf  ;;  %v9041_v46 = vadd.f32 %v9034_v10, %v8545_v57  ;;  %v9045_v36 = vadd.f32 %v9034_v10, %v8578_v20 }
 0x693   : > { %3922 = vmax.xlane.f32.xlu0 %v3921_v45  ;;  %3919 = vmax.xlane.f32.xlu1 %v3918_v30  ;;  %v3883_v15 = vmul.f32 0.1, %v3879_v17 }
 0x694   : > { %v3901_v2 = vadd.f32 %v9041_v46, %v8948_v25  ;;  %v3900_v16 = vadd.f32 %v9045_v36, %v8942_v35 }
 0x695   : > { %v9052_v51 = vadd.f32 %v3883_v15, %v8856_v42 }
 0x696   : > { %v3909_v47 = vmul.f32 10.0, %v3901_v2  ;;  %v3908_v50 = vmul.f32 10.0, %v3900_v16 }
 0x697   : > { %v9056_v26 = vadd.f32 %v9052_v51, %v8572_v18  ;;  %v9060_v61 = vadd.f32 %v9052_v51, %v8587_v55 }
 0x698   : > { %v3927_v49 = vsel %vm3208_vm11, %v3909_v47, -inf  ;;  %v3924_v24 = vsel %vm3206_vm10, %v3908_v50, -inf }
 0x699   : > { %3928 = vmax.xlane.f32.xlu0 %v3927_v49  ;;  %3925 = vmax.xlane.f32.xlu1 %v3924_v24  ;;  %v3903_v42 = vadd.f32 %v9056_v26, %v8960_v37  ;;  %v3902_v40 = vadd.f32 %v9060_v61, %v8956_v52 }
 0x69b   : > { %v3911_v48 = vmul.f32 10.0, %v3903_v42  ;;  %v3910_v22 = vmul.f32 10.0, %v3902_v40 }
 0x69d   : > { %v3933_v38 = vsel %vm3208_vm11, %v3911_v48, -inf  ;;  %v3930_v58 = vsel %vm3206_vm10, %v3910_v22, -inf }
 0x69e   : > { %3934 = vmax.xlane.f32.xlu0 %v3933_v38  ;;  %3931 = vmax.xlane.f32.xlu1 %v3930_v58 }
 0x719   : > { %v9070_v44 = vpop.xlane.xlu1 %3913  ;;  %v9072_v56 = vpop.xlane.xlu0 %3916 }
 0x71a   : > { %v3936_v19 = vsub.f32 %v3904_v3, %v9070_v44  ;;  %v3937_v34 = vsub.f32 %v3905_v12, %v9072_v56 }
 0x71c   : > { %v3944_v17 = vmul.f32 1.442695, %v3936_v19  ;;  %v3946_v45 = vmul.f32 1.442695, %v3937_v34 }
 0x71e   : > { %7460 = vpow2.f32 %v3944_v17 }
 0x71f   : > { %7462 = vpow2.f32 %v3946_v45 }
 0x720   : > { %v9076_v30 = vpop.xlane.xlu1 %3919  ;;  %v9078_v15 = vpop.xlane.xlu0 %3922 }
 0x721   : > { %v3938_v2 = vsub.f32 %v3906_v13, %v9076_v30  ;;  %v3939_v16 = vsub.f32 %v3907_v4, %v9078_v15 }
 0x723   : > { %v3948_v49 = vmul.f32 1.442695, %v3938_v2  ;;  %v3950_v24 = vmul.f32 1.442695, %v3939_v16 }
 0x725   : > { %7464 = vpow2.f32 %v3948_v49 }
 0x726   : > { %7466 = vpow2.f32 %v3950_v24  ;;  %v9082_v42 = vpop.xlane.xlu1 %3925  ;;  %v9084_v3 = vpop.xlane.xlu0 %3928 }
 0x727   : > { %v3940_v12 = vsub.f32 %v3908_v50, %v9082_v42  ;;  %v3941_v40 = vsub.f32 %v3909_v47, %v9084_v3 }
 0x728   : > { %v7461_v38 = vpop.eup %7460 }
 0x729   : > { %v7463_v58 = vpop.eup %7462  ;;  %v3952_v19 = vmul.f32 1.442695, %v3940_v12  ;;  %v3954_v34 = vmul.f32 1.442695, %v3941_v40  ;;  %v3960_v13 = vsel %vm3206_vm10, %v7461_v38, 0.0 }
 0x72a   : > { %3961 = vadd.xlane.f32.xlu1 %v3960_v13  ;;  %v3963_v4 = vsel %vm3208_vm11, %v7463_v58, 0.0 }
 0x72b   : > { %7468 = vpow2.f32 %v3952_v19  ;;  %v9090_v17 = vpop.xlane.xlu1 %3931  ;;  %v9092_v45 = vpop.xlane.xlu0 %3934  ;;  %3964 = vadd.xlane.f32.xlu0 %v3963_v4 }
 0x72c   : > { %7470 = vpow2.f32 %v3954_v34  ;;  %v3942_v50 = vsub.f32 %v3910_v22, %v9090_v17  ;;  %v3943_v47 = vsub.f32 %v3911_v48, %v9092_v45 }
 0x72e   : > { %v3956_v2 = vmul.f32 1.442695, %v3942_v50  ;;  %v3958_v16 = vmul.f32 1.442695, %v3943_v47 }
 0x72f   : > { %v7465_v49 = vpop.eup %7464 }
 0x730   : > { %v7467_v24 = vpop.eup %7466  ;;  %7472 = vpow2.f32 %v3956_v2  ;;  %v3966_v12 = vsel %vm3206_vm10, %v7465_v49, 0.0 }
 0x731   : > { %7474 = vpow2.f32 %v3958_v16  ;;  %3967 = vadd.xlane.f32.xlu1 %v3966_v12  ;;  %v3969_v40 = vsel %vm3208_vm11, %v7467_v24, 0.0 }
 0x732   : > { %3970 = vadd.xlane.f32.xlu0 %v3969_v40 }
 0x735   : > { %v7469_v38 = vpop.eup %7468 }
 0x736   : > { %v7471_v58 = vpop.eup %7470  ;;  %v3972_v19 = vsel %vm3206_vm10, %v7469_v38, 0.0 }
 0x737   : > { %3973 = vadd.xlane.f32.xlu1 %v3972_v19  ;;  %v3975_v22 = vsel %vm3208_vm11, %v7471_v58, 0.0 }
 0x738   : > { %3976 = vadd.xlane.f32.xlu0 %v3975_v22 }
 0x73a   : > { %v7473_v48 = vpop.eup %7472 }
 0x73b   : > { %v7475_v34 = vpop.eup %7474  ;;  %v3978_v13 = vsel %vm3206_vm10, %v7473_v48, 0.0 }
 0x73c   : > { %3979 = vadd.xlane.f32.xlu1 %v3978_v13  ;;  %v3981_v4 = vsel %vm3208_vm11, %v7475_v34, 0.0 }
 0x73d   : > { %3982 = vadd.xlane.f32.xlu0 %v3981_v4 }
 0x7b7   : > { %v3962_v50 = vpop.xlane.xlu1 %3961 }
 0x7b8   : > { %7476 = vlog2.f32 %v3962_v50  ;;  %v3965_v47 = vpop.xlane.xlu0 %3964 }
 0x7b9   : > { %7478 = vlog2.f32 %v3965_v47 }
 0x7be   : > { %v3968_v2 = vpop.xlane.xlu1 %3967 }
 0x7bf   : > { %7480 = vlog2.f32 %v3968_v2  ;;  %v3971_v16 = vpop.xlane.xlu0 %3970 }
 0x7c0   : > { %7482 = vlog2.f32 %v3971_v16 }
 0x7c2   : > { %v7477_v49 = vpop.eup %7476 }
 0x7c3   : > { %v7479_v24 = vpop.eup %7478  ;;  %v3985_v12 = vmul.f32 0.6931472, %v7477_v49 }
 0x7c4   : > { %v3987_v40 = vmul.f32 0.6931472, %v7479_v24  ;;  %v3974_v38 = vpop.xlane.xlu1 %3973 }
 0x7c5   : > { %v4000_v58 = vadd.f32 %v3985_v12, %v9070_v44  ;;  %7484 = vlog2.f32 %v3974_v38  ;;  %v3977_v19 = vpop.xlane.xlu0 %3976 }
 0x7c6   : > { %v4001_v22 = vadd.f32 %v3987_v40, %v9072_v56  ;;  %7486 = vlog2.f32 %v3977_v19 }
 0x7c7   : > { %v4008_v48 = vsub.f32 -2.7725887, %v4000_v58 }
 0x7c8   : > { %v4009_v34 = vsub.f32 %v8720_v53, %v4001_v22 }
 0x7c9   : > { %v7481_v13 = vpop.eup %7480  ;;  %v4016_v4 = vmul.f32 0.1, %v4008_v48  ;;  %v3980_v50 = vpop.xlane.xlu1 %3979 }
 0x7ca   : > { %v7483_v47 = vpop.eup %7482  ;;  %v4017_v2 = vmul.f32 0.1, %v4009_v34  ;;  %v3989_v16 = vmul.f32 0.6931472, %v7481_v13  ;;  %7488 = vlog2.f32 %v3980_v50  ;;  %v3983_v49 = vpop.xlane.xlu0 %3982 }
 0x7cb   : > { %v9106_v24 = vadd.f32 %v4016_v4, %v8910_v8  ;;  %v3991_v44 = vmul.f32 0.6931472, %v7483_v47  ;;  %7490 = vlog2.f32 %v3983_v49 }
 0x7cc   : > { %v4002_v12 = vadd.f32 %v3989_v16, %v9076_v30  ;;  %v9110_v56 = vadd.f32 %v4017_v2, %v8914_v21 }
 0x7cd   : > { %v4032_v40 = vadd.f32 %v9106_v24, %v9006_v32  ;;  %v4003_v38 = vadd.f32 %v3991_v44, %v9078_v15 }
 0x7ce   : > { %v4010_v58 = vsub.f32 -2.7725887, %v4002_v12  ;;  %v4033_v19 = vadd.f32 %v9110_v56, %v9002_v28 }
 0x7cf   : > { %v7485_v22 = vpop.eup %7484  ;;  %v9117_v48 = vmul.f32 10.0, %v4032_v40  ;;  %v4011_v8 = vsub.f32 %v8720_v53, %v4003_v38 }
 0x7d0   : > { %v7487_v34 = vpop.eup %7486  ;;  %v4018_v13 = vmul.f32 0.1, %v4010_v58  ;;  %v3993_v30 = vmul.f32 0.6931472, %v7485_v22  ;;  %v4041_v4 = vmul.f32 10.0, %v4033_v19 }
 0x7d1   : > { %v4019_v21 = vmul.f32 0.1, %v4011_v8  ;;  %v3995_v50 = vmul.f32 0.6931472, %v7487_v34  ;;  %v4048_v32 = vsel %vm3206_vm10, %v9117_v48, -inf }
 0x7d2   : > { %v9123_v15 = vadd.f32 %v4018_v13, %v8927_v9  ;;  %v4004_v47 = vadd.f32 %v3993_v30, %v9082_v42  ;;  %v4049_v28 = vsel %vm3208_vm11, %v4041_v4, -inf }
 0x7d3   : > { %v4005_v2 = vadd.f32 %v3995_v50, %v9084_v3  ;;  %v4050_v16 = vmax.f32 %v4048_v32, %v4049_v28  ;;  %v9129_v49 = vadd.f32 %v4019_v21, %v8933_v33 }
 0x7d4   : > { %v7489_v44 = vpop.eup %7488  ;;  %v4034_v12 = vadd.f32 %v9123_v15, %v9025_v54  ;;  %v4012_v40 = vsub.f32 -2.7725887, %v4004_v47 }
 0x7d5   : > { %v7491_v38 = vpop.eup %7490  ;;  %v4013_v58 = vsub.f32 %v8720_v53, %v4005_v2  ;;  %v3997_v9 = vmul.f32 0.6931472, %v7489_v44  ;;  %v4051_v19 = vrot.slane %v4050_v16, 4  ;;  %v4035_v42 = vadd.f32 %v9129_v49, %v9021_v0 }
 0x7d6   : > { %v4042_v22 = vmul.f32 10.0, %v4034_v12  ;;  %v4020_v8 = vmul.f32 0.1, %v4012_v40  ;;  %v3999_v3 = vmul.f32 0.6931472, %v7491_v38 }
 0x7d7   : > { %v4021_v34 = vmul.f32 0.1, %v4013_v58  ;;  %v4006_v33 = vadd.f32 %v3997_v9, %v9090_v17  ;;  %v4052_v13 = vmax.f32 %v4050_v16, %v4051_v19  ;;  %v4043_v30 = vmul.f32 10.0, %v4035_v42 }
 0x7d8   : > { %v9138_v21 = vadd.f32 %v4020_v8, %v8942_v35  ;;  %v4007_v54 = vadd.f32 %v3999_v3, %v9092_v45  ;;  %v4057_v50 = vsel %vm3206_vm10, %v4042_v22, -inf }
 0x7d9   : > { %v4014_v32 = vsub.f32 -2.7725887, %v4006_v33  ;;  %v4053_v47 = vrot.slane %v4052_v13, 2  ;;  %v4058_v28 = vsel %vm3208_vm11, %v4043_v30, -inf  ;;  %v9144_v0 = vadd.f32 %v4021_v34, %v8948_v25 }
 0x7da   : > { %v4036_v2 = vadd.f32 %v9138_v21, %v9045_v36  ;;  %v4015_v17 = vsub.f32 %v8720_v53, %v4007_v54  ;;  %v4059_v16 = vmax.f32 %v4057_v50, %v4058_v28 }
 0x7db   : > { %v4022_v44 = vmul.f32 0.1, %v4014_v32  ;;  %v4054_v35 = vmax.f32 %v4052_v13, %v4053_v47  ;;  %v4037_v45 = vadd.f32 %v9144_v0, %v9041_v46 }
 0x7dc   : > { %v4044_v12 = vmul.f32 10.0, %v4036_v2  ;;  %v4023_v40 = vmul.f32 0.1, %v4015_v17  ;;  %v4060_v38 = vrot.slane %v4059_v16, 4 }
 0x7dd   : > { %v9152_v58 = vadd.f32 %v4022_v44, %v8956_v52  ;;  %v4055_v9 = vrot.slane %v4054_v35, 1  ;;  %v4045_v25 = vmul.f32 10.0, %v4037_v45 }
 0x7de   : > { %v4061_v19 = vmax.f32 %v4059_v16, %v4060_v38  ;;  %v4066_v42 = vsel %vm3206_vm10, %v4044_v12, -inf  ;;  %v9156_v36 = vadd.f32 %v4023_v40, %v8960_v37 }
 0x7df   : > { %v4038_v8 = vadd.f32 %v9152_v58, %v9060_v61  ;;  %v9160_v3 = vmax.f32 %v4054_v35, %v4055_v9  ;;  %v4067_v46 = vsel %vm3208_vm11, %v4045_v25, -inf }
 0x7e0   : > { %v4062_v34 = vrot.slane %v4061_v19, 2  ;;  %v4068_v33 = vmax.f32 %v4066_v42, %v4067_v46  ;;  %v4039_v52 = vadd.f32 %v9156_v36, %v9056_v26 }
 0x7e1   : > { %v4046_v13 = vmul.f32 10.0, %v4038_v8  ;;  %v4084_v54 = vsub.f32 %v9117_v48, %v9160_v3  ;;  %v4085_v50 = vsub.f32 %v4041_v4, %v9160_v3 }
 0x7e2   : > { %v4063_v37 = vmax.f32 %v4061_v19, %v4062_v34  ;;  %v4069_v32 = vrot.slane %v4068_v33, 4  ;;  %v4047_v47 = vmul.f32 10.0, %v4039_v52 }
 0x7e3   : > { %v4092_v28 = vmul.f32 1.442695, %v4084_v54  ;;  %v4094_v61 = vmul.f32 1.442695, %v4085_v50  ;;  %v4075_v2 = vsel %vm3206_vm10, %v4046_v13, -inf }
 0x7e4   : > { %v4064_v17 = vrot.slane %v4063_v37, 1  ;;  %v4070_v16 = vmax.f32 %v4068_v33, %v4069_v32  ;;  %v4076_v44 = vsel %vm3208_vm11, %v4047_v47, -inf }
 0x7e5   : > { %7492 = vpow2.f32 %v4092_v28  ;;  %v4077_v35 = vmax.f32 %v4075_v2, %v4076_v44 }
 0x7e6   : > { %7494 = vpow2.f32 %v4094_v61  ;;  %v9170_v26 = vmax.f32 %v4063_v37, %v4064_v17  ;;  %v4071_v45 = vrot.slane %v4070_v16, 2 }
 0x7e7   : > { %v4078_v48 = vrot.slane %v4077_v35, 4 }
 0x7e8   : > { %v4086_v4 = vsub.f32 %v4042_v22, %v9170_v26  ;;  %v4087_v40 = vsub.f32 %v4043_v30, %v9170_v26  ;;  %v4072_v38 = vmax.f32 %v4070_v16, %v4071_v45 }
 0x7e9   : > { %v4079_v9 = vmax.f32 %v4077_v35, %v4078_v48 }
 0x7ea   : > { %v4096_v19 = vmul.f32 1.442695, %v4086_v4  ;;  %v4098_v42 = vmul.f32 1.442695, %v4087_v40  ;;  %v4073_v8 = vrot.slane %v4072_v38, 1 }
 0x7eb   : > { %v4080_v46 = vrot.slane %v4079_v9, 2 }
 0x7ec   : > { %7496 = vpow2.f32 %v4096_v19  ;;  %v9174_v34 = vmax.f32 %v4072_v38, %v4073_v8 }
 0x7ed   : > { %7498 = vpow2.f32 %v4098_v42  ;;  %v4081_v33 = vmax.f32 %v4079_v9, %v4080_v46 }
 0x7ee   : > { %v4088_v52 = vsub.f32 %v4044_v12, %v9174_v34  ;;  %v4089_v54 = vsub.f32 %v4045_v25, %v9174_v34 }
 0x7ef   : > { %v7493_v50 = vpop.eup %7492  ;;  %v4082_v37 = vrot.slane %v4081_v33, 1 }
 0x7f0   : > { %v7495_v22 = vpop.eup %7494  ;;  %v4108_v30 = vsel %vm3206_vm10, %v7493_v50, 0.0  ;;  %v4100_v32 = vmul.f32 1.442695, %v4088_v52  ;;  %v4102_v28 = vmul.f32 1.442695, %v4089_v54 }
 0x7f1   : > { %v4109_v61 = vsel %vm3208_vm11, %v7495_v22, 0.0  ;;  %v9180_v2 = vmax.f32 %v4081_v33, %v4082_v37 }
 0x7f2   : > { %v4110_v17 = vadd.f32 %v4109_v61, %v4108_v30  ;;  %7500 = vpow2.f32 %v4100_v32 }
 0x7f3   : > { %7502 = vpow2.f32 %v4102_v28  ;;  %v4090_v16 = vsub.f32 %v4046_v13, %v9180_v2  ;;  %v4091_v12 = vsub.f32 %v4047_v47, %v9180_v2 }
 0x7f4   : > { %v4111_v44 = vrot.slane %v4110_v17, 4 }
 0x7f5   : > { %v4104_v25 = vmul.f32 1.442695, %v4090_v16  ;;  %v4106_v35 = vmul.f32 1.442695, %v4091_v12 }
 0x7f6   : > { %v7497_v45 = vpop.eup %7496  ;;  %v4112_v48 = vadd.f32 %v4111_v44, %v4110_v17 }
 0x7f7   : > { %v7499_v4 = vpop.eup %7498  ;;  %v4117_v40 = vsel %vm3206_vm10, %v7497_v45, 0.0  ;;  %7504 = vpow2.f32 %v4104_v25 }
 0x7f8   : > { %v4113_v38 = vrot.slane %v4112_v48, 2  ;;  %v4118_v9 = vsel %vm3208_vm11, %v7499_v4, 0.0  ;;  %7506 = vpow2.f32 %v4106_v35 }
 0x7f9   : > { %v4119_v19 = vadd.f32 %v4118_v9, %v4117_v40 }
 0x7fa   : > { %v4114_v42 = vadd.f32 %v4113_v38, %v4112_v48 }
 0x7fb   : > { %v4120_v8 = vrot.slane %v4119_v19, 4 }
 0x7fc   : > { %v7501_v46 = vpop.eup %7500  ;;  %v4115_v13 = vrot.slane %v4114_v42, 1 }
 0x7fd   : > { %v7503_v33 = vpop.eup %7502  ;;  %v4121_v47 = vadd.f32 %v4120_v8, %v4119_v19  ;;  %v4126_v52 = vsel %vm3206_vm10, %v7501_v46, 0.0 }
 0x7fe   : > { %v4116_v54 = vadd.f32 %v4115_v13, %v4114_v42  ;;  %v4127_v50 = vsel %vm3208_vm11, %v7503_v33, 0.0 }
 0x7ff   : > { %v4122_v37 = vrot.slane %v4121_v47, 2  ;;  %v4128_v22 = vadd.f32 %v4127_v50, %v4126_v52 }
 0x800   : > { %7508 = vlog2.f32 %v4116_v54 }
 0x801   : > { %v7505_v30 = vpop.eup %7504  ;;  %v4123_v32 = vadd.f32 %v4122_v37, %v4121_v47  ;;  %v4129_v28 = vrot.slane %v4128_v22, 4 }
 0x802   : > { %v7507_v61 = vpop.eup %7506  ;;  %v4135_v17 = vsel %vm3206_vm10, %v7505_v30, 0.0 }
 0x803   : > { %v4124_v16 = vrot.slane %v4123_v32, 1  ;;  %v4130_v12 = vadd.f32 %v4129_v28, %v4128_v22  ;;  %v4136_v44 = vsel %vm3208_vm11, %v7507_v61, 0.0 }
 0x804   : > { %v4137_v25 = vadd.f32 %v4136_v44, %v4135_v17 }
 0x805   : > { %v4125_v35 = vadd.f32 %v4124_v16, %v4123_v32  ;;  %v4131_v45 = vrot.slane %v4130_v12, 2 }
 0x806   : > { %v4138_v48 = vrot.slane %v4137_v25, 4 }
 0x807   : > { %7510 = vlog2.f32 %v4125_v35  ;;  %v4132_v4 = vadd.f32 %v4131_v45, %v4130_v12 }
 0x808   : > { %v4139_v40 = vadd.f32 %v4138_v48, %v4137_v25 }
 0x809   : > { %v4133_v38 = vrot.slane %v4132_v4, 1 }
 0x80a   : > { %v7509_v9 = vpop.eup %7508  ;;  %v4140_v19 = vrot.slane %v4139_v40, 2 }
 0x80b   : > { %v4145_v42 = vmul.f32 0.6931472, %v7509_v9  ;;  %v4134_v8 = vadd.f32 %v4133_v38, %v4132_v4 }
 0x80c   : > { %v4141_v46 = vadd.f32 %v4140_v19, %v4139_v40 }
 0x80d   : > { %v4152_v13 = vadd.f32 %v4145_v42, %v9160_v3  ;;  %7512 = vlog2.f32 %v4134_v8 }
 0x80e   : > { %v4142_v33 = vrot.slane %v4141_v46, 1 }
 0x80f   : > { %v4156_v47 = vsub.f32 %v8619_v6, %v4152_v13 }
 0x810   : > { %v4143_v52 = vadd.f32 %v4142_v33, %v4141_v46 }
 0x811   : > { %v7511_v54 = vpop.eup %7510  ;;  %v4160_v50 = vmul.f32 0.1, %v4156_v47 }
 0x812   : > { %v4147_v37 = vmul.f32 0.6931472, %v7511_v54  ;;  %7514 = vlog2.f32 %v4143_v52 }
 0x813   : > { %v9193_v22 = vadd.f32 %v4160_v50, %v8997_v31 }
 0x814   : > { %v4153_v30 = vadd.f32 %v4147_v37, %v9170_v26 }
 0x815   : > { %v9198_v32 = vadd.f32 %v9193_v22, %v8527_v41  ;;  %v9202_v3 = vadd.f32 %v9193_v22, %v8551_v60 }
 0x816   : > { %v4157_v28 = vsub.f32 %v8619_v6, %v4153_v30 }
 0x817   : > { %v7513_v61 = vpop.eup %7512  ;;  %v4177_v17 = vadd.f32 %v9198_v32, %v9110_v56  ;;  %v4176_v31 = vadd.f32 %v9202_v3, %v9106_v24 }
 0x818   : > { %v4161_v16 = vmul.f32 0.1, %v4157_v28  ;;  %v4149_v12 = vmul.f32 0.6931472, %v7513_v61 }
 0x819   : > { %v4185_v26 = vmul.f32 10.0, %v4177_v17  ;;  %v4184_v44 = vmul.f32 10.0, %v4176_v31 }
 0x81a   : > { %v9210_v25 = vadd.f32 %v4161_v16, %v9014_v43  ;;  %v4154_v35 = vadd.f32 %v4149_v12, %v9174_v34 }
 0x81b   : > { %v4195_v45 = vsel %vm3208_vm11, %v4185_v26, -inf  ;;  %v4192_v48 = vsel %vm3206_vm10, %v4184_v44, -inf }
 0x81c   : > { %v7515_v4 = vpop.eup %7514  ;;  %4196 = vmax.xlane.f32.xlu0 %v4195_v45  ;;  %4193 = vmax.xlane.f32.xlu1 %v4192_v48  ;;  %v9217_v40 = vadd.f32 %v9210_v25, %v8536_v59  ;;  %v9221_v38 = vadd.f32 %v9210_v25, %v8560_v63  ;;  %v4158_v43 = vsub.f32 %v8619_v6, %v4154_v35 }
 0x81d   : > { %v4151_v9 = vmul.f32 0.6931472, %v7515_v4 }
 0x81e   : > { %v4179_v34 = vadd.f32 %v9217_v40, %v9129_v49  ;;  %v4178_v19 = vadd.f32 %v9221_v38, %v9123_v15  ;;  %v4162_v42 = vmul.f32 0.1, %v4158_v43 }
 0x81f   : > { %v4155_v8 = vadd.f32 %v4151_v9, %v9180_v2 }
 0x820   : > { %v4187_v46 = vmul.f32 10.0, %v4179_v34  ;;  %v4186_v13 = vmul.f32 10.0, %v4178_v19  ;;  %v9230_v33 = vadd.f32 %v4162_v42, %v9034_v10 }
 0x821   : > { %v4159_v47 = vsub.f32 %v8619_v6, %v4155_v8 }
 0x822   : > { %v4201_v52 = vsel %vm3208_vm11, %v4187_v46, -inf  ;;  %v4198_v54 = vsel %vm3206_vm10, %v4186_v13, -inf  ;;  %v9237_v50 = vadd.f32 %v9230_v33, %v8545_v57  ;;  %v9241_v37 = vadd.f32 %v9230_v33, %v8578_v20 }
 0x823   : > { %4202 = vmax.xlane.f32.xlu0 %v4201_v52  ;;  %4199 = vmax.xlane.f32.xlu1 %v4198_v54  ;;  %v4163_v2 = vmul.f32 0.1, %v4159_v47 }
 0x824   : > { %v4181_v10 = vadd.f32 %v9237_v50, %v9144_v0  ;;  %v4180_v30 = vadd.f32 %v9241_v37, %v9138_v21 }
 0x825   : > { %v9248_v28 = vadd.f32 %v4163_v2, %v9052_v51 }
 0x826   : > { %v4189_v61 = vmul.f32 10.0, %v4181_v10  ;;  %v4188_v17 = vmul.f32 10.0, %v4180_v30 }
 0x827   : > { %v9252_v31 = vadd.f32 %v9248_v28, %v8572_v18  ;;  %v9256_v16 = vadd.f32 %v9248_v28, %v8587_v55 }
 0x828   : > { %v4207_v12 = vsel %vm3208_vm11, %v4189_v61, -inf  ;;  %v4204_v35 = vsel %vm3206_vm10, %v4188_v17, -inf }
 0x829   : > { %4208 = vmax.xlane.f32.xlu0 %v4207_v12  ;;  %4205 = vmax.xlane.f32.xlu1 %v4204_v35  ;;  %v4183_v51 = vadd.f32 %v9252_v31, %v9156_v36  ;;  %v4182_v45 = vadd.f32 %v9256_v16, %v9152_v58 }
 0x82b   : > { %v4191_v48 = vmul.f32 10.0, %v4183_v51  ;;  %v4190_v4 = vmul.f32 10.0, %v4182_v45 }
 0x82d   : > { %v4213_v43 = vsel %vm3208_vm11, %v4191_v48, -inf  ;;  %v4210_v9 = vsel %vm3206_vm10, %v4190_v4, -inf }
 0x82e   : > { %4214 = vmax.xlane.f32.xlu0 %v4213_v43  ;;  %4211 = vmax.xlane.f32.xlu1 %v4210_v9 }
 0x8a9   : > { %v9266_v34 = vpop.xlane.xlu1 %4193  ;;  %v9268_v19 = vpop.xlane.xlu0 %4196 }
 0x8aa   : > { %v4216_v42 = vsub.f32 %v4184_v44, %v9266_v34  ;;  %v4217_v8 = vsub.f32 %v4185_v26, %v9268_v19 }
 0x8ac   : > { %v4224_v47 = vmul.f32 1.442695, %v4216_v42  ;;  %v4226_v52 = vmul.f32 1.442695, %v4217_v8 }
 0x8ae   : > { %7516 = vpow2.f32 %v4224_v47 }
 0x8af   : > { %7518 = vpow2.f32 %v4226_v52 }
 0x8b0   : > { %v9272_v54 = vpop.xlane.xlu1 %4199  ;;  %v9274_v2 = vpop.xlane.xlu0 %4202 }
 0x8b1   : > { %v4218_v10 = vsub.f32 %v4186_v13, %v9272_v54  ;;  %v4219_v30 = vsub.f32 %v4187_v46, %v9274_v2 }
 0x8b3   : > { %v4228_v12 = vmul.f32 1.442695, %v4218_v10  ;;  %v4230_v35 = vmul.f32 1.442695, %v4219_v30 }
 0x8b5   : > { %7520 = vpow2.f32 %v4228_v12 }
 0x8b6   : > { %7522 = vpow2.f32 %v4230_v35  ;;  %v9278_v51 = vpop.xlane.xlu1 %4205  ;;  %v9280_v44 = vpop.xlane.xlu0 %4208 }
 0x8b7   : > { %v4220_v26 = vsub.f32 %v4188_v17, %v9278_v51  ;;  %v4221_v45 = vsub.f32 %v4189_v61, %v9280_v44 }
 0x8b8   : > { %v7517_v43 = vpop.eup %7516 }
 0x8b9   : > { %v7519_v9 = vpop.eup %7518  ;;  %v4232_v42 = vmul.f32 1.442695, %v4220_v26  ;;  %v4234_v8 = vmul.f32 1.442695, %v4221_v45  ;;  %v4240_v13 = vsel %vm3206_vm10, %v7517_v43, 0.0 }
 0x8ba   : > { %4241 = vadd.xlane.f32.xlu1 %v4240_v13  ;;  %v4243_v46 = vsel %vm3208_vm11, %v7519_v9, 0.0 }
 0x8bb   : > { %7524 = vpow2.f32 %v4232_v42  ;;  %v9286_v47 = vpop.xlane.xlu1 %4211  ;;  %v9288_v52 = vpop.xlane.xlu0 %4214  ;;  %4244 = vadd.xlane.f32.xlu0 %v4243_v46 }
 0x8bc   : > { %7526 = vpow2.f32 %v4234_v8  ;;  %v4222_v17 = vsub.f32 %v4190_v4, %v9286_v47  ;;  %v4223_v61 = vsub.f32 %v4191_v48, %v9288_v52 }
 0x8be   : > { %v4236_v10 = vmul.f32 1.442695, %v4222_v17  ;;  %v4238_v30 = vmul.f32 1.442695, %v4223_v61 }
 0x8bf   : > { %v7521_v12 = vpop.eup %7520 }
 0x8c0   : > { %v7523_v35 = vpop.eup %7522  ;;  %7528 = vpow2.f32 %v4236_v10  ;;  %v4246_v26 = vsel %vm3206_vm10, %v7521_v12, 0.0 }
 0x8c1   : > { %7530 = vpow2.f32 %v4238_v30  ;;  %4247 = vadd.xlane.f32.xlu1 %v4246_v26  ;;  %v4249_v45 = vsel %vm3208_vm11, %v7523_v35, 0.0 }
 0x8c2   : > { %4250 = vadd.xlane.f32.xlu0 %v4249_v45 }
 0x8c5   : > { %v7525_v43 = vpop.eup %7524 }
 0x8c6   : > { %v7527_v9 = vpop.eup %7526  ;;  %v4252_v42 = vsel %vm3206_vm10, %v7525_v43, 0.0 }
 0x8c7   : > { %4253 = vadd.xlane.f32.xlu1 %v4252_v42  ;;  %v4255_v4 = vsel %vm3208_vm11, %v7527_v9, 0.0 }
 0x8c8   : > { %4256 = vadd.xlane.f32.xlu0 %v4255_v4 }
 0x8ca   : > { %v7529_v48 = vpop.eup %7528 }
 0x8cb   : > { %v7531_v8 = vpop.eup %7530  ;;  %v4258_v13 = vsel %vm3206_vm10, %v7529_v48, 0.0 }
 0x8cc   : > { %4259 = vadd.xlane.f32.xlu1 %v4258_v13  ;;  %v4261_v46 = vsel %vm3208_vm11, %v7531_v8, 0.0 }
 0x8cd   : > { %4262 = vadd.xlane.f32.xlu0 %v4261_v46 }
 0x947   : > { %v4242_v17 = vpop.xlane.xlu1 %4241 }
 0x948   : > { %7532 = vlog2.f32 %v4242_v17  ;;  %v4245_v61 = vpop.xlane.xlu0 %4244 }
 0x949   : > { %7534 = vlog2.f32 %v4245_v61 }
 0x94e   : > { %v4248_v10 = vpop.xlane.xlu1 %4247 }
 0x94f   : > { %7536 = vlog2.f32 %v4248_v10  ;;  %v4251_v30 = vpop.xlane.xlu0 %4250 }
 0x950   : > { %7538 = vlog2.f32 %v4251_v30 }
 0x952   : > { %v7533_v12 = vpop.eup %7532 }
 0x953   : > { %v7535_v35 = vpop.eup %7534  ;;  %v4265_v26 = vmul.f32 0.6931472, %v7533_v12 }
 0x954   : > { %v4267_v45 = vmul.f32 0.6931472, %v7535_v35  ;;  %v4254_v43 = vpop.xlane.xlu1 %4253 }
 0x955   : > { %v4280_v9 = vadd.f32 %v4265_v26, %v9266_v34  ;;  %7540 = vlog2.f32 %v4254_v43  ;;  %v4257_v42 = vpop.xlane.xlu0 %4256 }
 0x956   : > { %v4281_v4 = vadd.f32 %v4267_v45, %v9268_v19  ;;  %7542 = vlog2.f32 %v4257_v42 }
 0x957   : > { %v4288_v48 = vsub.f32 -2.7725887, %v4280_v9 }
 0x958   : > { %v4289_v8 = vsub.f32 %v8720_v53, %v4281_v4 }
 0x959   : > { %v7537_v13 = vpop.eup %7536  ;;  %v4296_v46 = vmul.f32 0.1, %v4288_v48  ;;  %v4260_v17 = vpop.xlane.xlu1 %4259 }
 0x95a   : > { %v7539_v61 = vpop.eup %7538  ;;  %v4297_v10 = vmul.f32 0.1, %v4289_v8  ;;  %v4269_v30 = vmul.f32 0.6931472, %v7537_v13  ;;  %7544 = vlog2.f32 %v4260_v17  ;;  %v4263_v12 = vpop.xlane.xlu0 %4262 }
 0x95b   : > { %v9302_v35 = vadd.f32 %v4296_v46, %v9106_v24  ;;  %v4271_v34 = vmul.f32 0.6931472, %v7539_v61  ;;  %7546 = vlog2.f32 %v4263_v12 }
 0x95c   : > { %v4282_v26 = vadd.f32 %v4269_v30, %v9272_v54  ;;  %v9306_v19 = vadd.f32 %v4297_v10, %v9110_v56 }
 0x95d   : > { %v4312_v45 = vadd.f32 %v9302_v35, %v9202_v3  ;;  %v4283_v43 = vadd.f32 %v4271_v34, %v9274_v2 }
 0x95e   : > { %v4290_v9 = vsub.f32 -2.7725887, %v4282_v26  ;;  %v4313_v42 = vadd.f32 %v9306_v19, %v9198_v32 }
 0x95f   : > { %v7541_v4 = vpop.eup %7540  ;;  %v9313_v48 = vmul.f32 10.0, %v4312_v45  ;;  %v4291_v24 = vsub.f32 %v8720_v53, %v4283_v43 }
 0x960   : > { %v7543_v8 = vpop.eup %7542  ;;  %v4298_v13 = vmul.f32 0.1, %v4290_v9  ;;  %v4273_v54 = vmul.f32 0.6931472, %v7541_v4  ;;  %v4321_v46 = vmul.f32 10.0, %v4313_v42 }
 0x961   : > { %v4328_v56 = vsel %vm3206_vm10, %v9313_v48, -inf  ;;  %v4299_v17 = vmul.f32 0.1, %v4291_v24  ;;  %v4275_v3 = vmul.f32 0.6931472, %v7543_v8 }
 0x962   : > { %v9319_v2 = vadd.f32 %v4298_v13, %v9123_v15  ;;  %v4284_v61 = vadd.f32 %v4273_v54, %v9278_v51  ;;  %v4329_v32 = vsel %vm3208_vm11, %v4321_v46, -inf }
 0x963   : > { %v4285_v10 = vadd.f32 %v4275_v3, %v9280_v44  ;;  %v4330_v30 = vmax.f32 %v4328_v56, %v4329_v32  ;;  %v9325_v12 = vadd.f32 %v4299_v17, %v9129_v49 }
 0x964   : > { %v7545_v34 = vpop.eup %7544  ;;  %v4314_v26 = vadd.f32 %v9319_v2, %v9221_v38  ;;  %v4292_v45 = vsub.f32 -2.7725887, %v4284_v61 }
 0x965   : > { %v7547_v43 = vpop.eup %7546  ;;  %v4293_v9 = vsub.f32 %v8720_v53, %v4285_v10  ;;  %v4277_v15 = vmul.f32 0.6931472, %v7545_v34  ;;  %v4331_v42 = vrot.slane %v4330_v30, 4  ;;  %v4315_v51 = vadd.f32 %v9325_v12, %v9217_v40 }
 0x966   : > { %v4322_v4 = vmul.f32 10.0, %v4314_v26  ;;  %v4300_v24 = vmul.f32 0.1, %v4292_v45  ;;  %v4279_v44 = vmul.f32 0.6931472, %v7547_v43 }
 0x967   : > { %v4301_v8 = vmul.f32 0.1, %v4293_v9  ;;  %v4286_v49 = vadd.f32 %v4277_v15, %v9286_v47  ;;  %v4332_v13 = vmax.f32 %v4330_v30, %v4331_v42  ;;  %v4323_v54 = vmul.f32 10.0, %v4315_v51 }
 0x968   : > { %v4337_v56 = vsel %vm3206_vm10, %v4322_v4, -inf  ;;  %v9335_v38 = vadd.f32 %v4300_v24, %v9138_v21  ;;  %v4287_v17 = vadd.f32 %v4279_v44, %v9288_v52 }
 0x969   : > { %v4294_v3 = vsub.f32 -2.7725887, %v4286_v49  ;;  %v4333_v61 = vrot.slane %v4332_v13, 2  ;;  %v4338_v32 = vsel %vm3208_vm11, %v4323_v54, -inf  ;;  %v9340_v40 = vadd.f32 %v4301_v8, %v9144_v0 }
 0x96a   : > { %v4316_v10 = vadd.f32 %v9335_v38, %v9241_v37  ;;  %v4295_v47 = vsub.f32 %v8720_v53, %v4287_v17  ;;  %v4339_v30 = vmax.f32 %v4337_v56, %v4338_v32 }
 0x96b   : > { %v4302_v34 = vmul.f32 0.1, %v4294_v3  ;;  %v4334_v26 = vmax.f32 %v4332_v13, %v4333_v61  ;;  %v4317_v21 = vadd.f32 %v9340_v40, %v9237_v50 }
 0x96c   : > { %v4324_v45 = vmul.f32 10.0, %v4316_v10  ;;  %v4303_v52 = vmul.f32 0.1, %v4295_v47  ;;  %v4340_v43 = vrot.slane %v4339_v30, 4 }
 0x96d   : > { %v9348_v9 = vadd.f32 %v4302_v34, %v9152_v58  ;;  %v4335_v15 = vrot.slane %v4334_v26, 1  ;;  %v4325_v0 = vmul.f32 10.0, %v4317_v21 }
 0x96e   : > { %v4346_v42 = vsel %vm3206_vm10, %v4324_v45, -inf  ;;  %v4341_v51 = vmax.f32 %v4339_v30, %v4340_v43  ;;  %v9352_v37 = vadd.f32 %v4303_v52, %v9156_v36 }
 0x96f   : > { %v4318_v24 = vadd.f32 %v9348_v9, %v9256_v16  ;;  %v9356_v44 = vmax.f32 %v4334_v26, %v4335_v15  ;;  %v4347_v50 = vsel %vm3208_vm11, %v4325_v0, -inf }
 0x970   : > { %v4342_v8 = vrot.slane %v4341_v51, 2  ;;  %v4348_v49 = vmax.f32 %v4346_v42, %v4347_v50  ;;  %v4319_v58 = vadd.f32 %v9352_v37, %v9252_v31 }
 0x971   : > { %v4326_v13 = vmul.f32 10.0, %v4318_v24  ;;  %v4364_v56 = vsub.f32 %v9313_v48, %v9356_v44  ;;  %v4365_v17 = vsub.f32 %v4321_v46, %v9356_v44 }
 0x972   : > { %v4343_v36 = vmax.f32 %v4341_v51, %v4342_v8  ;;  %v4349_v3 = vrot.slane %v4348_v49, 4  ;;  %v4327_v61 = vmul.f32 10.0, %v4319_v58 }
 0x973   : > { %v4355_v16 = vsel %vm3206_vm10, %v4326_v13, -inf  ;;  %v4372_v32 = vmul.f32 1.442695, %v4364_v56  ;;  %v4374_v10 = vmul.f32 1.442695, %v4365_v17 }
 0x974   : > { %v4344_v47 = vrot.slane %v4343_v36, 1  ;;  %v4350_v30 = vmax.f32 %v4348_v49, %v4349_v3  ;;  %v4356_v34 = vsel %vm3208_vm11, %v4327_v61, -inf }
 0x975   : > { %7548 = vpow2.f32 %v4372_v32  ;;  %v4357_v26 = vmax.f32 %v4355_v16, %v4356_v34 }
 0x976   : > { %7550 = vpow2.f32 %v4374_v10  ;;  %v9366_v31 = vmax.f32 %v4343_v36, %v4344_v47  ;;  %v4351_v21 = vrot.slane %v4350_v30, 2 }
 0x977   : > { %v4358_v48 = vrot.slane %v4357_v26, 4 }
 0x978   : > { %v4366_v46 = vsub.f32 %v4322_v4, %v9366_v31  ;;  %v4367_v52 = vsub.f32 %v4323_v54, %v9366_v31  ;;  %v4352_v43 = vmax.f32 %v4350_v30, %v4351_v21 }
 0x979   : > { %v4359_v15 = vmax.f32 %v4357_v26, %v4358_v48 }
 0x97a   : > { %v4376_v42 = vmul.f32 1.442695, %v4366_v46  ;;  %v4378_v51 = vmul.f32 1.442695, %v4367_v52  ;;  %v4353_v24 = vrot.slane %v4352_v43, 1 }
 0x97b   : > { %v4360_v50 = vrot.slane %v4359_v15, 2 }
 0x97c   : > { %7552 = vpow2.f32 %v4376_v42  ;;  %v9370_v8 = vmax.f32 %v4352_v43, %v4353_v24 }
 0x97d   : > { %7554 = vpow2.f32 %v4378_v51  ;;  %v4361_v49 = vmax.f32 %v4359_v15, %v4360_v50 }
 0x97e   : > { %v4368_v58 = vsub.f32 %v4324_v45, %v9370_v8  ;;  %v4369_v56 = vsub.f32 %v4325_v0, %v9370_v8 }
 0x97f   : > { %v7549_v17 = vpop.eup %7548  ;;  %v4362_v36 = vrot.slane %v4361_v49, 1 }
 0x980   : > { %v7551_v4 = vpop.eup %7550  ;;  %v4388_v54 = vsel %vm3206_vm10, %v7549_v17, 0.0  ;;  %v4380_v3 = vmul.f32 1.442695, %v4368_v58  ;;  %v4382_v16 = vmul.f32 1.442695, %v4369_v56 }
 0x981   : > { %v4389_v32 = vsel %vm3208_vm11, %v7551_v4, 0.0  ;;  %v9376_v10 = vmax.f32 %v4361_v49, %v4362_v36 }
 0x982   : > { %v4390_v47 = vadd.f32 %v4389_v32, %v4388_v54  ;;  %7556 = vpow2.f32 %v4380_v3 }
 0x983   : > { %7558 = vpow2.f32 %v4382_v16  ;;  %v4370_v30 = vsub.f32 %v4326_v13, %v9376_v10  ;;  %v4371_v45 = vsub.f32 %v4327_v61, %v9376_v10 }
 0x984   : > { %v4391_v34 = vrot.slane %v4390_v47, 4 }
 0x985   : > { %v4384_v0 = vmul.f32 1.442695, %v4370_v30  ;;  %v4386_v26 = vmul.f32 1.442695, %v4371_v45 }
 0x986   : > { %v7553_v21 = vpop.eup %7552  ;;  %v4392_v48 = vadd.f32 %v4391_v34, %v4390_v47 }
 0x987   : > { %v7555_v46 = vpop.eup %7554  ;;  %v4397_v52 = vsel %vm3206_vm10, %v7553_v21, 0.0  ;;  %7560 = vpow2.f32 %v4384_v0 }
 0x988   : > { %v4393_v43 = vrot.slane %v4392_v48, 2  ;;  %v4398_v15 = vsel %vm3208_vm11, %v7555_v46, 0.0  ;;  %7562 = vpow2.f32 %v4386_v26 }
 0x989   : > { %v4399_v42 = vadd.f32 %v4398_v15, %v4397_v52 }
 0x98a   : > { %v4394_v51 = vadd.f32 %v4393_v43, %v4392_v48 }
 0x98b   : > { %v4400_v24 = vrot.slane %v4399_v42, 4 }
 0x98c   : > { %v7557_v50 = vpop.eup %7556  ;;  %v4395_v13 = vrot.slane %v4394_v51, 1 }
 0x98d   : > { %v7559_v49 = vpop.eup %7558  ;;  %v4401_v61 = vadd.f32 %v4400_v24, %v4399_v42  ;;  %v4406_v58 = vsel %vm3206_vm10, %v7557_v50, 0.0 }
 0x98e   : > { %v4396_v56 = vadd.f32 %v4395_v13, %v4394_v51  ;;  %v4407_v17 = vsel %vm3208_vm11, %v7559_v49, 0.0 }
 0x98f   : > { %v4402_v36 = vrot.slane %v4401_v61, 2  ;;  %v4408_v4 = vadd.f32 %v4407_v17, %v4406_v58 }
 0x990   : > { %7564 = vlog2.f32 %v4396_v56 }
 0x991   : > { %v7561_v54 = vpop.eup %7560  ;;  %v4403_v3 = vadd.f32 %v4402_v36, %v4401_v61  ;;  %v4409_v16 = vrot.slane %v4408_v4, 4 }
 0x992   : > { %v7563_v32 = vpop.eup %7562  ;;  %v4415_v47 = vsel %vm3206_vm10, %v7561_v54, 0.0 }
 0x993   : > { %v4404_v30 = vrot.slane %v4403_v3, 1  ;;  %v4410_v45 = vadd.f32 %v4409_v16, %v4408_v4  ;;  %v4416_v34 = vsel %vm3208_vm11, %v7563_v32, 0.0 }
 0x994   : > { %v4417_v0 = vadd.f32 %v4416_v34, %v4415_v47 }
 0x995   : > { %v4405_v26 = vadd.f32 %v4404_v30, %v4403_v3  ;;  %v4411_v21 = vrot.slane %v4410_v45, 2 }
 0x996   : > { %v4418_v48 = vrot.slane %v4417_v0, 4 }
 0x997   : > { %7566 = vlog2.f32 %v4405_v26  ;;  %v4412_v46 = vadd.f32 %v4411_v21, %v4410_v45 }
 0x998   : > { %v4419_v52 = vadd.f32 %v4418_v48, %v4417_v0 }
 0x999   : > { %v4413_v43 = vrot.slane %v4412_v46, 1 }
 0x99a   : > { %v7565_v15 = vpop.eup %7564  ;;  %v4420_v42 = vrot.slane %v4419_v52, 2 }
 0x99b   : > { %v4425_v51 = vmul.f32 0.6931472, %v7565_v15  ;;  %v4414_v24 = vadd.f32 %v4413_v43, %v4412_v46 }
 0x99c   : > { %v4421_v50 = vadd.f32 %v4420_v42, %v4419_v52 }
 0x99d   : > { %v4432_v13 = vadd.f32 %v4425_v51, %v9356_v44  ;;  %7568 = vlog2.f32 %v4414_v24 }
 0x99e   : > { %v4422_v49 = vrot.slane %v4421_v50, 1 }
 0x99f   : > { %v4436_v61 = vsub.f32 %v8619_v6, %v4432_v13 }
 0x9a0   : > { %v4423_v58 = vadd.f32 %v4422_v49, %v4421_v50 }
 0x9a1   : > { %v7567_v56 = vpop.eup %7566  ;;  %v4440_v17 = vmul.f32 0.1, %v4436_v61 }
 0x9a2   : > { %v4427_v36 = vmul.f32 0.6931472, %v7567_v56  ;;  %7570 = vlog2.f32 %v4423_v58 }
 0x9a3   : > { %v9389_v4 = vadd.f32 %v4440_v17, %v9193_v22 }
 0x9a4   : > { %v4433_v54 = vadd.f32 %v4427_v36, %v9366_v31 }
 0x9a5   : > { %v9394_v3 = vadd.f32 %v9389_v4, %v8527_v41  ;;  %v9398_v44 = vadd.f32 %v9389_v4, %v8551_v60 }
 0x9a6   : > { %v4437_v16 = vsub.f32 %v8619_v6, %v4433_v54 }
 0x9a7   : > { %v7569_v32 = vpop.eup %7568  ;;  %v4457_v47 = vadd.f32 %v9394_v3, %v9306_v19  ;;  %v4456_v22 = vadd.f32 %v9398_v44, %v9302_v35 }
 0x9a8   : > { %v4441_v30 = vmul.f32 0.1, %v4437_v16  ;;  %v4429_v45 = vmul.f32 0.6931472, %v7569_v32 }
 0x9a9   : > { %v4465_v31 = vmul.f32 10.0, %v4457_v47  ;;  %v4464_v34 = vmul.f32 10.0, %v4456_v22 }
 0x9aa   : > { %v9406_v0 = vadd.f32 %v4441_v30, %v9210_v25  ;;  %v4434_v26 = vadd.f32 %v4429_v45, %v9370_v8 }
 0x9ab   : > { %v4475_v21 = vsel %vm3208_vm11, %v4465_v31, -inf  ;;  %v4472_v48 = vsel %vm3206_vm10, %v4464_v34, -inf }
 0x9ac   : > { %v7571_v46 = vpop.eup %7570  ;;  %4476 = vmax.xlane.f32.xlu0 %v4475_v21  ;;  %4473 = vmax.xlane.f32.xlu1 %v4472_v48  ;;  %v9413_v52 = vadd.f32 %v9406_v0, %v8536_v59  ;;  %v9417_v43 = vadd.f32 %v9406_v0, %v8560_v63  ;;  %v4438_v25 = vsub.f32 %v8619_v6, %v4434_v26 }
 0x9ad   : > { %v4431_v15 = vmul.f32 0.6931472, %v7571_v46 }
 0x9ae   : > { %v4459_v8 = vadd.f32 %v9413_v52, %v9325_v12  ;;  %v4458_v42 = vadd.f32 %v9417_v43, %v9319_v2  ;;  %v4442_v51 = vmul.f32 0.1, %v4438_v25 }
 0x9af   : > { %v4435_v24 = vadd.f32 %v4431_v15, %v9376_v10 }
 0x9b0   : > { %v4467_v50 = vmul.f32 10.0, %v4459_v8  ;;  %v4466_v13 = vmul.f32 10.0, %v4458_v42  ;;  %v9426_v49 = vadd.f32 %v4442_v51, %v9230_v33 }
 0x9b1   : > { %v4439_v61 = vsub.f32 %v8619_v6, %v4435_v24 }
 0x9b2   : > { %v4481_v58 = vsel %vm3208_vm11, %v4467_v50, -inf  ;;  %v4478_v56 = vsel %vm3206_vm10, %v4466_v13, -inf  ;;  %v9433_v17 = vadd.f32 %v9426_v49, %v8545_v57  ;;  %v9437_v36 = vadd.f32 %v9426_v49, %v8578_v20 }
 0x9b3   : > { %4482 = vmax.xlane.f32.xlu0 %v4481_v58  ;;  %4479 = vmax.xlane.f32.xlu1 %v4478_v56  ;;  %v4443_v10 = vmul.f32 0.1, %v4439_v61 }
 0x9b4   : > { %v4461_v33 = vadd.f32 %v9433_v17, %v9340_v40  ;;  %v4460_v54 = vadd.f32 %v9437_v36, %v9335_v38 }
 0x9b5   : > { %v9444_v16 = vadd.f32 %v4443_v10, %v9248_v28 }
 0x9b6   : > { %v4469_v32 = vmul.f32 10.0, %v4461_v33  ;;  %v4468_v47 = vmul.f32 10.0, %v4460_v54 }
 0x9b7   : > { %v9448_v22 = vadd.f32 %v9444_v16, %v8572_v18  ;;  %v9452_v30 = vadd.f32 %v9444_v16, %v8587_v55 }
 0x9b8   : > { %v4487_v45 = vsel %vm3208_vm11, %v4469_v32, -inf  ;;  %v4484_v26 = vsel %vm3206_vm10, %v4468_v47, -inf }
 0x9b9   : > { %4488 = vmax.xlane.f32.xlu0 %v4487_v45  ;;  %4485 = vmax.xlane.f32.xlu1 %v4484_v26  ;;  %v4463_v28 = vadd.f32 %v9448_v22, %v9352_v37  ;;  %v4462_v21 = vadd.f32 %v9452_v30, %v9348_v9 }
 0x9bb   : > { %v4471_v48 = vmul.f32 10.0, %v4463_v28  ;;  %v4470_v46 = vmul.f32 10.0, %v4462_v21 }
 0x9bd   : > { %v4493_v25 = vsel %vm3208_vm11, %v4471_v48, -inf  ;;  %v4490_v15 = vsel %vm3206_vm10, %v4470_v46, -inf }
 0x9be   : > { %4494 = vmax.xlane.f32.xlu0 %v4493_v25  ;;  %4491 = vmax.xlane.f32.xlu1 %v4490_v15 }
 0xa39   : > { %v9462_v8 = vpop.xlane.xlu1 %4473  ;;  %v9464_v42 = vpop.xlane.xlu0 %4476 }
 0xa3a   : > { %v4496_v51 = vsub.f32 %v4464_v34, %v9462_v8  ;;  %v4497_v24 = vsub.f32 %v4465_v31, %v9464_v42 }
 0xa3c   : > { %v4504_v61 = vmul.f32 1.442695, %v4496_v51  ;;  %v4506_v58 = vmul.f32 1.442695, %v4497_v24 }
 0xa3e   : > { %7572 = vpow2.f32 %v4504_v61 }
 0xa3f   : > { %7574 = vpow2.f32 %v4506_v58 }
 0xa40   : > { %v9468_v56 = vpop.xlane.xlu1 %4479  ;;  %v9470_v10 = vpop.xlane.xlu0 %4482 }
 0xa41   : > { %v4498_v33 = vsub.f32 %v4466_v13, %v9468_v56  ;;  %v4499_v54 = vsub.f32 %v4467_v50, %v9470_v10 }
 0xa43   : > { %v4508_v45 = vmul.f32 1.442695, %v4498_v33  ;;  %v4510_v26 = vmul.f32 1.442695, %v4499_v54 }
 0xa45   : > { %7576 = vpow2.f32 %v4508_v45 }
 0xa46   : > { %7578 = vpow2.f32 %v4510_v26  ;;  %v9474_v28 = vpop.xlane.xlu1 %4485  ;;  %v9476_v34 = vpop.xlane.xlu0 %4488 }
 0xa47   : > { %v4500_v31 = vsub.f32 %v4468_v47, %v9474_v28  ;;  %v4501_v21 = vsub.f32 %v4469_v32, %v9476_v34 }
 0xa48   : > { %v7573_v25 = vpop.eup %7572 }
 0xa49   : > { %v7575_v15 = vpop.eup %7574  ;;  %v4512_v51 = vmul.f32 1.442695, %v4500_v31  ;;  %v4514_v24 = vmul.f32 1.442695, %v4501_v21  ;;  %v4520_v13 = vsel %vm3206_vm10, %v7573_v25, 0.0 }
 0xa4a   : > { %4521 = vadd.xlane.f32.xlu1 %v4520_v13  ;;  %v4523_v50 = vsel %vm3208_vm11, %v7575_v15, 0.0 }
 0xa4b   : > { %7580 = vpow2.f32 %v4512_v51  ;;  %v9482_v61 = vpop.xlane.xlu1 %4491  ;;  %v9484_v58 = vpop.xlane.xlu0 %4494  ;;  %4524 = vadd.xlane.f32.xlu0 %v4523_v50 }
 0xa4c   : > { %7582 = vpow2.f32 %v4514_v24  ;;  %v4502_v47 = vsub.f32 %v4470_v46, %v9482_v61  ;;  %v4503_v32 = vsub.f32 %v4471_v48, %v9484_v58 }
 0xa4e   : > { %v4516_v33 = vmul.f32 1.442695, %v4502_v47  ;;  %v4518_v54 = vmul.f32 1.442695, %v4503_v32 }
 0xa4f   : > { %v7577_v45 = vpop.eup %7576 }
 0xa50   : > { %v7579_v26 = vpop.eup %7578  ;;  %7584 = vpow2.f32 %v4516_v33  ;;  %v4526_v31 = vsel %vm3206_vm10, %v7577_v45, 0.0 }
 0xa51   : > { %7586 = vpow2.f32 %v4518_v54  ;;  %4527 = vadd.xlane.f32.xlu1 %v4526_v31  ;;  %v4529_v21 = vsel %vm3208_vm11, %v7579_v26, 0.0 }
 0xa52   : > { %4530 = vadd.xlane.f32.xlu0 %v4529_v21 }
 0xa55   : > { %v7581_v25 = vpop.eup %7580 }
 0xa56   : > { %v7583_v15 = vpop.eup %7582  ;;  %v4532_v51 = vsel %vm3206_vm10, %v7581_v25, 0.0 }
 0xa57   : > { %4533 = vadd.xlane.f32.xlu1 %v4532_v51  ;;  %v4535_v46 = vsel %vm3208_vm11, %v7583_v15, 0.0 }
 0xa58   : > { %4536 = vadd.xlane.f32.xlu0 %v4535_v46 }
 0xa5a   : > { %v7585_v48 = vpop.eup %7584 }
 0xa5b   : > { %v7587_v24 = vpop.eup %7586  ;;  %v4538_v13 = vsel %vm3206_vm10, %v7585_v48, 0.0 }
 0xa5c   : > { %4539 = vadd.xlane.f32.xlu1 %v4538_v13  ;;  %v4541_v50 = vsel %vm3208_vm11, %v7587_v24, 0.0 }
 0xa5d   : > { %4542 = vadd.xlane.f32.xlu0 %v4541_v50 }
 0xad7   : > { %v4522_v47 = vpop.xlane.xlu1 %4521 }
 0xad8   : > { %7588 = vlog2.f32 %v4522_v47  ;;  %v4525_v32 = vpop.xlane.xlu0 %4524 }
 0xad9   : > { %7590 = vlog2.f32 %v4525_v32 }
 0xade   : > { %v4528_v33 = vpop.xlane.xlu1 %4527 }
 0xadf   : > { %7592 = vlog2.f32 %v4528_v33  ;;  %v4531_v54 = vpop.xlane.xlu0 %4530 }
 0xae0   : > { %7594 = vlog2.f32 %v4531_v54 }
 0xae2   : > { %v7589_v45 = vpop.eup %7588 }
 0xae3   : > { %v7591_v26 = vpop.eup %7590  ;;  %v4545_v31 = vmul.f32 0.6931472, %v7589_v45 }
 0xae4   : > { %v4547_v21 = vmul.f32 0.6931472, %v7591_v26  ;;  %v4534_v25 = vpop.xlane.xlu1 %4533 }
 0xae5   : > { %v4560_v15 = vadd.f32 %v4545_v31, %v9462_v8  ;;  %7596 = vlog2.f32 %v4534_v25  ;;  %v4537_v51 = vpop.xlane.xlu0 %4536 }
 0xae6   : > { %v4561_v46 = vadd.f32 %v4547_v21, %v9464_v42  ;;  %7598 = vlog2.f32 %v4537_v51 }
 0xae7   : > { %v4568_v48 = vsub.f32 -2.7725887, %v4560_v15 }
 0xae8   : > { %v4569_v24 = vsub.f32 %v8720_v53, %v4561_v46 }
 0xae9   : > { %v7593_v13 = vpop.eup %7592  ;;  %v4576_v50 = vmul.f32 0.1, %v4568_v48  ;;  %v4540_v47 = vpop.xlane.xlu1 %4539 }
 0xaea   : > { %v7595_v32 = vpop.eup %7594  ;;  %v4577_v33 = vmul.f32 0.1, %v4569_v24  ;;  %v4549_v54 = vmul.f32 0.6931472, %v7593_v13  ;;  %7600 = vlog2.f32 %v4540_v47  ;;  %v4543_v45 = vpop.xlane.xlu0 %4542 }
 0xaeb   : > { %v9498_v26 = vadd.f32 %v4576_v50, %v9302_v35  ;;  %v4551_v8 = vmul.f32 0.6931472, %v7595_v32  ;;  %7602 = vlog2.f32 %v4543_v45 }
 0xaec   : > { %v4562_v31 = vadd.f32 %v4549_v54, %v9468_v56  ;;  %v9502_v42 = vadd.f32 %v4577_v33, %v9306_v19 }
 0xaed   : > { %v4592_v21 = vadd.f32 %v9498_v26, %v9398_v44  ;;  %v4563_v25 = vadd.f32 %v4551_v8, %v9470_v10 }
 0xaee   : > { %v4570_v15 = vsub.f32 -2.7725887, %v4562_v31  ;;  %v4593_v51 = vadd.f32 %v9502_v42, %v9394_v3 }
 0xaef   : > { %v7597_v46 = vpop.eup %7596  ;;  %v9509_v48 = vmul.f32 10.0, %v4592_v21  ;;  %v4571_v35 = vsub.f32 %v8720_v53, %v4563_v25 }
 0xaf0   : > { %v7599_v24 = vpop.eup %7598  ;;  %v4578_v13 = vmul.f32 0.1, %v4570_v15  ;;  %v4553_v56 = vmul.f32 0.6931472, %v7597_v46  ;;  %v4601_v50 = vmul.f32 10.0, %v4593_v51 }
 0xaf1   : > { %v4608_v19 = vsel %vm3206_vm10, %v9509_v48, -inf  ;;  %v4579_v47 = vmul.f32 0.1, %v4571_v35  ;;  %v4555_v44 = vmul.f32 0.6931472, %v7599_v24 }
 0xaf2   : > { %v9515_v10 = vadd.f32 %v4578_v13, %v9319_v2  ;;  %v4564_v32 = vadd.f32 %v4553_v56, %v9474_v28  ;;  %v4609_v3 = vsel %vm3208_vm11, %v4601_v50, -inf }
 0xaf3   : > { %v4565_v33 = vadd.f32 %v4555_v44, %v9476_v34  ;;  %v4610_v54 = vmax.f32 %v4608_v19, %v4609_v3  ;;  %v9521_v45 = vadd.f32 %v4579_v47, %v9325_v12 }
 0xaf4   : > { %v7601_v8 = vpop.eup %7600  ;;  %v4594_v31 = vadd.f32 %v9515_v10, %v9417_v43  ;;  %v4572_v21 = vsub.f32 -2.7725887, %v4564_v32 }
 0xaf5   : > { %v7603_v25 = vpop.eup %7602  ;;  %v4573_v15 = vsub.f32 %v8720_v53, %v4565_v33  ;;  %v4557_v2 = vmul.f32 0.6931472, %v7601_v8  ;;  %v4611_v51 = vrot.slane %v4610_v54, 4  ;;  %v4595_v28 = vadd.f32 %v9521_v45, %v9413_v52 }
 0xaf6   : > { %v4602_v46 = vmul.f32 10.0, %v4594_v31  ;;  %v4580_v35 = vmul.f32 0.1, %v4572_v21  ;;  %v4559_v34 = vmul.f32 0.6931472, %v7603_v25 }
 0xaf7   : > { %v4581_v24 = vmul.f32 0.1, %v4573_v15  ;;  %v4566_v12 = vadd.f32 %v4557_v2, %v9482_v61  ;;  %v4612_v13 = vmax.f32 %v4610_v54, %v4611_v51  ;;  %v4603_v56 = vmul.f32 10.0, %v4595_v28 }
 0xaf8   : > { %v4617_v19 = vsel %vm3206_vm10, %v4602_v46, -inf  ;;  %v9531_v43 = vadd.f32 %v4580_v35, %v9335_v38  ;;  %v4567_v47 = vadd.f32 %v4559_v34, %v9484_v58 }
 0xaf9   : > { %v4574_v44 = vsub.f32 -2.7725887, %v4566_v12  ;;  %v4613_v32 = vrot.slane %v4612_v13, 2  ;;  %v4618_v3 = vsel %vm3208_vm11, %v4603_v56, -inf  ;;  %v9536_v52 = vadd.f32 %v4581_v24, %v9340_v40 }
 0xafa   : > { %v4596_v33 = vadd.f32 %v9531_v43, %v9437_v36  ;;  %v4575_v61 = vsub.f32 %v8720_v53, %v4567_v47  ;;  %v4619_v54 = vmax.f32 %v4617_v19, %v4618_v3 }
 0xafb   : > { %v4582_v8 = vmul.f32 0.1, %v4574_v44  ;;  %v4614_v31 = vmax.f32 %v4612_v13, %v4613_v32  ;;  %v4597_v38 = vadd.f32 %v9536_v52, %v9433_v17 }
 0xafc   : > { %v4604_v21 = vmul.f32 10.0, %v4596_v33  ;;  %v4583_v58 = vmul.f32 0.1, %v4575_v61  ;;  %v4620_v25 = vrot.slane %v4619_v54, 4 }
 0xafd   : > { %v9544_v15 = vadd.f32 %v4582_v8, %v9348_v9  ;;  %v4615_v2 = vrot.slane %v4614_v31, 1  ;;  %v4605_v40 = vmul.f32 10.0, %v4597_v38 }
 0xafe   : > { %v4626_v51 = vsel %vm3206_vm10, %v4604_v21, -inf  ;;  %v4621_v28 = vmax.f32 %v4619_v54, %v4620_v25  ;;  %v9548_v36 = vadd.f32 %v4583_v58, %v9352_v37 }
 0xaff   : > { %v4598_v35 = vadd.f32 %v9544_v15, %v9452_v30  ;;  %v9552_v34 = vmax.f32 %v4614_v31, %v4615_v2  ;;  %v4627_v17 = vsel %vm3208_vm11, %v4605_v40, -inf }
 0xb00   : > { %v4622_v24 = vrot.slane %v4621_v28, 2  ;;  %v4628_v12 = vmax.f32 %v4626_v51, %v4627_v17  ;;  %v4599_v9 = vadd.f32 %v9548_v36, %v9448_v22 }
 0xb01   : > { %v4606_v13 = vmul.f32 10.0, %v4598_v35  ;;  %v4644_v19 = vsub.f32 %v9509_v48, %v9552_v34  ;;  %v4645_v47 = vsub.f32 %v4601_v50, %v9552_v34 }
 0xb02   : > { %v4623_v37 = vmax.f32 %v4621_v28, %v4622_v24  ;;  %v4629_v44 = vrot.slane %v4628_v12, 4  ;;  %v4607_v32 = vmul.f32 10.0, %v4599_v9 }
 0xb03   : > { %v4635_v30 = vsel %vm3206_vm10, %v4606_v13, -inf  ;;  %v4652_v3 = vmul.f32 1.442695, %v4644_v19  ;;  %v4654_v33 = vmul.f32 1.442695, %v4645_v47 }
 0xb04   : > { %v4624_v61 = vrot.slane %v4623_v37, 1  ;;  %v4630_v54 = vmax.f32 %v4628_v12, %v4629_v44  ;;  %v4636_v8 = vsel %vm3208_vm11, %v4607_v32, -inf }
 0xb05   : > { %7604 = vpow2.f32 %v4652_v3  ;;  %v4637_v31 = vmax.f32 %v4635_v30, %v4636_v8 }
 0xb06   : > { %7606 = vpow2.f32 %v4654_v33  ;;  %v9562_v22 = vmax.f32 %v4623_v37, %v4624_v61  ;;  %v4631_v38 = vrot.slane %v4630_v54, 2 }
 0xb07   : > { %v4638_v48 = vrot.slane %v4637_v31, 4 }
 0xb08   : > { %v4646_v50 = vsub.f32 %v4602_v46, %v9562_v22  ;;  %v4647_v58 = vsub.f32 %v4603_v56, %v9562_v22  ;;  %v4632_v25 = vmax.f32 %v4630_v54, %v4631_v38 }
 0xb09   : > { %v4639_v2 = vmax.f32 %v4637_v31, %v4638_v48 }
 0xb0a   : > { %v4656_v51 = vmul.f32 1.442695, %v4646_v50  ;;  %v4658_v28 = vmul.f32 1.442695, %v4647_v58  ;;  %v4633_v35 = vrot.slane %v4632_v25, 1 }
 0xb0b   : > { %v4640_v17 = vrot.slane %v4639_v2, 2 }
 0xb0c   : > { %7608 = vpow2.f32 %v4656_v51  ;;  %v9566_v24 = vmax.f32 %v4632_v25, %v4633_v35 }
 0xb0d   : > { %7610 = vpow2.f32 %v4658_v28  ;;  %v4641_v12 = vmax.f32 %v4639_v2, %v4640_v17 }
 0xb0e   : > { %v4648_v9 = vsub.f32 %v4604_v21, %v9566_v24  ;;  %v4649_v19 = vsub.f32 %v4605_v40, %v9566_v24 }
 0xb0f   : > { %v7605_v47 = vpop.eup %7604  ;;  %v4642_v37 = vrot.slane %v4641_v12, 1 }
 0xb10   : > { %v7607_v46 = vpop.eup %7606  ;;  %v4668_v56 = vsel %vm3206_vm10, %v7605_v47, 0.0  ;;  %v4660_v44 = vmul.f32 1.442695, %v4648_v9  ;;  %v4662_v30 = vmul.f32 1.442695, %v4649_v19 }
 0xb11   : > { %v4669_v3 = vsel %vm3208_vm11, %v7607_v46, 0.0  ;;  %v9572_v33 = vmax.f32 %v4641_v12, %v4642_v37 }
 0xb12   : > { %v4670_v61 = vadd.f32 %v4669_v3, %v4668_v56  ;;  %7612 = vpow2.f32 %v4660_v44 }
 0xb13   : > { %7614 = vpow2.f32 %v4662_v30  ;;  %v4650_v54 = vsub.f32 %v4606_v13, %v9572_v33  ;;  %v4651_v21 = vsub.f32 %v4607_v32, %v9572_v33 }
 0xb14   : > { %v4671_v8 = vrot.slane %v4670_v61, 4 }
 0xb15   : > { %v4664_v40 = vmul.f32 1.442695, %v4650_v54  ;;  %v4666_v31 = vmul.f32 1.442695, %v4651_v21 }
 0xb16   : > { %v7609_v38 = vpop.eup %7608  ;;  %v4672_v48 = vadd.f32 %v4671_v8, %v4670_v61 }
 0xb17   : > { %v7611_v50 = vpop.eup %7610  ;;  %v4677_v58 = vsel %vm3206_vm10, %v7609_v38, 0.0  ;;  %7616 = vpow2.f32 %v4664_v40 }
 0xb18   : > { %v4673_v25 = vrot.slane %v4672_v48, 2  ;;  %v4678_v2 = vsel %vm3208_vm11, %v7611_v50, 0.0  ;;  %7618 = vpow2.f32 %v4666_v31 }
 0xb19   : > { %v4679_v51 = vadd.f32 %v4678_v2, %v4677_v58 }
 0xb1a   : > { %v4674_v28 = vadd.f32 %v4673_v25, %v4672_v48 }
 0xb1b   : > { %v4680_v35 = vrot.slane %v4679_v51, 4 }
 0xb1c   : > { %v7613_v17 = vpop.eup %7612  ;;  %v4675_v13 = vrot.slane %v4674_v28, 1 }
 0xb1d   : > { %v7615_v12 = vpop.eup %7614  ;;  %v4681_v32 = vadd.f32 %v4680_v35, %v4679_v51  ;;  %v4686_v9 = vsel %vm3206_vm10, %v7613_v17, 0.0 }
 0xb1e   : > { %v4676_v19 = vadd.f32 %v4675_v13, %v4674_v28  ;;  %v4687_v47 = vsel %vm3208_vm11, %v7615_v12, 0.0 }
 0xb1f   : > { %v4682_v37 = vrot.slane %v4681_v32, 2  ;;  %v4688_v46 = vadd.f32 %v4687_v47, %v4686_v9 }
 0xb20   : > { %7620 = vlog2.f32 %v4676_v19 }
 0xb21   : > { %v7617_v56 = vpop.eup %7616  ;;  %v4683_v44 = vadd.f32 %v4682_v37, %v4681_v32  ;;  %v4689_v30 = vrot.slane %v4688_v46, 4 }
 0xb22   : > { %v7619_v3 = vpop.eup %7618  ;;  %v4695_v61 = vsel %vm3206_vm10, %v7617_v56, 0.0 }
 0xb23   : > { %v4684_v54 = vrot.slane %v4683_v44, 1  ;;  %v4690_v21 = vadd.f32 %v4689_v30, %v4688_v46  ;;  %v4696_v8 = vsel %vm3208_vm11, %v7619_v3, 0.0 }
 0xb24   : > { %v4697_v40 = vadd.f32 %v4696_v8, %v4695_v61 }
 0xb25   : > { %v4685_v31 = vadd.f32 %v4684_v54, %v4683_v44  ;;  %v4691_v38 = vrot.slane %v4690_v21, 2 }
 0xb26   : > { %v4698_v48 = vrot.slane %v4697_v40, 4 }
 0xb27   : > { %7622 = vlog2.f32 %v4685_v31  ;;  %v4692_v50 = vadd.f32 %v4691_v38, %v4690_v21 }
 0xb28   : > { %v4699_v58 = vadd.f32 %v4698_v48, %v4697_v40 }
 0xb29   : > { %v4693_v25 = vrot.slane %v4692_v50, 1 }
 0xb2a   : > { %v7621_v2 = vpop.eup %7620  ;;  %v4700_v51 = vrot.slane %v4699_v58, 2 }
 0xb2b   : > { %v4705_v28 = vmul.f32 0.6931472, %v7621_v2  ;;  %v4694_v35 = vadd.f32 %v4693_v25, %v4692_v50 }
 0xb2c   : > { %v4701_v17 = vadd.f32 %v4700_v51, %v4699_v58 }
 0xb2d   : > { %v4712_v13 = vadd.f32 %v4705_v28, %v9552_v34  ;;  %7624 = vlog2.f32 %v4694_v35 }
 0xb2e   : > { %v4702_v12 = vrot.slane %v4701_v17, 1 }
 0xb2f   : > { %v4716_v32 = vsub.f32 %v8619_v6, %v4712_v13 }
 0xb30   : > { %v4703_v9 = vadd.f32 %v4702_v12, %v4701_v17 }
 0xb31   : > { %v7623_v19 = vpop.eup %7622  ;;  %v4720_v47 = vmul.f32 0.1, %v4716_v32 }
 0xb32   : > { %v4707_v37 = vmul.f32 0.6931472, %v7623_v19  ;;  %7626 = vlog2.f32 %v4703_v9 }
 0xb33   : > { %v9585_v46 = vadd.f32 %v4720_v47, %v9389_v4 }
 0xb34   : > { %v4713_v56 = vadd.f32 %v4707_v37, %v9562_v22 }
 0xb35   : > { %v9590_v44 = vadd.f32 %v9585_v46, %v8527_v41  ;;  %v9594_v34 = vadd.f32 %v9585_v46, %v8551_v60 }
 0xb36   : > { %v4717_v30 = vsub.f32 %v8619_v6, %v4713_v56 }
 0xb37   : > { %v7625_v3 = vpop.eup %7624  ;;  %v4737_v61 = vadd.f32 %v9590_v44, %v9502_v42  ;;  %v4736_v4 = vadd.f32 %v9594_v34, %v9498_v26 }
 0xb38   : > { %v4721_v54 = vmul.f32 0.1, %v4717_v30  ;;  %v4709_v21 = vmul.f32 0.6931472, %v7625_v3 }
 0xb39   : > { %v4745_v22 = vmul.f32 10.0, %v4737_v61  ;;  %v4744_v8 = vmul.f32 10.0, %v4736_v4 }
 0xb3a   : > { %v9602_v40 = vadd.f32 %v4721_v54, %v9406_v0  ;;  %v4714_v31 = vadd.f32 %v4709_v21, %v9566_v24 }
 0xb3b   : > { %v4755_v38 = vsel %vm3208_vm11, %v4745_v22, -inf  ;;  %v4752_v48 = vsel %vm3206_vm10, %v4744_v8, -inf }
 0xb3c   : > { %v7627_v50 = vpop.eup %7626  ;;  %4756 = vmax.xlane.f32.xlu0 %v4755_v38  ;;  %4753 = vmax.xlane.f32.xlu1 %v4752_v48  ;;  %v9609_v58 = vadd.f32 %v9602_v40, %v8536_v59  ;;  %v9613_v25 = vadd.f32 %v9602_v40, %v8560_v63  ;;  %v4718_v0 = vsub.f32 %v8619_v6, %v4714_v31 }
 0xb3d   : > { %v4711_v2 = vmul.f32 0.6931472, %v7627_v50 }
 0xb3e   : > { %v4739_v24 = vadd.f32 %v9609_v58, %v9521_v45  ;;  %v4738_v51 = vadd.f32 %v9613_v25, %v9515_v10  ;;  %v4722_v28 = vmul.f32 0.1, %v4718_v0 }
 0xb3f   : > { %v4715_v35 = vadd.f32 %v4711_v2, %v9572_v33 }
 0xb40   : > { %v4747_v17 = vmul.f32 10.0, %v4739_v24  ;;  %v4746_v13 = vmul.f32 10.0, %v4738_v51  ;;  %v9622_v12 = vadd.f32 %v4722_v28, %v9426_v49 }
 0xb41   : > { %v4719_v32 = vsub.f32 %v8619_v6, %v4715_v35 }
 0xb42   : > { %v4761_v9 = vsel %vm3208_vm11, %v4747_v17, -inf  ;;  %v4758_v19 = vsel %vm3206_vm10, %v4746_v13, -inf  ;;  %v9629_v47 = vadd.f32 %v9622_v12, %v8545_v57  ;;  %v9633_v37 = vadd.f32 %v9622_v12, %v8578_v20 }
 0xb43   : > { %4762 = vmax.xlane.f32.xlu0 %v4761_v9  ;;  %4759 = vmax.xlane.f32.xlu1 %v4758_v19  ;;  %v4723_v33 = vmul.f32 0.1, %v4719_v32 }
 0xb44   : > { %v4741_v49 = vadd.f32 %v9629_v47, %v9536_v52  ;;  %v4740_v56 = vadd.f32 %v9633_v37, %v9531_v43 }
 0xb45   : > { %v9640_v30 = vadd.f32 %v4723_v33, %v9444_v16 }
 0xb46   : > { %v4749_v3 = vmul.f32 10.0, %v4741_v49  ;;  %v4748_v61 = vmul.f32 10.0, %v4740_v56 }
 0xb47   : > { %v9644_v4 = vadd.f32 %v9640_v30, %v8572_v18  ;;  %v9648_v54 = vadd.f32 %v9640_v30, %v8587_v55 }
 0xb48   : > { %v4767_v21 = vsel %vm3208_vm11, %v4749_v3, -inf  ;;  %v4764_v31 = vsel %vm3206_vm10, %v4748_v61, -inf }
 0xb49   : > { %4768 = vmax.xlane.f32.xlu0 %v4767_v21  ;;  %4765 = vmax.xlane.f32.xlu1 %v4764_v31  ;;  %v4743_v16 = vadd.f32 %v9644_v4, %v9548_v36  ;;  %v4742_v38 = vadd.f32 %v9648_v54, %v9544_v15 }
 0xb4b   : > { %v4751_v48 = vmul.f32 10.0, %v4743_v16  ;;  %v4750_v50 = vmul.f32 10.0, %v4742_v38 }
 0xb4d   : > { %v4773_v0 = vsel %vm3208_vm11, %v4751_v48, -inf  ;;  %v4770_v2 = vsel %vm3206_vm10, %v4750_v50, -inf }
 0xb4e   : > { %4774 = vmax.xlane.f32.xlu0 %v4773_v0  ;;  %4771 = vmax.xlane.f32.xlu1 %v4770_v2 }
 0xbc9   : > { %v9658_v24 = vpop.xlane.xlu1 %4753  ;;  %v9660_v51 = vpop.xlane.xlu0 %4756 }
 0xbca   : > { %v4776_v28 = vsub.f32 %v4744_v8, %v9658_v24  ;;  %v4777_v35 = vsub.f32 %v4745_v22, %v9660_v51 }
 0xbcc   : > { %v4784_v32 = vmul.f32 1.442695, %v4776_v28  ;;  %v4786_v9 = vmul.f32 1.442695, %v4777_v35 }
 0xbce   : > { %7628 = vpow2.f32 %v4784_v32 }
 0xbcf   : > { %7630 = vpow2.f32 %v4786_v9 }
 0xbd0   : > { %v9664_v19 = vpop.xlane.xlu1 %4759  ;;  %v9666_v33 = vpop.xlane.xlu0 %4762 }
 0xbd1   : > { %v4778_v49 = vsub.f32 %v4746_v13, %v9664_v19  ;;  %v4779_v56 = vsub.f32 %v4747_v17, %v9666_v33 }
 0xbd3   : > { %v4788_v21 = vmul.f32 1.442695, %v4778_v49  ;;  %v4790_v31 = vmul.f32 1.442695, %v4779_v56 }
 0xbd5   : > { %7632 = vpow2.f32 %v4788_v21 }
 0xbd6   : > { %7634 = vpow2.f32 %v4790_v31  ;;  %v9670_v16 = vpop.xlane.xlu1 %4765  ;;  %v9672_v8 = vpop.xlane.xlu0 %4768 }
 0xbd7   : > { %v4780_v22 = vsub.f32 %v4748_v61, %v9670_v16  ;;  %v4781_v38 = vsub.f32 %v4749_v3, %v9672_v8 }
 0xbd8   : > { %v7629_v0 = vpop.eup %7628 }
 0xbd9   : > { %v7631_v2 = vpop.eup %7630  ;;  %v4792_v28 = vmul.f32 1.442695, %v4780_v22  ;;  %v4794_v35 = vmul.f32 1.442695, %v4781_v38  ;;  %v4800_v13 = vsel %vm3206_vm10, %v7629_v0, 0.0 }
 0xbda   : > { %4801 = vadd.xlane.f32.xlu1 %v4800_v13  ;;  %v4803_v17 = vsel %vm3208_vm11, %v7631_v2, 0.0 }
 0xbdb   : > { %7636 = vpow2.f32 %v4792_v28  ;;  %v9678_v32 = vpop.xlane.xlu1 %4771  ;;  %v9680_v9 = vpop.xlane.xlu0 %4774  ;;  %4804 = vadd.xlane.f32.xlu0 %v4803_v17 }
 0xbdc   : > { %7638 = vpow2.f32 %v4794_v35  ;;  %v4782_v61 = vsub.f32 %v4750_v50, %v9678_v32  ;;  %v4783_v3 = vsub.f32 %v4751_v48, %v9680_v9 }
 0xbde   : > { %v4796_v49 = vmul.f32 1.442695, %v4782_v61  ;;  %v4798_v56 = vmul.f32 1.442695, %v4783_v3 }
 0xbdf   : > { %v7633_v21 = vpop.eup %7632 }
 0xbe0   : > { %v7635_v31 = vpop.eup %7634  ;;  %7640 = vpow2.f32 %v4796_v49  ;;  %v4806_v22 = vsel %vm3206_vm10, %v7633_v21, 0.0 }
 0xbe1   : > { %7642 = vpow2.f32 %v4798_v56  ;;  %4807 = vadd.xlane.f32.xlu1 %v4806_v22  ;;  %v4809_v38 = vsel %vm3208_vm11, %v7635_v31, 0.0 }
 0xbe2   : > { %4810 = vadd.xlane.f32.xlu0 %v4809_v38 }
 0xbe5   : > { %v7637_v0 = vpop.eup %7636 }
 0xbe6   : > { %v7639_v2 = vpop.eup %7638  ;;  %v4812_v28 = vsel %vm3206_vm10, %v7637_v0, 0.0 }
 0xbe7   : > { %4813 = vadd.xlane.f32.xlu1 %v4812_v28  ;;  %v4815_v50 = vsel %vm3208_vm11, %v7639_v2, 0.0 }
 0xbe8   : > { %4816 = vadd.xlane.f32.xlu0 %v4815_v50 }
 0xbea   : > { %v7641_v48 = vpop.eup %7640 }
 0xbeb   : > { %v7643_v35 = vpop.eup %7642  ;;  %v4818_v13 = vsel %vm3206_vm10, %v7641_v48, 0.0 }
 0xbec   : > { %4819 = vadd.xlane.f32.xlu1 %v4818_v13  ;;  %v4821_v17 = vsel %vm3208_vm11, %v7643_v35, 0.0 }
 0xbed   : > { %4822 = vadd.xlane.f32.xlu0 %v4821_v17 }
 0xc67   : > { %v4802_v61 = vpop.xlane.xlu1 %4801 }
 0xc68   : > { %7644 = vlog2.f32 %v4802_v61  ;;  %v4805_v3 = vpop.xlane.xlu0 %4804 }
 0xc69   : > { %7646 = vlog2.f32 %v4805_v3 }
 0xc6e   : > { %v4808_v49 = vpop.xlane.xlu1 %4807 }
 0xc6f   : > { %7648 = vlog2.f32 %v4808_v49  ;;  %v4811_v56 = vpop.xlane.xlu0 %4810 }
 0xc70   : > { %7650 = vlog2.f32 %v4811_v56 }
 0xc72   : > { %v7645_v21 = vpop.eup %7644 }
 0xc73   : > { %v7647_v31 = vpop.eup %7646  ;;  %v4825_v22 = vmul.f32 0.6931472, %v7645_v21 }
 0xc74   : > { %v4827_v38 = vmul.f32 0.6931472, %v7647_v31  ;;  %v4814_v0 = vpop.xlane.xlu1 %4813 }
 0xc75   : > { %v4840_v2 = vadd.f32 %v4825_v22, %v9658_v24  ;;  %7652 = vlog2.f32 %v4814_v0  ;;  %v4817_v28 = vpop.xlane.xlu0 %4816 }
 0xc76   : > { %v4841_v50 = vadd.f32 %v4827_v38, %v9660_v51  ;;  %7654 = vlog2.f32 %v4817_v28 }
 0xc77   : > { %v4848_v48 = vsub.f32 -2.7725887, %v4840_v2 }
 0xc78   : > { %v4849_v35 = vsub.f32 %v8720_v53, %v4841_v50 }
 0xc79   : > { %v7649_v13 = vpop.eup %7648  ;;  %v4856_v17 = vmul.f32 0.1, %v4848_v48  ;;  %v4820_v61 = vpop.xlane.xlu1 %4819 }
 0xc7a   : > { %v7651_v3 = vpop.eup %7650  ;;  %v4857_v49 = vmul.f32 0.1, %v4849_v35  ;;  %v4829_v56 = vmul.f32 0.6931472, %v7649_v13  ;;  %7656 = vlog2.f32 %v4820_v61  ;;  %v4823_v21 = vpop.xlane.xlu0 %4822 }
 0xc7b   : > { %v9694_v31 = vadd.f32 %v4856_v17, %v9498_v26  ;;  %v4831_v24 = vmul.f32 0.6931472, %v7651_v3  ;;  %7658 = vlog2.f32 %v4823_v21 }
 0xc7c   : > { %v4842_v22 = vadd.f32 %v4829_v56, %v9664_v19  ;;  %v9698_v51 = vadd.f32 %v4857_v49, %v9502_v42 }
 0xc7d   : > { %v4872_v38 = vadd.f32 %v9694_v31, %v9594_v34  ;;  %v4843_v0 = vadd.f32 %v4831_v24, %v9666_v33 }
 0xc7e   : > { %v4850_v2 = vsub.f32 -2.7725887, %v4842_v22  ;;  %v4873_v28 = vadd.f32 %v9698_v51, %v9590_v44 }
 0xc7f   : > { %v7653_v50 = vpop.eup %7652  ;;  %v9705_v48 = vmul.f32 10.0, %v4872_v38  ;;  %v4851_v26 = vsub.f32 %v8720_v53, %v4843_v0 }
 0xc80   : > { %v7655_v35 = vpop.eup %7654  ;;  %v4858_v13 = vmul.f32 0.1, %v4850_v2  ;;  %v4833_v19 = vmul.f32 0.6931472, %v7653_v50  ;;  %v4881_v17 = vmul.f32 10.0, %v4873_v28 }
 0xc81   : > { %v4888_v42 = vsel %vm3206_vm10, %v9705_v48, -inf  ;;  %v4859_v61 = vmul.f32 0.1, %v4851_v26  ;;  %v4835_v34 = vmul.f32 0.6931472, %v7655_v35 }
 0xc82   : > { %v9711_v33 = vadd.f32 %v4858_v13, %v9515_v10  ;;  %v4844_v3 = vadd.f32 %v4833_v19, %v9670_v16  ;;  %v4889_v44 = vsel %vm3208_vm11, %v4881_v17, -inf }
 0xc83   : > { %v4845_v49 = vadd.f32 %v4835_v34, %v9672_v8  ;;  %v4890_v56 = vmax.f32 %v4888_v42, %v4889_v44  ;;  %v9717_v21 = vadd.f32 %v4859_v61, %v9521_v45 }
 0xc84   : > { %v7657_v24 = vpop.eup %7656  ;;  %v4874_v22 = vadd.f32 %v9711_v33, %v9613_v25  ;;  %v4852_v38 = vsub.f32 -2.7725887, %v4844_v3 }
 0xc85   : > { %v7659_v0 = vpop.eup %7658  ;;  %v4853_v2 = vsub.f32 %v8720_v53, %v4845_v49  ;;  %v4837_v10 = vmul.f32 0.6931472, %v7657_v24  ;;  %v4891_v28 = vrot.slane %v4890_v56, 4  ;;  %v4875_v16 = vadd.f32 %v9717_v21, %v9609_v58 }
 0xc86   : > { %v4882_v50 = vmul.f32 10.0, %v4874_v22  ;;  %v4860_v26 = vmul.f32 0.1, %v4852_v38  ;;  %v4839_v8 = vmul.f32 0.6931472, %v7659_v0 }
 0xc87   : > { %v4861_v35 = vmul.f32 0.1, %v4853_v2  ;;  %v4846_v45 = vadd.f32 %v4837_v10, %v9678_v32  ;;  %v4892_v13 = vmax.f32 %v4890_v56, %v4891_v28  ;;  %v4883_v19 = vmul.f32 10.0, %v4875_v16 }
 0xc88   : > { %v4897_v42 = vsel %vm3206_vm10, %v4882_v50, -inf  ;;  %v9727_v25 = vadd.f32 %v4860_v26, %v9531_v43  ;;  %v4847_v61 = vadd.f32 %v4839_v8, %v9680_v9 }
 0xc89   : > { %v4854_v34 = vsub.f32 -2.7725887, %v4846_v45  ;;  %v4893_v3 = vrot.slane %v4892_v13, 2  ;;  %v4898_v44 = vsel %vm3208_vm11, %v4883_v19, -inf  ;;  %v9732_v58 = vadd.f32 %v4861_v35, %v9536_v52 }
 0xc8a   : > { %v4876_v49 = vadd.f32 %v9727_v25, %v9633_v37  ;;  %v4855_v32 = vsub.f32 %v8720_v53, %v4847_v61  ;;  %v4899_v56 = vmax.f32 %v4897_v42, %v4898_v44 }
 0xc8b   : > { %v4862_v24 = vmul.f32 0.1, %v4854_v34  ;;  %v4894_v22 = vmax.f32 %v4892_v13, %v4893_v3  ;;  %v4877_v43 = vadd.f32 %v9732_v58, %v9629_v47 }
 0xc8c   : > { %v4884_v38 = vmul.f32 10.0, %v4876_v49  ;;  %v4863_v9 = vmul.f32 0.1, %v4855_v32  ;;  %v4900_v0 = vrot.slane %v4899_v56, 4 }
 0xc8d   : > { %v9740_v2 = vadd.f32 %v4862_v24, %v9544_v15  ;;  %v4895_v10 = vrot.slane %v4894_v22, 1  ;;  %v4885_v52 = vmul.f32 10.0, %v4877_v43 }
 0xc8e   : > { %v4906_v28 = vsel %vm3206_vm10, %v4884_v38, -inf  ;;  %v4901_v16 = vmax.f32 %v4899_v56, %v4900_v0  ;;  %v9744_v37 = vadd.f32 %v4863_v9, %v9548_v36 }
 0xc8f   : > { %v4878_v26 = vadd.f32 %v9740_v2, %v9648_v54  ;;  %v9748_v8 = vmax.f32 %v4894_v22, %v4895_v10  ;;  %v4907_v47 = vsel %vm3208_vm11, %v4885_v52, -inf }
 0xc90   : > { %v4902_v35 = vrot.slane %v4901_v16, 2  ;;  %v4908_v45 = vmax.f32 %v4906_v28, %v4907_v47  ;;  %v4879_v15 = vadd.f32 %v9744_v37, %v9644_v4 }
 0xc91   : > { %v4886_v13 = vmul.f32 10.0, %v4878_v26  ;;  %v4924_v42 = vsub.f32 %v9705_v48, %v9748_v8  ;;  %v4925_v61 = vsub.f32 %v4881_v17, %v9748_v8 }
 0xc92   : > { %v4903_v36 = vmax.f32 %v4901_v16, %v4902_v35  ;;  %v4909_v34 = vrot.slane %v4908_v45, 4  ;;  %v4887_v3 = vmul.f32 10.0, %v4879_v15 }
 0xc93   : > { %v4915_v54 = vsel %vm3206_vm10, %v4886_v13, -inf  ;;  %v4932_v44 = vmul.f32 1.442695, %v4924_v42  ;;  %v4934_v49 = vmul.f32 1.442695, %v4925_v61 }
 0xc94   : > { %v4904_v32 = vrot.slane %v4903_v36, 1  ;;  %v4910_v56 = vmax.f32 %v4908_v45, %v4909_v34  ;;  %v4916_v24 = vsel %vm3208_vm11, %v4887_v3, -inf }
 0xc95   : > { %7660 = vpow2.f32 %v4932_v44  ;;  %v4917_v22 = vmax.f32 %v4915_v54, %v4916_v24 }
 0xc96   : > { %7662 = vpow2.f32 %v4934_v49  ;;  %v9758_v4 = vmax.f32 %v4903_v36, %v4904_v32  ;;  %v4911_v43 = vrot.slane %v4910_v56, 2 }
 0xc97   : > { %v4918_v48 = vrot.slane %v4917_v22, 4 }
 0xc98   : > { %v4926_v17 = vsub.f32 %v4882_v50, %v9758_v4  ;;  %v4927_v9 = vsub.f32 %v4883_v19, %v9758_v4  ;;  %v4912_v0 = vmax.f32 %v4910_v56, %v4911_v43 }
 0xc99   : > { %v4919_v10 = vmax.f32 %v4917_v22, %v4918_v48 }
 0xc9a   : > { %v4936_v28 = vmul.f32 1.442695, %v4926_v17  ;;  %v4938_v16 = vmul.f32 1.442695, %v4927_v9  ;;  %v4913_v26 = vrot.slane %v4912_v0, 1 }
 0xc9b   : > { %v4920_v47 = vrot.slane %v4919_v10, 2 }
 0xc9c   : > { %7664 = vpow2.f32 %v4936_v28  ;;  %v9762_v35 = vmax.f32 %v4912_v0, %v4913_v26 }
 0xc9d   : > { %7666 = vpow2.f32 %v4938_v16  ;;  %v4921_v45 = vmax.f32 %v4919_v10, %v4920_v47 }
 0xc9e   : > { %v4928_v15 = vsub.f32 %v4884_v38, %v9762_v35  ;;  %v4929_v42 = vsub.f32 %v4885_v52, %v9762_v35 }
 0xc9f   : > { %v7661_v61 = vpop.eup %7660  ;;  %v4922_v36 = vrot.slane %v4921_v45, 1 }
 0xca0   : > { %v7663_v50 = vpop.eup %7662  ;;  %v4948_v19 = vsel %vm3206_vm10, %v7661_v61, 0.0  ;;  %v4940_v34 = vmul.f32 1.442695, %v4928_v15  ;;  %v4942_v54 = vmul.f32 1.442695, %v4929_v42 }
 0xca1   : > { %v4949_v44 = vsel %vm3208_vm11, %v7663_v50, 0.0  ;;  %v9768_v49 = vmax.f32 %v4921_v45, %v4922_v36 }
 0xca2   : > { %v4950_v32 = vadd.f32 %v4949_v44, %v4948_v19  ;;  %7668 = vpow2.f32 %v4940_v34 }
 0xca3   : > { %7670 = vpow2.f32 %v4942_v54  ;;  %v4930_v56 = vsub.f32 %v4886_v13, %v9768_v49  ;;  %v4931_v38 = vsub.f32 %v4887_v3, %v9768_v49 }
 0xca4   : > { %v4951_v24 = vrot.slane %v4950_v32, 4 }
 0xca5   : > { %v4944_v52 = vmul.f32 1.442695, %v4930_v56  ;;  %v4946_v22 = vmul.f32 1.442695, %v4931_v38 }
 0xca6   : > { %v7665_v43 = vpop.eup %7664  ;;  %v4952_v48 = vadd.f32 %v4951_v24, %v4950_v32 }
 0xca7   : > { %v7667_v17 = vpop.eup %7666  ;;  %v4957_v9 = vsel %vm3206_vm10, %v7665_v43, 0.0  ;;  %7672 = vpow2.f32 %v4944_v52 }
 0xca8   : > { %v4953_v0 = vrot.slane %v4952_v48, 2  ;;  %v4958_v10 = vsel %vm3208_vm11, %v7667_v17, 0.0  ;;  %7674 = vpow2.f32 %v4946_v22 }
 0xca9   : > { %v4959_v28 = vadd.f32 %v4958_v10, %v4957_v9 }
 0xcaa   : > { %v4954_v16 = vadd.f32 %v4953_v0, %v4952_v48 }
 0xcab   : > { %v4960_v26 = vrot.slane %v4959_v28, 4 }
 0xcac   : > { %v7669_v47 = vpop.eup %7668  ;;  %v4955_v13 = vrot.slane %v4954_v16, 1 }
 0xcad   : > { %v7671_v45 = vpop.eup %7670  ;;  %v4961_v3 = vadd.f32 %v4960_v26, %v4959_v28  ;;  %v4966_v15 = vsel %vm3206_vm10, %v7669_v47, 0.0 }
 0xcae   : > { %v4956_v42 = vadd.f32 %v4955_v13, %v4954_v16  ;;  %v4967_v61 = vsel %vm3208_vm11, %v7671_v45, 0.0 }
 0xcaf   : > { %v4962_v36 = vrot.slane %v4961_v3, 2  ;;  %v4968_v50 = vadd.f32 %v4967_v61, %v4966_v15 }
 0xcb0   : > { %7676 = vlog2.f32 %v4956_v42 }
 0xcb1   : > { %v7673_v19 = vpop.eup %7672  ;;  %v4963_v34 = vadd.f32 %v4962_v36, %v4961_v3  ;;  %v4969_v54 = vrot.slane %v4968_v50, 4 }
 0xcb2   : > { %v7675_v44 = vpop.eup %7674  ;;  %v4975_v32 = vsel %vm3206_vm10, %v7673_v19, 0.0 }
 0xcb3   : > { %v4964_v56 = vrot.slane %v4963_v34, 1  ;;  %v4970_v38 = vadd.f32 %v4969_v54, %v4968_v50  ;;  %v4976_v24 = vsel %vm3208_vm11, %v7675_v44, 0.0 }
 0xcb4   : > { %v4977_v52 = vadd.f32 %v4976_v24, %v4975_v32 }
 0xcb5   : > { %v4965_v22 = vadd.f32 %v4964_v56, %v4963_v34  ;;  %v4971_v43 = vrot.slane %v4970_v38, 2 }
 0xcb6   : > { %v4978_v48 = vrot.slane %v4977_v52, 4 }
 0xcb7   : > { %7678 = vlog2.f32 %v4965_v22  ;;  %v4972_v17 = vadd.f32 %v4971_v43, %v4970_v38 }
 0xcb8   : > { %v4979_v9 = vadd.f32 %v4978_v48, %v4977_v52 }
 0xcb9   : > { %v4973_v0 = vrot.slane %v4972_v17, 1 }
 0xcba   : > { %v7677_v10 = vpop.eup %7676  ;;  %v4980_v28 = vrot.slane %v4979_v9, 2 }
 0xcbb   : > { %v4985_v16 = vmul.f32 0.6931472, %v7677_v10  ;;  %v4974_v26 = vadd.f32 %v4973_v0, %v4972_v17 }
 0xcbc   : > { %v4981_v47 = vadd.f32 %v4980_v28, %v4979_v9 }
 0xcbd   : > { %v4992_v13 = vadd.f32 %v4985_v16, %v9748_v8  ;;  %7680 = vlog2.f32 %v4974_v26 }
 0xcbe   : > { %v4982_v45 = vrot.slane %v4981_v47, 1 }
 0xcbf   : > { %v4996_v3 = vsub.f32 %v8619_v6, %v4992_v13 }
 0xcc0   : > { %v4983_v15 = vadd.f32 %v4982_v45, %v4981_v47 }
 0xcc1   : > { %v7679_v42 = vpop.eup %7678  ;;  %v5000_v61 = vmul.f32 0.1, %v4996_v3 }
 0xcc2   : > { %v4987_v36 = vmul.f32 0.6931472, %v7679_v42  ;;  %7682 = vlog2.f32 %v4983_v15 }
 0xcc3   : > { %v9781_v50 = vadd.f32 %v5000_v61, %v9585_v46 }
 0xcc4   : > { %v4993_v19 = vadd.f32 %v4987_v36, %v9758_v4 }
 0xcc5   : > { %v9786_v34 = vadd.f32 %v9781_v50, %v8527_v41  ;;  %v9790_v8 = vadd.f32 %v9781_v50, %v8551_v60 }
 0xcc6   : > { %v4997_v54 = vsub.f32 %v8619_v6, %v4993_v19 }
 0xcc7   : > { %v7681_v44 = vpop.eup %7680  ;;  %v5017_v32 = vadd.f32 %v9786_v34, %v9698_v51  ;;  %v5016_v46 = vadd.f32 %v9790_v8, %v9694_v31 }
 0xcc8   : > { %v5001_v56 = vmul.f32 0.1, %v4997_v54  ;;  %v4989_v38 = vmul.f32 0.6931472, %v7681_v44 }
 0xcc9   : > { %v5025_v4 = vmul.f32 10.0, %v5017_v32  ;;  %v5024_v24 = vmul.f32 10.0, %v5016_v46 }
 0xcca   : > { %v9798_v52 = vadd.f32 %v5001_v56, %v9602_v40  ;;  %v4994_v22 = vadd.f32 %v4989_v38, %v9762_v35 }
 0xccb   : > { %v5035_v43 = vsel %vm3208_vm11, %v5025_v4, -inf  ;;  %v5032_v48 = vsel %vm3206_vm10, %v5024_v24, -inf }
 0xccc   : > { %v7683_v17 = vpop.eup %7682  ;;  %5036 = vmax.xlane.f32.xlu0 %v5035_v43  ;;  %5033 = vmax.xlane.f32.xlu1 %v5032_v48  ;;  %v9805_v9 = vadd.f32 %v9798_v52, %v8536_v59  ;;  %v9809_v0 = vadd.f32 %v9798_v52, %v8560_v63  ;;  %v4998_v40 = vsub.f32 %v8619_v6, %v4994_v22 }
 0xccd   : > { %v4991_v10 = vmul.f32 0.6931472, %v7683_v17 }
 0xcce   : > { %v5019_v35 = vadd.f32 %v9805_v9, %v9717_v21  ;;  %v5018_v28 = vadd.f32 %v9809_v0, %v9711_v33  ;;  %v5002_v16 = vmul.f32 0.1, %v4998_v40 }
 0xccf   : > { %v4995_v26 = vadd.f32 %v4991_v10, %v9768_v49 }
 0xcd0   : > { %v5027_v47 = vmul.f32 10.0, %v5019_v35  ;;  %v5026_v13 = vmul.f32 10.0, %v5018_v28  ;;  %v9818_v45 = vadd.f32 %v5002_v16, %v9622_v12 }
 0xcd1   : > { %v4999_v3 = vsub.f32 %v8619_v6, %v4995_v26 }
 0xcd2   : > { %v5041_v15 = vsel %vm3208_vm11, %v5027_v47, -inf  ;;  %v5038_v42 = vsel %vm3206_vm10, %v5026_v13, -inf  ;;  %v9825_v61 = vadd.f32 %v9818_v45, %v8545_v57  ;;  %v9829_v36 = vadd.f32 %v9818_v45, %v8578_v20 }
 0xcd3   : > { %5042 = vmax.xlane.f32.xlu0 %v5041_v15  ;;  %5039 = vmax.xlane.f32.xlu1 %v5038_v42  ;;  %v5003_v49 = vmul.f32 0.1, %v4999_v3 }
 0xcd4   : > { %v5021_v12 = vadd.f32 %v9825_v61, %v9732_v58  ;;  %v5020_v19 = vadd.f32 %v9829_v36, %v9727_v25 }
 0xcd5   : > { %v9836_v54 = vadd.f32 %v5003_v49, %v9640_v30 }
 0xcd6   : > { %v5029_v44 = vmul.f32 10.0, %v5021_v12  ;;  %v5028_v32 = vmul.f32 10.0, %v5020_v19 }
 0xcd7   : > { %v9840_v46 = vadd.f32 %v9836_v54, %v8572_v18  ;;  %v9844_v56 = vadd.f32 %v9836_v54, %v8587_v55 }
 0xcd8   : > { %v5047_v38 = vsel %vm3208_vm11, %v5029_v44, -inf  ;;  %v5044_v22 = vsel %vm3206_vm10, %v5028_v32, -inf }
 0xcd9   : > { %5048 = vmax.xlane.f32.xlu0 %v5047_v38  ;;  %5045 = vmax.xlane.f32.xlu1 %v5044_v22  ;;  %v5023_v30 = vadd.f32 %v9840_v46, %v9744_v37  ;;  %v5022_v43 = vadd.f32 %v9844_v56, %v9740_v2 }
 0xcdb   : > { %v5031_v48 = vmul.f32 10.0, %v5023_v30  ;;  %v5030_v17 = vmul.f32 10.0, %v5022_v43 }
 0xcdd   : > { %v5053_v40 = vsel %vm3208_vm11, %v5031_v48, -inf  ;;  %v5050_v10 = vsel %vm3206_vm10, %v5030_v17, -inf }
 0xcde   : > { %5054 = vmax.xlane.f32.xlu0 %v5053_v40  ;;  %5051 = vmax.xlane.f32.xlu1 %v5050_v10 }
 0xd59   : > { %v9854_v35 = vpop.xlane.xlu1 %5033  ;;  %v9856_v28 = vpop.xlane.xlu0 %5036 }
 0xd5a   : > { %v5056_v16 = vsub.f32 %v5024_v24, %v9854_v35  ;;  %v5057_v26 = vsub.f32 %v5025_v4, %v9856_v28 }
 0xd5c   : > { %v5064_v3 = vmul.f32 1.442695, %v5056_v16  ;;  %v5066_v15 = vmul.f32 1.442695, %v5057_v26 }
 0xd5e   : > { %7684 = vpow2.f32 %v5064_v3 }
 0xd5f   : > { %7686 = vpow2.f32 %v5066_v15 }
 0xd60   : > { %v9860_v42 = vpop.xlane.xlu1 %5039  ;;  %v9862_v49 = vpop.xlane.xlu0 %5042 }
 0xd61   : > { %v5058_v12 = vsub.f32 %v5026_v13, %v9860_v42  ;;  %v5059_v19 = vsub.f32 %v5027_v47, %v9862_v49 }
 0xd63   : > { %v5068_v38 = vmul.f32 1.442695, %v5058_v12  ;;  %v5070_v22 = vmul.f32 1.442695, %v5059_v19 }
 0xd65   : > { %7688 = vpow2.f32 %v5068_v38 }
 0xd66   : > { %7690 = vpow2.f32 %v5070_v22  ;;  %v9866_v30 = vpop.xlane.xlu1 %5045  ;;  %v9868_v24 = vpop.xlane.xlu0 %5048 }
 0xd67   : > { %v5060_v4 = vsub.f32 %v5028_v32, %v9866_v30  ;;  %v5061_v43 = vsub.f32 %v5029_v44, %v9868_v24 }
 0xd68   : > { %v7685_v40 = vpop.eup %7684 }
 0xd69   : > { %v7687_v10 = vpop.eup %7686  ;;  %v5072_v16 = vmul.f32 1.442695, %v5060_v4  ;;  %v5074_v26 = vmul.f32 1.442695, %v5061_v43  ;;  %v5080_v13 = vsel %vm3206_vm10, %v7685_v40, 0.0 }
 0xd6a   : > { %5081 = vadd.xlane.f32.xlu1 %v5080_v13  ;;  %v5083_v47 = vsel %vm3208_vm11, %v7687_v10, 0.0 }
 0xd6b   : > { %7692 = vpow2.f32 %v5072_v16  ;;  %v9874_v3 = vpop.xlane.xlu1 %5051  ;;  %v9876_v15 = vpop.xlane.xlu0 %5054  ;;  %5084 = vadd.xlane.f32.xlu0 %v5083_v47 }
 0xd6c   : > { %7694 = vpow2.f32 %v5074_v26  ;;  %v5062_v32 = vsub.f32 %v5030_v17, %v9874_v3  ;;  %v5063_v44 = vsub.f32 %v5031_v48, %v9876_v15 }
 0xd6e   : > { %v5076_v12 = vmul.f32 1.442695, %v5062_v32  ;;  %v5078_v19 = vmul.f32 1.442695, %v5063_v44 }
 0xd6f   : > { %v7689_v38 = vpop.eup %7688 }
 0xd70   : > { %v7691_v22 = vpop.eup %7690  ;;  %7696 = vpow2.f32 %v5076_v12  ;;  %v5086_v4 = vsel %vm3206_vm10, %v7689_v38, 0.0 }
 0xd71   : > { %7698 = vpow2.f32 %v5078_v19  ;;  %5087 = vadd.xlane.f32.xlu1 %v5086_v4  ;;  %v5089_v43 = vsel %vm3208_vm11, %v7691_v22, 0.0 }
 0xd72   : > { %5090 = vadd.xlane.f32.xlu0 %v5089_v43 }
 0xd75   : > { %v7693_v40 = vpop.eup %7692 }
 0xd76   : > { %v7695_v10 = vpop.eup %7694  ;;  %v5092_v16 = vsel %vm3206_vm10, %v7693_v40, 0.0 }
 0xd77   : > { %5093 = vadd.xlane.f32.xlu1 %v5092_v16  ;;  %v5095_v17 = vsel %vm3208_vm11, %v7695_v10, 0.0 }
 0xd78   : > { %5096 = vadd.xlane.f32.xlu0 %v5095_v17 }
 0xd7a   : > { %v7697_v48 = vpop.eup %7696 }
 0xd7b   : > { %v7699_v26 = vpop.eup %7698  ;;  %v5098_v13 = vsel %vm3206_vm10, %v7697_v48, 0.0 }
 0xd7c   : > { %5099 = vadd.xlane.f32.xlu1 %v5098_v13  ;;  %v5101_v47 = vsel %vm3208_vm11, %v7699_v26, 0.0 }
 0xd7d   : > { %5102 = vadd.xlane.f32.xlu0 %v5101_v47 }
 0xdf7   : > { %v5082_v32 = vpop.xlane.xlu1 %5081 }
 0xdf8   : > { %7700 = vlog2.f32 %v5082_v32  ;;  %v5085_v44 = vpop.xlane.xlu0 %5084 }
 0xdf9   : > { %7702 = vlog2.f32 %v5085_v44 }
 0xdfe   : > { %v5088_v12 = vpop.xlane.xlu1 %5087 }
 0xdff   : > { %7704 = vlog2.f32 %v5088_v12  ;;  %v5091_v19 = vpop.xlane.xlu0 %5090 }
 0xe00   : > { %7706 = vlog2.f32 %v5091_v19 }
 0xe02   : > { %v7701_v38 = vpop.eup %7700 }
 0xe03   : > { %v7703_v22 = vpop.eup %7702  ;;  %v5105_v4 = vmul.f32 0.6931472, %v7701_v38 }
 0xe04   : > { %v5107_v43 = vmul.f32 0.6931472, %v7703_v22  ;;  %v5094_v40 = vpop.xlane.xlu1 %5093 }
 0xe05   : > { %v5120_v10 = vadd.f32 %v5105_v4, %v9854_v35  ;;  %7708 = vlog2.f32 %v5094_v40  ;;  %v5097_v16 = vpop.xlane.xlu0 %5096 }
 0xe06   : > { %v5121_v17 = vadd.f32 %v5107_v43, %v9856_v28  ;;  %7710 = vlog2.f32 %v5097_v16 }
 0xe07   : > { %v5128_v48 = vsub.f32 -2.7725887, %v5120_v10 }
 0xe08   : > { %v5129_v26 = vsub.f32 %v8720_v53, %v5121_v17 }
 0xe09   : > { %v7705_v13 = vpop.eup %7704  ;;  %v5136_v47 = vmul.f32 0.1, %v5128_v48  ;;  %v5100_v32 = vpop.xlane.xlu1 %5099 }
 0xe0a   : > { %v7707_v44 = vpop.eup %7706  ;;  %v5137_v12 = vmul.f32 0.1, %v5129_v26  ;;  %v5109_v19 = vmul.f32 0.6931472, %v7705_v13  ;;  %7712 = vlog2.f32 %v5100_v32  ;;  %v5103_v38 = vpop.xlane.xlu0 %5102 }
 0xe0b   : > { %v9890_v22 = vadd.f32 %v5136_v47, %v9694_v31  ;;  %v5111_v35 = vmul.f32 0.6931472, %v7707_v44  ;;  %7714 = vlog2.f32 %v5103_v38 }
 0xe0c   : > { %v5122_v4 = vadd.f32 %v5109_v19, %v9860_v42  ;;  %v9894_v28 = vadd.f32 %v5137_v12, %v9698_v51 }
 0xe0d   : > { %v5152_v43 = vadd.f32 %v9890_v22, %v9790_v8  ;;  %v5123_v40 = vadd.f32 %v5111_v35, %v9862_v49 }
 0xe0e   : > { %v5130_v10 = vsub.f32 -2.7725887, %v5122_v4  ;;  %v5153_v16 = vadd.f32 %v9894_v28, %v9786_v34 }
 0xe0f   : > { %v7709_v17 = vpop.eup %7708  ;;  %v9901_v48 = vmul.f32 10.0, %v5152_v43  ;;  %v5131_v31 = vsub.f32 %v8720_v53, %v5123_v40 }
 0xe10   : > { %v7711_v26 = vpop.eup %7710  ;;  %v5138_v13 = vmul.f32 0.1, %v5130_v10  ;;  %v5113_v42 = vmul.f32 0.6931472, %v7709_v17  ;;  %v5161_v47 = vmul.f32 10.0, %v5153_v16 }
 0xe11   : > { %v5168_v51 = vsel %vm3206_vm10, %v9901_v48, -inf  ;;  %v5139_v32 = vmul.f32 0.1, %v5131_v31  ;;  %v5115_v8 = vmul.f32 0.6931472, %v7711_v26 }
 0xe12   : > { %v9907_v49 = vadd.f32 %v5138_v13, %v9711_v33  ;;  %v5124_v44 = vadd.f32 %v5113_v42, %v9866_v30  ;;  %v5169_v34 = vsel %vm3208_vm11, %v5161_v47, -inf }
 0xe13   : > { %v5125_v12 = vadd.f32 %v5115_v8, %v9868_v24  ;;  %v5170_v19 = vmax.f32 %v5168_v51, %v5169_v34  ;;  %v9913_v38 = vadd.f32 %v5139_v32, %v9717_v21 }
 0xe14   : > { %v7713_v35 = vpop.eup %7712  ;;  %v5154_v4 = vadd.f32 %v9907_v49, %v9809_v0  ;;  %v5132_v43 = vsub.f32 -2.7725887, %v5124_v44 }
 0xe15   : > { %v7715_v40 = vpop.eup %7714  ;;  %v5133_v10 = vsub.f32 %v8720_v53, %v5125_v12  ;;  %v5117_v33 = vmul.f32 0.6931472, %v7713_v35  ;;  %v5171_v16 = vrot.slane %v5170_v19, 4  ;;  %v5155_v30 = vadd.f32 %v9913_v38, %v9805_v9 }
 0xe16   : > { %v5162_v17 = vmul.f32 10.0, %v5154_v4  ;;  %v5140_v31 = vmul.f32 0.1, %v5132_v43  ;;  %v5119_v24 = vmul.f32 0.6931472, %v7715_v40 }
 0xe17   : > { %v5141_v26 = vmul.f32 0.1, %v5133_v10  ;;  %v5126_v21 = vadd.f32 %v5117_v33, %v9874_v3  ;;  %v5172_v13 = vmax.f32 %v5170_v19, %v5171_v16  ;;  %v5163_v42 = vmul.f32 10.0, %v5155_v30 }
 0xe18   : > { %v5177_v51 = vsel %vm3206_vm10, %v5162_v17, -inf  ;;  %v9923_v0 = vadd.f32 %v5140_v31, %v9727_v25  ;;  %v5127_v32 = vadd.f32 %v5119_v24, %v9876_v15 }
 0xe19   : > { %v5134_v8 = vsub.f32 -2.7725887, %v5126_v21  ;;  %v5173_v44 = vrot.slane %v5172_v13, 2  ;;  %v5178_v34 = vsel %vm3208_vm11, %v5163_v42, -inf  ;;  %v9928_v9 = vadd.f32 %v5141_v26, %v9732_v58 }
 0xe1a   : > { %v5156_v12 = vadd.f32 %v9923_v0, %v9829_v36  ;;  %v5135_v3 = vsub.f32 %v8720_v53, %v5127_v32  ;;  %v5179_v19 = vmax.f32 %v5177_v51, %v5178_v34 }
 0xe1b   : > { %v5142_v35 = vmul.f32 0.1, %v5134_v8  ;;  %v5174_v4 = vmax.f32 %v5172_v13, %v5173_v44  ;;  %v5157_v25 = vadd.f32 %v9928_v9, %v9825_v61 }
 0xe1c   : > { %v5164_v43 = vmul.f32 10.0, %v5156_v12  ;;  %v5143_v15 = vmul.f32 0.1, %v5135_v3  ;;  %v5180_v40 = vrot.slane %v5179_v19, 4 }
 0xe1d   : > { %v9936_v10 = vadd.f32 %v5142_v35, %v9740_v2  ;;  %v5175_v33 = vrot.slane %v5174_v4, 1  ;;  %v5165_v58 = vmul.f32 10.0, %v5157_v25 }
 0xe1e   : > { %v5186_v16 = vsel %vm3206_vm10, %v5164_v43, -inf  ;;  %v5181_v30 = vmax.f32 %v5179_v19, %v5180_v40  ;;  %v9940_v36 = vadd.f32 %v5143_v15, %v9744_v37 }
 0xe1f   : > { %v5158_v31 = vadd.f32 %v9936_v10, %v9844_v56  ;;  %v9944_v24 = vmax.f32 %v5174_v4, %v5175_v33  ;;  %v5187_v61 = vsel %vm3208_vm11, %v5165_v58, -inf }
 0xe20   : > { %v5182_v26 = vrot.slane %v5181_v30, 2  ;;  %v5188_v21 = vmax.f32 %v5186_v16, %v5187_v61  ;;  %v5159_v2 = vadd.f32 %v9940_v36, %v9840_v46 }
 0xe21   : > { %v5166_v13 = vmul.f32 10.0, %v5158_v31  ;;  %v5204_v51 = vsub.f32 %v9901_v48, %v9944_v24  ;;  %v5205_v32 = vsub.f32 %v5161_v47, %v9944_v24 }
 0xe22   : > { %v5183_v37 = vmax.f32 %v5181_v30, %v5182_v26  ;;  %v5189_v8 = vrot.slane %v5188_v21, 4  ;;  %v5167_v44 = vmul.f32 10.0, %v5159_v2 }
 0xe23   : > { %v5195_v56 = vsel %vm3206_vm10, %v5166_v13, -inf  ;;  %v5212_v34 = vmul.f32 1.442695, %v5204_v51  ;;  %v5214_v12 = vmul.f32 1.442695, %v5205_v32 }
 0xe24   : > { %v5184_v3 = vrot.slane %v5183_v37, 1  ;;  %v5190_v19 = vmax.f32 %v5188_v21, %v5189_v8  ;;  %v5196_v35 = vsel %vm3208_vm11, %v5167_v44, -inf }
 0xe25   : > { %7716 = vpow2.f32 %v5212_v34  ;;  %v5197_v4 = vmax.f32 %v5195_v56, %v5196_v35 }
 0xe26   : > { %7718 = vpow2.f32 %v5214_v12  ;;  %v9954_v46 = vmax.f32 %v5183_v37, %v5184_v3  ;;  %v5191_v25 = vrot.slane %v5190_v19, 2 }
 0xe27   : > { %v5198_v48 = vrot.slane %v5197_v4, 4 }
 0xe28   : > { %v5206_v47 = vsub.f32 %v5162_v17, %v9954_v46  ;;  %v5207_v15 = vsub.f32 %v5163_v42, %v9954_v46  ;;  %v5192_v40 = vmax.f32 %v5190_v19, %v5191_v25 }
 0xe29   : > { %v5199_v33 = vmax.f32 %v5197_v4, %v5198_v48 }
 0xe2a   : > { %v5216_v16 = vmul.f32 1.442695, %v5206_v47  ;;  %v5218_v30 = vmul.f32 1.442695, %v5207_v15  ;;  %v5193_v31 = vrot.slane %v5192_v40, 1 }
 0xe2b   : > { %v5200_v61 = vrot.slane %v5199_v33, 2 }
 0xe2c   : > { %7720 = vpow2.f32 %v5216_v16  ;;  %v9958_v26 = vmax.f32 %v5192_v40, %v5193_v31 }
 0xe2d   : > { %7722 = vpow2.f32 %v5218_v30  ;;  %v5201_v21 = vmax.f32 %v5199_v33, %v5200_v61 }
 0xe2e   : > { %v5208_v2 = vsub.f32 %v5164_v43, %v9958_v26  ;;  %v5209_v51 = vsub.f32 %v5165_v58, %v9958_v26 }
 0xe2f   : > { %v7717_v32 = vpop.eup %7716  ;;  %v5202_v37 = vrot.slane %v5201_v21, 1 }
 0xe30   : > { %v7719_v17 = vpop.eup %7718  ;;  %v5228_v42 = vsel %vm3206_vm10, %v7717_v32, 0.0  ;;  %v5220_v8 = vmul.f32 1.442695, %v5208_v2  ;;  %v5222_v56 = vmul.f32 1.442695, %v5209_v51 }
 0xe31   : > { %v5229_v34 = vsel %vm3208_vm11, %v7719_v17, 0.0  ;;  %v9964_v12 = vmax.f32 %v5201_v21, %v5202_v37 }
 0xe32   : > { %v5230_v3 = vadd.f32 %v5229_v34, %v5228_v42  ;;  %7724 = vpow2.f32 %v5220_v8 }
 0xe33   : > { %7726 = vpow2.f32 %v5222_v56  ;;  %v5210_v19 = vsub.f32 %v5166_v13, %v9964_v12  ;;  %v5211_v43 = vsub.f32 %v5167_v44, %v9964_v12 }
 0xe34   : > { %v5231_v35 = vrot.slane %v5230_v3, 4 }
 0xe35   : > { %v5224_v58 = vmul.f32 1.442695, %v5210_v19  ;;  %v5226_v4 = vmul.f32 1.442695, %v5211_v43 }
 0xe36   : > { %v7721_v25 = vpop.eup %7720  ;;  %v5232_v48 = vadd.f32 %v5231_v35, %v5230_v3 }
 0xe37   : > { %v7723_v47 = vpop.eup %7722  ;;  %v5237_v15 = vsel %vm3206_vm10, %v7721_v25, 0.0  ;;  %7728 = vpow2.f32 %v5224_v58 }
 0xe38   : > { %v5233_v40 = vrot.slane %v5232_v48, 2  ;;  %v5238_v33 = vsel %vm3208_vm11, %v7723_v47, 0.0  ;;  %7730 = vpow2.f32 %v5226_v4 }
 0xe39   : > { %v5239_v16 = vadd.f32 %v5238_v33, %v5237_v15 }
 0xe3a   : > { %v5234_v30 = vadd.f32 %v5233_v40, %v5232_v48 }
 0xe3b   : > { %v5240_v31 = vrot.slane %v5239_v16, 4 }
 0xe3c   : > { %v7725_v61 = vpop.eup %7724  ;;  %v5235_v13 = vrot.slane %v5234_v30, 1 }
 0xe3d   : > { %v7727_v21 = vpop.eup %7726  ;;  %v5241_v44 = vadd.f32 %v5240_v31, %v5239_v16  ;;  %v5246_v2 = vsel %vm3206_vm10, %v7725_v61, 0.0 }
 0xe3e   : > { %v5236_v51 = vadd.f32 %v5235_v13, %v5234_v30  ;;  %v5247_v32 = vsel %vm3208_vm11, %v7727_v21, 0.0 }
 0xe3f   : > { %v5242_v37 = vrot.slane %v5241_v44, 2  ;;  %v5248_v17 = vadd.f32 %v5247_v32, %v5246_v2 }
 0xe40   : > { %7732 = vlog2.f32 %v5236_v51 }
 0xe41   : > { %v7729_v42 = vpop.eup %7728  ;;  %v5243_v8 = vadd.f32 %v5242_v37, %v5241_v44  ;;  %v5249_v56 = vrot.slane %v5248_v17, 4 }
 0xe42   : > { %v7731_v34 = vpop.eup %7730  ;;  %v5255_v3 = vsel %vm3206_vm10, %v7729_v42, 0.0 }
 0xe43   : > { %v5244_v19 = vrot.slane %v5243_v8, 1  ;;  %v5250_v43 = vadd.f32 %v5249_v56, %v5248_v17  ;;  %v5256_v35 = vsel %vm3208_vm11, %v7731_v34, 0.0 }
 0xe44   : > { %v5257_v58 = vadd.f32 %v5256_v35, %v5255_v3 }
 0xe45   : > { %v5245_v4 = vadd.f32 %v5244_v19, %v5243_v8  ;;  %v5251_v25 = vrot.slane %v5250_v43, 2 }
 0xe46   : > { %v5258_v48 = vrot.slane %v5257_v58, 4 }
 0xe47   : > { %7734 = vlog2.f32 %v5245_v4  ;;  %v5252_v47 = vadd.f32 %v5251_v25, %v5250_v43 }
 0xe48   : > { %v5259_v15 = vadd.f32 %v5258_v48, %v5257_v58 }
 0xe49   : > { %v5253_v40 = vrot.slane %v5252_v47, 1 }
 0xe4a   : > { %v7733_v33 = vpop.eup %7732  ;;  %v5260_v16 = vrot.slane %v5259_v15, 2 }
 0xe4b   : > { %v5265_v30 = vmul.f32 0.6931472, %v7733_v33  ;;  %v5254_v31 = vadd.f32 %v5253_v40, %v5252_v47 }
 0xe4c   : > { %v5261_v61 = vadd.f32 %v5260_v16, %v5259_v15 }
 0xe4d   : > { %v5272_v13 = vadd.f32 %v5265_v30, %v9944_v24  ;;  %7736 = vlog2.f32 %v5254_v31 }
 0xe4e   : > { %v5262_v21 = vrot.slane %v5261_v61, 1 }
 0xe4f   : > { %v5276_v44 = vsub.f32 %v8619_v6, %v5272_v13 }
 0xe50   : > { %v5263_v2 = vadd.f32 %v5262_v21, %v5261_v61 }
 0xe51   : > { %v7735_v51 = vpop.eup %7734  ;;  %v5280_v32 = vmul.f32 0.1, %v5276_v44 }
 0xe52   : > { %v5267_v37 = vmul.f32 0.6931472, %v7735_v51  ;;  %7738 = vlog2.f32 %v5263_v2 }
 0xe53   : > { %v9977_v17 = vadd.f32 %v5280_v32, %v9781_v50 }
 0xe54   : > { %v5273_v42 = vadd.f32 %v5267_v37, %v9954_v46 }
 0xe55   : > { %v9982_v8 = vadd.f32 %v9977_v17, %v8527_v41  ;;  %v9986_v24 = vadd.f32 %v9977_v17, %v8551_v60 }
 0xe56   : > { %v5277_v56 = vsub.f32 %v8619_v6, %v5273_v42 }
 0xe57   : > { %v7737_v34 = vpop.eup %7736  ;;  %v5297_v3 = vadd.f32 %v9982_v8, %v9894_v28  ;;  %v5296_v50 = vadd.f32 %v9986_v24, %v9890_v22 }
 0xe58   : > { %v5281_v19 = vmul.f32 0.1, %v5277_v56  ;;  %v5269_v43 = vmul.f32 0.6931472, %v7737_v34 }
 0xe59   : > { %v5305_v46 = vmul.f32 10.0, %v5297_v3  ;;  %v5304_v35 = vmul.f32 10.0, %v5296_v50 }
 0xe5a   : > { %v9994_v58 = vadd.f32 %v5281_v19, %v9798_v52  ;;  %v5274_v4 = vadd.f32 %v5269_v43, %v9958_v26 }
 0xe5b   : > { %v5315_v25 = vsel %vm3208_vm11, %v5305_v46, -inf  ;;  %v5312_v48 = vsel %vm3206_vm10, %v5304_v35, -inf }
 0xe5c   : > { %v7739_v47 = vpop.eup %7738  ;;  %5316 = vmax.xlane.f32.xlu0 %v5315_v25  ;;  %5313 = vmax.xlane.f32.xlu1 %v5312_v48  ;;  %v10001_v15 = vadd.f32 %v9994_v58, %v8536_v59  ;;  %v10005_v40 = vadd.f32 %v9994_v58, %v8560_v63  ;;  %v5278_v52 = vsub.f32 %v8619_v6, %v5274_v4 }
 0xe5d   : > { %v5271_v33 = vmul.f32 0.6931472, %v7739_v47 }
 0xe5e   : > { %v5299_v26 = vadd.f32 %v10001_v15, %v9913_v38  ;;  %v5298_v16 = vadd.f32 %v10005_v40, %v9907_v49  ;;  %v5282_v30 = vmul.f32 0.1, %v5278_v52 }
 0xe5f   : > { %v5275_v31 = vadd.f32 %v5271_v33, %v9964_v12 }
 0xe60   : > { %v5307_v61 = vmul.f32 10.0, %v5299_v26  ;;  %v5306_v13 = vmul.f32 10.0, %v5298_v16  ;;  %v10014_v21 = vadd.f32 %v5282_v30, %v9818_v45 }
 0xe61   : > { %v5279_v44 = vsub.f32 %v8619_v6, %v5275_v31 }
 0xe62   : > { %v5321_v2 = vsel %vm3208_vm11, %v5307_v61, -inf  ;;  %v5318_v51 = vsel %vm3206_vm10, %v5306_v13, -inf  ;;  %v10021_v32 = vadd.f32 %v10014_v21, %v8545_v57  ;;  %v10025_v37 = vadd.f32 %v10014_v21, %v8578_v20 }
 0xe63   : > { %5322 = vmax.xlane.f32.xlu0 %v5321_v2  ;;  %5319 = vmax.xlane.f32.xlu1 %v5318_v51  ;;  %v5283_v12 = vmul.f32 0.1, %v5279_v44 }
 0xe64   : > { %v5301_v45 = vadd.f32 %v10021_v32, %v9928_v9  ;;  %v5300_v42 = vadd.f32 %v10025_v37, %v9923_v0 }
 0xe65   : > { %v10032_v56 = vadd.f32 %v5283_v12, %v9836_v54 }
 0xe66   : > { %v5309_v34 = vmul.f32 10.0, %v5301_v45  ;;  %v5308_v3 = vmul.f32 10.0, %v5300_v42 }
 0xe67   : > { %v10036_v50 = vadd.f32 %v10032_v56, %v8572_v18  ;;  %v10040_v19 = vadd.f32 %v10032_v56, %v8587_v55 }
 0xe68   : > { %v5327_v43 = vsel %vm3208_vm11, %v5309_v34, -inf  ;;  %v5324_v4 = vsel %vm3206_vm10, %v5308_v3, -inf }
 0xe69   : > { %5328 = vmax.xlane.f32.xlu0 %v5327_v43  ;;  %5325 = vmax.xlane.f32.xlu1 %v5324_v4  ;;  %v5303_v54 = vadd.f32 %v10036_v50, %v9940_v36  ;;  %v5302_v25 = vadd.f32 %v10040_v19, %v9936_v10 }
 0xe6b   : > { %v5311_v48 = vmul.f32 10.0, %v5303_v54  ;;  %v5310_v47 = vmul.f32 10.0, %v5302_v25 }
 0xe6d   : > { %v5333_v52 = vsel %vm3208_vm11, %v5311_v48, -inf  ;;  %v5330_v33 = vsel %vm3206_vm10, %v5310_v47, -inf }
 0xe6e   : > { %5334 = vmax.xlane.f32.xlu0 %v5333_v52  ;;  %5331 = vmax.xlane.f32.xlu1 %v5330_v33 }
 0xee9   : > { %v10050_v26 = vpop.xlane.xlu1 %5313  ;;  %v10052_v16 = vpop.xlane.xlu0 %5316 }
 0xeea   : > { %v5336_v30 = vsub.f32 %v5304_v35, %v10050_v26  ;;  %v5337_v31 = vsub.f32 %v5305_v46, %v10052_v16 }
 0xeec   : > { %v5344_v44 = vmul.f32 1.442695, %v5336_v30  ;;  %v5346_v2 = vmul.f32 1.442695, %v5337_v31 }
 0xeee   : > { %7740 = vpow2.f32 %v5344_v44 }
 0xeef   : > { %7742 = vpow2.f32 %v5346_v2 }
 0xef0   : > { %v10056_v51 = vpop.xlane.xlu1 %5319  ;;  %v10058_v12 = vpop.xlane.xlu0 %5322 }
 0xef1   : > { %v5338_v45 = vsub.f32 %v5306_v13, %v10056_v51  ;;  %v5339_v42 = vsub.f32 %v5307_v61, %v10058_v12 }
 0xef3   : > { %v5348_v43 = vmul.f32 1.442695, %v5338_v45  ;;  %v5350_v4 = vmul.f32 1.442695, %v5339_v42 }
 0xef5   : > { %7744 = vpow2.f32 %v5348_v43 }
 0xef6   : > { %7746 = vpow2.f32 %v5350_v4  ;;  %v10062_v54 = vpop.xlane.xlu1 %5325  ;;  %v10064_v35 = vpop.xlane.xlu0 %5328 }
 0xef7   : > { %v5340_v46 = vsub.f32 %v5308_v3, %v10062_v54  ;;  %v5341_v25 = vsub.f32 %v5309_v34, %v10064_v35 }
 0xef8   : > { %v7741_v52 = vpop.eup %7740 }
 0xef9   : > { %v7743_v33 = vpop.eup %7742  ;;  %v5352_v30 = vmul.f32 1.442695, %v5340_v46  ;;  %v5354_v31 = vmul.f32 1.442695, %v5341_v25  ;;  %v5360_v13 = vsel %vm3206_vm10, %v7741_v52, 0.0 }
 0xefa   : > { %5361 = vadd.xlane.f32.xlu1 %v5360_v13  ;;  %v5363_v61 = vsel %vm3208_vm11, %v7743_v33, 0.0 }
 0xefb   : > { %7748 = vpow2.f32 %v5352_v30  ;;  %v10070_v44 = vpop.xlane.xlu1 %5331  ;;  %v10072_v2 = vpop.xlane.xlu0 %5334  ;;  %5364 = vadd.xlane.f32.xlu0 %v5363_v61 }
 0xefc   : > { %7750 = vpow2.f32 %v5354_v31  ;;  %v5342_v3 = vsub.f32 %v5310_v47, %v10070_v44  ;;  %v5343_v34 = vsub.f32 %v5311_v48, %v10072_v2 }
 0xefe   : > { %v5356_v45 = vmul.f32 1.442695, %v5342_v3  ;;  %v5358_v42 = vmul.f32 1.442695, %v5343_v34 }
 0xeff   : > { %v7745_v43 = vpop.eup %7744 }
 0xf00   : > { %v7747_v4 = vpop.eup %7746  ;;  %7752 = vpow2.f32 %v5356_v45  ;;  %v5366_v46 = vsel %vm3206_vm10, %v7745_v43, 0.0 }
 0xf01   : > { %7754 = vpow2.f32 %v5358_v42  ;;  %5367 = vadd.xlane.f32.xlu1 %v5366_v46  ;;  %v5369_v25 = vsel %vm3208_vm11, %v7747_v4, 0.0 }
 0xf02   : > { %5370 = vadd.xlane.f32.xlu0 %v5369_v25 }
 0xf05   : > { %v7749_v52 = vpop.eup %7748 }
 0xf06   : > { %v7751_v33 = vpop.eup %7750  ;;  %v5372_v30 = vsel %vm3206_vm10, %v7749_v52, 0.0 }
 0xf07   : > { %5373 = vadd.xlane.f32.xlu1 %v5372_v30  ;;  %v5375_v47 = vsel %vm3208_vm11, %v7751_v33, 0.0 }
 0xf08   : > { %5376 = vadd.xlane.f32.xlu0 %v5375_v47 }
 0xf0a   : > { %v7753_v48 = vpop.eup %7752 }
 0xf0b   : > { %v7755_v31 = vpop.eup %7754  ;;  %v5378_v13 = vsel %vm3206_vm10, %v7753_v48, 0.0 }
 0xf0c   : > { %5379 = vadd.xlane.f32.xlu1 %v5378_v13  ;;  %v5381_v61 = vsel %vm3208_vm11, %v7755_v31, 0.0 }
 0xf0d   : > { %5382 = vadd.xlane.f32.xlu0 %v5381_v61 }
 0xf87   : > { %v5362_v3 = vpop.xlane.xlu1 %5361 }
 0xf88   : > { %7756 = vlog2.f32 %v5362_v3  ;;  %v5365_v34 = vpop.xlane.xlu0 %5364 }
 0xf89   : > { %7758 = vlog2.f32 %v5365_v34 }
 0xf8e   : > { %v5368_v45 = vpop.xlane.xlu1 %5367 }
 0xf8f   : > { %7760 = vlog2.f32 %v5368_v45  ;;  %v5371_v42 = vpop.xlane.xlu0 %5370 }
 0xf90   : > { %7762 = vlog2.f32 %v5371_v42 }
 0xf92   : > { %v7757_v43 = vpop.eup %7756 }
 0xf93   : > { %v7759_v4 = vpop.eup %7758  ;;  %v5385_v46 = vmul.f32 0.6931472, %v7757_v43 }
 0xf94   : > { %v5387_v25 = vmul.f32 0.6931472, %v7759_v4  ;;  %v5374_v52 = vpop.xlane.xlu1 %5373 }
 0xf95   : > { %v5400_v33 = vadd.f32 %v5385_v46, %v10050_v26  ;;  %7764 = vlog2.f32 %v5374_v52  ;;  %v5377_v30 = vpop.xlane.xlu0 %5376 }
 0xf96   : > { %v5401_v47 = vadd.f32 %v5387_v25, %v10052_v16  ;;  %7766 = vlog2.f32 %v5377_v30 }
 0xf97   : > { %v5408_v48 = vsub.f32 -2.7725887, %v5400_v33 }
 0xf98   : > { %v5409_v31 = vsub.f32 %v8720_v53, %v5401_v47 }
 0xf99   : > { %v7761_v13 = vpop.eup %7760  ;;  %v5416_v61 = vmul.f32 0.1, %v5408_v48  ;;  %v5380_v3 = vpop.xlane.xlu1 %5379 }
 0xf9a   : > { %v7763_v34 = vpop.eup %7762  ;;  %v5417_v45 = vmul.f32 0.1, %v5409_v31  ;;  %v5389_v42 = vmul.f32 0.6931472, %v7761_v13  ;;  %7768 = vlog2.f32 %v5380_v3  ;;  %v5383_v43 = vpop.xlane.xlu0 %5382 }
 0xf9b   : > { %v10086_v4 = vadd.f32 %v5416_v61, %v9890_v22  ;;  %v5391_v26 = vmul.f32 0.6931472, %v7763_v34  ;;  %7770 = vlog2.f32 %v5383_v43 }
 0xf9c   : > { %v5402_v46 = vadd.f32 %v5389_v42, %v10056_v51  ;;  %v10090_v16 = vadd.f32 %v5417_v45, %v9894_v28 }
 0xf9d   : > { %v5432_v25 = vadd.f32 %v10086_v4, %v9986_v24  ;;  %v5403_v52 = vadd.f32 %v5391_v26, %v10058_v12 }
 0xf9e   : > { %v5410_v33 = vsub.f32 -2.7725887, %v5402_v46  ;;  %v5433_v30 = vadd.f32 %v10090_v16, %v9982_v8 }
 0xf9f   : > { %v7765_v47 = vpop.eup %7764  ;;  %v10097_v48 = vmul.f32 10.0, %v5432_v25  ;;  %v5411_v22 = vsub.f32 %v8720_v53, %v5403_v52 }
 0xfa0   : > { %v7767_v31 = vpop.eup %7766  ;;  %v5418_v13 = vmul.f32 0.1, %v5410_v33  ;;  %v5393_v51 = vmul.f32 0.6931472, %v7765_v47  ;;  %v5441_v61 = vmul.f32 10.0, %v5433_v30 }
 0xfa1   : > { %v5448_v28 = vsel %vm3206_vm10, %v10097_v48, -inf  ;;  %v5419_v3 = vmul.f32 0.1, %v5411_v22  ;;  %v5395_v24 = vmul.f32 0.6931472, %v7767_v31 }
 0xfa2   : > { %v10103_v12 = vadd.f32 %v5418_v13, %v9907_v49  ;;  %v5404_v34 = vadd.f32 %v5393_v51, %v10062_v54  ;;  %v5449_v8 = vsel %vm3208_vm11, %v5441_v61, -inf }
 0xfa3   : > { %v5405_v45 = vadd.f32 %v5395_v24, %v10064_v35  ;;  %v5450_v42 = vmax.f32 %v5448_v28, %v5449_v8  ;;  %v10109_v43 = vadd.f32 %v5419_v3, %v9913_v38 }
 0xfa4   : > { %v7769_v26 = vpop.eup %7768  ;;  %v5434_v46 = vadd.f32 %v10103_v12, %v10005_v40  ;;  %v5412_v25 = vsub.f32 -2.7725887, %v5404_v34 }
 0xfa5   : > { %v7771_v52 = vpop.eup %7770  ;;  %v5413_v33 = vsub.f32 %v8720_v53, %v5405_v45  ;;  %v5397_v49 = vmul.f32 0.6931472, %v7769_v26  ;;  %v5451_v30 = vrot.slane %v5450_v42, 4  ;;  %v5435_v54 = vadd.f32 %v10109_v43, %v10001_v15 }
 0xfa6   : > { %v5442_v47 = vmul.f32 10.0, %v5434_v46  ;;  %v5420_v22 = vmul.f32 0.1, %v5412_v25  ;;  %v5399_v35 = vmul.f32 0.6931472, %v7771_v52 }
 0xfa7   : > { %v5421_v31 = vmul.f32 0.1, %v5413_v33  ;;  %v5406_v38 = vadd.f32 %v5397_v49, %v10070_v44  ;;  %v5452_v13 = vmax.f32 %v5450_v42, %v5451_v30  ;;  %v5443_v51 = vmul.f32 10.0, %v5435_v54 }
 0xfa8   : > { %v5457_v28 = vsel %vm3206_vm10, %v5442_v47, -inf  ;;  %v10119_v40 = vadd.f32 %v5420_v22, %v9923_v0  ;;  %v5407_v3 = vadd.f32 %v5399_v35, %v10072_v2 }
 0xfa9   : > { %v5414_v24 = vsub.f32 -2.7725887, %v5406_v38  ;;  %v5453_v34 = vrot.slane %v5452_v13, 2  ;;  %v5458_v8 = vsel %vm3208_vm11, %v5443_v51, -inf  ;;  %v10124_v15 = vadd.f32 %v5421_v31, %v9928_v9 }
 0xfaa   : > { %v5436_v45 = vadd.f32 %v10119_v40, %v10025_v37  ;;  %v5415_v44 = vsub.f32 %v8720_v53, %v5407_v3  ;;  %v5459_v42 = vmax.f32 %v5457_v28, %v5458_v8 }
 0xfab   : > { %v5422_v26 = vmul.f32 0.1, %v5414_v24  ;;  %v5454_v46 = vmax.f32 %v5452_v13, %v5453_v34  ;;  %v5437_v0 = vadd.f32 %v10124_v15, %v10021_v32 }
 0xfac   : > { %v5444_v25 = vmul.f32 10.0, %v5436_v45  ;;  %v5423_v2 = vmul.f32 0.1, %v5415_v44  ;;  %v5460_v52 = vrot.slane %v5459_v42, 4 }
 0xfad   : > { %v10132_v33 = vadd.f32 %v5422_v26, %v9936_v10  ;;  %v5455_v49 = vrot.slane %v5454_v46, 1  ;;  %v5445_v9 = vmul.f32 10.0, %v5437_v0 }
 0xfae   : > { %v5466_v30 = vsel %vm3206_vm10, %v5444_v25, -inf  ;;  %v5461_v54 = vmax.f32 %v5459_v42, %v5460_v52  ;;  %v10136_v37 = vadd.f32 %v5423_v2, %v9940_v36 }
 0xfaf   : > { %v5438_v22 = vadd.f32 %v10132_v33, %v10040_v19  ;;  %v10140_v35 = vmax.f32 %v5454_v46, %v5455_v49  ;;  %v5467_v32 = vsel %vm3208_vm11, %v5445_v9, -inf }
 0xfb0   : > { %v5462_v31 = vrot.slane %v5461_v54, 2  ;;  %v5468_v38 = vmax.f32 %v5466_v30, %v5467_v32  ;;  %v5439_v10 = vadd.f32 %v10136_v37, %v10036_v50 }
 0xfb1   : > { %v5446_v13 = vmul.f32 10.0, %v5438_v22  ;;  %v5484_v28 = vsub.f32 %v10097_v48, %v10140_v35  ;;  %v5485_v3 = vsub.f32 %v5441_v61, %v10140_v35 }
 0xfb2   : > { %v5463_v36 = vmax.f32 %v5461_v54, %v5462_v31  ;;  %v5469_v24 = vrot.slane %v5468_v38, 4  ;;  %v5447_v34 = vmul.f32 10.0, %v5439_v10 }
 0xfb3   : > { %v5475_v19 = vsel %vm3206_vm10, %v5446_v13, -inf  ;;  %v5492_v8 = vmul.f32 1.442695, %v5484_v28  ;;  %v5494_v45 = vmul.f32 1.442695, %v5485_v3 }
 0xfb4   : > { %v5464_v44 = vrot.slane %v5463_v36, 1  ;;  %v5470_v42 = vmax.f32 %v5468_v38, %v5469_v24  ;;  %v5476_v26 = vsel %vm3208_vm11, %v5447_v34, -inf }
 0xfb5   : > { %7772 = vpow2.f32 %v5492_v8  ;;  %v5477_v46 = vmax.f32 %v5475_v19, %v5476_v26 }
 0xfb6   : > { %7774 = vpow2.f32 %v5494_v45  ;;  %v10150_v50 = vmax.f32 %v5463_v36, %v5464_v44  ;;  %v5471_v0 = vrot.slane %v5470_v42, 2 }
 0xfb7   : > { %v5478_v48 = vrot.slane %v5477_v46, 4 }
 0xfb8   : > { %v5486_v61 = vsub.f32 %v5442_v47, %v10150_v50  ;;  %v5487_v2 = vsub.f32 %v5443_v51, %v10150_v50  ;;  %v5472_v52 = vmax.f32 %v5470_v42, %v5471_v0 }
 0xfb9   : > { %v5479_v49 = vmax.f32 %v5477_v46, %v5478_v48 }
 0xfba   : > { %v5496_v30 = vmul.f32 1.442695, %v5486_v61  ;;  %v5498_v54 = vmul.f32 1.442695, %v5487_v2  ;;  %v5473_v22 = vrot.slane %v5472_v52, 1 }
 0xfbb   : > { %v5480_v32 = vrot.slane %v5479_v49, 2 }
 0xfbc   : > { %7776 = vpow2.f32 %v5496_v30  ;;  %v10154_v31 = vmax.f32 %v5472_v52, %v5473_v22 }
 0xfbd   : > { %7778 = vpow2.f32 %v5498_v54  ;;  %v5481_v38 = vmax.f32 %v5479_v49, %v5480_v32 }
 0xfbe   : > { %v5488_v10 = vsub.f32 %v5444_v25, %v10154_v31  ;;  %v5489_v28 = vsub.f32 %v5445_v9, %v10154_v31 }
 0xfbf   : > { %v7773_v3 = vpop.eup %7772  ;;  %v5482_v36 = vrot.slane %v5481_v38, 1 }
 0xfc0   : > { %v7775_v47 = vpop.eup %7774  ;;  %v5508_v51 = vsel %vm3206_vm10, %v7773_v3, 0.0  ;;  %v5500_v24 = vmul.f32 1.442695, %v5488_v10  ;;  %v5502_v19 = vmul.f32 1.442695, %v5489_v28 }
 0xfc1   : > { %v5509_v8 = vsel %vm3208_vm11, %v7775_v47, 0.0  ;;  %v10160_v45 = vmax.f32 %v5481_v38, %v5482_v36 }
 0xfc2   : > { %v5510_v44 = vadd.f32 %v5509_v8, %v5508_v51  ;;  %7780 = vpow2.f32 %v5500_v24 }
 0xfc3   : > { %7782 = vpow2.f32 %v5502_v19  ;;  %v5490_v42 = vsub.f32 %v5446_v13, %v10160_v45  ;;  %v5491_v25 = vsub.f32 %v5447_v34, %v10160_v45 }
 0xfc4   : > { %v5511_v26 = vrot.slane %v5510_v44, 4 }
 0xfc5   : > { %v5504_v9 = vmul.f32 1.442695, %v5490_v42  ;;  %v5506_v46 = vmul.f32 1.442695, %v5491_v25 }
 0xfc6   : > { %v7777_v0 = vpop.eup %7776  ;;  %v5512_v48 = vadd.f32 %v5511_v26, %v5510_v44 }
 0xfc7   : > { %v7779_v61 = vpop.eup %7778  ;;  %v5517_v2 = vsel %vm3206_vm10, %v7777_v0, 0.0  ;;  %7784 = vpow2.f32 %v5504_v9 }
 0xfc8   : > { %v5513_v52 = vrot.slane %v5512_v48, 2  ;;  %v5518_v49 = vsel %vm3208_vm11, %v7779_v61, 0.0  ;;  %7786 = vpow2.f32 %v5506_v46 }
 0xfc9   : > { %v5519_v30 = vadd.f32 %v5518_v49, %v5517_v2 }
 0xfca   : > { %v5514_v54 = vadd.f32 %v5513_v52, %v5512_v48 }
 0xfcb   : > { %v5520_v22 = vrot.slane %v5519_v30, 4 }
 0xfcc   : > { %v7781_v32 = vpop.eup %7780  ;;  %v5515_v13 = vrot.slane %v5514_v54, 1 }
 0xfcd   : > { %v7783_v38 = vpop.eup %7782  ;;  %v5521_v34 = vadd.f32 %v5520_v22, %v5519_v30  ;;  %v5526_v10 = vsel %vm3206_vm10, %v7781_v32, 0.0 }
 0xfce   : > { %v5516_v28 = vadd.f32 %v5515_v13, %v5514_v54  ;;  %v5527_v3 = vsel %vm3208_vm11, %v7783_v38, 0.0 }
 0xfcf   : > { %v5522_v36 = vrot.slane %v5521_v34, 2  ;;  %v5528_v47 = vadd.f32 %v5527_v3, %v5526_v10 }
 0xfd0   : > { %7788 = vlog2.f32 %v5516_v28 }
 0xfd1   : > { %v7785_v51 = vpop.eup %7784  ;;  %v5523_v24 = vadd.f32 %v5522_v36, %v5521_v34  ;;  %v5529_v19 = vrot.slane %v5528_v47, 4 }
 0xfd2   : > { %v7787_v8 = vpop.eup %7786  ;;  %v5535_v44 = vsel %vm3206_vm10, %v7785_v51, 0.0 }
 0xfd3   : > { %v5524_v42 = vrot.slane %v5523_v24, 1  ;;  %v5530_v25 = vadd.f32 %v5529_v19, %v5528_v47  ;;  %v5536_v26 = vsel %vm3208_vm11, %v7787_v8, 0.0 }
 0xfd4   : > { %v5537_v9 = vadd.f32 %v5536_v26, %v5535_v44 }
 0xfd5   : > { %v5525_v46 = vadd.f32 %v5524_v42, %v5523_v24  ;;  %v5531_v0 = vrot.slane %v5530_v25, 2 }
 0xfd6   : > { %v5538_v48 = vrot.slane %v5537_v9, 4 }
 0xfd7   : > { %7790 = vlog2.f32 %v5525_v46  ;;  %v5532_v61 = vadd.f32 %v5531_v0, %v5530_v25 }
 0xfd8   : > { %v5539_v2 = vadd.f32 %v5538_v48, %v5537_v9 }
 0xfd9   : > { %v5533_v52 = vrot.slane %v5532_v61, 1 }
 0xfda   : > { %v7789_v49 = vpop.eup %7788  ;;  %v5540_v30 = vrot.slane %v5539_v2, 2 }
 0xfdb   : > { %v5545_v54 = vmul.f32 0.6931472, %v7789_v49  ;;  %v5534_v22 = vadd.f32 %v5533_v52, %v5532_v61 }
 0xfdc   : > { %v5541_v32 = vadd.f32 %v5540_v30, %v5539_v2 }
 0xfdd   : > { %v5552_v13 = vadd.f32 %v5545_v54, %v10140_v35  ;;  %7792 = vlog2.f32 %v5534_v22 }
 0xfde   : > { %v5542_v38 = vrot.slane %v5541_v32, 1 }
 0xfdf   : > { %v5556_v34 = vsub.f32 %v8619_v6, %v5552_v13 }
 0xfe0   : > { %v5543_v10 = vadd.f32 %v5542_v38, %v5541_v32 }
 0xfe1   : > { %v7791_v28 = vpop.eup %7790  ;;  %v5560_v3 = vmul.f32 0.1, %v5556_v34 }
 0xfe2   : > { %v5547_v36 = vmul.f32 0.6931472, %v7791_v28  ;;  %7794 = vlog2.f32 %v5543_v10 }
 0xfe3   : > { %v10173_v47 = vadd.f32 %v5560_v3, %v9977_v17 }
 0xfe4   : > { %v5553_v51 = vadd.f32 %v5547_v36, %v10150_v50 }
 0xfe5   : > { %v10178_v24 = vadd.f32 %v10173_v47, %v8527_v41  ;;  %v10182_v35 = vadd.f32 %v10173_v47, %v8551_v60 }
 0xfe6   : > { %v5557_v19 = vsub.f32 %v8619_v6, %v5553_v51 }
 0xfe7   : > { %v7793_v8 = vpop.eup %7792  ;;  %v5577_v44 = vadd.f32 %v10178_v24, %v10090_v16  ;;  %v5576_v17 = vadd.f32 %v10182_v35, %v10086_v4 }
 0xfe8   : > { %v5561_v42 = vmul.f32 0.1, %v5557_v19  ;;  %v5549_v25 = vmul.f32 0.6931472, %v7793_v8 }
 0xfe9   : > { %v5585_v50 = vmul.f32 10.0, %v5577_v44  ;;  %v5584_v26 = vmul.f32 10.0, %v5576_v17 }
 0xfea   : > { %v10190_v9 = vadd.f32 %v5561_v42, %v9994_v58  ;;  %v5554_v46 = vadd.f32 %v5549_v25, %v10154_v31 }
 0xfeb   : > { %v5595_v0 = vsel %vm3208_vm11, %v5585_v50, -inf  ;;  %v5592_v48 = vsel %vm3206_vm10, %v5584_v26, -inf }
 0xfec   : > { %v7795_v61 = vpop.eup %7794  ;;  %5596 = vmax.xlane.f32.xlu0 %v5595_v0  ;;  %5593 = vmax.xlane.f32.xlu1 %v5592_v48  ;;  %v10197_v2 = vadd.f32 %v10190_v9, %v8536_v59  ;;  %v10201_v52 = vadd.f32 %v10190_v9, %v8560_v63  ;;  %v5558_v58 = vsub.f32 %v8619_v6, %v5554_v46 }
 0xfed   : > { %v5551_v49 = vmul.f32 0.6931472, %v7795_v61 }
 0xfee   : > { %v5579_v31 = vadd.f32 %v10197_v2, %v10109_v43  ;;  %v5578_v30 = vadd.f32 %v10201_v52, %v10103_v12  ;;  %v5562_v54 = vmul.f32 0.1, %v5558_v58 }
 0xfef   : > { %v5555_v22 = vadd.f32 %v5551_v49, %v10160_v45 }
 0xff0   : > { %v5587_v32 = vmul.f32 10.0, %v5579_v31  ;;  %v5586_v13 = vmul.f32 10.0, %v5578_v30  ;;  %v10210_v38 = vadd.f32 %v5562_v54, %v10014_v21 }
 0xff1   : > { %v5559_v34 = vsub.f32 %v8619_v6, %v5555_v22 }
 0xff2   : > { %v5601_v10 = vsel %vm3208_vm11, %v5587_v32, -inf  ;;  %v5598_v28 = vsel %vm3206_vm10, %v5586_v13, -inf  ;;  %v10217_v3 = vadd.f32 %v10210_v38, %v8545_v57  ;;  %v10221_v36 = vadd.f32 %v10210_v38, %v8578_v20 }
 0xff3   : > { %5602 = vmax.xlane.f32.xlu0 %v5601_v10  ;;  %5599 = vmax.xlane.f32.xlu1 %v5598_v28  ;;  %v5563_v45 = vmul.f32 0.1, %v5559_v34 }
 0xff4   : > { %v5581_v21 = vadd.f32 %v10217_v3, %v10124_v15  ;;  %v5580_v51 = vadd.f32 %v10221_v36, %v10119_v40 }
 0xff5   : > { %v10228_v19 = vadd.f32 %v5563_v45, %v10032_v56 }
 0xff6   : > { %v5589_v8 = vmul.f32 10.0, %v5581_v21  ;;  %v5588_v44 = vmul.f32 10.0, %v5580_v51 }
 0xff7   : > { %v10232_v17 = vadd.f32 %v10228_v19, %v8572_v18  ;;  %v10236_v42 = vadd.f32 %v10228_v19, %v8587_v55 }
 0xff8   : > { %v5607_v25 = vsel %vm3208_vm11, %v5589_v8, -inf  ;;  %v5604_v46 = vsel %vm3206_vm10, %v5588_v44, -inf }
 0xff9   : > { %5608 = vmax.xlane.f32.xlu0 %v5607_v25  ;;  %5605 = vmax.xlane.f32.xlu1 %v5604_v46  ;;  %v5583_v56 = vadd.f32 %v10232_v17, %v10136_v37  ;;  %v5582_v0 = vadd.f32 %v10236_v42, %v10132_v33 }
 0xffb   : > { %v5591_v48 = vmul.f32 10.0, %v5583_v56  ;;  %v5590_v61 = vmul.f32 10.0, %v5582_v0 }
 0xffd   : > { %v5613_v58 = vsel %vm3208_vm11, %v5591_v48, -inf  ;;  %v5610_v49 = vsel %vm3206_vm10, %v5590_v61, -inf }
 0xffe   : > { %5614 = vmax.xlane.f32.xlu0 %v5613_v58  ;;  %5611 = vmax.xlane.f32.xlu1 %v5610_v49 }
0x1079   : > { %v10246_v31 = vpop.xlane.xlu1 %5593  ;;  %v10248_v30 = vpop.xlane.xlu0 %5596 }
0x107a   : > { %v5616_v54 = vsub.f32 %v5584_v26, %v10246_v31  ;;  %v5617_v22 = vsub.f32 %v5585_v50, %v10248_v30 }
0x107c   : > { %v5624_v34 = vmul.f32 1.442695, %v5616_v54  ;;  %v5626_v10 = vmul.f32 1.442695, %v5617_v22 }
0x107e   : > { %7796 = vpow2.f32 %v5624_v34 }
0x107f   : > { %7798 = vpow2.f32 %v5626_v10 }
0x1080   : > { %v10252_v28 = vpop.xlane.xlu1 %5599  ;;  %v10254_v45 = vpop.xlane.xlu0 %5602 }
0x1081   : > { %v5618_v21 = vsub.f32 %v5586_v13, %v10252_v28  ;;  %v5619_v51 = vsub.f32 %v5587_v32, %v10254_v45 }
0x1083   : > { %v5628_v25 = vmul.f32 1.442695, %v5618_v21  ;;  %v5630_v46 = vmul.f32 1.442695, %v5619_v51 }
0x1085   : > { %7800 = vpow2.f32 %v5628_v25 }
0x1086   : > { %7802 = vpow2.f32 %v5630_v46  ;;  %v10258_v56 = vpop.xlane.xlu1 %5605  ;;  %v10260_v26 = vpop.xlane.xlu0 %5608 }
0x1087   : > { %v5620_v50 = vsub.f32 %v5588_v44, %v10258_v56  ;;  %v5621_v0 = vsub.f32 %v5589_v8, %v10260_v26 }
0x1088   : > { %v7797_v58 = vpop.eup %7796 }
0x1089   : > { %v7799_v49 = vpop.eup %7798  ;;  %v5632_v54 = vmul.f32 1.442695, %v5620_v50  ;;  %v5634_v22 = vmul.f32 1.442695, %v5621_v0  ;;  %v5640_v13 = vsel %vm3206_vm10, %v7797_v58, 0.0 }
0x108a   : > { %5641 = vadd.xlane.f32.xlu1 %v5640_v13  ;;  %v5643_v32 = vsel %vm3208_vm11, %v7799_v49, 0.0 }
0x108b   : > { %7804 = vpow2.f32 %v5632_v54  ;;  %v10266_v34 = vpop.xlane.xlu1 %5611  ;;  %v10268_v10 = vpop.xlane.xlu0 %5614  ;;  %5644 = vadd.xlane.f32.xlu0 %v5643_v32 }
0x108c   : > { %7806 = vpow2.f32 %v5634_v22  ;;  %v5622_v44 = vsub.f32 %v5590_v61, %v10266_v34  ;;  %v5623_v8 = vsub.f32 %v5591_v48, %v10268_v10 }
0x108e   : > { %v5636_v21 = vmul.f32 1.442695, %v5622_v44  ;;  %v5638_v51 = vmul.f32 1.442695, %v5623_v8 }
0x108f   : > { %v7801_v25 = vpop.eup %7800 }
0x1090   : > { %v7803_v46 = vpop.eup %7802  ;;  %7808 = vpow2.f32 %v5636_v21  ;;  %v5646_v50 = vsel %vm3206_vm10, %v7801_v25, 0.0 }
0x1091   : > { %7810 = vpow2.f32 %v5638_v51  ;;  %5647 = vadd.xlane.f32.xlu1 %v5646_v50  ;;  %v5649_v0 = vsel %vm3208_vm11, %v7803_v46, 0.0 }
0x1092   : > { %5650 = vadd.xlane.f32.xlu0 %v5649_v0 }
0x1095   : > { %v7805_v58 = vpop.eup %7804 }
0x1096   : > { %v7807_v49 = vpop.eup %7806  ;;  %v5652_v54 = vsel %vm3206_vm10, %v7805_v58, 0.0 }
0x1097   : > { %5653 = vadd.xlane.f32.xlu1 %v5652_v54  ;;  %v5655_v61 = vsel %vm3208_vm11, %v7807_v49, 0.0 }
0x1098   : > { %5656 = vadd.xlane.f32.xlu0 %v5655_v61 }
0x109a   : > { %v7809_v48 = vpop.eup %7808 }
0x109b   : > { %v7811_v22 = vpop.eup %7810  ;;  %v5658_v13 = vsel %vm3206_vm10, %v7809_v48, 0.0 }
0x109c   : > { %5659 = vadd.xlane.f32.xlu1 %v5658_v13  ;;  %v5661_v32 = vsel %vm3208_vm11, %v7811_v22, 0.0 }
0x109d   : > { %5662 = vadd.xlane.f32.xlu0 %v5661_v32 }
0x1117   : > { %v5642_v44 = vpop.xlane.xlu1 %5641 }
0x1118   : > { %7812 = vlog2.f32 %v5642_v44  ;;  %v5645_v8 = vpop.xlane.xlu0 %5644 }
0x1119   : > { %7814 = vlog2.f32 %v5645_v8 }
0x111e   : > { %v5648_v21 = vpop.xlane.xlu1 %5647 }
0x111f   : > { %7816 = vlog2.f32 %v5648_v21  ;;  %v5651_v51 = vpop.xlane.xlu0 %5650 }
0x1120   : > { %7818 = vlog2.f32 %v5651_v51 }
0x1122   : > { %v7813_v25 = vpop.eup %7812 }
0x1123   : > { %v7815_v46 = vpop.eup %7814  ;;  %v5665_v50 = vmul.f32 0.6931472, %v7813_v25 }
0x1124   : > { %v5667_v0 = vmul.f32 0.6931472, %v7815_v46  ;;  %v5654_v58 = vpop.xlane.xlu1 %5653 }
0x1125   : > { %v5680_v49 = vadd.f32 %v5665_v50, %v10246_v31  ;;  %7820 = vlog2.f32 %v5654_v58  ;;  %v5657_v54 = vpop.xlane.xlu0 %5656 }
0x1126   : > { %v5681_v61 = vadd.f32 %v5667_v0, %v10248_v30  ;;  %7822 = vlog2.f32 %v5657_v54 }
0x1127   : > { %v5688_v48 = vsub.f32 -2.7725887, %v5680_v49 }
0x1128   : > { %v5689_v22 = vsub.f32 %v8720_v53, %v5681_v61 }
0x1129   : > { %v7817_v13 = vpop.eup %7816  ;;  %v5696_v32 = vmul.f32 0.1, %v5688_v48  ;;  %v5660_v44 = vpop.xlane.xlu1 %5659 }
0x112a   : > { %v7819_v8 = vpop.eup %7818  ;;  %v5697_v21 = vmul.f32 0.1, %v5689_v22  ;;  %v5669_v51 = vmul.f32 0.6931472, %v7817_v13  ;;  %7824 = vlog2.f32 %v5660_v44  ;;  %v5663_v25 = vpop.xlane.xlu0 %5662 }
0x112b   : > { %v10282_v46 = vadd.f32 %v5696_v32, %v10086_v4  ;;  %v5671_v31 = vmul.f32 0.6931472, %v7819_v8  ;;  %7826 = vlog2.f32 %v5663_v25 }
0x112c   : > { %v5682_v50 = vadd.f32 %v5669_v51, %v10252_v28  ;;  %v10286_v30 = vadd.f32 %v5697_v21, %v10090_v16 }
0x112d   : > { %v5712_v0 = vadd.f32 %v10282_v46, %v10182_v35  ;;  %v5683_v58 = vadd.f32 %v5671_v31, %v10254_v45 }
0x112e   : > { %v5690_v49 = vsub.f32 -2.7725887, %v5682_v50  ;;  %v5713_v54 = vadd.f32 %v10286_v30, %v10178_v24 }
0x112f   : > { %v7821_v61 = vpop.eup %7820  ;;  %v10293_v48 = vmul.f32 10.0, %v5712_v0  ;;  %v5691_v4 = vsub.f32 %v8720_v53, %v5683_v58 }
0x1130   : > { %v7823_v22 = vpop.eup %7822  ;;  %v5698_v13 = vmul.f32 0.1, %v5690_v49  ;;  %v5673_v28 = vmul.f32 0.6931472, %v7821_v61  ;;  %v5721_v32 = vmul.f32 10.0, %v5713_v54 }
0x1131   : > { %v5728_v16 = vsel %vm3206_vm10, %v10293_v48, -inf  ;;  %v5699_v44 = vmul.f32 0.1, %v5691_v4  ;;  %v5675_v35 = vmul.f32 0.6931472, %v7823_v22 }
0x1132   : > { %v10299_v45 = vadd.f32 %v5698_v13, %v10103_v12  ;;  %v5684_v8 = vadd.f32 %v5673_v28, %v10258_v56  ;;  %v5729_v24 = vsel %vm3208_vm11, %v5721_v32, -inf }
0x1133   : > { %v5685_v21 = vadd.f32 %v5675_v35, %v10260_v26  ;;  %v5730_v51 = vmax.f32 %v5728_v16, %v5729_v24  ;;  %v10305_v25 = vadd.f32 %v5699_v44, %v10109_v43 }
0x1134   : > { %v7825_v31 = vpop.eup %7824  ;;  %v5714_v50 = vadd.f32 %v10299_v45, %v10201_v52  ;;  %v5692_v0 = vsub.f32 -2.7725887, %v5684_v8 }
0x1135   : > { %v7827_v58 = vpop.eup %7826  ;;  %v5693_v49 = vsub.f32 %v8720_v53, %v5685_v21  ;;  %v5677_v12 = vmul.f32 0.6931472, %v7825_v31  ;;  %v5731_v54 = vrot.slane %v5730_v51, 4  ;;  %v5715_v56 = vadd.f32 %v10305_v25, %v10197_v2 }
0x1136   : > { %v5722_v61 = vmul.f32 10.0, %v5714_v50  ;;  %v5700_v4 = vmul.f32 0.1, %v5692_v0  ;;  %v5679_v26 = vmul.f32 0.6931472, %v7827_v58 }
0x1137   : > { %v5701_v22 = vmul.f32 0.1, %v5693_v49  ;;  %v5686_v43 = vadd.f32 %v5677_v12, %v10266_v34  ;;  %v5732_v13 = vmax.f32 %v5730_v51, %v5731_v54  ;;  %v5723_v28 = vmul.f32 10.0, %v5715_v56 }
0x1138   : > { %v5737_v16 = vsel %vm3206_vm10, %v5722_v61, -inf  ;;  %v10315_v52 = vadd.f32 %v5700_v4, %v10119_v40  ;;  %v5687_v44 = vadd.f32 %v5679_v26, %v10268_v10 }
0x1139   : > { %v5694_v35 = vsub.f32 -2.7725887, %v5686_v43  ;;  %v5733_v8 = vrot.slane %v5732_v13, 2  ;;  %v5738_v24 = vsel %vm3208_vm11, %v5723_v28, -inf  ;;  %v10320_v2 = vadd.f32 %v5701_v22, %v10124_v15 }
0x113a   : > { %v5716_v21 = vadd.f32 %v10315_v52, %v10221_v36  ;;  %v5695_v34 = vsub.f32 %v8720_v53, %v5687_v44  ;;  %v5739_v51 = vmax.f32 %v5737_v16, %v5738_v24 }
0x113b   : > { %v5702_v31 = vmul.f32 0.1, %v5694_v35  ;;  %v5734_v50 = vmax.f32 %v5732_v13, %v5733_v8  ;;  %v5717_v40 = vadd.f32 %v10320_v2, %v10217_v3 }
0x113c   : > { %v5724_v0 = vmul.f32 10.0, %v5716_v21  ;;  %v5703_v10 = vmul.f32 0.1, %v5695_v34  ;;  %v5740_v58 = vrot.slane %v5739_v51, 4 }
0x113d   : > { %v10328_v49 = vadd.f32 %v5702_v31, %v10132_v33  ;;  %v5735_v12 = vrot.slane %v5734_v50, 1  ;;  %v5725_v15 = vmul.f32 10.0, %v5717_v40 }
0x113e   : > { %v5746_v54 = vsel %vm3206_vm10, %v5724_v0, -inf  ;;  %v5741_v56 = vmax.f32 %v5739_v51, %v5740_v58  ;;  %v10332_v36 = vadd.f32 %v5703_v10, %v10136_v37 }
0x113f   : > { %v5718_v4 = vadd.f32 %v10328_v49, %v10236_v42  ;;  %v10336_v26 = vmax.f32 %v5734_v50, %v5735_v12  ;;  %v5747_v3 = vsel %vm3208_vm11, %v5725_v15, -inf }
0x1140   : > { %v5742_v22 = vrot.slane %v5741_v56, 2  ;;  %v5748_v43 = vmax.f32 %v5746_v54, %v5747_v3  ;;  %v5719_v33 = vadd.f32 %v10332_v36, %v10232_v17 }
0x1141   : > { %v5726_v13 = vmul.f32 10.0, %v5718_v4  ;;  %v5764_v16 = vsub.f32 %v10293_v48, %v10336_v26  ;;  %v5765_v44 = vsub.f32 %v5721_v32, %v10336_v26 }
0x1142   : > { %v5743_v37 = vmax.f32 %v5741_v56, %v5742_v22  ;;  %v5749_v35 = vrot.slane %v5748_v43, 4  ;;  %v5727_v8 = vmul.f32 10.0, %v5719_v33 }
0x1143   : > { %v5755_v42 = vsel %vm3206_vm10, %v5726_v13, -inf  ;;  %v5772_v24 = vmul.f32 1.442695, %v5764_v16  ;;  %v5774_v21 = vmul.f32 1.442695, %v5765_v44 }
0x1144   : > { %v5744_v34 = vrot.slane %v5743_v37, 1  ;;  %v5750_v51 = vmax.f32 %v5748_v43, %v5749_v35  ;;  %v5756_v31 = vsel %vm3208_vm11, %v5727_v8, -inf }
0x1145   : > { %7828 = vpow2.f32 %v5772_v24  ;;  %v5757_v50 = vmax.f32 %v5755_v42, %v5756_v31 }
0x1146   : > { %7830 = vpow2.f32 %v5774_v21  ;;  %v10346_v17 = vmax.f32 %v5743_v37, %v5744_v34  ;;  %v5751_v40 = vrot.slane %v5750_v51, 2 }
0x1147   : > { %v5758_v48 = vrot.slane %v5757_v50, 4 }
0x1148   : > { %v5766_v32 = vsub.f32 %v5722_v61, %v10346_v17  ;;  %v5767_v10 = vsub.f32 %v5723_v28, %v10346_v17  ;;  %v5752_v58 = vmax.f32 %v5750_v51, %v5751_v40 }
0x1149   : > { %v5759_v12 = vmax.f32 %v5757_v50, %v5758_v48 }
0x114a   : > { %v5776_v54 = vmul.f32 1.442695, %v5766_v32  ;;  %v5778_v56 = vmul.f32 1.442695, %v5767_v10  ;;  %v5753_v4 = vrot.slane %v5752_v58, 1 }
0x114b   : > { %v5760_v3 = vrot.slane %v5759_v12, 2 }
0x114c   : > { %7832 = vpow2.f32 %v5776_v54  ;;  %v10350_v22 = vmax.f32 %v5752_v58, %v5753_v4 }
0x114d   : > { %7834 = vpow2.f32 %v5778_v56  ;;  %v5761_v43 = vmax.f32 %v5759_v12, %v5760_v3 }
0x114e   : > { %v5768_v33 = vsub.f32 %v5724_v0, %v10350_v22  ;;  %v5769_v16 = vsub.f32 %v5725_v15, %v10350_v22 }
0x114f   : > { %v7829_v44 = vpop.eup %7828  ;;  %v5762_v37 = vrot.slane %v5761_v43, 1 }
0x1150   : > { %v7831_v61 = vpop.eup %7830  ;;  %v5788_v28 = vsel %vm3206_vm10, %v7829_v44, 0.0  ;;  %v5780_v35 = vmul.f32 1.442695, %v5768_v33  ;;  %v5782_v42 = vmul.f32 1.442695, %v5769_v16 }
0x1151   : > { %v5789_v24 = vsel %vm3208_vm11, %v7831_v61, 0.0  ;;  %v10356_v21 = vmax.f32 %v5761_v43, %v5762_v37 }
0x1152   : > { %v5790_v34 = vadd.f32 %v5789_v24, %v5788_v28  ;;  %7836 = vpow2.f32 %v5780_v35 }
0x1153   : > { %7838 = vpow2.f32 %v5782_v42  ;;  %v5770_v51 = vsub.f32 %v5726_v13, %v10356_v21  ;;  %v5771_v0 = vsub.f32 %v5727_v8, %v10356_v21 }
0x1154   : > { %v5791_v31 = vrot.slane %v5790_v34, 4 }
0x1155   : > { %v5784_v15 = vmul.f32 1.442695, %v5770_v51  ;;  %v5786_v50 = vmul.f32 1.442695, %v5771_v0 }
0x1156   : > { %v7833_v40 = vpop.eup %7832  ;;  %v5792_v48 = vadd.f32 %v5791_v31, %v5790_v34 }
0x1157   : > { %v7835_v32 = vpop.eup %7834  ;;  %v5797_v10 = vsel %vm3206_vm10, %v7833_v40, 0.0  ;;  %7840 = vpow2.f32 %v5784_v15 }
0x1158   : > { %v5793_v58 = vrot.slane %v5792_v48, 2  ;;  %v5798_v12 = vsel %vm3208_vm11, %v7835_v32, 0.0  ;;  %7842 = vpow2.f32 %v5786_v50 }
0x1159   : > { %v5799_v54 = vadd.f32 %v5798_v12, %v5797_v10 }
0x115a   : > { %v5794_v56 = vadd.f32 %v5793_v58, %v5792_v48 }
0x115b   : > { %v5800_v4 = vrot.slane %v5799_v54, 4 }
0x115c   : > { %v7837_v3 = vpop.eup %7836  ;;  %v5795_v13 = vrot.slane %v5794_v56, 1 }
0x115d   : > { %v7839_v43 = vpop.eup %7838  ;;  %v5801_v8 = vadd.f32 %v5800_v4, %v5799_v54  ;;  %v5806_v33 = vsel %vm3206_vm10, %v7837_v3, 0.0 }
0x115e   : > { %v5796_v16 = vadd.f32 %v5795_v13, %v5794_v56  ;;  %v5807_v44 = vsel %vm3208_vm11, %v7839_v43, 0.0 }
0x115f   : > { %v5802_v37 = vrot.slane %v5801_v8, 2  ;;  %v5808_v61 = vadd.f32 %v5807_v44, %v5806_v33 }
0x1160   : > { %7844 = vlog2.f32 %v5796_v16 }
0x1161   : > { %v7841_v28 = vpop.eup %7840  ;;  %v5803_v35 = vadd.f32 %v5802_v37, %v5801_v8  ;;  %v5809_v42 = vrot.slane %v5808_v61, 4 }
0x1162   : > { %v7843_v24 = vpop.eup %7842  ;;  %v5815_v34 = vsel %vm3206_vm10, %v7841_v28, 0.0 }
0x1163   : > { %v5804_v51 = vrot.slane %v5803_v35, 1  ;;  %v5810_v0 = vadd.f32 %v5809_v42, %v5808_v61  ;;  %v5816_v31 = vsel %vm3208_vm11, %v7843_v24, 0.0 }
0x1164   : > { %v5817_v15 = vadd.f32 %v5816_v31, %v5815_v34 }
0x1165   : > { %v5805_v50 = vadd.f32 %v5804_v51, %v5803_v35  ;;  %v5811_v40 = vrot.slane %v5810_v0, 2 }
0x1166   : > { %v5818_v48 = vrot.slane %v5817_v15, 4 }
0x1167   : > { %7846 = vlog2.f32 %v5805_v50  ;;  %v5812_v32 = vadd.f32 %v5811_v40, %v5810_v0 }
0x1168   : > { %v5819_v10 = vadd.f32 %v5818_v48, %v5817_v15 }
0x1169   : > { %v5813_v58 = vrot.slane %v5812_v32, 1 }
0x116a   : > { %v7845_v12 = vpop.eup %7844  ;;  %v5820_v54 = vrot.slane %v5819_v10, 2 }
0x116b   : > { %v5825_v56 = vmul.f32 0.6931472, %v7845_v12  ;;  %v5814_v4 = vadd.f32 %v5813_v58, %v5812_v32 }
0x116c   : > { %v5821_v3 = vadd.f32 %v5820_v54, %v5819_v10 }
0x116d   : > { %v5832_v13 = vadd.f32 %v5825_v56, %v10336_v26  ;;  %7848 = vlog2.f32 %v5814_v4 }
0x116e   : > { %v5822_v43 = vrot.slane %v5821_v3, 1 }
0x116f   : > { %v5836_v8 = vsub.f32 %v8619_v6, %v5832_v13 }
0x1170   : > { %v5823_v33 = vadd.f32 %v5822_v43, %v5821_v3 }
0x1171   : > { %v7847_v16 = vpop.eup %7846  ;;  %v5840_v44 = vmul.f32 0.1, %v5836_v8 }
0x1172   : > { %v5827_v37 = vmul.f32 0.6931472, %v7847_v16  ;;  %7850 = vlog2.f32 %v5823_v33 }
0x1173   : > { %v5844_v61 = vadd.f32 %v5840_v44, %v10173_v47 }
0x1174   : > { %v5833_v28 = vadd.f32 %v5827_v37, %v10346_v17 }
0x1175   : > { %v10371_v35 = vadd.f32 %v5844_v61, %v8527_v41  ;;  %v10374_v42 = vadd.f32 %v5844_v61, %v8551_v60 }
0x1176   : > { %v5837_v26 = vsub.f32 %v8619_v6, %v5833_v28 }
0x1177   : > { %v7849_v24 = vpop.eup %7848  ;;  %v5857_v34 = vadd.f32 %v10371_v35, %v10286_v30  ;;  %v5856_v51 = vadd.f32 %v10374_v42, %v10282_v46 }
0x1178   : > { %v5841_v0 = vmul.f32 0.1, %v5837_v26  ;;  %v5829_v31 = vmul.f32 0.6931472, %v7849_v24 }
0x1179   : > { %v5865_v47 = vmul.f32 10.0, %v5857_v34  ;;  %v5864_v15 = vmul.f32 10.0, %v5856_v51 }
0x117a   : > { %v5845_v17 = vadd.f32 %v5841_v0, %v10190_v9  ;;  %v5834_v41 = vadd.f32 %v5829_v31, %v10350_v22 }
0x117b   : > { %v5875_v60 = vsel %vm3208_vm11, %v5865_v47, -inf  ;;  %v5872_v50 = vsel %vm3206_vm10, %v5864_v15, -inf }
0x117c   : > { %v7851_v40 = vpop.eup %7850  ;;  %5876 = vmax.xlane.f32.xlu0 %v5875_v60  ;;  %5873 = vmax.xlane.f32.xlu1 %v5872_v50  ;;  %v10386_v48 = vadd.f32 %v5845_v17, %v8536_v59  ;;  %v10389_v32 = vadd.f32 %v5845_v17, %v8560_v63  ;;  %v5838_v10 = vsub.f32 %v8619_v6, %v5834_v41 }
0x117d   : > { %v5831_v58 = vmul.f32 0.6931472, %v7851_v40 }
0x117e   : > { %v5859_v9 = vadd.f32 %v10386_v48, %v10305_v25  ;;  %v5858_v22 = vadd.f32 %v10389_v32, %v10299_v45  ;;  %v5842_v12 = vmul.f32 0.1, %v5838_v10 }
0x117f   : > { %v5835_v54 = vadd.f32 %v5831_v58, %v10356_v21 }
0x1180   : > { %v5867_v56 = vmul.f32 10.0, %v5859_v9  ;;  %v5866_v4 = vmul.f32 10.0, %v5858_v22  ;;  %v5846_v59 = vadd.f32 %v5842_v12, %v10210_v38 }
0x1181   : > { %v5839_v3 = vsub.f32 %v8619_v6, %v5835_v54 }
0x1182   : > { %v5881_v63 = vsel %vm3208_vm11, %v5867_v56, -inf  ;;  %v5878_v13 = vsel %vm3206_vm10, %v5866_v4, -inf  ;;  %v10402_v43 = vadd.f32 %v5846_v59, %v8545_v57  ;;  %v10405_v8 = vadd.f32 %v5846_v59, %v8578_v20 }
0x1183   : > { %5882 = vmax.xlane.f32.xlu0 %v5881_v63  ;;  %5879 = vmax.xlane.f32.xlu1 %v5878_v13  ;;  %v5843_v33 = vmul.f32 0.1, %v5839_v3 }
0x1184   : > { %v5861_v21 = vadd.f32 %v10402_v43, %v10320_v2  ;;  %v5860_v38 = vadd.f32 %v10405_v8, %v10315_v52 }
0x1185   : > { %v5847_v6 = vadd.f32 %v5843_v33, %v10228_v19 }
0x1186   : > { %v5869_v16 = vmul.f32 10.0, %v5861_v21  ;;  %v5868_v44 = vmul.f32 10.0, %v5860_v38 }
0x1187   : > { %v10413_v37 = vadd.f32 %v5847_v6, %v8572_v18  ;;  %v10416_v57 = vadd.f32 %v5847_v6, %v8587_v55 }
0x1188   : > { %v5887_v20 = vsel %vm3208_vm11, %v5869_v16, -inf  ;;  %v5884_v61 = vsel %vm3206_vm10, %v5868_v44, -inf }
0x1189   : > { %5888 = vmax.xlane.f32.xlu0 %v5887_v20  ;;  %5885 = vmax.xlane.f32.xlu1 %v5884_v61  ;;  %v5863_v28 = vadd.f32 %v10413_v37, %v10332_v36  ;;  %v5862_v19 = vadd.f32 %v10416_v57, %v10328_v49 }
0x118b   : > { %v5871_v26 = vmul.f32 10.0, %v5863_v28  ;;  %v5870_v24 = vmul.f32 10.0, %v5862_v19 }
0x118d   : > { %v5893_v18 = vsel %vm3208_vm11, %v5871_v26, -inf  ;;  %v5890_v34 = vsel %vm3206_vm10, %v5870_v24, -inf }
0x118e   : > { %5894 = vmax.xlane.f32.xlu0 %v5893_v18  ;;  %5891 = vmax.xlane.f32.xlu1 %v5890_v34 }
0x1209   : > { %v10426_v55 = vpop.xlane.xlu1 %5873  ;;  %v10428_v51 = vpop.xlane.xlu0 %5876 }
0x120a   : > { %v5896_v0 = vsub.f32 %v5864_v15, %v10426_v55  ;;  %v5897_v31 = vsub.f32 %v5865_v47, %v10428_v51 }
0x120c   : > { %v5904_v17 = vmul.f32 1.442695, %v5896_v0  ;;  %v5906_v41 = vmul.f32 1.442695, %v5897_v31 }
0x120e   : > { %7852 = vpow2.f32 %v5904_v17 }
0x120f   : > { %7854 = vpow2.f32 %v5906_v41 }
0x1210   : > { %v10432_v60 = vpop.xlane.xlu1 %5879  ;;  %v10434_v50 = vpop.xlane.xlu0 %5882 }
0x1211   : > { %v5898_v40 = vsub.f32 %v5866_v4, %v10432_v60  ;;  %v5899_v10 = vsub.f32 %v5867_v56, %v10434_v50 }
0x1213   : > { %v5908_v58 = vmul.f32 1.442695, %v5898_v40  ;;  %v5910_v9 = vmul.f32 1.442695, %v5899_v10 }
0x1215   : > { %7856 = vpow2.f32 %v5908_v58 }
0x1216   : > { %7858 = vpow2.f32 %v5910_v9  ;;  %v10438_v22 = vpop.xlane.xlu1 %5885  ;;  %v10440_v15 = vpop.xlane.xlu0 %5888 }
0x1217   : > { %v5900_v47 = vsub.f32 %v5868_v44, %v10438_v22  ;;  %v5901_v12 = vsub.f32 %v5869_v16, %v10440_v15 }
0x1218   : > { %v7853_v54 = vpop.eup %7852 }
0x1219   : > { %v7855_v59 = vpop.eup %7854  ;;  %v5912_v3 = vmul.f32 1.442695, %v5900_v47  ;;  %v5914_v63 = vmul.f32 1.442695, %v5901_v12  ;;  %v5920_v4 = vsel %vm3206_vm10, %v7853_v54, 0.0 }
0x121a   : > { %5921 = vadd.xlane.f32.xlu1 %v5920_v4  ;;  %v5923_v56 = vsel %vm3208_vm11, %v7855_v59, 0.0 }
0x121b   : > { %7860 = vpow2.f32 %v5912_v3  ;;  %v10446_v13 = vpop.xlane.xlu1 %5891  ;;  %v10448_v33 = vpop.xlane.xlu0 %5894  ;;  %5924 = vadd.xlane.f32.xlu0 %v5923_v56 }
0x121c   : > { %7862 = vpow2.f32 %v5914_v63  ;;  %v5902_v21 = vsub.f32 %v5870_v24, %v10446_v13  ;;  %v5903_v38 = vsub.f32 %v5871_v26, %v10448_v33 }
0x121e   : > { %v5916_v6 = vmul.f32 1.442695, %v5902_v21  ;;  %v5918_v16 = vmul.f32 1.442695, %v5903_v38 }
0x121f   : > { %v7857_v44 = vpop.eup %7856 }
0x1220   : > { %v7859_v20 = vpop.eup %7858  ;;  %7864 = vpow2.f32 %v5916_v6  ;;  %v5926_v61 = vsel %vm3206_vm10, %v7857_v44, 0.0 }
0x1221   : > { %7866 = vpow2.f32 %v5918_v16  ;;  %5927 = vadd.xlane.f32.xlu1 %v5926_v61  ;;  %v5929_v28 = vsel %vm3208_vm11, %v7859_v20, 0.0 }
0x1222   : > { %5930 = vadd.xlane.f32.xlu0 %v5929_v28 }
0x1225   : > { %v7861_v19 = vpop.eup %7860 }
0x1226   : > { %v7863_v18 = vpop.eup %7862  ;;  %v5932_v34 = vsel %vm3206_vm10, %v7861_v19, 0.0 }
0x1227   : > { %5933 = vadd.xlane.f32.xlu1 %v5932_v34  ;;  %v5935_v24 = vsel %vm3208_vm11, %v7863_v18, 0.0 }
0x1228   : > { %5936 = vadd.xlane.f32.xlu0 %v5935_v24 }
0x122a   : > { %v7865_v26 = vpop.eup %7864 }
0x122b   : > { %v7867_v0 = vpop.eup %7866  ;;  %v5938_v31 = vsel %vm3206_vm10, %v7865_v26, 0.0 }
0x122c   : > { %5939 = vadd.xlane.f32.xlu1 %v5938_v31  ;;  %v5941_v17 = vsel %vm3208_vm11, %v7867_v0, 0.0 }
0x122d   : > { %5942 = vadd.xlane.f32.xlu0 %v5941_v17 }
0x12a7   : > { %v5922_v41 = vpop.xlane.xlu1 %5921 }
0x12a8   : > { %7868 = vlog2.f32 %v5922_v41  ;;  %v5925_v40 = vpop.xlane.xlu0 %5924 }
0x12a9   : > { %7870 = vlog2.f32 %v5925_v40 }
0x12ae   : > { %v5928_v10 = vpop.xlane.xlu1 %5927 }
0x12af   : > { %7872 = vlog2.f32 %v5928_v10  ;;  %v5931_v58 = vpop.xlane.xlu0 %5930 }
0x12b0   : > { %7874 = vlog2.f32 %v5931_v58 }
0x12b2   : > { %v7869_v9 = vpop.eup %7868 }
0x12b3   : > { %v7871_v47 = vpop.eup %7870  ;;  %v5945_v12 = vmul.f32 0.6931472, %v7869_v9 }
0x12b4   : > { %v5947_v54 = vmul.f32 0.6931472, %v7871_v47  ;;  %v5934_v59 = vpop.xlane.xlu1 %5933 }
0x12b5   : > { %v5960_v3 = vadd.f32 %v5945_v12, %v10426_v55  ;;  %7876 = vlog2.f32 %v5934_v59  ;;  %v5937_v63 = vpop.xlane.xlu0 %5936 }
0x12b6   : > { %v5961_v4 = vadd.f32 %v5947_v54, %v10428_v51  ;;  %7878 = vlog2.f32 %v5937_v63 }
0x12b7   : > { %v5968_v56 = vsub.f32 -2.7725887, %v5960_v3 }
0x12b8   : > { %v5969_v21 = vsub.f32 %v8720_v53, %v5961_v4 }
0x12b9   : > { %v7873_v38 = vpop.eup %7872  ;;  %v5976_v6 = vmul.f32 0.1, %v5968_v56  ;;  %v5940_v16 = vpop.xlane.xlu1 %5939 }
0x12ba   : > { %v7875_v44 = vpop.eup %7874  ;;  %v5977_v20 = vmul.f32 0.1, %v5969_v21  ;;  %v5949_v61 = vmul.f32 0.6931472, %v7873_v38  ;;  %7880 = vlog2.f32 %v5940_v16  ;;  %v5943_v28 = vpop.xlane.xlu0 %5942 }
0x12bb   : > { %v5984_v19 = vadd.f32 %v5976_v6, %v10282_v46  ;;  %v5951_v18 = vmul.f32 0.6931472, %v7875_v44  ;;  %7882 = vlog2.f32 %v5943_v28 }
0x12bc   : > { %v5985_v55 = vadd.f32 %v5977_v20, %v10286_v30  ;;  %v5962_v51 = vadd.f32 %v5949_v61, %v10432_v60 }
0x12bd   : > { %v5992_v34 = vadd.f32 %v5984_v19, %v10374_v42  ;;  %v5963_v24 = vadd.f32 %v5951_v18, %v10434_v50 }
0x12be   : > { %v5993_v26 = vadd.f32 %v5985_v55, %v10371_v35  ;;  %v5970_v0 = vsub.f32 -2.7725887, %v5962_v51 }
0x12bf   : > { %v7877_v31 = vpop.eup %7876  ;;  %v6000_v17 = vmul.f32 10.0, %v5992_v34  ;;  %v5971_v41 = vsub.f32 %v8720_v53, %v5963_v24 }
0x12c0   : > { %v7879_v40 = vpop.eup %7878  ;;  %v6001_v10 = vmul.f32 10.0, %v5993_v26  ;;  %v5978_v46 = vmul.f32 0.1, %v5970_v0  ;;  %v5953_v58 = vmul.f32 0.6931472, %v7877_v31 }
0x12c1   : > { %v6008_v9 = vmul.f32 1.442695, %v6000_v17  ;;  %v5979_v47 = vmul.f32 0.1, %v5971_v41  ;;  %v5955_v30 = vmul.f32 0.6931472, %v7879_v40 }
0x12c2   : > { %v6010_v12 = vmul.f32 1.442695, %v6001_v10  ;;  %v5986_v60 = vadd.f32 %v5978_v46, %v10299_v45  ;;  %v5964_v42 = vadd.f32 %v5953_v58, %v10438_v22 }
0x12c3   : > { %7884 = vpow2.f32 %v6008_v9  ;;  %v5987_v35 = vadd.f32 %v5979_v47, %v10305_v25  ;;  %v5965_v50 = vadd.f32 %v5955_v30, %v10440_v15 }
0x12c4   : > { %v7881_v54 = vpop.eup %7880  ;;  %7886 = vpow2.f32 %v6010_v12  ;;  %v5994_v59 = vadd.f32 %v5986_v60, %v10389_v32  ;;  %v5972_v3 = vsub.f32 -2.7725887, %v5964_v42 }
0x12c5   : > { %v7883_v63 = vpop.eup %7882  ;;  %v5995_v4 = vadd.f32 %v5987_v35, %v10386_v48  ;;  %v5973_v56 = vsub.f32 %v8720_v53, %v5965_v50  ;;  %v5957_v21 = vmul.f32 0.6931472, %v7881_v54 }
0x12c6   : > { %v6002_v38 = vmul.f32 10.0, %v5994_v59  ;;  %v5980_v45 = vmul.f32 0.1, %v5972_v3  ;;  %v5959_v6 = vmul.f32 0.6931472, %v7883_v63 }
0x12c7   : > { %v6003_v22 = vmul.f32 10.0, %v5995_v4  ;;  %v5981_v16 = vmul.f32 0.1, %v5973_v56  ;;  %v5966_v25 = vadd.f32 %v5957_v21, %v10446_v13 }
0x12c8   : > { %v6012_v44 = vmul.f32 1.442695, %v6002_v38  ;;  %v5988_v15 = vadd.f32 %v5980_v45, %v10315_v52  ;;  %v5967_v20 = vadd.f32 %v5959_v6, %v10448_v33 }
0x12c9   : > { %v6014_v32 = vmul.f32 1.442695, %v6003_v22  ;;  %v5989_v61 = vadd.f32 %v5981_v16, %v10320_v2  ;;  %v5974_v28 = vsub.f32 -2.7725887, %v5966_v25 }
0x12ca   : > { %7888 = vpow2.f32 %v6012_v44  ;;  %v5996_v48 = vadd.f32 %v5988_v15, %v10405_v8  ;;  %v5975_v19 = vsub.f32 %v8720_v53, %v5967_v20 }
0x12cb   : > { %7890 = vpow2.f32 %v6014_v32  ;;  %v5997_v18 = vadd.f32 %v5989_v61, %v10402_v43  ;;  %v5982_v55 = vmul.f32 0.1, %v5974_v28  ;;  %v6079_v32 = vsel %vm3206_vm10, 1.0, %v7983_v39 }
0x12cc   : > { %v6004_v51 = vmul.f32 10.0, %v5996_v48  ;;  %v5983_v13 = vmul.f32 0.1, %v5975_v19 }
0x12cd   : > { %v7885_v34 = vpop.eup %7884  ;;  %v6005_v24 = vmul.f32 10.0, %v5997_v18  ;;  %v5990_v52 = vadd.f32 %v5982_v55, %v10328_v49 }
0x12ce   : > { %v7887_v33 = vpop.eup %7886  ;;  %v6024_v26 = vmul.f32 %v7885_v34, %v8445_v27  ;;  %v6016_v2 = vmul.f32 1.442695, %v6004_v51  ;;  %v5991_v0 = vadd.f32 %v5983_v13, %v10332_v36 }
0x12cf   : > { %v6025_v8 = vmul.f32 %v7887_v33, %v8443_v23  ;;  %v6018_v31 = vmul.f32 1.442695, %v6005_v24  ;;  %v5998_v53 = vadd.f32 %v5990_v52, %v10416_v57 }
0x12d0   : > { %v6032_v43 = vsel %vm3206_vm10, %v6024_v26, 0.0  ;;  %7892 = vpow2.f32 %v6016_v2  ;;  %v5999_v17 = vadd.f32 %v5991_v0, %v10413_v37 }
0x12d1   : > { %7894 = vpow2.f32 %v6018_v31  ;;  %v6006_v41 = vmul.f32 10.0, %v5998_v53  ;;  %v6033_v49 = vsel %vm3208_vm11, %v6025_v8, 0.0 }
0x12d2   : > { %v6007_v40 = vmul.f32 10.0, %v5999_v17  ;;  %v6034_v10 = vadd.f32 %v6033_v49, %v6032_v43 }
0x12d3   : > { %v6020_v27 = vmul.f32 1.442695, %v6006_v41 }
0x12d4   : > { %v7889_v46 = vpop.eup %7888  ;;  %v6022_v58 = vmul.f32 1.442695, %v6007_v40  ;;  %v6035_v9 = vrot.slane %v6034_v10, 4  ;;  %v7985_v40 = vmov 1.0  }
0x12d5   : > { %v7891_v36 = vpop.eup %7890  ;;  %v6026_v23 = vmul.f32 %v7889_v46, %v8449_v14  ;;  %7896 = vpow2.f32 %v6020_v27 }
0x12d6   : > { %v6027_v57 = vmul.f32 %v7891_v36, %v8447_v29  ;;  %7898 = vpow2.f32 %v6022_v58  ;;  %v6036_v60 = vadd.f32 %v6035_v9, %v6034_v10 }
0x12d7   : > { %v6041_v47 = vsel %vm3206_vm10, %v6026_v23, 0.0 }
0x12d8   : > { %v6042_v37 = vsel %vm3208_vm11, %v6027_v57, 0.0  ;;  %v6037_v3 = vrot.slane %v6036_v60, 2 }
0x12d9   : > { %v6043_v30 = vadd.f32 %v6042_v37, %v6041_v47 }
0x12da   : > { %v7893_v12 = vpop.eup %7892 }
0x12db   : > { %v7895_v42 = vpop.eup %7894  ;;  %v6028_v35 = vmul.f32 %v7893_v12, %v8492_v1  ;;  %v6044_v50 = vrot.slane %v6043_v30, 4  ;;  %v6038_v1 = vadd.f32 %v6037_v3, %v6036_v60 }
0x12dc   : > { %v6029_v54 = vmul.f32 %v7895_v42, %v8490_v62 }
0x12dd   : > { %v6045_v59 = vadd.f32 %v6044_v50, %v6043_v30  ;;  %v6050_v14 = vsel %vm3206_vm10, %v6028_v35, 0.0  ;;  %v6039_v61 = vrot.slane %v6038_v1, 1 }
0x12de   : > { %v6051_v29 = vsel %vm3208_vm11, %v6029_v54, 0.0 }
0x12df   : > { %v7897_v63 = vpop.eup %7896  ;;  %v6046_v4 = vrot.slane %v6045_v59, 2  ;;  %v6052_v56 = vadd.f32 %v6051_v29, %v6050_v14  ;;  %v6040_v55 = vadd.f32 %v6039_v61, %v6038_v1 }
0x12e0   : > { %v7899_v21 = vpop.eup %7898  ;;  %v6030_v38 = vmul.f32 %v7897_v63, %v8500_v5 }
0x12e1   : > { %v6031_v45 = vmul.f32 %v7899_v21, %v8498_v7  ;;  %v6047_v6 = vadd.f32 %v6046_v4, %v6045_v59  ;;  %v6053_v22 = vrot.slane %v6052_v56, 4  ;;  %v6150_v7 = vsub.f32 %v6079_v32, %v6079_v32 }
0x12e2   : > { %v6059_v16 = vsel %vm3206_vm10, %v6030_v38, 0.0 }
0x12e3   : > { %v6054_v62 = vadd.f32 %v6053_v22, %v6052_v56  ;;  %v6060_v25 = vsel %vm3208_vm11, %v6031_v45, 0.0  ;;  %v6048_v44 = vrot.slane %v6047_v6, 1  ;;  %v6151_v52 = vand.u32 4294901760, %v6150_v7 }
0x12e4   : > { %v6061_v15 = vadd.f32 %v6060_v25, %v6059_v16 }
0x12e5   : > { %v6055_v20 = vrot.slane %v6054_v62, 2  ;;  %v6049_v5 = vadd.f32 %v6048_v44, %v6047_v6  ;;  %v6152_v39 = vsub.f32 %v6150_v7, %v6151_v52 }
0x12e6   : > { %v6062_v28 = vrot.slane %v6061_v15, 4 }
0x12e7   : > { %v6056_v48 = vadd.f32 %v6055_v20, %v6054_v62  ;;  %v6073_v24 = vsel %vm6072_vm12, %v6049_v5, %v6040_v55  ;;  %v6153_v53 = vand.u32 4294901760, %v6152_v39 }
0x12e8   : > { %v6063_v19 = vadd.f32 %v6062_v28, %v6061_v15 }
0x12e9   : > { %v6057_v18 = vrot.slane %v6056_v48, 1 }
0x12ea   : > { %v6064_v51 = vrot.slane %v6063_v19, 2 }
0x12eb   : > { %v6058_v13 = vadd.f32 %v6057_v18, %v6056_v48 }
0x12ec   : > { %v6065_v34 = vadd.f32 %v6064_v51, %v6063_v19 }
0x12ed   : > { %v6075_v33 = vsel %vm6074_vm13, %v6058_v13, %v6073_v24 }
0x12ee   : > { %v6066_v26 = vrot.slane %v6065_v34, 1 }
0x12f0   : > { %v6067_v2 = vadd.f32 %v6066_v26, %v6065_v34 }
0x12f2   : > { %v6077_v0 = vsel %vm6076_vm14, %v6067_v2, %v6075_v33 }
0x12f3   : > { %v6081_v8 = vsel %vm3206_vm10, %v6077_v0, 0 }
0x12f4   : > { %v6084_v31 = vand.u32 4294901760, %v6081_v8 }
0x12f6   : > { %6979 = vmatpush3.xpose.msra.mxu1 %v6084_v31  ;;  %v6161_v43 = vsub.f32 %v6081_v8, %v6084_v31 }
0x12f7   : > { %6983 = vmatprep.subr.mxu1 %v7982_v11 }
0x12f8   : > { %v6162_v17 = vand.u32 4294901760, %v6161_v43 }
0x12f9   : > { %6981 = vmatmul.mubr.f32.vlgmr.msra.gmra.mrb[6].mxu1 %v6153_v53 }
0x12fa   : > { %v6163_v41 = vsub.f32 %v6161_v43, %v6162_v17  ;;  %6985 = vmatprep.mubr.msk.f32.mxu1 %vm7981_vm4, %v7982_v11 }
0x12fc   : > { %v6164_v49 = vand.u32 4294901760, %v6163_v41 }
0x12fe   : > { %6984 = vmatpush3.xpose.msra.mxu1 %v6164_v49 }
0x12ff   : > { %6988 = vmatprep.subr.mxu1 %v7982_v11 }
0x1301   : > { %6986 = vmatmul.mubr.msk.f32.vlgmr.msra.gmra.mrb[6].mxu1 %vm3206_vm10, %v7985_v40 }
0x1302   : > { %6989 = vmatpush3.xpose.msra.mxu1 %v6161_v43  ;;  %6990 = vmatprep.mubr.msk.f32.mxu1 %vm7981_vm4, %v7982_v11 }
0x1303   : > { %6993 = vmatprep.subr.mxu1 %v7982_v11 }
0x1309   : > { %6991 = vmatmul.mubr.f32.vlgmr.msra.gmra.mrb[6].mxu1 %v6150_v7 }
0x130a   : > { %6994 = vmatpush3.xpose.msra.mxu1 %v6084_v31  ;;  %6995 = vmatprep.mubr.msk.f32.mxu1 %vm7981_vm4, %v7982_v11 }
0x130b   : > { %6998 = vmatprep.subr.mxu1 %v7982_v11 }
0x1311   : > { %6996 = vmatmul.mubr.f32.vlgmr.msra.gmra.mrb[6].mxu1 %v6151_v52 }
0x1312   : > { %6999 = vmatpush3.xpose.msra.mxu1 %v6162_v17  ;;  %7000 = vmatprep.mubr.msk.f32.mxu1 %vm7981_vm4, %v7982_v11 }
0x1313   : > { %7003 = vmatprep.subr.mxu1 %v7982_v11 }
0x1319   : > { %7001 = vmatmul.mubr.msk.f32.vlgmr.msra.gmra.mrb[6].mxu1 %vm3206_vm10, %v7985_v40 }
0x131a   : > { %7004 = vmatpush3.xpose.msra.mxu1 %v6084_v31  ;;  %7005 = vmatprep.mubr.msk.f32.mxu1 %vm7981_vm4, %v7982_v11 }
0x1321   : > { %7006 = vmatmul.mubr.msk.f32.vlgmr.msra.gmra.mrb[6].mxu1 %vm3206_vm10, %v7985_v40 }
0x13f4   : > { %v6525_v10 = vpop.f32.mrb[6].mxu1 }
0x13f5   : > { %v6529_v27 = vmul.f32 10.0, %v6525_v10  ;;  %v7007_v46 = vpop.f32.mrb[7].mxu1 }
0x13f7   : > { %6531 = vst.msk [vmem:[%s194_s19] sm:$0x1] %vm6530_vm15, %v6529_v27 }
0x13f8   : > { %7913 = shalt.err (!%p7910_p5)
}
0x13f9   : > { %s7914_s5 = scalar_lea.hbm %s10528_s27, 16  ;;  %s7918_s8 = scalar_lea.hbm %s10578_s3, 32 }
0x13fa   : > { %p7915_p6 = scmp.ne.s32.totalorder %s10528_s27, %s7914_s5  ;;  %p7919_p10 = scmp.lt.u32.totalorder %s10528_s27, %s10578_s3 }
0x13fb   : > { %p7920_p11 = scmp.lt.u32.totalorder %s7918_s8, %s7914_s5  ;;  %p7922_p13 = scmp.lt.u32.totalorder %s7914_s5, %s10528_s27 }
0x13fc   : > { %p7916_p7 = pnand %p7915_p6, %p8047_p4 }
0x13fd   : > { %p7921_p12 = por %p7920_p11, %p7919_p10 }
0x13fe   : > { %p7917_p9 = pneg %p7916_p7 }
0x13ff   : > { %p7923_p0 = por %p7922_p13, %p7921_p12 }
0x1401   : > { %p7924_p1 = pnand %p7923_p0, %p7917_p9 }
0x1403   : > { %7927 = shalt.err (!%p7924_p1)
}
0x1404   : > { %7183 = dma.vmem_to_hbm [thread:$0]  (%p8047_p4), %s10530_s21, 16, %s10528_s27, %s6533_s28  }
0x1405 PF: > { %p7189_p2 = scmp.ge.s32.totalorder %s7978_s17, 2  ;;  %s6558_s11 = sand.u32 1, %s7958_s12  }
0x1406   : > { %s6559_s18 = scalar_lea.sflag [#allocation3], %s6558_s11 }
0x1407   : > { %p7186_p3 = pnand %p7189_p2, %p8054_p8 }
0x1409   : > { %7953 = dma.done.wait (!%p7186_p3), %s6559_s18, 16  }
0x140a   : > { %7955 = vsyncadd (!%p7186_p3), %s6559_s18, 4294967280  ;;  %s16_s17 = sadd.s32 1, %s7978_s17   ;;  %s10583_s12 = smov %s7962_s13 }
0x140b   : > { %p13_p5 = scmp.ge.s32.totalorder %s16_s17, 4   ;;  %s10584_s13 = smov %s7966_s14 }
0x140c   : > { %s10585_s14 = smov %s8060_s25  ;;  %s10586_s15 = smov %s7974_s16 }
0x140d   : > { %s10587_s16 = smov %s10589_s20  ;;  %15 = sbr.rel (!%p13_p5) target bundleno = 4 (0x4), region = 70 }
0x1414   :  { %6563 = vsyncpa [#allocation3], 1 }
0x1415   :  { %6565 = vsyncpa [#allocation3 + $0x1], 1 }

// kernel: transformer_agg_forward.2
= control target key start
LH: loop header
LB: loop body
LE: loop exit
PB: predicated region body
PF: predicated region fallthrough
CT: control target
= control target key end

     0   :  { %s16097_s24 = smov 0   ;;  %s17583_s0 = inlined_call_operand.vmem [shape: f32[6,8,32], index: 0, kind: input, shape index: {}]   ;;  %s17584_s1 = inlined_call_operand.vmem [shape: f32[32,96], index: 1, kind: input, shape index: {}]   ;;  %s17585_s2 = inlined_call_operand.vmem [shape: f32[1,96], index: 2, kind: input, shape index: {}]   ;;  %s17586_s3 = inlined_call_operand.vmem [shape: f32[32,32], index: 3, kind: input, shape index: {}]   ;;  %s17587_s4 = inlined_call_operand.vmem [shape: f32[32,32], index: 4, kind: input, shape index: {}]   ;;  %s17588_s5 = inlined_call_operand.vmem [shape: f32[32,32], index: 5, kind: input, shape index: {}]   ;;  %s17589_s6 = inlined_call_operand.vmem [shape: f32[8,32], index: 6, kind: input, shape index: {}]   ;;  %s17590_s7 = inlined_call_operand.vmem [shape: f32[6,8,32], index: 7, kind: output, shape index: {}]  }
   0x1 LB: > { %s13905_s25 = sadd.s32 4294967295, %s16044_s24   ;;  %p13909_p0 = scmp.ge.s32.totalorder %s16044_s24, 1  ;;  %s16044_s24 = sphi %s16097_s24, %s17_s24  }
   0x2   : > { %p238_p1 = scmp.lt.s32.totalorder %s16044_s24, 3 }
   0x4   : > { %p239_p2 = pnand %p13909_p0, %p238_p1 }
   0x5   : > { %v285_v0 = vld [vmem:[%s17584_s1] sm:$0xff] (!%p239_p2)  ;;  %v286_v1 = vld [vmem:[%s17584_s1 + $0x8] sm:$0xff] (!%p239_p2)  ;;  %v287_v2 = vld [vmem:[%s17584_s1 + $0x10] sm:$0xff] (!%p239_p2)  ;;  %v16046_v3 = vmov (!%p239_p2), 0.0|0.0   ;;  %vm16047_vm0 = vmmov (!%p239_p2), 0   ;;  %v16048_v8 = vmov (!%p239_p2), 0.0  }
   0x6   : > { %242 = sbr.rel (%p239_p2) target bundleno = 3237 (0xca5), region = 48  ;;  %15506 = vmatprep.subr.bf16.mxu0 (!%p239_p2), %v16046_v3  ;;  %v307_v4 = vand.u32 (!%p239_p2), 4294901760, %v285_v0  ;;  %v310_v5 = vand.u32 (!%p239_p2), 4294901760, %v286_v1  ;;  %v288_v6 = vld [vmem:[%s17584_s1 + $0x18] sm:$0xff] (!%p239_p2)  ;;  %v313_v7 = vand.u32 (!%p239_p2), 4294901760, %v287_v2  ;;  %14386 = vmatprep.mubr.msk.f32.mxu0 (!%p239_p2), %vm16047_vm0, %v16048_v8  ;;  %vm296_vm1 = vcmask (!%p239_p2), 261120  }
   0x7   : > { %s270_s11 = smul.u32 (!%p239_p2), 3, %s13905_s25  ;;  %v316_v9 = vand.u32 (!%p239_p2), 4294901760, %v288_v6  ;;  %14480 = vmatprep.subr.mxu1 (!%p239_p2), %v16048_v8  ;;  %14482 = vmatprep.mubr.msk.f32.mxu1 (!%p239_p2), %vm16047_vm0, %v16048_v8  ;;  %v13912_v55 = vld [vmem:[%s17585_s2] ss:$0 sm:$0xff] (!%p239_p2)  ;;  %s16049_s18 = smov (!%p239_p2), 120   ;;  %vm921_vm2 = vcmask (!%p239_p2), 64512  }
   0x8   : > { %v16123_v10 = vpack.c.bf16 (!%p239_p2), %v310_v5, %v307_v4  ;;  %v16125_v11 = vsub.f32 (!%p239_p2), %v285_v0, %v307_v4  ;;  %v16127_v12 = vsub.f32 (!%p239_p2), %v286_v1, %v310_v5  ;;  %v16132_v14 = vsub.f32 (!%p239_p2), %v287_v2, %v313_v7  ;;  %s16050_s19 = smov (!%p239_p2), 96   ;;  %s16051_s20 = smov (!%p239_p2), 112  }
   0x9   : > { %p271_p3 = scmp.lt.s32.totalorder (!%p239_p2), %s270_s11, 5  ;;  %v16130_v13 = vpack.c.bf16 (!%p239_p2), %v316_v9, %v313_v7  ;;  %v16134_v15 = vsub.f32 (!%p239_p2), %v288_v6, %v316_v9  ;;  %s16052_s21 = smov (!%p239_p2), 104   ;;  %vm11951_vm3 = vcmask (!%p239_p2), 130048   ;;  %vm11955_vm4 = vcmask (!%p239_p2), 195584  }
   0xa   : > { %15508 = vmatpush3.bf16.msra.mxu0 (!%p239_p2), %v16123_v10  ;;  %v408_v16 = vand.u32 (!%p239_p2), 4294901760, %v16125_v11  ;;  %v415_v17 = vand.u32 (!%p239_p2), 4294901760, %v16127_v12  ;;  %v422_v22 = vand.u32 (!%p239_p2), 4294901760, %v16132_v14  ;;  %v15519_v51 = vpack.c.bf16 (!%p239_p2), %v16127_v12, %v16125_v11  ;;  %s16053_s22 = smov (!%p239_p2), 64   ;;  %s16054_s23 = smov (!%p239_p2), 8  }
   0xb   : > { %15509 = vmatprep.subr.bf16.mxu0 (!%p239_p2), %v16046_v3  ;;  %v429_v23 = vand.u32 (!%p239_p2), 4294901760, %v16134_v15  ;;  %v15522_v52 = vpack.c.bf16 (!%p239_p2), %v16134_v15, %v16132_v14  ;;  %s16055_s25 = smov (!%p239_p2), 16   ;;  %s16056_s13 = smov (!%p239_p2), 24  }
   0xc   : > { %v409_v20 = vsub.f32 (!%p239_p2), %v16125_v11, %v408_v16  ;;  %v416_v26 = vsub.f32 (!%p239_p2), %v16127_v12, %v415_v17  ;;  %v423_v36 = vsub.f32 (!%p239_p2), %v16132_v14, %v422_v22  ;;  %v15531_v53 = vpack.c.bf16 (!%p239_p2), %v415_v17, %v408_v16 }
   0xd   : > { %s17592_s11 = smov (!%p271_p3, %s270_s11), 5  ;;  %v430_v37 = vsub.f32 %v16134_v15, %v429_v23  ;;  %v15534_v54 = vpack.c.bf16 %v429_v23, %v422_v22 }
   0xe   : > { %s13910_s12 = sshll.u32 %s17592_s11, 3  ;;  %15511 = vmatpush3.bf16.msra.mxu0 %v16130_v13  ;;  %v410_v34 = vand.u32 4294901760, %v409_v20  ;;  %v417_v35 = vand.u32 4294901760, %v416_v26  ;;  %v424_v44 = vand.u32 4294901760, %v423_v36 }
   0xf   : > { %s16147_s15 = scalar_lea.vmem %s17583_s0, %s13910_s12  ;;  %15512 = vmatprep.subr.bf16.mxu0 %v16046_v3  ;;  %v431_v45 = vand.u32 4294901760, %v430_v37  ;;  %s280_s27 = scalar_lea.vmem %s17590_s7, %s13910_s12 }
  0x10   : > { %v282_v18 = vld [vmem:[%s16147_s15] sm:$0xff]  ;;  %v283_v19 = vld [vmem:[%s16147_s15 + $0x8] sm:$0xff]  ;;  %v284_v21 = vld [vmem:[%s16147_s15 + $0x10] sm:$0xff]  ;;  %v15513_v43 = vpack.c.bf16 %v417_v35, %v410_v34 }
  0x11   : > { %v298_v24 = vsel %vm296_vm1, %v282_v18, 0  ;;  %v301_v25 = vsel %vm296_vm1, %v283_v19, 0  ;;  %v304_v27 = vsel %vm296_vm1, %v284_v21, 0  ;;  %v15516_v49 = vpack.c.bf16 %v431_v45, %v424_v44 }
  0x12   : > { %v16165_v28 = vand.u32 4294901760, %v298_v24  ;;  %v16167_v29 = vand.u32 4294901760, %v301_v25  ;;  %v16169_v30 = vand.u32 4294901760, %v304_v27 }
  0x14   : > { %v376_v31 = vsub.f32 %v298_v24, %v16165_v28  ;;  %v386_v32 = vsub.f32 %v301_v25, %v16167_v29  ;;  %v396_v33 = vsub.f32 %v304_v27, %v16169_v30 }
  0x16   : > { %v377_v38 = vand.u32 4294901760, %v376_v31  ;;  %v387_v39 = vand.u32 4294901760, %v386_v32  ;;  %v397_v42 = vand.u32 4294901760, %v396_v33 }
  0x18   : > { %v378_v40 = vsub.f32 %v376_v31, %v377_v38  ;;  %v388_v41 = vsub.f32 %v386_v32, %v387_v39  ;;  %v398_v48 = vsub.f32 %v396_v33, %v397_v42 }
  0x1a   : > { %v379_v46 = vand.u32 4294901760, %v378_v40  ;;  %v389_v47 = vand.u32 4294901760, %v388_v41  ;;  %v399_v50 = vand.u32 4294901760, %v398_v48 }
  0x1c   : > { %14387 = vmatmul.mubr.f32.vlgmr.msra.gmra.mrb[0].mxu0 %v379_v46 }
  0x1d   : > { %14389 = vmatprep.mubr.msk.f32.mxu0 %vm16047_vm0, %v16048_v8  ;;  %15514 = vmatpush3.bf16.msra.mxu0 %v15513_v43 }
  0x1e   : > { %15515 = vmatprep.subr.bf16.mxu0 %v16046_v3 }
  0x20   : > { %14390 = vmatmul.mubr.f32.gmra.mrb[2].mxu0 %v389_v47 }
  0x21   : > { %14392 = vmatprep.mubr.msk.f32.mxu0 %vm16047_vm0, %v16048_v8  ;;  %15517 = vmatpush3.bf16.msra.mxu0 %v15516_v49 }
  0x22   : > { %15518 = vmatprep.subr.bf16.mxu0 %v16046_v3 }
  0x24   : > { %14393 = vmatmul.mubr.f32.gmra.mrb[4].mxu0 %v399_v50 }
  0x25   : > { %14403 = vmatprep.mubr.msk.f32.mxu0 %vm16047_vm0, %v16048_v8 }
  0x28   : > { %14404 = vmatmul.mubr.f32.vlgmr.msra.gmra.mrb[0].mxu0 %v16165_v28 }
  0x29   : > { %14406 = vmatprep.mubr.msk.f32.mxu0 %vm16047_vm0, %v16048_v8  ;;  %15520 = vmatpush3.bf16.msra.mxu0 %v15519_v51 }
  0x2a   : > { %15521 = vmatprep.subr.bf16.mxu0 %v16046_v3 }
  0x2c   : > { %14407 = vmatmul.mubr.f32.gmra.mrb[2].mxu0 %v16167_v29 }
  0x2d   : > { %14409 = vmatprep.mubr.msk.f32.mxu0 %vm16047_vm0, %v16048_v8  ;;  %15523 = vmatpush3.bf16.msra.mxu0 %v15522_v52 }
  0x2e   : > { %15524 = vmatprep.subr.bf16.mxu0 %v16046_v3 }
  0x30   : > { %14410 = vmatmul.mubr.f32.gmra.mrb[4].mxu0 %v16169_v30 }
  0x31   : > { %14420 = vmatprep.mubr.msk.f32.mxu0 %vm16047_vm0, %v16048_v8 }
  0x34   : > { %14421 = vmatmul.mubr.f32.vlgmr.msra.gmra.mrb[0].mxu0 %v376_v31 }
  0x35   : > { %14423 = vmatprep.mubr.msk.f32.mxu0 %vm16047_vm0, %v16048_v8  ;;  %15526 = vmatpush3.bf16.msra.mxu0 %v16123_v10 }
  0x36   : > { %15527 = vmatprep.subr.bf16.mxu0 %v16046_v3 }
  0x38   : > { %14424 = vmatmul.mubr.f32.gmra.mrb[2].mxu0 %v386_v32 }
  0x39   : > { %14426 = vmatprep.mubr.msk.f32.mxu0 %vm16047_vm0, %v16048_v8  ;;  %15529 = vmatpush3.bf16.msra.mxu0 %v16130_v13 }
  0x3a   : > { %15530 = vmatprep.subr.bf16.mxu0 %v16046_v3 }
  0x3c   : > { %14427 = vmatmul.mubr.f32.gmra.mrb[4].mxu0 %v396_v33 }
  0x3d   : > { %14437 = vmatprep.mubr.msk.f32.mxu0 %vm16047_vm0, %v16048_v8 }
  0x40   : > { %14438 = vmatmul.mubr.f32.vlgmr.msra.gmra.mrb[0].mxu0 %v377_v38 }
  0x41   : > { %14440 = vmatprep.mubr.msk.f32.mxu0 %vm16047_vm0, %v16048_v8  ;;  %15532 = vmatpush3.bf16.msra.mxu0 %v15531_v53 }
  0x42   : > { %15533 = vmatprep.subr.bf16.mxu0 %v16046_v3 }
  0x44   : > { %14441 = vmatmul.mubr.f32.gmra.mrb[2].mxu0 %v387_v39 }
  0x45   : > { %14443 = vmatprep.mubr.msk.f32.mxu0 %vm16047_vm0, %v16048_v8  ;;  %15535 = vmatpush3.bf16.msra.mxu0 %v15534_v54 }
  0x46   : > { %15536 = vmatprep.subr.bf16.mxu0 %v16046_v3 }
  0x48   : > { %14444 = vmatmul.mubr.f32.gmra.mrb[4].mxu0 %v397_v42 }
  0x49   : > { %14454 = vmatprep.mubr.msk.f32.mxu0 %vm16047_vm0, %v16048_v8 }
  0x4c   : > { %14455 = vmatmul.mubr.f32.vlgmr.msra.gmra.mrb[0].mxu0 %v16165_v28 }
  0x4d   : > { %14457 = vmatprep.mubr.msk.f32.mxu0 %vm16047_vm0, %v16048_v8  ;;  %15538 = vmatpush3.bf16.msra.mxu0 %v16123_v10 }
  0x4e   : > { %15539 = vmatprep.subr.bf16.mxu0 %v16046_v3 }
  0x50   : > { %14458 = vmatmul.mubr.f32.gmra.mrb[2].mxu0 %v16167_v29 }
  0x51   : > { %14460 = vmatprep.mubr.msk.f32.mxu0 %vm16047_vm0, %v16048_v8  ;;  %15541 = vmatpush3.bf16.msra.mxu0 %v16130_v13 }
  0x52   : > { %14600 = vmatprep.subr.mxu0 %v16048_v8 }
  0x54   : > { %14461 = vmatmul.mubr.f32.gmra.mrb[4].mxu0 %v16169_v30 }
  0x55   : > { %14471 = vmatprep.mubr.msk.f32.mxu0 %vm16047_vm0, %v16048_v8 }
  0x58   : > { %14472 = vmatmul.mubr.f32.vlgmr.msra.gmra.mrb[0].mxu0 %v16165_v28 }
  0x59   : > { %14474 = vmatprep.mubr.msk.f32.mxu0 %vm16047_vm0, %v16048_v8 }
  0x5c   : > { %14475 = vmatmul.mubr.f32.gmra.mrb[2].mxu0 %v16167_v29 }
  0x5d   : > { %14477 = vmatprep.mubr.msk.f32.mxu0 %vm16047_vm0, %v16048_v8 }
  0x60   : > { %14478 = vmatmul.mubr.f32.gmra.mrb[4].mxu0 %v16169_v30 }
  0x61   : > { %14602 = vmatprep.mubr.msk.f32.mxu0 %vm16047_vm0, %v16048_v8 }
 0x12b   : > { %v861_v56 = vpop.f32.mrb[0].mxu0 }
 0x12c   : > { %v16254_v57 = vadd.f32 %v13912_v55, %v861_v56  ;;  %v14473_v58 = vpop.f32.mrb[1].mxu0 }
 0x12e   : > { %880 = vrot.lane.b32.xlu1 %v16254_v57, %s16049_s18  ;;  %919 = vrot.lane.b32.xlu0 %v16254_v57, %s16050_s19  ;;  %v907_v1 = vmul.f32 0.35355338, %v16254_v57 }
 0x12f   : > { %v867_v59 = vpop.f32.mrb[2].mxu0 }
 0x130   : > { %v16259_v60 = vadd.f32 %v13912_v55, %v867_v59  ;;  %v14476_v61 = vpop.f32.mrb[3].mxu0  ;;  %v923_v2 = vsel %vm921_vm2, %v907_v1, 0 }
 0x131   : > { %v993_v4 = vand.u32 4294901760, %v923_v2 }
 0x132   : > { %1373 = vrot.lane.b32.xlu0 %v16259_v60, %s16050_s19  ;;  %v908_v23 = vmul.f32 0.35355338, %v16259_v60 }
 0x133   : > { %v873_v62 = vpop.f32.mrb[4].mxu0  ;;  %v994_v5 = vsub.f32 %v923_v2, %v993_v4 }
 0x134   : > { %v16263_v63 = vadd.f32 %v13912_v55, %v873_v62  ;;  %v14479_v0 = vpop.f32.mrb[5].mxu0  ;;  %v1376_v24 = vsel %vm921_vm2, %v908_v23, 0 }
 0x135   : > { %v995_v6 = vand.u32 4294901760, %v994_v5  ;;  %v1446_v26 = vand.u32 4294901760, %v1376_v24 }
 0x136   : > { %882 = vrot.lane.b32.xlu0 %v16259_v60, %s16049_s18  ;;  %1826 = vrot.lane.b32.xlu1 %v16263_v63, %s16050_s19  ;;  %v909_v36 = vmul.f32 0.35355338, %v16263_v63 }
 0x137   : > { %v996_v11 = vsub.f32 %v994_v5, %v995_v6  ;;  %v1447_v28 = vsub.f32 %v1376_v24, %v1446_v26 }
 0x138   : > { %v1829_v37 = vsel %vm921_vm2, %v909_v36, 0 }
 0x139   : > { %v997_v15 = vand.u32 4294901760, %v996_v11  ;;  %v1448_v30 = vand.u32 4294901760, %v1447_v28  ;;  %v16332_v39 = vand.u32 4294901760, %v1829_v37 }
 0x13a   : > { %884 = vrot.lane.b32.xlu1 %v16263_v63, %s16049_s18 }
 0x13b   : > { %v1449_v32 = vsub.f32 %v1447_v28, %v1448_v30  ;;  %v1900_v41 = vsub.f32 %v1829_v37, %v16332_v39 }
 0x13d   : > { %v1450_v34 = vand.u32 4294901760, %v1449_v32  ;;  %v1901_v43 = vand.u32 4294901760, %v1900_v41 }
 0x13e   : > { %889 = vrot.lane.b32.xlu1 %v16254_v57, %s16051_s20 }
 0x13f   : > { %v1902_v45 = vsub.f32 %v1900_v41, %v1901_v43 }
 0x141   : > { %v1903_v47 = vand.u32 4294901760, %v1902_v45 }
 0x1a0   : > { %v16272_v7 = vpop.permute.xlu1 %880  ;;  %v920_v9 = vpop.permute.xlu0 %919 }
 0x1a1   : > { %v925_v10 = vsel %vm921_vm2, %v920_v9, 0  ;;  %2279 = vrot.lane.b32.xlu0 %v16272_v7, %s16050_s19  ;;  %v910_v52 = vmul.f32 0.35355338, %v16272_v7 }
 0x1a2   : > { %v928_v12 = vand.u32 4294901760, %v925_v10 }
 0x1a3   : > { %v2282_v55 = vsel %vm921_vm2, %v910_v52, 0 }
 0x1a4   : > { %v1005_v13 = vsub.f32 %v925_v10, %v928_v12  ;;  %14481 = vmatpush3.xpose.msra.mxu1 %v928_v12  ;;  %v1374_v14 = vpop.permute.xlu0 %1373  ;;  %v16366_v61 = vand.u32 4294901760, %v2282_v55 }
 0x1a5   : > { %891 = vrot.lane.b32.xlu0 %v16259_v60, %s16051_s20  ;;  %14485 = vmatprep.subr.mxu1 %v16048_v8  ;;  %v1378_v25 = vsel %vm921_vm2, %v1374_v14, 0 }
 0x1a6   : > { %v1006_v16 = vand.u32 4294901760, %v1005_v13  ;;  %v1381_v27 = vand.u32 4294901760, %v1378_v25 }
 0x1a7   : > { %14483 = vmatmul.mubr.f32.vlgmr.msra.gmra.mrb[0].mxu1 %v997_v15 }
 0x1a8   : > { %v1007_v17 = vsub.f32 %v1005_v13, %v1006_v16  ;;  %v16279_v18 = vpop.permute.xlu0 %882  ;;  %v1827_v19 = vpop.permute.xlu1 %1826  ;;  %14487 = vmatprep.mubr.msk.f32.mxu1 %vm16047_vm0, %v16048_v8  ;;  %v1458_v29 = vsub.f32 %v1378_v25, %v1381_v27 }
 0x1a9   : > { %2732 = vrot.lane.b32.xlu1 %v16279_v18, %s16050_s19  ;;  %v1831_v38 = vsel %vm921_vm2, %v1827_v19, 0  ;;  %v911_v49 = vmul.f32 0.35355338, %v16279_v18 }
 0x1aa   : > { %v1008_v20 = vand.u32 4294901760, %v1007_v17  ;;  %v1459_v31 = vand.u32 4294901760, %v1458_v29  ;;  %v1834_v40 = vand.u32 4294901760, %v1831_v38 }
 0x1ab   : > { %v2735_v50 = vsel %vm921_vm2, %v911_v49, 0 }
 0x1ac   : > { %14486 = vmatpush3.xpose.msra.mxu1 %v1008_v20  ;;  %v16285_v21 = vpop.permute.xlu1 %884  ;;  %v1460_v33 = vsub.f32 %v1458_v29, %v1459_v31  ;;  %v1911_v42 = vsub.f32 %v1831_v38, %v1834_v40  ;;  %v16350_v51 = vand.u32 4294901760, %v2735_v50 }
 0x1ad   : > { %893 = vrot.lane.b32.xlu1 %v16263_v63, %s16051_s20  ;;  %3185 = vrot.lane.b32.xlu0 %v16285_v21, %s16050_s19 }
 0x1ae   : > { %14490 = vmatprep.subr.mxu1 %v16048_v8  ;;  %v1461_v35 = vand.u32 4294901760, %v1460_v33  ;;  %v1912_v44 = vand.u32 4294901760, %v1911_v42  ;;  %v16357_v54 = vsub.f32 %v2735_v50, %v16350_v51  ;;  %v912_v33 = vmul.f32 0.35355338, %v16285_v21 }
 0x1af   : > { %14488 = vmatmul.mubr.f32.vlgmr.msra.gmra.mrb[0].mxu1 %v993_v4 }
 0x1b0   : > { %14491 = vmatpush3.xpose.msra.mxu1 %v1005_v13  ;;  %v16291_v22 = vpop.permute.xlu1 %889  ;;  %14492 = vmatprep.mubr.msk.f32.mxu1 %vm16047_vm0, %v16048_v8  ;;  %v1913_v46 = vsub.f32 %v1911_v42, %v1912_v44  ;;  %v2807_v59 = vand.u32 4294901760, %v16357_v54  ;;  %v3188_v36 = vsel %vm921_vm2, %v912_v33, 0 }
 0x1b1   : > { %898 = vrot.lane.b32.xlu0 %v16254_v57, %s16052_s21  ;;  %3638 = vrot.lane.b32.xlu1 %v16291_v22, %s16050_s19 }
 0x1b2   : > { %14495 = vmatprep.subr.mxu1 %v16048_v8  ;;  %v1914_v48 = vand.u32 4294901760, %v1913_v46  ;;  %v2808_v1 = vsub.f32 %v16357_v54, %v2807_v59 }
 0x1b5   : > { %900 = vrot.lane.b32.xlu1 %v16259_v60, %s16052_s21 }
 0x1b7   : > { %14493 = vmatmul.mubr.f32.vlgmr.msra.gmra.mrb[0].mxu1 %v994_v5 }
 0x1b8   : > { %14496 = vmatpush3.xpose.msra.mxu1 %v928_v12  ;;  %14497 = vmatprep.mubr.msk.f32.mxu1 %vm16047_vm0, %v16048_v8 }
 0x1b9   : > { %14500 = vmatprep.subr.mxu1 %v16048_v8 }
 0x1bf   : > { %14498 = vmatmul.mubr.f32.vlgmr.msra.gmra.mrb[0].mxu1 %v995_v6 }
 0x1c0   : > { %14501 = vmatpush3.xpose.msra.mxu1 %v1006_v16  ;;  %14502 = vmatprep.mubr.msk.f32.mxu1 %vm16047_vm0, %v16048_v8 }
 0x1c1   : > { %14505 = vmatprep.subr.mxu1 %v16048_v8 }
 0x1c7   : > { %14503 = vmatmul.mubr.f32.vlgmr.msra.gmra.mrb[0].mxu1 %v993_v4 }
 0x1c8   : > { %14506 = vmatpush3.xpose.msra.mxu1 %v928_v12  ;;  %14507 = vmatprep.mubr.msk.f32.mxu1 %vm16047_vm0, %v16048_v8  ;;  %v2809_v12 = vand.u32 4294901760, %v2808_v1 }
 0x1c9   : > { %14510 = vmatprep.subr.mxu1 %v16048_v8 }
 0x1cf   : > { %14508 = vmatmul.mubr.f32.vlgmr.msra.gmra.mrb[0].mxu1 %v993_v4  ;;  %v16380_v4 = vsub.f32 %v2282_v55, %v16366_v61 }
 0x1d0   : > { %14511 = vmatpush3.xpose.msra.mxu1 %v1381_v27  ;;  %14512 = vmatprep.mubr.msk.f32.mxu1 %vm16047_vm0, %v16048_v8 }
 0x1d1   : > { %14515 = vmatprep.subr.mxu1 %v16048_v8  ;;  %v2354_v14 = vand.u32 4294901760, %v16380_v4 }
 0x1d3   : > { %14513 = vmatmul.mubr.f32.vlgmr.msra.gmra.mrb[2].mxu1 %v1450_v34  ;;  %v2355_v23 = vsub.f32 %v16380_v4, %v2354_v14 }
 0x1d4   : > { %14516 = vmatpush3.xpose.msra.mxu1 %v1461_v35  ;;  %14517 = vmatprep.mubr.msk.f32.mxu1 %vm16047_vm0, %v16048_v8 }
 0x1d5   : > { %14520 = vmatprep.subr.mxu1 %v16048_v8 }
 0x1db   : > { %14518 = vmatmul.mubr.f32.vlgmr.msra.gmra.mrb[2].mxu1 %v1446_v26 }
 0x1dc   : > { %14521 = vmatpush3.xpose.msra.mxu1 %v1458_v29  ;;  %14522 = vmatprep.mubr.msk.f32.mxu1 %vm16047_vm0, %v16048_v8 }
 0x1dd   : > { %14525 = vmatprep.subr.mxu1 %v16048_v8 }
 0x1e3   : > { %14523 = vmatmul.mubr.f32.vlgmr.msra.gmra.mrb[2].mxu1 %v1447_v28  ;;  %v913_v28 = vmul.f32 0.35355338, %v16291_v22 }
 0x1e4   : > { %14526 = vmatpush3.xpose.msra.mxu1 %v1381_v27  ;;  %14527 = vmatprep.mubr.msk.f32.mxu1 %vm16047_vm0, %v16048_v8 }
 0x1e5   : > { %14530 = vmatprep.subr.mxu1 %v16048_v8  ;;  %v3641_v29 = vsel %vm921_vm2, %v913_v28, 0 }
 0x1eb   : > { %14528 = vmatmul.mubr.f32.vlgmr.msra.gmra.mrb[2].mxu1 %v1448_v30 }
 0x1ec   : > { %14531 = vmatpush3.xpose.msra.mxu1 %v1459_v31  ;;  %14532 = vmatprep.mubr.msk.f32.mxu1 %vm16047_vm0, %v16048_v8  ;;  %v16443_v31 = vand.u32 4294901760, %v3641_v29 }
 0x1ed   : > { %14535 = vmatprep.subr.mxu1 %v16048_v8 }
 0x1ee   : > { %v3712_v34 = vsub.f32 %v3641_v29, %v16443_v31 }
 0x1f0   : > { %v3713_v38 = vand.u32 4294901760, %v3712_v34 }
 0x1f3   : > { %14533 = vmatmul.mubr.f32.vlgmr.msra.gmra.mrb[2].mxu1 %v1446_v26 }
 0x1f4   : > { %14536 = vmatpush3.xpose.msra.mxu1 %v1381_v27  ;;  %14537 = vmatprep.mubr.msk.f32.mxu1 %vm16047_vm0, %v16048_v8 }
 0x1f5   : > { %14540 = vmatprep.subr.mxu1 %v16048_v8 }
 0x1fb   : > { %14538 = vmatmul.mubr.f32.vlgmr.msra.gmra.mrb[2].mxu1 %v1446_v26  ;;  %v2356_v26 = vand.u32 4294901760, %v2355_v23 }
 0x1fc   : > { %14541 = vmatpush3.xpose.msra.mxu1 %v1834_v40  ;;  %14542 = vmatprep.mubr.msk.f32.mxu1 %vm16047_vm0, %v16048_v8 }
 0x1fd   : > { %14545 = vmatprep.subr.mxu1 %v16048_v8 }
 0x1ff   : > { %14543 = vmatmul.mubr.f32.vlgmr.msra.gmra.mrb[4].mxu1 %v1903_v47 }
 0x200   : > { %14546 = vmatpush3.xpose.msra.mxu1 %v1914_v48  ;;  %14547 = vmatprep.mubr.msk.f32.mxu1 %vm16047_vm0, %v16048_v8 }
 0x201   : > { %14550 = vmatprep.subr.mxu1 %v16048_v8 }
 0x207   : > { %14548 = vmatmul.mubr.f32.vlgmr.msra.gmra.mrb[4].mxu1 %v16332_v39 }
 0x208   : > { %14551 = vmatpush3.xpose.msra.mxu1 %v1911_v42  ;;  %14552 = vmatprep.mubr.msk.f32.mxu1 %vm16047_vm0, %v16048_v8  ;;  %v3714_v42 = vsub.f32 %v3712_v34, %v3713_v38 }
 0x209   : > { %14555 = vmatprep.subr.mxu1 %v16048_v8 }
 0x20a   : > { %v3715_v46 = vand.u32 4294901760, %v3714_v42 }
 0x20f   : > { %14553 = vmatmul.mubr.f32.vlgmr.msra.gmra.mrb[4].mxu1 %v1900_v41 }
 0x210   : > { %14556 = vmatpush3.xpose.msra.mxu1 %v1834_v40  ;;  %14557 = vmatprep.mubr.msk.f32.mxu1 %vm16047_vm0, %v16048_v8 }
 0x211   : > { %14560 = vmatprep.subr.mxu1 %v16048_v8 }
 0x213   : > { %v2280_v53 = vpop.permute.xlu0 %2279 }
 0x214   : > { %v2284_v56 = vsel %vm921_vm2, %v2280_v53, 0 }
 0x215   : > { %v16371_v62 = vand.u32 4294901760, %v2284_v56 }
 0x217   : > { %v16361_v58 = vpop.permute.xlu0 %891  ;;  %14558 = vmatmul.mubr.f32.vlgmr.msra.gmra.mrb[4].mxu1 %v1901_v43  ;;  %v16385_v6 = vsub.f32 %v2284_v56, %v16371_v62 }
 0x218   : > { %14561 = vmatpush3.xpose.msra.mxu1 %v1912_v44  ;;  %4091 = vrot.lane.b32.xlu0 %v16361_v58, %s16050_s19 }
 0x219   : > { %14562 = vmatprep.mubr.msk.f32.mxu1 %vm16047_vm0, %v16048_v8  ;;  %14565 = vmatprep.subr.mxu1 %v16048_v8  ;;  %v2365_v15 = vand.u32 4294901760, %v16385_v6 }
 0x21b   : > { %v2733_v0 = vpop.permute.xlu1 %2732  ;;  %v2366_v24 = vsub.f32 %v16385_v6, %v2365_v15 }
 0x21c   : > { %v2737_v2 = vsel %vm921_vm2, %v2733_v0, 0  ;;  %902 = vrot.lane.b32.xlu0 %v16263_v63, %s16052_s21 }
 0x21d   : > { %v16382_v5 = vand.u32 4294901760, %v2737_v2  ;;  %v2367_v27 = vand.u32 4294901760, %v2366_v24 }
 0x21f   : > { %v2817_v9 = vsub.f32 %v2737_v2, %v16382_v5  ;;  %v16388_v10 = vpop.permute.xlu0 %3185  ;;  %14601 = vmatpush3.xpose.msra.mxu0 %v16382_v5  ;;  %v16391_v11 = vpop.permute.xlu1 %893  ;;  %14563 = vmatmul.mubr.f32.vlgmr.msra.gmra.mrb[4].mxu1 %v16332_v39 }
 0x220   : > { %14566 = vmatpush3.xpose.msra.mxu1 %v1834_v40  ;;  %4544 = vrot.lane.b32.xlu1 %v16391_v11, %s16050_s19  ;;  %v3190_v37 = vsel %vm921_vm2, %v16388_v10, 0 }
 0x221   : > { %v2818_v13 = vand.u32 4294901760, %v2817_v9  ;;  %14567 = vmatprep.mubr.msk.f32.mxu1 %vm16047_vm0, %v16048_v8  ;;  %14570 = vmatprep.subr.mxu1 %v16048_v8  ;;  %v16469_v41 = vand.u32 4294901760, %v3190_v37 }
 0x222   : > { %14603 = vmatmul.mubr.f32.vlgmr.msra.gmra.mrb[6].mxu0 %v2809_v12  ;;  %14605 = vmatprep.subr.mxu0 %v16048_v8 }
 0x223   : > { %v2819_v16 = vsub.f32 %v2817_v9, %v2818_v13  ;;  %v16402_v17 = vpop.permute.xlu0 %898  ;;  %v3639_v19 = vpop.permute.xlu1 %3638  ;;  %14607 = vmatprep.mubr.msk.f32.mxu0 %vm16047_vm0, %v16048_v8  ;;  %v3270_v45 = vsub.f32 %v3190_v37, %v16469_v41 }
 0x224   : > { %4997 = vrot.lane.b32.xlu0 %v16402_v17, %s16050_s19  ;;  %v3643_v30 = vsel %vm921_vm2, %v3639_v19, 0 }
 0x225   : > { %v2820_v20 = vand.u32 4294901760, %v2819_v16  ;;  %v16448_v32 = vand.u32 4294901760, %v3643_v30  ;;  %v3271_v49 = vand.u32 4294901760, %v3270_v45 }
 0x227   : > { %14606 = vmatpush3.xpose.msra.mxu0 %v2820_v20  ;;  %v16410_v25 = vpop.permute.xlu1 %900  ;;  %14568 = vmatmul.mubr.f32.vlgmr.msra.gmra.mrb[4].mxu1 %v16332_v39  ;;  %v3723_v35 = vsub.f32 %v3643_v30, %v16448_v32  ;;  %v16464_v39 = vand.u32 4294901760, %v3188_v36 }
 0x228   : > { %14571 = vmatpush3.xpose.msra.mxu1 %v16371_v62  ;;  %5450 = vrot.lane.b32.xlu1 %v16410_v25, %s16050_s19 }
 0x229   : > { %14572 = vmatprep.mubr.msk.f32.mxu1 %vm16047_vm0, %v16048_v8  ;;  %14575 = vmatprep.subr.mxu1 %v16048_v8  ;;  %v3724_v40 = vand.u32 4294901760, %v3723_v35  ;;  %v3259_v43 = vsub.f32 %v3188_v36, %v16464_v39 }
 0x22a   : > { %14608 = vmatmul.mubr.f32.vlgmr.msra.gmra.mrb[6].mxu0 %v16350_v51  ;;  %14610 = vmatprep.subr.mxu0 %v16048_v8 }
 0x22b   : > { %14573 = vmatmul.mubr.f32.vlgmr.msra.gmra.mrb[6].mxu1 %v2356_v26  ;;  %14611 = vmatpush3.xpose.msra.mxu0 %v2817_v9  ;;  %v3725_v44 = vsub.f32 %v3723_v35, %v3724_v40  ;;  %v3260_v48 = vand.u32 4294901760, %v3259_v43 }
 0x22c   : > { %14576 = vmatpush3.xpose.msra.mxu1 %v2367_v27  ;;  %14612 = vmatprep.mubr.msk.f32.mxu0 %vm16047_vm0, %v16048_v8 }
 0x22d   : > { %14615 = vmatprep.subr.mxu0 %v16048_v8  ;;  %14577 = vmatprep.mubr.msk.f32.mxu1 %vm16047_vm0, %v16048_v8  ;;  %v3726_v47 = vand.u32 4294901760, %v3725_v44  ;;  %v3261_v50 = vsub.f32 %v3259_v43, %v3260_v48 }
 0x22e   : > { %14580 = vmatprep.subr.mxu1 %v16048_v8 }
 0x22f   : > { %v3262_v52 = vand.u32 4294901760, %v3261_v50 }
 0x232   : > { %14613 = vmatmul.mubr.f32.vlgmr.msra.gmra.mrb[6].mxu0 %v16357_v54  ;;  %v914_v54 = vmul.f32 0.35355338, %v16361_v58 }
 0x233   : > { %14616 = vmatpush3.xpose.msra.mxu0 %v16382_v5  ;;  %14578 = vmatmul.mubr.f32.vlgmr.msra.gmra.mrb[6].mxu1 %v16366_v61 }
 0x234   : > { %14581 = vmatpush3.xpose.msra.mxu1 %v16385_v6  ;;  %14617 = vmatprep.mubr.msk.f32.mxu0 %vm16047_vm0, %v16048_v8  ;;  %v4094_v55 = vsel %vm921_vm2, %v914_v54, 0 }
 0x235   : > { %14620 = vmatprep.subr.mxu0 %v16048_v8  ;;  %14582 = vmatprep.mubr.msk.f32.mxu1 %vm16047_vm0, %v16048_v8  ;;  %v16532_v56 = vand.u32 4294901760, %v4094_v55 }
 0x236   : > { %14585 = vmatprep.subr.mxu1 %v16048_v8 }
 0x23a   : > { %14618 = vmatmul.mubr.f32.vlgmr.msra.gmra.mrb[6].mxu0 %v2807_v59  ;;  %v915_v59 = vmul.f32 0.35355338, %v16391_v11 }
 0x23b   : > { %14621 = vmatpush3.xpose.msra.mxu0 %v2818_v13  ;;  %14583 = vmatmul.mubr.f32.vlgmr.msra.gmra.mrb[6].mxu1 %v16380_v4 }
 0x23c   : > { %14586 = vmatpush3.xpose.msra.mxu1 %v16371_v62  ;;  %14622 = vmatprep.mubr.msk.f32.mxu0 %vm16047_vm0, %v16048_v8 }
 0x23d   : > { %14625 = vmatprep.subr.mxu0 %v16048_v8  ;;  %14587 = vmatprep.mubr.msk.f32.mxu1 %vm16047_vm0, %v16048_v8 }
 0x23e   : > { %14590 = vmatprep.subr.mxu1 %v16048_v8 }
 0x242   : > { %14623 = vmatmul.mubr.f32.vlgmr.msra.gmra.mrb[6].mxu0 %v16350_v51 }
 0x243   : > { %14626 = vmatpush3.xpose.msra.mxu0 %v16382_v5  ;;  %14588 = vmatmul.mubr.f32.vlgmr.msra.gmra.mrb[6].mxu1 %v2354_v14 }
 0x244   : > { %14591 = vmatpush3.xpose.msra.mxu1 %v2365_v15  ;;  %14627 = vmatprep.mubr.msk.f32.mxu0 %vm16047_vm0, %v16048_v8 }
 0x245   : > { %14660 = vmatprep.subr.mxu0 %v16048_v8  ;;  %14592 = vmatprep.mubr.msk.f32.mxu1 %vm16047_vm0, %v16048_v8 }
 0x246   : > { %14595 = vmatprep.subr.mxu1 %v16048_v8 }
 0x24a   : > { %14628 = vmatmul.mubr.f32.vlgmr.msra.gmra.mrb[6].mxu0 %v16350_v51  ;;  %v3272_v51 = vsub.f32 %v3270_v45, %v3271_v49 }
 0x24b   : > { %14661 = vmatpush3.xpose.msra.mxu0 %v16448_v32  ;;  %14593 = vmatmul.mubr.f32.vlgmr.msra.gmra.mrb[6].mxu1 %v16366_v61 }
 0x24c   : > { %14596 = vmatpush3.xpose.msra.mxu1 %v16371_v62  ;;  %14662 = vmatprep.mubr.msk.f32.mxu0 %vm16047_vm0, %v16048_v8  ;;  %v3273_v53 = vand.u32 4294901760, %v3272_v51  ;;  %v4547_v62 = vsel %vm921_vm2, %v915_v59, 0 }
 0x24d   : > { %14665 = vmatprep.subr.mxu0 %v16048_v8  ;;  %14597 = vmatprep.mubr.msk.f32.mxu1 %vm16047_vm0, %v16048_v8  ;;  %v16540_v0 = vand.u32 4294901760, %v4547_v62 }
 0x24e   : > { %14663 = vmatmul.mubr.f32.vlgmr.msra.gmra.mrb[8].mxu0 %v3715_v46  ;;  %14630 = vmatprep.subr.mxu1 %v16048_v8 }
 0x24f   : > { %14666 = vmatpush3.xpose.msra.mxu0 %v3726_v47  ;;  %14667 = vmatprep.mubr.msk.f32.mxu0 %vm16047_vm0, %v16048_v8  ;;  %v16543_v4 = vsub.f32 %v4547_v62, %v16540_v0 }
 0x250   : > { %14670 = vmatprep.subr.mxu0 %v16048_v8 }
 0x251   : > { %v4619_v14 = vand.u32 4294901760, %v16543_v4 }
 0x253   : > { %14598 = vmatmul.mubr.f32.vlgmr.msra.gmra.mrb[6].mxu1 %v16366_v61  ;;  %v4165_v61 = vsub.f32 %v4094_v55, %v16532_v56  ;;  %v4620_v23 = vsub.f32 %v16543_v4, %v4619_v14 }
 0x254   : > { %14631 = vmatpush3.xpose.msra.mxu1 %v16469_v41  ;;  %14632 = vmatprep.mubr.msk.f32.mxu1 %vm16047_vm0, %v16048_v8 }
 0x255   : > { %14635 = vmatprep.subr.mxu1 %v16048_v8  ;;  %v4166_v1 = vand.u32 4294901760, %v4165_v61  ;;  %v4621_v28 = vand.u32 4294901760, %v4620_v23 }
 0x256   : > { %14668 = vmatmul.mubr.f32.vlgmr.msra.gmra.mrb[8].mxu0 %v16443_v31 }
 0x257   : > { %14671 = vmatpush3.xpose.msra.mxu0 %v3723_v35  ;;  %14633 = vmatmul.mubr.f32.vlgmr.msra.gmra.mrb[8].mxu1 %v3262_v52  ;;  %v4167_v6 = vsub.f32 %v4165_v61, %v4166_v1  ;;  %v916_v35 = vmul.f32 0.35355338, %v16402_v17 }
 0x258   : > { %14636 = vmatpush3.xpose.msra.mxu1 %v3273_v53  ;;  %14672 = vmatprep.mubr.msk.f32.mxu0 %vm16047_vm0, %v16048_v8 }
 0x259   : > { %14675 = vmatprep.subr.mxu0 %v16048_v8  ;;  %14637 = vmatprep.mubr.msk.f32.mxu1 %vm16047_vm0, %v16048_v8  ;;  %v4168_v13 = vand.u32 4294901760, %v4167_v6  ;;  %v5000_v37 = vsel %vm921_vm2, %v916_v35, 0 }
 0x25a   : > { %14640 = vmatprep.subr.mxu1 %v16048_v8 }
 0x25e   : > { %14673 = vmatmul.mubr.f32.vlgmr.msra.gmra.mrb[8].mxu0 %v3712_v34 }
 0x25f   : > { %14676 = vmatpush3.xpose.msra.mxu0 %v16448_v32  ;;  %14638 = vmatmul.mubr.f32.vlgmr.msra.gmra.mrb[8].mxu1 %v16464_v39 }
 0x260   : > { %14641 = vmatpush3.xpose.msra.mxu1 %v3270_v45  ;;  %14677 = vmatprep.mubr.msk.f32.mxu0 %vm16047_vm0, %v16048_v8 }
 0x261   : > { %14680 = vmatprep.subr.mxu0 %v16048_v8  ;;  %14642 = vmatprep.mubr.msk.f32.mxu1 %vm16047_vm0, %v16048_v8 }
 0x262   : > { %14645 = vmatprep.subr.mxu1 %v16048_v8 }
 0x266   : > { %14678 = vmatmul.mubr.f32.vlgmr.msra.gmra.mrb[8].mxu0 %v3713_v38 }
 0x267   : > { %14681 = vmatpush3.xpose.msra.mxu0 %v3724_v40  ;;  %14643 = vmatmul.mubr.f32.vlgmr.msra.gmra.mrb[8].mxu1 %v3259_v43  ;;  %v917_v40 = vmul.f32 0.35355338, %v16410_v25 }
 0x268   : > { %14646 = vmatpush3.xpose.msra.mxu1 %v16469_v41  ;;  %14682 = vmatprep.mubr.msk.f32.mxu0 %vm16047_vm0, %v16048_v8 }
 0x269   : > { %14685 = vmatprep.subr.mxu0 %v16048_v8  ;;  %14647 = vmatprep.mubr.msk.f32.mxu1 %vm16047_vm0, %v16048_v8  ;;  %v5453_v44 = vsel %vm921_vm2, %v917_v40, 0 }
 0x26a   : > { %14650 = vmatprep.subr.mxu1 %v16048_v8  ;;  %v16611_v47 = vand.u32 4294901760, %v5453_v44 }
 0x26c   : > { %v5524_v51 = vsub.f32 %v5453_v44, %v16611_v47 }
 0x26e   : > { %14683 = vmatmul.mubr.f32.vlgmr.msra.gmra.mrb[8].mxu0 %v16443_v31  ;;  %v5525_v59 = vand.u32 4294901760, %v5524_v51 }
 0x26f   : > { %14686 = vmatpush3.xpose.msra.mxu0 %v16448_v32  ;;  %14648 = vmatmul.mubr.f32.vlgmr.msra.gmra.mrb[8].mxu1 %v3260_v48 }
 0x270   : > { %14651 = vmatpush3.xpose.msra.mxu1 %v3271_v49  ;;  %14687 = vmatprep.mubr.msk.f32.mxu0 %vm16047_vm0, %v16048_v8 }
 0x271   : > { %14652 = vmatprep.mubr.msk.f32.mxu1 %vm16047_vm0, %v16048_v8  ;;  %14655 = vmatprep.subr.mxu1 %v16048_v8 }
 0x272   : > { %14720 = vmatprep.subr.mxu0 %v16048_v8 }
 0x276   : > { %14688 = vmatmul.mubr.f32.vlgmr.msra.gmra.mrb[8].mxu0 %v16443_v31 }
 0x277   : > { %14653 = vmatmul.mubr.f32.vlgmr.msra.gmra.mrb[8].mxu1 %v16464_v39  ;;  %14722 = vmatprep.mubr.msk.f32.mxu0 %vm16047_vm0, %v16048_v8 }
 0x278   : > { %14656 = vmatpush3.xpose.msra.mxu1 %v16469_v41  ;;  %14657 = vmatprep.mubr.msk.f32.mxu1 %vm16047_vm0, %v16048_v8 }
 0x279   : > { %14690 = vmatprep.subr.mxu1 %v16048_v8 }
 0x27f   : > { %14658 = vmatmul.mubr.f32.vlgmr.msra.gmra.mrb[8].mxu1 %v16464_v39  ;;  %v16590_v39 = vand.u32 4294901760, %v5000_v37 }
 0x280   : > { %14692 = vmatprep.mubr.msk.f32.mxu1 %vm16047_vm0, %v16048_v8 }
 0x281   : > { %v16602_v43 = vsub.f32 %v5000_v37, %v16590_v39 }
 0x283   : > { %v5072_v48 = vand.u32 4294901760, %v16602_v43 }
 0x285   : > { %v5073_v52 = vsub.f32 %v16602_v43, %v5072_v48 }
 0x287   : > { %v5074_v55 = vand.u32 4294901760, %v5073_v52 }
 0x28a   : > { %v4092_v2 = vpop.permute.xlu0 %4091 }
 0x28b   : > { %v4096_v5 = vsel %vm921_vm2, %v4092_v2, 0 }
 0x28c   : > { %v16546_v9 = vand.u32 4294901760, %v4096_v5 }
 0x28e   : > { %v4176_v10 = vsub.f32 %v4096_v5, %v16546_v9  ;;  %v16549_v12 = vpop.permute.xlu0 %902  ;;  %14691 = vmatpush3.xpose.msra.mxu1 %v16546_v9 }
 0x28f   : > { %5903 = vrot.lane.b32.xlu0 %v16549_v12, %s16050_s19  ;;  %14695 = vmatprep.subr.mxu1 %v16048_v8 }
 0x290   : > { %v4177_v15 = vand.u32 4294901760, %v4176_v10 }
 0x291   : > { %14693 = vmatmul.mubr.f32.vlgmr.msra.gmra.mrb[10].mxu1 %v4168_v13 }
 0x292   : > { %v4178_v16 = vsub.f32 %v4176_v10, %v4177_v15  ;;  %v4545_v19 = vpop.permute.xlu1 %4544  ;;  %14697 = vmatprep.mubr.msk.f32.mxu1 %vm16047_vm0, %v16048_v8 }
 0x293   : > { %v4549_v20 = vsel %vm921_vm2, %v4545_v19, 0 }
 0x294   : > { %v4179_v24 = vand.u32 4294901760, %v4178_v16  ;;  %v16560_v26 = vand.u32 4294901760, %v4549_v20 }
 0x296   : > { %v4629_v27 = vsub.f32 %v4549_v20, %v16560_v26  ;;  %14696 = vmatpush3.xpose.msra.mxu1 %v4179_v24  ;;  %14721 = vmatpush3.xpose.msra.mxu0 %v16560_v26  ;;  %v4998_v36 = vpop.permute.xlu0 %4997 }
 0x297   : > { %14700 = vmatprep.subr.mxu1 %v16048_v8  ;;  %14725 = vmatprep.subr.mxu0 %v16048_v8  ;;  %v5002_v38 = vsel %vm921_vm2, %v4998_v36, 0 }
 0x298   : > { %v4630_v29 = vand.u32 4294901760, %v4629_v27  ;;  %v16596_v41 = vand.u32 4294901760, %v5002_v38 }
 0x299   : > { %14698 = vmatmul.mubr.f32.vlgmr.msra.gmra.mrb[10].mxu1 %v16532_v56  ;;  %14723 = vmatmul.mubr.f32.vlgmr.msra.gmra.mrb[10].mxu0 %v4621_v28 }
 0x29a   : > { %v4631_v30 = vsub.f32 %v4629_v27, %v4630_v29  ;;  %14701 = vmatpush3.xpose.msra.mxu1 %v4176_v10  ;;  %14702 = vmatprep.mubr.msk.f32.mxu1 %vm16047_vm0, %v16048_v8  ;;  %v5451_v42 = vpop.permute.xlu1 %5450  ;;  %v16606_v45 = vsub.f32 %v5002_v38, %v16596_v41 }
 0x29b   : > { %14705 = vmatprep.subr.mxu1 %v16048_v8  ;;  %14727 = vmatprep.mubr.msk.f32.mxu0 %vm16047_vm0, %v16048_v8  ;;  %v5455_v46 = vsel %vm921_vm2, %v5451_v42, 0 }
 0x29c   : > { %v4632_v31 = vand.u32 4294901760, %v4631_v30  ;;  %v5083_v49 = vand.u32 4294901760, %v16606_v45  ;;  %v16619_v50 = vand.u32 4294901760, %v5455_v46 }
 0x29e   : > { %14726 = vmatpush3.xpose.msra.mxu0 %v4632_v31  ;;  %v5084_v53 = vsub.f32 %v16606_v45, %v5083_v49  ;;  %v5535_v54 = vsub.f32 %v5455_v46, %v16619_v50 }
 0x29f   : > { %14730 = vmatprep.subr.mxu0 %v16048_v8 }
 0x2a0   : > { %v5536_v62 = vand.u32 4294901760, %v5535_v54 }
 0x2a1   : > { %14703 = vmatmul.mubr.f32.vlgmr.msra.gmra.mrb[10].mxu1 %v4165_v61  ;;  %14728 = vmatmul.mubr.f32.vlgmr.msra.gmra.mrb[10].mxu0 %v16540_v0  ;;  %v5085_v61 = vand.u32 4294901760, %v5084_v53 }
 0x2a2   : > { %14706 = vmatpush3.xpose.msra.mxu1 %v16546_v9  ;;  %v16575_v32 = vpop.f32.mrb[0].mxu1  ;;  %14731 = vmatpush3.xpose.msra.mxu0 %v4629_v27 }
 0x2a3   : > { %v14509_v33 = vpop.f32.mrb[1].mxu1  ;;  %v6356_v34 = vsel %vm921_vm2, %v16575_v32, -inf  ;;  %14707 = vmatprep.mubr.msk.f32.mxu1 %vm16047_vm0, %v16048_v8  ;;  %14710 = vmatprep.subr.mxu1 %v16048_v8 }
 0x2a4   : > { %6357 = vmax.xlane.f32.xlu1 %v6356_v34  ;;  %14732 = vmatprep.mubr.msk.f32.mxu0 %vm16047_vm0, %v16048_v8 }
 0x2a5   : > { %14735 = vmatprep.subr.mxu0 %v16048_v8 }
 0x2a9   : > { %14708 = vmatmul.mubr.f32.vlgmr.msra.gmra.mrb[10].mxu1 %v4166_v1  ;;  %14733 = vmatmul.mubr.f32.vlgmr.msra.gmra.mrb[10].mxu0 %v16543_v4  ;;  %v5537_v1 = vsub.f32 %v5535_v54, %v5536_v62 }
 0x2aa   : > { %14711 = vmatpush3.xpose.msra.mxu1 %v4177_v15  ;;  %14736 = vmatpush3.xpose.msra.mxu0 %v16560_v26 }
 0x2ab   : > { %14712 = vmatprep.mubr.msk.f32.mxu1 %vm16047_vm0, %v16048_v8  ;;  %14715 = vmatprep.subr.mxu1 %v16048_v8  ;;  %v5538_v4 = vand.u32 4294901760, %v5537_v1 }
 0x2ac   : > { %14737 = vmatprep.mubr.msk.f32.mxu0 %vm16047_vm0, %v16048_v8  ;;  %14740 = vmatprep.subr.mxu0 %v16048_v8 }
 0x2b1   : > { %14713 = vmatmul.mubr.f32.vlgmr.msra.gmra.mrb[10].mxu1 %v16532_v56  ;;  %14738 = vmatmul.mubr.f32.vlgmr.msra.gmra.mrb[10].mxu0 %v4619_v14 }
 0x2b2   : > { %14716 = vmatpush3.xpose.msra.mxu1 %v16546_v9  ;;  %14741 = vmatpush3.xpose.msra.mxu0 %v4630_v29  ;;  %v918_v9 = vmul.f32 0.35355338, %v16549_v12 }
 0x2b3   : > { %14717 = vmatprep.mubr.msk.f32.mxu1 %vm16047_vm0, %v16048_v8  ;;  %14742 = vmatprep.mubr.msk.f32.mxu0 %vm16047_vm0, %v16048_v8 }
 0x2b4   : > { %14745 = vmatprep.subr.mxu0 %v16048_v8  ;;  %14750 = vmatprep.subr.mxu1 %v16048_v8  ;;  %v5906_v10 = vsel %vm921_vm2, %v918_v9, 0 }
 0x2b5   : > { %v5976_v13 = vand.u32 4294901760, %v5906_v10 }
 0x2b7   : > { %v5977_v14 = vsub.f32 %v5906_v10, %v5976_v13 }
 0x2b9   : > { %14718 = vmatmul.mubr.f32.vlgmr.msra.gmra.mrb[10].mxu1 %v16532_v56  ;;  %14743 = vmatmul.mubr.f32.vlgmr.msra.gmra.mrb[10].mxu0 %v16540_v0  ;;  %v5526_v56 = vsub.f32 %v5524_v51, %v5525_v59  ;;  %v5978_v20 = vand.u32 4294901760, %v5977_v14 }
 0x2ba   : > { %14746 = vmatpush3.xpose.msra.mxu0 %v16560_v26  ;;  %14751 = vmatpush3.xpose.msra.mxu1 %v16596_v41 }
 0x2bb   : > { %14752 = vmatprep.mubr.msk.f32.mxu1 %vm16047_vm0, %v16048_v8  ;;  %14755 = vmatprep.subr.mxu1 %v16048_v8  ;;  %v5527_v2 = vand.u32 4294901760, %v5526_v56  ;;  %v5979_v26 = vsub.f32 %v5977_v14, %v5978_v20 }
 0x2bc   : > { %14747 = vmatprep.mubr.msk.f32.mxu0 %vm16047_vm0, %v16048_v8  ;;  %14780 = vmatprep.subr.mxu0 %v16048_v8 }
 0x2bd   : > { %14753 = vmatmul.mubr.f32.vlgmr.msra.gmra.mrb[12].mxu1 %v5074_v55  ;;  %v5980_v29 = vand.u32 4294901760, %v5979_v26 }
 0x2be   : > { %14756 = vmatpush3.xpose.msra.mxu1 %v5085_v61  ;;  %14757 = vmatprep.mubr.msk.f32.mxu1 %vm16047_vm0, %v16048_v8 }
 0x2bf   : > { %14760 = vmatprep.subr.mxu1 %v16048_v8 }
 0x2c1   : > { %14748 = vmatmul.mubr.f32.vlgmr.msra.gmra.mrb[10].mxu0 %v16540_v0 }
 0x2c2   : > { %14781 = vmatpush3.xpose.msra.mxu0 %v16619_v50  ;;  %14782 = vmatprep.mubr.msk.f32.mxu0 %vm16047_vm0, %v16048_v8 }
 0x2c3   : > { %14785 = vmatprep.subr.mxu0 %v16048_v8 }
 0x2c5   : > { %14758 = vmatmul.mubr.f32.vlgmr.msra.gmra.mrb[12].mxu1 %v16590_v39  ;;  %14783 = vmatmul.mubr.f32.vlgmr.msra.gmra.mrb[12].mxu0 %v5527_v2 }
 0x2c6   : > { %14761 = vmatpush3.xpose.msra.mxu1 %v16606_v45  ;;  %14786 = vmatpush3.xpose.msra.mxu0 %v5538_v4 }
 0x2c7   : > { %14762 = vmatprep.mubr.msk.f32.mxu1 %vm16047_vm0, %v16048_v8  ;;  %14765 = vmatprep.subr.mxu1 %v16048_v8 }
 0x2c8   : > { %14787 = vmatprep.mubr.msk.f32.mxu0 %vm16047_vm0, %v16048_v8  ;;  %14790 = vmatprep.subr.mxu0 %v16048_v8 }
 0x2cd   : > { %14763 = vmatmul.mubr.f32.vlgmr.msra.gmra.mrb[12].mxu1 %v16602_v43  ;;  %14788 = vmatmul.mubr.f32.vlgmr.msra.gmra.mrb[12].mxu0 %v16611_v47 }
 0x2ce   : > { %14766 = vmatpush3.xpose.msra.mxu1 %v16596_v41  ;;  %14791 = vmatpush3.xpose.msra.mxu0 %v5535_v54  ;;  %v16656_v0 = vpop.f32.mrb[2].mxu1 }
 0x2cf   : > { %v14539_v5 = vpop.f32.mrb[3].mxu1  ;;  %v6359_v6 = vsel %vm921_vm2, %v16656_v0, -inf  ;;  %14767 = vmatprep.mubr.msk.f32.mxu1 %vm16047_vm0, %v16048_v8  ;;  %14770 = vmatprep.subr.mxu1 %v16048_v8 }
 0x2d0   : > { %6360 = vmax.xlane.f32.xlu0 %v6359_v6  ;;  %14792 = vmatprep.mubr.msk.f32.mxu0 %vm16047_vm0, %v16048_v8 }
 0x2d1   : > { %14795 = vmatprep.subr.mxu0 %v16048_v8 }
 0x2d5   : > { %14768 = vmatmul.mubr.f32.vlgmr.msra.gmra.mrb[12].mxu1 %v5072_v48  ;;  %14793 = vmatmul.mubr.f32.vlgmr.msra.gmra.mrb[12].mxu0 %v5524_v51 }
 0x2d6   : > { %14771 = vmatpush3.xpose.msra.mxu1 %v5083_v49  ;;  %14796 = vmatpush3.xpose.msra.mxu0 %v16619_v50 }
 0x2d7   : > { %14772 = vmatprep.mubr.msk.f32.mxu1 %vm16047_vm0, %v16048_v8  ;;  %14775 = vmatprep.subr.mxu1 %v16048_v8 }
 0x2d8   : > { %14797 = vmatprep.mubr.msk.f32.mxu0 %vm16047_vm0, %v16048_v8  ;;  %14800 = vmatprep.subr.mxu0 %v16048_v8 }
 0x2dd   : > { %14773 = vmatmul.mubr.f32.vlgmr.msra.gmra.mrb[12].mxu1 %v16590_v39  ;;  %14798 = vmatmul.mubr.f32.vlgmr.msra.gmra.mrb[12].mxu0 %v5525_v59 }
 0x2de   : > { %14776 = vmatpush3.xpose.msra.mxu1 %v16596_v41  ;;  %14801 = vmatpush3.xpose.msra.mxu0 %v5536_v62 }
 0x2df   : > { %14777 = vmatprep.mubr.msk.f32.mxu1 %vm16047_vm0, %v16048_v8  ;;  %14802 = vmatprep.mubr.msk.f32.mxu0 %vm16047_vm0, %v16048_v8 }
 0x2e0   : > { %14805 = vmatprep.subr.mxu0 %v16048_v8  ;;  %14810 = vmatprep.subr.mxu1 %v16048_v8 }
 0x2e5   : > { %14778 = vmatmul.mubr.f32.vlgmr.msra.gmra.mrb[12].mxu1 %v16590_v39  ;;  %14803 = vmatmul.mubr.f32.vlgmr.msra.gmra.mrb[12].mxu0 %v16611_v47 }
 0x2e6   : > { %14806 = vmatpush3.xpose.msra.mxu0 %v16619_v50  ;;  %14807 = vmatprep.mubr.msk.f32.mxu0 %vm16047_vm0, %v16048_v8 }
 0x2e7   : > { %14812 = vmatprep.mubr.msk.f32.mxu1 %vm16047_vm0, %v16048_v8  ;;  %14840 = vmatprep.subr.mxu0 %v16048_v8 }
 0x2ed   : > { %14808 = vmatmul.mubr.f32.vlgmr.msra.gmra.mrb[12].mxu0 %v16611_v47 }
 0x2ee   : > { %14842 = vmatprep.mubr.msk.f32.mxu0 %vm16047_vm0, %v16048_v8 }
 0x2fa   : > { %v16694_v15 = vpop.f32.mrb[4].mxu1 }
 0x2fb   : > { %v14569_v16 = vpop.f32.mrb[5].mxu1  ;;  %v6362_v19 = vsel %vm921_vm2, %v16694_v15, -inf }
 0x2fc   : > { %6363 = vmax.xlane.f32.xlu0 %v6362_v19 }
 0x301   : > { %v5904_v23 = vpop.permute.xlu0 %5903 }
 0x302   : > { %v5908_v24 = vsel %vm921_vm2, %v5904_v23, 0 }
 0x303   : > { %v5911_v27 = vand.u32 4294901760, %v5908_v24 }
 0x305   : > { %v5988_v28 = vsub.f32 %v5908_v24, %v5911_v27  ;;  %14811 = vmatpush3.xpose.msra.mxu1 %v5911_v27 }
 0x306   : > { %14815 = vmatprep.subr.mxu1 %v16048_v8 }
 0x307   : > { %v5989_v30 = vand.u32 4294901760, %v5988_v28 }
 0x308   : > { %14813 = vmatmul.mubr.f32.vlgmr.msra.gmra.mrb[14].mxu1 %v5980_v29 }
 0x309   : > { %v5990_v31 = vsub.f32 %v5988_v28, %v5989_v30  ;;  %14817 = vmatprep.mubr.msk.f32.mxu1 %vm16047_vm0, %v16048_v8 }
 0x30b   : > { %v5991_v33 = vand.u32 4294901760, %v5990_v31 }
 0x30d   : > { %14816 = vmatpush3.xpose.msra.mxu1 %v5991_v33 }
 0x30e   : > { %14820 = vmatprep.subr.mxu1 %v16048_v8 }
 0x310   : > { %14818 = vmatmul.mubr.f32.vlgmr.msra.gmra.mrb[14].mxu1 %v5976_v13 }
 0x311   : > { %14821 = vmatpush3.xpose.msra.mxu1 %v5988_v28  ;;  %14822 = vmatprep.mubr.msk.f32.mxu1 %vm16047_vm0, %v16048_v8 }
 0x312   : > { %6488 = vrot.lane.b32.xlu0 %v16254_v57, %s16053_s22  ;;  %14825 = vmatprep.subr.mxu1 %v16048_v8 }
 0x318   : > { %14823 = vmatmul.mubr.f32.vlgmr.msra.gmra.mrb[14].mxu1 %v5977_v14 }
 0x319   : > { %14826 = vmatpush3.xpose.msra.mxu1 %v5911_v27  ;;  %14827 = vmatprep.mubr.msk.f32.mxu1 %vm16047_vm0, %v16048_v8 }
 0x31a   : > { %14830 = vmatprep.subr.mxu1 %v16048_v8 }
 0x31d   : > { %v16711_v34 = vpop.f32.mrb[6].mxu0 }
 0x31e   : > { %v14629_v35 = vpop.f32.mrb[7].mxu0  ;;  %v6368_v38 = vsel %vm921_vm2, %v16711_v34, -inf }
 0x320   : > { %14828 = vmatmul.mubr.f32.vlgmr.msra.gmra.mrb[14].mxu1 %v5978_v20 }
 0x321   : > { %14831 = vmatpush3.xpose.msra.mxu1 %v5989_v30  ;;  %14832 = vmatprep.mubr.msk.f32.mxu1 %vm16047_vm0, %v16048_v8 }
 0x322   : > { %14835 = vmatprep.subr.mxu1 %v16048_v8 }
 0x326   : > { %v2728_v57 = vpop.f32.mrb[6].mxu1 }
 0x327   : > { %v14599_v36 = vpop.f32.mrb[7].mxu1  ;;  %v6365_v37 = vsel %vm921_vm2, %v2728_v57, -inf }
 0x328   : > { %14833 = vmatmul.mubr.f32.vlgmr.msra.gmra.mrb[14].mxu1 %v5976_v13  ;;  %6366 = vmax.xlane.f32.xlu1 %v6365_v37 }
 0x329   : > { %14836 = vmatpush3.xpose.msra.mxu1 %v5911_v27  ;;  %14837 = vmatprep.mubr.msk.f32.mxu1 %vm16047_vm0, %v16048_v8 }
 0x32a   : > { %14870 = vmatprep.subr.mxu1 %v16048_v8 }
 0x330   : > { %14838 = vmatmul.mubr.f32.vlgmr.msra.gmra.mrb[14].mxu1 %v5976_v13 }
 0x331   : > { %6369 = vmax.xlane.f32.xlu0 %v6368_v38  ;;  %14872 = vmatprep.mubr.msk.f32.mxu1 %vm16047_vm0, %v16048_v8  ;;  %v6358_v39 = vpop.xlane.xlu1 %6357 }
 0x332   : > { %v6392_v40 = vsub.f32 %v16575_v32, %v6358_v39 }
 0x334   : > { %v6404_v43 = vmul.f32 1.442695, %v6392_v40 }
 0x336   : > { %15975 = vpow2.f32 %v6404_v43 }
 0x339   : > { %6940 = vrot.lane.b32.xlu1 %v16259_v60, %s16053_s22 }
 0x340   : > { %v16733_v47 = vpop.eup %15975 }
 0x341   : > { %v6428_v60 = vsel %vm921_vm2, %v16733_v47, 0.0 }
 0x349   : > { %v16727_v41 = vpop.f32.mrb[8].mxu0 }
 0x34a   : > { %v14689_v42 = vpop.f32.mrb[9].mxu0  ;;  %v6374_v50 = vsel %vm921_vm2, %v16727_v41, -inf }
 0x352   : > { %v16729_v44 = vpop.f32.mrb[8].mxu1 }
 0x353   : > { %v14659_v45 = vpop.f32.mrb[9].mxu1  ;;  %v6371_v46 = vsel %vm921_vm2, %v16729_v44, -inf }
 0x354   : > { %6372 = vmax.xlane.f32.xlu0 %v6371_v46 }
 0x35d   : > { %v6361_v48 = vpop.xlane.xlu0 %6360  ;;  %6429 = vadd.xlane.f32.xlu1 %v6428_v60 }
 0x35e   : > { %v6393_v32 = vsub.f32 %v16656_v0, %v6361_v48 }
 0x360   : > { %v6406_v49 = vmul.f32 1.442695, %v6393_v32 }
 0x361   : > { %6375 = vmax.xlane.f32.xlu1 %v6374_v50 }
 0x362   : > { %15977 = vpow2.f32 %v6406_v49 }
 0x36c   : > { %v16740_v51 = vpop.eup %15977 }
 0x36d   : > { %v6431_v52 = vsel %vm921_vm2, %v16740_v51, 0.0 }
 0x36e   : > { %6432 = vadd.xlane.f32.xlu1 %v6431_v52 }
 0x389   : > { %v6364_v53 = vpop.xlane.xlu0 %6363 }
 0x38a   : > { %v6394_v54 = vsub.f32 %v16694_v15, %v6364_v53 }
 0x38c   : > { %v6408_v55 = vmul.f32 1.442695, %v6394_v54  ;;  %v16745_v59 = vpop.f32.mrb[10].mxu1 }
 0x38d   : > { %v6489_v61 = vpop.permute.xlu0 %6488  ;;  %v14719_v62 = vpop.f32.mrb[11].mxu1  ;;  %v6377_v56 = vsel %vm921_vm2, %v16745_v59, -inf }
 0x38e   : > { %15979 = vpow2.f32 %v6408_v55  ;;  %v16749_v1 = vand.u32 4294901760, %v6489_v61  ;;  %6378 = vmax.xlane.f32.xlu0 %v6377_v56 }
 0x390   : > { %14841 = vmatpush3.msra.mxu0 %v16749_v1  ;;  %v6572_v38 = vsub.f32 %v6489_v61, %v16749_v1 }
 0x391   : > { %14845 = vmatprep.subr.mxu0 %v16048_v8 }
 0x392   : > { %v6573_v43 = vand.u32 4294901760, %v6572_v38 }
 0x394   : > { %v16753_v2 = vpop.f32.mrb[10].mxu0  ;;  %v6574_v60 = vsub.f32 %v6572_v38, %v6573_v43 }
 0x395   : > { %v14749_v4 = vpop.f32.mrb[11].mxu0 }
 0x396   : > { %v6575_v49 = vand.u32 4294901760, %v6574_v60 }
 0x398   : > { %v16755_v0 = vpop.eup %15979 }
 0x399   : > { %v6434_v5 = vsel %vm921_vm2, %v16755_v0, 0.0 }
 0x39a   : > { %6435 = vadd.xlane.f32.xlu0 %v6434_v5 }
 0x3b0   : > { %7392 = vrot.lane.b32.xlu0 %v16263_v63, %s16053_s22 }
 0x3b5   : > { %v6367_v6 = vpop.xlane.xlu1 %6366 }
 0x3b6   : > { %v6395_v9 = vsub.f32 %v2728_v57, %v6367_v6 }
 0x3b8   : > { %v6410_v10 = vmul.f32 1.442695, %v6395_v9  ;;  %v16761_v13 = vpop.f32.mrb[12].mxu1 }
 0x3b9   : > { %v6941_v14 = vpop.permute.xlu1 %6940  ;;  %v14779_v15 = vpop.f32.mrb[13].mxu1  ;;  %v6383_v30 = vsel %vm921_vm2, %v16761_v13, -inf }
 0x3ba   : > { %15981 = vpow2.f32 %v6410_v10  ;;  %v16763_v16 = vand.u32 4294901760, %v6941_v14 }
 0x3bc   : > { %14871 = vmatpush3.msra.mxu1 %v16763_v16  ;;  %v7024_v55 = vsub.f32 %v6941_v14, %v16763_v16 }
 0x3bd   : > { %14875 = vmatprep.subr.mxu1 %v16048_v8 }
 0x3be   : > { %v6370_v19 = vpop.xlane.xlu0 %6369  ;;  %v7025_v5 = vand.u32 4294901760, %v7024_v55 }
 0x3bf   : > { %v6396_v20 = vsub.f32 %v16711_v34, %v6370_v19 }
 0x3c0   : > { %v16768_v23 = vpop.f32.mrb[12].mxu0  ;;  %v7026_v10 = vsub.f32 %v7024_v55, %v7025_v5 }
 0x3c1   : > { %v6412_v63 = vmul.f32 1.442695, %v6396_v20  ;;  %v14809_v24 = vpop.f32.mrb[13].mxu0 }
 0x3c2   : > { %v7027_v19 = vand.u32 4294901760, %v7026_v10 }
 0x3c3   : > { %15983 = vpow2.f32 %v6412_v63 }
 0x3c4   : > { %v16770_v26 = vpop.eup %15981 }
 0x3c5   : > { %v6437_v27 = vsel %vm921_vm2, %v16770_v26, 0.0 }
 0x3c6   : > { %6438 = vadd.xlane.f32.xlu1 %v6437_v27 }
 0x3cd   : > { %v16774_v28 = vpop.eup %15983 }
 0x3ce   : > { %v6440_v29 = vsel %vm921_vm2, %v16774_v28, 0.0 }
 0x3cf   : > { %6441 = vadd.xlane.f32.xlu0 %v6440_v29 }
 0x3d3   : > { %6384 = vmax.xlane.f32.xlu0 %v6383_v30  ;;  %v6386_v30 = vsel %vm921_vm2, %v16768_v23, -inf }
 0x3d7   : > { %7844 = vrot.lane.b32.xlu1 %v16272_v7, %s16053_s22 }
 0x3e1   : > { %v6373_v31 = vpop.xlane.xlu0 %6372 }
 0x3e2   : > { %v6397_v33 = vsub.f32 %v16729_v44, %v6373_v31 }
 0x3e4   : > { %v6414_v35 = vmul.f32 1.442695, %v6397_v33 }
 0x3e9   : > { %8296 = vrot.lane.b32.xlu0 %v16279_v18, %s16053_s22  ;;  %v6380_v18 = vsel %vm921_vm2, %v16753_v2, -inf }
 0x3ea   : > { %v6430_v34 = vpop.xlane.xlu1 %6429 }
 0x3eb   : > { %15985 = vrcp.f32 %v6430_v34 }
 0x3ec   : > { %15987 = vpow2.f32 %v6414_v35 }
 0x3ee   : > { %v6376_v57 = vpop.xlane.xlu1 %6375 }
 0x3ef   : > { %v6398_v36 = vsub.f32 %v16727_v41, %v6376_v57 }
 0x3f1   : > { %v6416_v40 = vmul.f32 1.442695, %v6398_v36 }
 0x3f3   : > { %15989 = vpow2.f32 %v6416_v40 }
 0x3f5   : > { %v15986_v37 = vpop.eup %15985 }
 0x3f6   : > { %v6465_v39 = vmul.f32 %v15986_v37, %v16733_v47  ;;  %v16793_v44 = vpop.eup %15987 }
 0x3f7   : > { %v6443_v47 = vsel %vm921_vm2, %v16793_v44, 0.0 }
 0x3f8   : > { %v6492_v7 = vsel %vm921_vm2, %v6465_v39, 0 }
 0x3f9   : > { %v16789_v42 = vand.u32 4294901760, %v6492_v7 }
 0x3fb   : > { %v6433_v45 = vpop.xlane.xlu1 %6432  ;;  %6381 = vmax.xlane.f32.xlu1 %v6380_v18  ;;  %v6561_v41 = vsub.f32 %v6492_v7, %v16789_v42 }
 0x3fc   : > { %15991 = vrcp.f32 %v6433_v45 }
 0x3fd   : > { %v6562_v46 = vand.u32 4294901760, %v6561_v41  ;;  %v16800_v52 = vpop.eup %15989 }
 0x3fe   : > { %v6446_v62 = vsel %vm921_vm2, %v16800_v52, 0.0 }
 0x3ff   : > { %6444 = vadd.xlane.f32.xlu1 %v6443_v47  ;;  %v6563_v48 = vsub.f32 %v6561_v41, %v6562_v46 }
 0x401   : > { %v6564_v32 = vand.u32 4294901760, %v6563_v48 }
 0x403   : > { %v16798_v50 = vpop.f32.mrb[14].mxu1  ;;  %14843 = vmatmul.mubr.f32.vlgmr.msra.gmra.mrb[14].mxu0 %v6564_v32 }
 0x404   : > { %14846 = vmatpush3.msra.mxu0 %v6575_v49  ;;  %v14839_v53 = vpop.f32.mrb[15].mxu1  ;;  %14847 = vmatprep.mubr.msk.f32.mxu0 %vm16047_vm0, %v16048_v8  ;;  %v6389_v6 = vsel %vm921_vm2, %v16798_v50, -inf }
 0x405   : > { %14850 = vmatprep.subr.mxu0 %v16048_v8 }
 0x406   : > { %v15992_v54 = vpop.eup %15991 }
 0x407   : > { %v6467_v61 = vmul.f32 %v15992_v54, %v16740_v51 }
 0x408   : > { %6447 = vadd.xlane.f32.xlu0 %v6446_v62 }
 0x409   : > { %v6944_v56 = vsel %vm921_vm2, %v6467_v61, 0 }
 0x40a   : > { %v16810_v4 = vand.u32 4294901760, %v6944_v56 }
 0x40b   : > { %14848 = vmatmul.mubr.f32.vlgmr.msra.gmra.mrb[14].mxu0 %v16789_v42 }
 0x40c   : > { %14851 = vmatpush3.msra.mxu0 %v6572_v38  ;;  %6390 = vmax.xlane.f32.xlu0 %v6389_v6  ;;  %v7013_v9 = vsub.f32 %v6944_v56, %v16810_v4 }
 0x40d   : > { %14852 = vmatprep.mubr.msk.f32.mxu0 %vm16047_vm0, %v16048_v8  ;;  %14855 = vmatprep.subr.mxu0 %v16048_v8 }
 0x40e   : > { %v7014_v51 = vand.u32 4294901760, %v7013_v9 }
 0x410   : > { %8748 = vrot.lane.b32.xlu1 %v16285_v21, %s16053_s22  ;;  %v7015_v14 = vsub.f32 %v7013_v9, %v7014_v51 }
 0x412   : > { %v7016_v15 = vand.u32 4294901760, %v7015_v14 }
 0x413   : > { %14853 = vmatmul.mubr.f32.vlgmr.msra.gmra.mrb[14].mxu0 %v6561_v41 }
 0x414   : > { %14856 = vmatpush3.msra.mxu0 %v16749_v1  ;;  %14873 = vmatmul.mubr.f32.vlgmr.msra.gmra.mrb[16].mxu1 %v7016_v15 }
 0x415   : > { %14876 = vmatpush3.msra.mxu1 %v7027_v19  ;;  %14857 = vmatprep.mubr.msk.f32.mxu0 %vm16047_vm0, %v16048_v8 }
 0x416   : > { %14860 = vmatprep.subr.mxu0 %v16048_v8  ;;  %14877 = vmatprep.mubr.msk.f32.mxu1 %vm16047_vm0, %v16048_v8 }
 0x417   : > { %14880 = vmatprep.subr.mxu1 %v16048_v8 }
 0x41b   : > { %14858 = vmatmul.mubr.f32.vlgmr.msra.gmra.mrb[14].mxu0 %v6562_v46  ;;  %v6379_v21 = vpop.xlane.xlu0 %6378 }
 0x41c   : > { %14861 = vmatpush3.msra.mxu0 %v6573_v43  ;;  %14878 = vmatmul.mubr.f32.vlgmr.msra.gmra.mrb[16].mxu1 %v16810_v4  ;;  %v6399_v20 = vsub.f32 %v16745_v59, %v6379_v21 }
 0x41d   : > { %14881 = vmatpush3.msra.mxu1 %v7024_v55  ;;  %14862 = vmatprep.mubr.msk.f32.mxu0 %vm16047_vm0, %v16048_v8 }
 0x41e   : > { %14865 = vmatprep.subr.mxu0 %v16048_v8  ;;  %14882 = vmatprep.mubr.msk.f32.mxu1 %vm16047_vm0, %v16048_v8  ;;  %v6418_v63 = vmul.f32 1.442695, %v6399_v20 }
 0x41f   : > { %14885 = vmatprep.subr.mxu1 %v16048_v8 }
 0x422   : > { %9200 = vrot.lane.b32.xlu0 %v16291_v22, %s16053_s22 }
 0x423   : > { %14863 = vmatmul.mubr.f32.vlgmr.msra.gmra.mrb[14].mxu0 %v16789_v42 }
 0x424   : > { %14866 = vmatpush3.msra.mxu0 %v16749_v1  ;;  %14883 = vmatmul.mubr.f32.vlgmr.msra.gmra.mrb[16].mxu1 %v7013_v9 }
 0x425   : > { %14886 = vmatpush3.msra.mxu1 %v16763_v16  ;;  %14867 = vmatprep.mubr.msk.f32.mxu0 %vm16047_vm0, %v16048_v8 }
 0x426   : > { %14887 = vmatprep.mubr.msk.f32.mxu1 %vm16047_vm0, %v16048_v8  ;;  %14890 = vmatprep.subr.mxu1 %v16048_v8 }
 0x427   : > { %v6436_v59 = vpop.xlane.xlu0 %6435  ;;  %14900 = vmatprep.subr.mxu0 %v16048_v8 }
 0x428   : > { %15993 = vrcp.f32 %v6436_v59 }
 0x429   : > { %15995 = vpow2.f32 %v6418_v63 }
 0x42b   : > { %14868 = vmatmul.mubr.f32.vlgmr.msra.gmra.mrb[14].mxu0 %v16789_v42  ;;  %v7393_v22 = vpop.permute.xlu0 %7392 }
 0x42c   : > { %v7399_v1 = vand.u32 4294901760, %v7393_v22  ;;  %14888 = vmatmul.mubr.f32.vlgmr.msra.gmra.mrb[16].mxu1 %v7014_v51  ;;  %14902 = vmatprep.mubr.msk.f32.mxu0 %vm16047_vm0, %v16048_v8 }
 0x42d   : > { %14891 = vmatpush3.msra.mxu1 %v7025_v5  ;;  %14892 = vmatprep.mubr.msk.f32.mxu1 %vm16047_vm0, %v16048_v8 }
 0x42e   : > { %14901 = vmatpush3.msra.mxu0 %v7399_v1  ;;  %14895 = vmatprep.subr.mxu1 %v16048_v8  ;;  %v7476_v29 = vsub.f32 %v7393_v22, %v7399_v1 }
 0x42f   : > { %14905 = vmatprep.subr.mxu0 %v16048_v8 }
 0x432   : > { %v15994_v24 = vpop.eup %15993 }
 0x433   : > { %v6469_v27 = vmul.f32 %v15994_v24, %v16755_v0  ;;  %v16857_v31 = vpop.eup %15995  ;;  %v7477_v0 = vand.u32 4294901760, %v7476_v29 }
 0x434   : > { %14893 = vmatmul.mubr.f32.vlgmr.msra.gmra.mrb[16].mxu1 %v16810_v4  ;;  %6387 = vmax.xlane.f32.xlu1 %v6386_v30  ;;  %v6449_v35 = vsel %vm921_vm2, %v16857_v31, 0.0 }
 0x435   : > { %14896 = vmatpush3.msra.mxu1 %v16763_v16  ;;  %14897 = vmatprep.mubr.msk.f32.mxu1 %vm16047_vm0, %v16048_v8  ;;  %v7396_v33 = vsel %vm921_vm2, %v6469_v27, 0  ;;  %v7478_v37 = vsub.f32 %v7476_v29, %v7477_v0 }
 0x436   : > { %v7464_v34 = vand.u32 4294901760, %v7396_v33  ;;  %14930 = vmatprep.subr.mxu1 %v16048_v8 }
 0x437   : > { %v7479_v39 = vand.u32 4294901760, %v7478_v37 }
 0x438   : > { %6450 = vadd.xlane.f32.xlu1 %v6449_v35  ;;  %v7465_v57 = vsub.f32 %v7396_v33, %v7464_v34 }
 0x43a   : > { %v7466_v36 = vand.u32 4294901760, %v7465_v57 }
 0x43c   : > { %14898 = vmatmul.mubr.f32.vlgmr.msra.gmra.mrb[16].mxu1 %v16810_v4  ;;  %v7467_v38 = vsub.f32 %v7465_v57, %v7466_v36 }
 0x43d   : > { %14932 = vmatprep.mubr.msk.f32.mxu1 %vm16047_vm0, %v16048_v8 }
 0x43e   : > { %v7468_v16 = vand.u32 4294901760, %v7467_v38 }
 0x440   : > { %14903 = vmatmul.mubr.f32.vlgmr.msra.gmra.mrb[16].mxu0 %v7468_v16 }
 0x441   : > { %14906 = vmatpush3.msra.mxu0 %v7479_v39  ;;  %14907 = vmatprep.mubr.msk.f32.mxu0 %vm16047_vm0, %v16048_v8 }
 0x442   : > { %14910 = vmatprep.subr.mxu0 %v16048_v8 }
 0x448   : > { %14908 = vmatmul.mubr.f32.vlgmr.msra.gmra.mrb[16].mxu0 %v7464_v34 }
 0x449   : > { %14911 = vmatpush3.msra.mxu0 %v7476_v29  ;;  %9652 = vrot.lane.b32.xlu1 %v16361_v58, %s16053_s22 }
 0x44a   : > { %14912 = vmatprep.mubr.msk.f32.mxu0 %vm16047_vm0, %v16048_v8  ;;  %14915 = vmatprep.subr.mxu0 %v16048_v8 }
 0x450   : > { %14913 = vmatmul.mubr.f32.vlgmr.msra.gmra.mrb[16].mxu0 %v7465_v57 }
 0x451   : > { %14916 = vmatpush3.msra.mxu0 %v7399_v1  ;;  %14917 = vmatprep.mubr.msk.f32.mxu0 %vm16047_vm0, %v16048_v8 }
 0x452   : > { %14920 = vmatprep.subr.mxu0 %v16048_v8 }
 0x453   : > { %v6439_v40 = vpop.xlane.xlu1 %6438 }
 0x454   : > { %15997 = vrcp.f32 %v6439_v40 }
 0x457   : > { %v7845_v7 = vpop.permute.xlu1 %7844 }
 0x458   : > { %v16881_v42 = vand.u32 4294901760, %v7845_v7  ;;  %14918 = vmatmul.mubr.f32.vlgmr.msra.gmra.mrb[16].mxu0 %v7466_v36 }
 0x459   : > { %14921 = vmatpush3.msra.mxu0 %v7477_v0  ;;  %14922 = vmatprep.mubr.msk.f32.mxu0 %vm16047_vm0, %v16048_v8 }
 0x45a   : > { %14931 = vmatpush3.msra.mxu1 %v16881_v42  ;;  %14925 = vmatprep.subr.mxu0 %v16048_v8  ;;  %v7928_v45 = vsub.f32 %v7845_v7, %v16881_v42 }
 0x45b   : > { %14935 = vmatprep.subr.mxu1 %v16048_v8 }
 0x45c   : > { %v6442_v58 = vpop.xlane.xlu0 %6441  ;;  %v7929_v48 = vand.u32 4294901760, %v7928_v45 }
 0x45d   : > { %15999 = vrcp.f32 %v6442_v58 }
 0x45e   : > { %v15998_v43 = vpop.eup %15997 }
 0x45f   : > { %v6471_v18 = vmul.f32 %v15998_v43, %v16770_v26 }
 0x460   : > { %14923 = vmatmul.mubr.f32.vlgmr.msra.gmra.mrb[16].mxu0 %v7464_v34  ;;  %v6385_v41 = vpop.xlane.xlu0 %6384 }
 0x461   : > { %14926 = vmatpush3.msra.mxu0 %v7399_v1  ;;  %v6401_v46 = vsub.f32 %v16761_v13, %v6385_v41  ;;  %14927 = vmatprep.mubr.msk.f32.mxu0 %vm16047_vm0, %v16048_v8  ;;  %v7848_v60 = vsel %vm921_vm2, %v6471_v18, 0  ;;  %v7930_v13 = vsub.f32 %v7928_v45, %v7929_v48 }
 0x462   : > { %14960 = vmatprep.subr.mxu0 %v16048_v8  ;;  %v16895_v47 = vand.u32 4294901760, %v7848_v60 }
 0x463   : > { %v6422_v32 = vmul.f32 1.442695, %v6401_v46  ;;  %v7931_v6 = vand.u32 4294901760, %v7930_v13 }
 0x464   : > { %v8297_v49 = vpop.permute.xlu0 %8296  ;;  %v7917_v26 = vsub.f32 %v7848_v60, %v16895_v47 }
 0x465   : > { %16001 = vpow2.f32 %v6422_v32  ;;  %v16898_v53 = vand.u32 4294901760, %v8297_v49 }
 0x466   : > { %v7918_v54 = vand.u32 4294901760, %v7917_v26 }
 0x467   : > { %v16000_v55 = vpop.eup %15999  ;;  %v8380_v62 = vsub.f32 %v8297_v49, %v16898_v53 }
 0x468   : > { %v6473_v61 = vmul.f32 %v16000_v55, %v16774_v28  ;;  %14928 = vmatmul.mubr.f32.vlgmr.msra.gmra.mrb[16].mxu0 %v7464_v34  ;;  %v7919_v56 = vsub.f32 %v7917_v26, %v7918_v54 }
 0x469   : > { %14961 = vmatpush3.msra.mxu0 %v16898_v53  ;;  %14962 = vmatprep.mubr.msk.f32.mxu0 %vm16047_vm0, %v16048_v8  ;;  %v8381_v51 = vand.u32 4294901760, %v8380_v62 }
 0x46a   : > { %v7920_v4 = vand.u32 4294901760, %v7919_v56  ;;  %14965 = vmatprep.subr.mxu0 %v16048_v8  ;;  %v8300_v5 = vsel %vm921_vm2, %v6473_v61, 0 }
 0x46b   : > { %v16907_v9 = vand.u32 4294901760, %v8300_v5  ;;  %v8382_v15 = vsub.f32 %v8380_v62, %v8381_v51 }
 0x46c   : > { %14933 = vmatmul.mubr.f32.vlgmr.msra.gmra.mrb[18].mxu1 %v7920_v4 }
 0x46d   : > { %14936 = vmatpush3.msra.mxu1 %v7931_v6  ;;  %14937 = vmatprep.mubr.msk.f32.mxu1 %vm16047_vm0, %v16048_v8  ;;  %v8369_v28 = vsub.f32 %v8300_v5, %v16907_v9  ;;  %v8383_v63 = vand.u32 4294901760, %v8382_v15 }
 0x46e   : > { %14940 = vmatprep.subr.mxu1 %v16048_v8 }
 0x46f   : > { %v16913_v10 = vpop.eup %16001  ;;  %v8370_v14 = vand.u32 4294901760, %v8369_v28 }
 0x470   : > { %v6455_v19 = vsel %vm921_vm2, %v16913_v10, 0.0 }
 0x471   : > { %6456 = vadd.xlane.f32.xlu0 %v6455_v19  ;;  %v8371_v21 = vsub.f32 %v8369_v28, %v8370_v14 }
 0x473   : > { %v8372_v20 = vand.u32 4294901760, %v8371_v21 }
 0x474   : > { %14938 = vmatmul.mubr.f32.vlgmr.msra.gmra.mrb[18].mxu1 %v16895_v47 }
 0x475   : > { %14941 = vmatpush3.msra.mxu1 %v7928_v45  ;;  %14963 = vmatmul.mubr.f32.vlgmr.msra.gmra.mrb[18].mxu0 %v8372_v20 }
 0x476   : > { %14966 = vmatpush3.msra.mxu0 %v8383_v63  ;;  %14942 = vmatprep.mubr.msk.f32.mxu1 %vm16047_vm0, %v16048_v8 }
 0x477   : > { %14945 = vmatprep.subr.mxu1 %v16048_v8  ;;  %14967 = vmatprep.mubr.msk.f32.mxu0 %vm16047_vm0, %v16048_v8 }
 0x478   : > { %14970 = vmatprep.subr.mxu0 %v16048_v8 }
 0x47c   : > { %14943 = vmatmul.mubr.f32.vlgmr.msra.gmra.mrb[18].mxu1 %v7917_v26 }
 0x47d   : > { %14946 = vmatpush3.msra.mxu1 %v16881_v42  ;;  %14968 = vmatmul.mubr.f32.vlgmr.msra.gmra.mrb[18].mxu0 %v16907_v9 }
 0x47e   : > { %14971 = vmatpush3.msra.mxu0 %v8380_v62  ;;  %14947 = vmatprep.mubr.msk.f32.mxu1 %vm16047_vm0, %v16048_v8 }
 0x47f   : > { %14950 = vmatprep.subr.mxu1 %v16048_v8  ;;  %14972 = vmatprep.mubr.msk.f32.mxu0 %vm16047_vm0, %v16048_v8 }
 0x480   : > { %14975 = vmatprep.subr.mxu0 %v16048_v8 }
 0x484   : > { %14948 = vmatmul.mubr.f32.vlgmr.msra.gmra.mrb[18].mxu1 %v7918_v54 }
 0x485   : > { %14951 = vmatpush3.msra.mxu1 %v7929_v48  ;;  %14973 = vmatmul.mubr.f32.vlgmr.msra.gmra.mrb[18].mxu0 %v8369_v28 }
 0x486   : > { %14976 = vmatpush3.msra.mxu0 %v16898_v53  ;;  %14952 = vmatprep.mubr.msk.f32.mxu1 %vm16047_vm0, %v16048_v8 }
 0x487   : > { %10104 = vrot.lane.b32.xlu0 %v16391_v11, %s16053_s22  ;;  %14955 = vmatprep.subr.mxu1 %v16048_v8 }
 0x488   : > { %v6382_v59 = vpop.xlane.xlu1 %6381  ;;  %14977 = vmatprep.mubr.msk.f32.mxu0 %vm16047_vm0, %v16048_v8  ;;  %14980 = vmatprep.subr.mxu0 %v16048_v8 }
 0x489   : > { %v6400_v22 = vsub.f32 %v16753_v2, %v6382_v59 }
 0x48b   : > { %v6420_v1 = vmul.f32 1.442695, %v6400_v22 }
 0x48c   : > { %14953 = vmatmul.mubr.f32.vlgmr.msra.gmra.mrb[18].mxu1 %v16895_v47  ;;  %v6445_v24 = vpop.xlane.xlu1 %6444 }
 0x48d   : > { %16003 = vpow2.f32 %v6420_v1  ;;  %14956 = vmatpush3.msra.mxu1 %v16881_v42  ;;  %14978 = vmatmul.mubr.f32.vlgmr.msra.gmra.mrb[18].mxu0 %v8370_v14 }
 0x48e   : > { %16005 = vrcp.f32 %v6445_v24  ;;  %14981 = vmatpush3.msra.mxu0 %v8381_v51  ;;  %14957 = vmatprep.mubr.msk.f32.mxu1 %vm16047_vm0, %v16048_v8 }
 0x48f   : > { %14990 = vmatprep.subr.mxu1 %v16048_v8  ;;  %14982 = vmatprep.mubr.msk.f32.mxu0 %vm16047_vm0, %v16048_v8 }
 0x490   : > { %v8749_v11 = vpop.permute.xlu1 %8748  ;;  %14985 = vmatprep.subr.mxu0 %v16048_v8 }
 0x491   : > { %v16950_v2 = vand.u32 4294901760, %v8749_v11 }
 0x493   : > { %v8832_v0 = vsub.f32 %v8749_v11, %v16950_v2 }
 0x494   : > { %14958 = vmatmul.mubr.f32.vlgmr.msra.gmra.mrb[18].mxu1 %v16895_v47 }
 0x495   : > { %14991 = vmatpush3.msra.mxu1 %v16950_v2  ;;  %14983 = vmatmul.mubr.f32.vlgmr.msra.gmra.mrb[18].mxu0 %v16907_v9  ;;  %v6448_v27 = vpop.xlane.xlu0 %6447  ;;  %v8833_v16 = vand.u32 4294901760, %v8832_v0 }
 0x496   : > { %14986 = vmatpush3.msra.mxu0 %v16898_v53  ;;  %16007 = vrcp.f32 %v6448_v27  ;;  %14987 = vmatprep.mubr.msk.f32.mxu0 %vm16047_vm0, %v16048_v8 }
 0x497   : > { %v16958_v29 = vpop.eup %16003  ;;  %15020 = vmatprep.subr.mxu0 %v16048_v8  ;;  %14992 = vmatprep.mubr.msk.f32.mxu1 %vm16047_vm0, %v16048_v8  ;;  %v8834_v42 = vsub.f32 %v8832_v0, %v8833_v16 }
 0x498   : > { %v16006_v30 = vpop.eup %16005  ;;  %v6452_v33 = vsel %vm921_vm2, %v16958_v29, 0.0  ;;  %14995 = vmatprep.subr.mxu1 %v16048_v8 }
 0x499   : > { %v6475_v34 = vmul.f32 %v16006_v30, %v16793_v44  ;;  %v6391_v35 = vpop.xlane.xlu0 %6390  ;;  %6453 = vadd.xlane.f32.xlu1 %v6452_v33  ;;  %v8835_v60 = vand.u32 4294901760, %v8834_v42 }
 0x49a   : > { %v6403_v57 = vsub.f32 %v16798_v50, %v6391_v35 }
 0x49b   : > { %v8752_v36 = vsel %vm921_vm2, %v6475_v34, 0 }
 0x49c   : > { %v6426_v37 = vmul.f32 1.442695, %v6403_v57  ;;  %v16970_v38 = vand.u32 4294901760, %v8752_v36 }
 0x49d   : > { %14988 = vmatmul.mubr.f32.vlgmr.msra.gmra.mrb[18].mxu0 %v16907_v9  ;;  %v9201_v39 = vpop.permute.xlu0 %9200 }
 0x49e   : > { %16009 = vpow2.f32 %v6426_v37  ;;  %v16973_v40 = vand.u32 4294901760, %v9201_v39  ;;  %v8821_v44 = vsub.f32 %v8752_v36, %v16970_v38  ;;  %15022 = vmatprep.mubr.msk.f32.mxu0 %vm16047_vm0, %v16048_v8 }
 0x4a0   : > { %v16008_v7 = vpop.eup %16007  ;;  %15021 = vmatpush3.msra.mxu0 %v16973_v40  ;;  %v8822_v50 = vand.u32 4294901760, %v8821_v44  ;;  %v9284_v43 = vsub.f32 %v9201_v39, %v16973_v40 }
 0x4a1   : > { %v6477_v58 = vmul.f32 %v16008_v7, %v16800_v52  ;;  %15025 = vmatprep.subr.mxu0 %v16048_v8 }
 0x4a2   : > { %v8823_v18 = vsub.f32 %v8821_v44, %v8822_v50  ;;  %v9285_v47 = vand.u32 4294901760, %v9284_v43 }
 0x4a3   : > { %v9204_v45 = vsel %vm921_vm2, %v6477_v58, 0 }
 0x4a4   : > { %v8824_v41 = vand.u32 4294901760, %v8823_v18  ;;  %v16983_v46 = vand.u32 4294901760, %v9204_v45  ;;  %v9286_v49 = vsub.f32 %v9284_v43, %v9285_v47 }
 0x4a6   : > { %14993 = vmatmul.mubr.f32.vlgmr.msra.gmra.mrb[20].mxu1 %v8824_v41  ;;  %v9273_v48 = vsub.f32 %v9204_v45, %v16983_v46  ;;  %v9287_v55 = vand.u32 4294901760, %v9286_v49 }
 0x4a7   : > { %14996 = vmatpush3.msra.mxu1 %v8835_v60  ;;  %14997 = vmatprep.mubr.msk.f32.mxu1 %vm16047_vm0, %v16048_v8 }
 0x4a8   : > { %v16988_v52 = vpop.eup %16009  ;;  %15000 = vmatprep.subr.mxu1 %v16048_v8  ;;  %v9274_v32 = vand.u32 4294901760, %v9273_v48 }
 0x4a9   : > { %v6461_v26 = vsel %vm921_vm2, %v16988_v52, 0.0 }
 0x4aa   : > { %6462 = vadd.xlane.f32.xlu0 %v6461_v26  ;;  %10556 = vrot.lane.b32.xlu1 %v16402_v17, %s16053_s22  ;;  %v9275_v53 = vsub.f32 %v9273_v48, %v9274_v32 }
 0x4ac   : > { %v9276_v54 = vand.u32 4294901760, %v9275_v53 }
 0x4ae   : > { %14998 = vmatmul.mubr.f32.vlgmr.msra.gmra.mrb[20].mxu1 %v16970_v38  ;;  %15023 = vmatmul.mubr.f32.vlgmr.msra.gmra.mrb[20].mxu0 %v9276_v54 }
 0x4af   : > { %15001 = vmatpush3.msra.mxu1 %v8832_v0  ;;  %15026 = vmatpush3.msra.mxu0 %v9287_v55 }
 0x4b0   : > { %15002 = vmatprep.mubr.msk.f32.mxu1 %vm16047_vm0, %v16048_v8  ;;  %15005 = vmatprep.subr.mxu1 %v16048_v8 }
 0x4b1   : > { %15027 = vmatprep.mubr.msk.f32.mxu0 %vm16047_vm0, %v16048_v8  ;;  %15030 = vmatprep.subr.mxu0 %v16048_v8 }
 0x4b6   : > { %15003 = vmatmul.mubr.f32.vlgmr.msra.gmra.mrb[20].mxu1 %v8821_v44  ;;  %15028 = vmatmul.mubr.f32.vlgmr.msra.gmra.mrb[20].mxu0 %v16983_v46 }
 0x4b7   : > { %15006 = vmatpush3.msra.mxu1 %v16950_v2  ;;  %15031 = vmatpush3.msra.mxu0 %v9284_v43 }
 0x4b8   : > { %15007 = vmatprep.mubr.msk.f32.mxu1 %vm16047_vm0, %v16048_v8  ;;  %15010 = vmatprep.subr.mxu1 %v16048_v8 }
 0x4b9   : > { %15032 = vmatprep.mubr.msk.f32.mxu0 %vm16047_vm0, %v16048_v8  ;;  %15035 = vmatprep.subr.mxu0 %v16048_v8 }
 0x4be   : > { %15008 = vmatmul.mubr.f32.vlgmr.msra.gmra.mrb[20].mxu1 %v8822_v50  ;;  %15033 = vmatmul.mubr.f32.vlgmr.msra.gmra.mrb[20].mxu0 %v9273_v48 }
 0x4bf   : > { %15011 = vmatpush3.msra.mxu1 %v8833_v16  ;;  %15036 = vmatpush3.msra.mxu0 %v16973_v40 }
 0x4c0   : > { %11008 = vrot.lane.b32.xlu0 %v16410_v25, %s16053_s22  ;;  %15012 = vmatprep.mubr.msk.f32.mxu1 %vm16047_vm0, %v16048_v8 }
 0x4c1   : > { %v6388_v17 = vpop.xlane.xlu1 %6387  ;;  %15015 = vmatprep.subr.mxu1 %v16048_v8  ;;  %15037 = vmatprep.mubr.msk.f32.mxu0 %vm16047_vm0, %v16048_v8 }
 0x4c2   : > { %v6402_v13 = vsub.f32 %v16768_v23, %v6388_v17  ;;  %15040 = vmatprep.subr.mxu0 %v16048_v8 }
 0x4c4   : > { %v6424_v61 = vmul.f32 1.442695, %v6402_v13 }
 0x4c5   : > { %v6451_v62 = vpop.xlane.xlu1 %6450 }
 0x4c6   : > { %16011 = vpow2.f32 %v6424_v61  ;;  %15013 = vmatmul.mubr.f32.vlgmr.msra.gmra.mrb[20].mxu1 %v16970_v38  ;;  %15038 = vmatmul.mubr.f32.vlgmr.msra.gmra.mrb[20].mxu0 %v9274_v32 }
 0x4c7   : > { %15016 = vmatpush3.msra.mxu1 %v16950_v2  ;;  %16013 = vrcp.f32 %v6451_v62  ;;  %15041 = vmatpush3.msra.mxu0 %v9285_v47 }
 0x4c8   : > { %15017 = vmatprep.mubr.msk.f32.mxu1 %vm16047_vm0, %v16048_v8  ;;  %15050 = vmatprep.subr.mxu1 %v16048_v8 }
 0x4c9   : > { %v9653_v25 = vpop.permute.xlu1 %9652  ;;  %15042 = vmatprep.mubr.msk.f32.mxu0 %vm16047_vm0, %v16048_v8  ;;  %15045 = vmatprep.subr.mxu0 %v16048_v8 }
 0x4ca   : > { %v9659_v23 = vand.u32 4294901760, %v9653_v25 }
 0x4cc   : > { %v9736_v9 = vsub.f32 %v9653_v25, %v9659_v23 }
 0x4ce   : > { %15018 = vmatmul.mubr.f32.vlgmr.msra.gmra.mrb[20].mxu1 %v16970_v38  ;;  %15043 = vmatmul.mubr.f32.vlgmr.msra.gmra.mrb[20].mxu0 %v16983_v46  ;;  %v9737_v14 = vand.u32 4294901760, %v9736_v9 }
 0x4cf   : > { %15051 = vmatpush3.msra.mxu1 %v9659_v23  ;;  %15046 = vmatpush3.msra.mxu0 %v16973_v40 }
 0x4d0   : > { %v17031_v56 = vpop.eup %16011  ;;  %15047 = vmatprep.mubr.msk.f32.mxu0 %vm16047_vm0, %v16048_v8  ;;  %15052 = vmatprep.mubr.msk.f32.mxu1 %vm16047_vm0, %v16048_v8  ;;  %v9738_v21 = vsub.f32 %v9736_v9, %v9737_v14 }
 0x4d1   : > { %v16014_v4 = vpop.eup %16013  ;;  %v6458_v5 = vsel %vm921_vm2, %v17031_v56, 0.0  ;;  %15055 = vmatprep.subr.mxu1 %v16048_v8  ;;  %15080 = vmatprep.subr.mxu0 %v16048_v8 }
 0x4d2   : > { %v6479_v6 = vmul.f32 %v16014_v4, %v16857_v31  ;;  %6459 = vadd.xlane.f32.xlu1 %v6458_v5  ;;  %v9739_v59 = vand.u32 4294901760, %v9738_v21 }
 0x4d4   : > { %v9656_v51 = vsel %vm921_vm2, %v6479_v6, 0 }
 0x4d5   : > { %v9724_v28 = vand.u32 4294901760, %v9656_v51 }
 0x4d6   : > { %15048 = vmatmul.mubr.f32.vlgmr.msra.gmra.mrb[20].mxu0 %v16983_v46 }
 0x4d7   : > { %v9725_v15 = vsub.f32 %v9656_v51, %v9724_v28  ;;  %15082 = vmatprep.mubr.msk.f32.mxu0 %vm16047_vm0, %v16048_v8 }
 0x4d9   : > { %v9726_v19 = vand.u32 4294901760, %v9725_v15 }
 0x4db   : > { %v9727_v20 = vsub.f32 %v9725_v15, %v9726_v19 }
 0x4dd   : > { %v9728_v63 = vand.u32 4294901760, %v9727_v20 }
 0x4df   : > { %15053 = vmatmul.mubr.f32.vlgmr.msra.gmra.mrb[22].mxu1 %v9728_v63 }
 0x4e0   : > { %15056 = vmatpush3.msra.mxu1 %v9739_v59  ;;  %15057 = vmatprep.mubr.msk.f32.mxu1 %vm16047_vm0, %v16048_v8 }
 0x4e1   : > { %15060 = vmatprep.subr.mxu1 %v16048_v8 }
 0x4e3   : > { %11460 = vrot.lane.b32.xlu1 %v16549_v12, %s16053_s22 }
 0x4e7   : > { %15058 = vmatmul.mubr.f32.vlgmr.msra.gmra.mrb[22].mxu1 %v9724_v28 }
 0x4e8   : > { %15061 = vmatpush3.msra.mxu1 %v9736_v9  ;;  %15062 = vmatprep.mubr.msk.f32.mxu1 %vm16047_vm0, %v16048_v8 }
 0x4e9   : > { %15065 = vmatprep.subr.mxu1 %v16048_v8 }
 0x4ef   : > { %15063 = vmatmul.mubr.f32.vlgmr.msra.gmra.mrb[22].mxu1 %v9725_v15 }
 0x4f0   : > { %15066 = vmatpush3.msra.mxu1 %v9659_v23  ;;  %15067 = vmatprep.mubr.msk.f32.mxu1 %vm16047_vm0, %v16048_v8 }
 0x4f1   : > { %15070 = vmatprep.subr.mxu1 %v16048_v8 }
 0x4f7   : > { %15068 = vmatmul.mubr.f32.vlgmr.msra.gmra.mrb[22].mxu1 %v9726_v19 }
 0x4f8   : > { %15071 = vmatpush3.msra.mxu1 %v9737_v14  ;;  %15072 = vmatprep.mubr.msk.f32.mxu1 %vm16047_vm0, %v16048_v8 }
 0x4f9   : > { %15075 = vmatprep.subr.mxu1 %v16048_v8 }
 0x4fe   : > { %v6457_v12 = vpop.xlane.xlu0 %6456  ;;  %v17060_v31 = vpop.f32.mrb[14].mxu0 }
 0x4ff   : > { %15073 = vmatmul.mubr.f32.vlgmr.msra.gmra.mrb[22].mxu1 %v9724_v28  ;;  %v14869_v22 = vpop.f32.mrb[15].mxu0  ;;  %16015 = vrcp.f32 %v6457_v12 }
 0x500   : > { %15076 = vmatpush3.msra.mxu1 %v9659_v23  ;;  %15077 = vmatprep.mubr.msk.f32.mxu1 %vm16047_vm0, %v16048_v8 }
 0x501   : > { %15110 = vmatprep.subr.mxu1 %v16048_v8 }
 0x502   : > { %v10105_v1 = vpop.permute.xlu0 %10104 }
 0x503   : > { %v17065_v24 = vand.u32 4294901760, %v10105_v1 }
 0x505   : > { %15081 = vmatpush3.msra.mxu0 %v17065_v24  ;;  %v10188_v7 = vsub.f32 %v10105_v1, %v17065_v24 }
 0x506   : > { %15085 = vmatprep.subr.mxu0 %v16048_v8 }
 0x507   : > { %15078 = vmatmul.mubr.f32.vlgmr.msra.gmra.mrb[22].mxu1 %v9724_v28  ;;  %v10189_v18 = vand.u32 4294901760, %v10188_v7 }
 0x508   : > { %15112 = vmatprep.mubr.msk.f32.mxu1 %vm16047_vm0, %v16048_v8 }
 0x509   : > { %v16016_v27 = vpop.eup %16015  ;;  %v10190_v41 = vsub.f32 %v10188_v7, %v10189_v18 }
 0x50a   : > { %v6483_v30 = vmul.f32 %v16016_v27, %v16913_v10 }
 0x50b   : > { %v10191_v32 = vand.u32 4294901760, %v10190_v41 }
 0x50c   : > { %v10560_v33 = vsel %vm921_vm2, %v6483_v30, 0 }
 0x50d   : > { %v17075_v34 = vand.u32 4294901760, %v10560_v33 }
 0x50f   : > { %v17071_v11 = vpop.f32.mrb[16].mxu1  ;;  %v10629_v0 = vsub.f32 %v10560_v33, %v17075_v34 }
 0x510   : > { %v14899_v2 = vpop.f32.mrb[17].mxu1 }
 0x511   : > { %v10630_v35 = vand.u32 4294901760, %v10629_v0 }
 0x513   : > { %v10631_v36 = vsub.f32 %v10629_v0, %v10630_v35 }
 0x515   : > { %v10632_v16 = vand.u32 4294901760, %v10631_v36 }
 0x526   : > { %v6454_v57 = vpop.xlane.xlu1 %6453 }
 0x527   : > { %16017 = vrcp.f32 %v6454_v57 }
 0x52a   : > { %v10557_v37 = vpop.permute.xlu1 %10556 }
 0x52b   : > { %v10563_v38 = vand.u32 4294901760, %v10557_v37 }
 0x52d   : > { %v10640_v39 = vsub.f32 %v10557_v37, %v10563_v38  ;;  %15111 = vmatpush3.msra.mxu1 %v10563_v38 }
 0x52e   : > { %15113 = vmatmul.mubr.f32.vlgmr.msra.gmra.mrb[24].mxu1 %v10632_v16  ;;  %15115 = vmatprep.subr.mxu1 %v16048_v8 }
 0x52f   : > { %v10641_v40 = vand.u32 4294901760, %v10640_v39  ;;  %15117 = vmatprep.mubr.msk.f32.mxu1 %vm16047_vm0, %v16048_v8 }
 0x531   : > { %v16018_v10 = vpop.eup %16017  ;;  %v10642_v44 = vsub.f32 %v10640_v39, %v10641_v40 }
 0x532   : > { %v6481_v50 = vmul.f32 %v16018_v10, %v16958_v29 }
 0x533   : > { %v10643_v42 = vand.u32 4294901760, %v10642_v44 }
 0x534   : > { %v10108_v58 = vsel %vm921_vm2, %v6481_v50, 0 }
 0x535   : > { %15116 = vmatpush3.msra.mxu1 %v10643_v42  ;;  %v17084_v43 = vand.u32 4294901760, %v10108_v58 }
 0x536   : > { %15118 = vmatmul.mubr.f32.vlgmr.msra.gmra.mrb[24].mxu1 %v17075_v34  ;;  %15120 = vmatprep.subr.mxu1 %v16048_v8 }
 0x537   : > { %15121 = vmatpush3.msra.mxu1 %v10640_v39  ;;  %15122 = vmatprep.mubr.msk.f32.mxu1 %vm16047_vm0, %v16048_v8  ;;  %v10177_v45 = vsub.f32 %v10108_v58, %v17084_v43  ;;  %v6463_v49 = vpop.xlane.xlu0 %6462  ;;  %v11966_v39 = vld [vmem:[%s17586_s3] sm:$0xff]  ;;  %v11969_v58 = vld [vmem:[%s17586_s3 + $0x18] sm:$0xff] }
 0x538   : > { %15125 = vmatprep.subr.mxu1 %v16048_v8  ;;  %16019 = vrcp.f32 %v6463_v49  ;;  %v11984_v10 = vand.u32 4294901760, %v11966_v39 }
 0x539   : > { %v10178_v29 = vand.u32 4294901760, %v10177_v45 }
 0x53b   : > { %v17092_v46 = vpop.f32.mrb[16].mxu0  ;;  %v10179_v60 = vsub.f32 %v10177_v45, %v10178_v29  ;;  %v11009_v62 = vpop.permute.xlu0 %11008 }
 0x53c   : > { %v14929_v47 = vpop.f32.mrb[17].mxu0  ;;  %v17131_v5 = vand.u32 4294901760, %v11009_v62 }
 0x53d   : > { %v10180_v48 = vand.u32 4294901760, %v10179_v60 }
 0x53e   : > { %15123 = vmatmul.mubr.f32.vlgmr.msra.gmra.mrb[24].mxu1 %v10629_v0  ;;  %v11092_v19 = vsub.f32 %v11009_v62, %v17131_v5 }
 0x53f   : > { %15126 = vmatpush3.msra.mxu1 %v10563_v38  ;;  %15083 = vmatmul.mubr.f32.vlgmr.msra.gmra.mrb[22].mxu0 %v10180_v48 }
 0x540   : > { %15086 = vmatpush3.msra.mxu0 %v10191_v32  ;;  %15127 = vmatprep.mubr.msk.f32.mxu1 %vm16047_vm0, %v16048_v8  ;;  %v11093_v12 = vand.u32 4294901760, %v11092_v19 }
 0x541   : > { %15130 = vmatprep.subr.mxu1 %v16048_v8  ;;  %15087 = vmatprep.mubr.msk.f32.mxu0 %vm16047_vm0, %v16048_v8 }
 0x542   : > { %15090 = vmatprep.subr.mxu0 %v16048_v8  ;;  %v16020_v26 = vpop.eup %16019  ;;  %v11094_v2 = vsub.f32 %v11092_v19, %v11093_v12 }
 0x543   : > { %v6487_v53 = vmul.f32 %v16020_v26, %v16988_v52 }
 0x544   : > { %v11095_v33 = vand.u32 4294901760, %v11094_v2 }
 0x545   : > { %v11464_v54 = vsel %vm921_vm2, %v6487_v53, 0 }
 0x546   : > { %15128 = vmatmul.mubr.f32.vlgmr.msra.gmra.mrb[24].mxu1 %v10630_v35  ;;  %v17117_v55 = vand.u32 4294901760, %v11464_v54 }
 0x547   : > { %15131 = vmatpush3.msra.mxu1 %v10641_v40  ;;  %15088 = vmatmul.mubr.f32.vlgmr.msra.gmra.mrb[22].mxu0 %v17084_v43  ;;  %v11967_v40 = vld [vmem:[%s17586_s3 + $0x8] sm:$0xff] }
 0x548   : > { %15091 = vmatpush3.msra.mxu0 %v10188_v7  ;;  %15132 = vmatprep.mubr.msk.f32.mxu1 %vm16047_vm0, %v16048_v8  ;;  %v11533_v52 = vsub.f32 %v11464_v54, %v17117_v55  ;;  %v11987_v44 = vand.u32 4294901760, %v11967_v40  ;;  %v12084_v7 = vsub.f32 %v11966_v39, %v11984_v10 }
 0x549   : > { %15135 = vmatprep.subr.mxu1 %v16048_v8  ;;  %15092 = vmatprep.mubr.msk.f32.mxu0 %vm16047_vm0, %v16048_v8 }
 0x54a   : > { %15095 = vmatprep.subr.mxu0 %v16048_v8  ;;  %v11534_v17 = vand.u32 4294901760, %v11533_v52  ;;  %v12091_v50 = vsub.f32 %v11967_v40, %v11987_v44  ;;  %v17202_v60 = vpack.c.bf16 %v11987_v44, %v11984_v10 }
 0x54c   : > { %v11535_v61 = vsub.f32 %v11533_v52, %v11534_v17  ;;  %v15555_v42 = vpack.c.bf16 %v12091_v50, %v12084_v7 }
 0x54e   : > { %15133 = vmatmul.mubr.f32.vlgmr.msra.gmra.mrb[24].mxu1 %v17075_v34  ;;  %v11536_v4 = vand.u32 4294901760, %v11535_v61 }
 0x54f   : > { %15136 = vmatpush3.msra.mxu1 %v10563_v38  ;;  %15093 = vmatmul.mubr.f32.vlgmr.msra.gmra.mrb[22].mxu0 %v10177_v45 }
 0x550   : > { %15096 = vmatpush3.msra.mxu0 %v17065_v24  ;;  %15137 = vmatprep.mubr.msk.f32.mxu1 %vm16047_vm0, %v16048_v8 }
 0x551   : > { %15097 = vmatprep.mubr.msk.f32.mxu0 %vm16047_vm0, %v16048_v8  ;;  %15100 = vmatprep.subr.mxu0 %v16048_v8 }
 0x552   : > { %15170 = vmatprep.subr.mxu1 %v16048_v8 }
 0x556   : > { %15138 = vmatmul.mubr.f32.vlgmr.msra.gmra.mrb[24].mxu1 %v17075_v34 }
 0x557   : > { %15098 = vmatmul.mubr.f32.vlgmr.msra.gmra.mrb[22].mxu0 %v10178_v29  ;;  %15172 = vmatprep.mubr.msk.f32.mxu1 %vm16047_vm0, %v16048_v8 }
 0x558   : > { %15101 = vmatpush3.msra.mxu0 %v10189_v18  ;;  %15102 = vmatprep.mubr.msk.f32.mxu0 %vm16047_vm0, %v16048_v8  ;;  %v11993_v18 = vand.u32 4294901760, %v11969_v58 }
 0x559   : > { %15105 = vmatprep.subr.mxu0 %v16048_v8 }
 0x55a   : > { %v12105_v29 = vsub.f32 %v11969_v58, %v11993_v18 }
 0x55f   : > { %15103 = vmatmul.mubr.f32.vlgmr.msra.gmra.mrb[22].mxu0 %v17084_v43  ;;  %v6460_v13 = vpop.xlane.xlu1 %6459 }
 0x560   : > { %15106 = vmatpush3.msra.mxu0 %v17065_v24  ;;  %16021 = vrcp.f32 %v6460_v13  ;;  %15107 = vmatprep.mubr.msk.f32.mxu0 %vm16047_vm0, %v16048_v8 }
 0x561   : > { %15140 = vmatprep.subr.mxu0 %v16048_v8 }
 0x563   : > { %v11461_v25 = vpop.permute.xlu1 %11460 }
 0x564   : > { %v11467_v23 = vand.u32 4294901760, %v11461_v25 }
 0x566   : > { %v11544_v6 = vsub.f32 %v11461_v25, %v11467_v23  ;;  %15171 = vmatpush3.msra.mxu1 %v11467_v23 }
 0x567   : > { %v8292_v9 = vpop.f32.mrb[18].mxu1  ;;  %15108 = vmatmul.mubr.f32.vlgmr.msra.gmra.mrb[22].mxu0 %v17084_v43  ;;  %15173 = vmatmul.mubr.f32.vlgmr.msra.gmra.mrb[26].mxu1 %v11536_v4  ;;  %v12085_v4 = vand.u32 4294901760, %v12084_v7 }
 0x568   : > { %v11545_v51 = vand.u32 4294901760, %v11544_v6  ;;  %15141 = vmatpush3.msra.mxu0 %v17131_v5  ;;  %v14959_v28 = vpop.f32.mrb[19].mxu1  ;;  %11915 = vrot.lane.b32.xlu1 %v8292_v9, %s16054_s23 }
 0x569   : > { %15175 = vmatprep.subr.mxu1 %v16048_v8  ;;  %15177 = vmatprep.mubr.msk.f32.mxu1 %vm16047_vm0, %v16048_v8 }
 0x56a   : > { %v16022_v14 = vpop.eup %16021  ;;  %v11546_v15 = vsub.f32 %v11544_v6, %v11545_v51  ;;  %15142 = vmatprep.mubr.msk.f32.mxu0 %vm16047_vm0, %v16048_v8  ;;  %15145 = vmatprep.subr.mxu0 %v16048_v8 }
 0x56b   : > { %v6485_v21 = vmul.f32 %v16022_v14, %v17031_v56 }
 0x56c   : > { %v11547_v20 = vand.u32 4294901760, %v11546_v15 }
 0x56d   : > { %v11012_v63 = vsel %vm921_vm2, %v6485_v21, 0  ;;  %v12106_v21 = vand.u32 4294901760, %v12105_v29 }
 0x56e   : > { %15176 = vmatpush3.msra.mxu1 %v11547_v20  ;;  %v11080_v59 = vand.u32 4294901760, %v11012_v63 }
 0x56f   : > { %15178 = vmatmul.mubr.f32.vlgmr.msra.gmra.mrb[26].mxu1 %v17117_v55  ;;  %15180 = vmatprep.subr.mxu1 %v16048_v8 }
 0x570   : > { %v8744_v22 = vpop.f32.mrb[18].mxu0  ;;  %15181 = vmatpush3.msra.mxu1 %v11544_v6  ;;  %15182 = vmatprep.mubr.msk.f32.mxu1 %vm16047_vm0, %v16048_v8  ;;  %v11081_v1 = vsub.f32 %v11012_v63, %v11080_v59 }
 0x571   : > { %11917 = vrot.lane.b32.xlu0 %v8744_v22, %s16054_s23  ;;  %v14989_v24 = vpop.f32.mrb[19].mxu0  ;;  %15185 = vmatprep.subr.mxu1 %v16048_v8 }
 0x572   : > { %v11082_v56 = vand.u32 4294901760, %v11081_v1 }
 0x574   : > { %v11083_v27 = vsub.f32 %v11081_v1, %v11082_v56 }
 0x576   : > { %v11084_v30 = vand.u32 4294901760, %v11083_v27 }
 0x577   : > { %15183 = vmatmul.mubr.f32.vlgmr.msra.gmra.mrb[26].mxu1 %v11533_v52 }
 0x578   : > { %15186 = vmatpush3.msra.mxu1 %v11467_v23  ;;  %15143 = vmatmul.mubr.f32.vlgmr.msra.gmra.mrb[24].mxu0 %v11084_v30 }
 0x579   : > { %15146 = vmatpush3.msra.mxu0 %v11095_v33  ;;  %15187 = vmatprep.mubr.msk.f32.mxu1 %vm16047_vm0, %v16048_v8 }
 0x57a   : > { %15190 = vmatprep.subr.mxu1 %v16048_v8  ;;  %15147 = vmatprep.mubr.msk.f32.mxu0 %vm16047_vm0, %v16048_v8 }
 0x57b   : > { %15150 = vmatprep.subr.mxu0 %v16048_v8 }
 0x57f   : > { %15188 = vmatmul.mubr.f32.vlgmr.msra.gmra.mrb[26].mxu1 %v11534_v17 }
 0x580   : > { %15191 = vmatpush3.msra.mxu1 %v11545_v51  ;;  %15148 = vmatmul.mubr.f32.vlgmr.msra.gmra.mrb[24].mxu0 %v11080_v59  ;;  %v12086_v51 = vsub.f32 %v12084_v7, %v12085_v4 }
 0x581   : > { %15151 = vmatpush3.msra.mxu0 %v11092_v19  ;;  %15192 = vmatprep.mubr.msk.f32.mxu1 %vm16047_vm0, %v16048_v8 }
 0x582   : > { %15195 = vmatprep.subr.mxu1 %v16048_v8  ;;  %15152 = vmatprep.mubr.msk.f32.mxu0 %vm16047_vm0, %v16048_v8 }
 0x583   : > { %15155 = vmatprep.subr.mxu0 %v16048_v8 }
 0x587   : > { %15193 = vmatmul.mubr.f32.vlgmr.msra.gmra.mrb[26].mxu1 %v17117_v55 }
 0x588   : > { %15196 = vmatpush3.msra.mxu1 %v11467_v23  ;;  %15153 = vmatmul.mubr.f32.vlgmr.msra.gmra.mrb[24].mxu0 %v11081_v1 }
 0x589   : > { %15156 = vmatpush3.msra.mxu0 %v17131_v5  ;;  %15197 = vmatprep.mubr.msk.f32.mxu1 %vm16047_vm0, %v16048_v8 }
 0x58a   : > { %15157 = vmatprep.mubr.msk.f32.mxu0 %vm16047_vm0, %v16048_v8  ;;  %15160 = vmatprep.subr.mxu0 %v16048_v8 }
 0x58b   : > { %15554 = vmatprep.subr.bf16.mxu1 %v16046_v3 }
 0x58f   : > { %15198 = vmatmul.mubr.f32.vlgmr.msra.gmra.mrb[26].mxu1 %v17117_v55 }
 0x590   : > { %15158 = vmatmul.mubr.f32.vlgmr.msra.gmra.mrb[24].mxu0 %v11082_v56  ;;  %15242 = vmatprep.mubr.msk.f32.mxu1 %vm16047_vm0, %v16048_v8 }
 0x591   : > { %15161 = vmatpush3.msra.mxu0 %v11093_v12  ;;  %15162 = vmatprep.mubr.msk.f32.mxu0 %vm16047_vm0, %v16048_v8  ;;  %v12107_v12 = vsub.f32 %v12105_v29, %v12106_v21 }
 0x592   : > { %15165 = vmatprep.subr.mxu0 %v16048_v8  ;;  %15556 = vmatpush3.bf16.msra.mxu1 %v15555_v42 }
 0x593   : > { %15557 = vmatprep.subr.bf16.mxu1 %v16046_v3  ;;  %v12108_v27 = vand.u32 4294901760, %v12107_v12 }
 0x598   : > { %15163 = vmatmul.mubr.f32.vlgmr.msra.gmra.mrb[24].mxu0 %v11080_v59 }
 0x599   : > { %15166 = vmatpush3.msra.mxu0 %v17131_v5  ;;  %15167 = vmatprep.mubr.msk.f32.mxu0 %vm16047_vm0, %v16048_v8  ;;  %v12092_v5 = vand.u32 4294901760, %v12091_v50 }
 0x59a   : > { %15542 = vmatprep.subr.bf16.mxu0 %v16046_v3 }
 0x59b   : > { %v12093_v28 = vsub.f32 %v12091_v50, %v12092_v5  ;;  %v15567_v15 = vpack.c.bf16 %v12092_v5, %v12085_v4 }
 0x59d   : > { %v12094_v63 = vand.u32 4294901760, %v12093_v28 }
 0x5a0   : > { %15168 = vmatmul.mubr.f32.vlgmr.msra.gmra.mrb[24].mxu0 %v11080_v59 }
 0x5a1   : > { %v9196_v34 = vpop.f32.mrb[20].mxu1  ;;  %15208 = vmatprep.mubr.msk.f32.mxu0 %vm16047_vm0, %v16048_v8  ;;  %15544 = vmatpush3.bf16.msra.mxu0 %v17202_v60 }
 0x5a2   : > { %v15019_v0 = vpop.f32.mrb[21].mxu1  ;;  %15545 = vmatprep.subr.bf16.mxu0 %v16046_v3 }
 0x5a9   : > { %v9648_v35 = vpop.f32.mrb[20].mxu0 }
 0x5aa   : > { %11927 = vrot.lane.b32.xlu0 %v9648_v35, %s16055_s25  ;;  %v15049_v57 = vpop.f32.mrb[21].mxu0 }
 0x5da   : > { %v10100_v36 = vpop.f32.mrb[22].mxu1  ;;  %v11916_v17 = vpop.permute.xlu1 %11915 }
 0x5db   : > { %11929 = vrot.lane.b32.xlu1 %v10100_v36, %s16055_s25  ;;  %v15079_v37 = vpop.f32.mrb[23].mxu1  ;;  %v11948_v62 = vsel %vm921_vm2, %v17060_v31, %v11916_v17  ;;  %v12087_v31 = vand.u32 4294901760, %v12086_v51  ;;  %v13913_v17 = vld [vmem:[%s17589_s6] ss:$0 sm:$0xff] }
 0x5dd   : > { %v15549_v56 = vpack.c.bf16 %v12094_v63, %v12087_v31 }
 0x5e3   : > { %v11918_v38 = vpop.permute.xlu0 %11917 }
 0x5e4   : > { %v17187_v16 = vsel %vm921_vm2, %v17071_v11, %v11918_v38  ;;  %v11968_v11 = vld [vmem:[%s17586_s3 + $0x10] sm:$0xff] }
 0x5e5   : > { %v11990_v43 = vand.u32 4294901760, %v11968_v11 }
 0x5e7   : > { %v12098_v45 = vsub.f32 %v11968_v11, %v11990_v43  ;;  %v17206_v47 = vpack.c.bf16 %v11993_v18, %v11990_v43 }
 0x5e9   : > { %v15558_v41 = vpack.c.bf16 %v12105_v29, %v12098_v45  ;;  %15547 = vmatpush3.bf16.msra.mxu0 %v17206_v47  ;;  %v12099_v19 = vand.u32 4294901760, %v12098_v45 }
 0x5ea   : > { %15548 = vmatprep.subr.bf16.mxu0 %v16046_v3 }
 0x5eb   : > { %15559 = vmatpush3.bf16.msra.mxu1 %v15558_v41  ;;  %v12100_v59 = vsub.f32 %v12098_v45, %v12099_v19  ;;  %v15570_v1 = vpack.c.bf16 %v12106_v21, %v12099_v19 }
 0x5ec   : > { %15566 = vmatprep.subr.bf16.mxu1 %v16046_v3 }
 0x5ed   : > { %v12101_v2 = vand.u32 4294901760, %v12100_v59 }
 0x5ef   : > { %v15552_v33 = vpack.c.bf16 %v12108_v27, %v12101_v2 }
 0x61c   : > { %v11928_v61 = vpop.permute.xlu0 %11927 }
 0x61d   : > { %v11952_v25 = vsel %vm11951_vm3, %v11948_v62, %v11928_v61 }
 0x629   : > { %v11004_v48 = vpop.f32.mrb[24].mxu1 }
 0x62a   : > { %11939 = vrot.lane.b32.xlu1 %v11004_v48, %s16056_s13  ;;  %v15139_v32 = vpop.f32.mrb[25].mxu1 }
 0x62e   : > { %11919 = vrot.lane.b32.xlu1 %v9196_v34, %s16054_s23 }
 0x63a   : > { %v10552_v49 = vpop.f32.mrb[22].mxu0 }
 0x63b   : > { %v15109_v26 = vpop.f32.mrb[23].mxu0 }
 0x64d   : > { %v11930_v13 = vpop.permute.xlu1 %11929 }
 0x64e   : > { %v11953_v34 = vsel %vm11951_vm3, %v17187_v16, %v11930_v13 }
 0x662   : > { %v11908_v53 = vpop.f32.mrb[26].mxu1 }
 0x663   : > { %11943 = vrot.lane.b32.xlu1 %v11908_v53, %s16056_s13  ;;  %v15199_v54 = vpop.f32.mrb[27].mxu1 }
 0x673   : > { %v11456_v55 = vpop.f32.mrb[24].mxu0 }
 0x674   : > { %11941 = vrot.lane.b32.xlu0 %v11456_v55, %s16056_s13  ;;  %v15169_v52 = vpop.f32.mrb[25].mxu0 }
 0x678   : > { %11931 = vrot.lane.b32.xlu0 %v10552_v49, %s16055_s25 }
 0x69c   : > { %v11940_v23 = vpop.permute.xlu1 %11939 }
 0x69d   : > { %v11956_v6 = vsel %vm11955_vm4, %v11952_v25, %v11940_v23 }
 0x69e   : > { %v11975_v9 = vsel %vm296_vm1, %v11956_v6, 0 }
 0x69f   : > { %v17218_v14 = vand.u32 4294901760, %v11975_v9 }
 0x6a0   : > { %v11920_v35 = vpop.permute.xlu1 %11919 }
 0x6a1   : > { %v17221_v20 = vsub.f32 %v11975_v9, %v17218_v14  ;;  %v11950_v38 = vsel %vm921_vm2, %v17092_v46, %v11920_v35 }
 0x6a3   : > { %v12054_v22 = vand.u32 4294901760, %v17221_v20  ;;  %15243 = vmatmul.mubr.f32.vlgmr.msra.gmra.mrb[28].mxu1 %v17221_v20 }
 0x6a4   : > { %15245 = vmatprep.mubr.msk.f32.mxu1 %vm16047_vm0, %v16048_v8  ;;  %15568 = vmatpush3.bf16.msra.mxu1 %v15567_v15 }
 0x6a5   : > { %v12055_v24 = vsub.f32 %v17221_v20, %v12054_v22  ;;  %15569 = vmatprep.subr.bf16.mxu1 %v16046_v3 }
 0x6a7   : > { %v12056_v30 = vand.u32 4294901760, %v12055_v24 }
 0x6a8   : > { %15571 = vmatpush3.bf16.msra.mxu1 %v15570_v1 }
 0x6a9   : > { %15209 = vmatmul.mubr.f32.vlgmr.msra.gmra.mrb[26].mxu0 %v12056_v30  ;;  %15578 = vmatprep.subr.bf16.mxu1 %v16046_v3 }
 0x6aa   : > { %15211 = vmatprep.mubr.msk.f32.mxu0 %vm16047_vm0, %v16048_v8  ;;  %15550 = vmatpush3.bf16.msra.mxu0 %v15549_v56 }
 0x6ab   : > { %15551 = vmatprep.subr.bf16.mxu0 %v16046_v3 }
 0x6ae   : > { %15553 = vmatpush3.bf16.msra.mxu0 %v15552_v33 }
 0x6af   : > { %15560 = vmatprep.subr.bf16.mxu0 %v16046_v3 }
 0x6d5   : > { %v11944_v40 = vpop.permute.xlu1 %11943 }
 0x6e6   : > { %v11942_v0 = vpop.permute.xlu0 %11941 }
 0x6e7   : > { %v11957_v57 = vsel %vm11955_vm4, %v11953_v34, %v11942_v0 }
 0x6e8   : > { %v11978_v36 = vsel %vm296_vm1, %v11957_v57, 0 }
 0x6e9   : > { %v12062_v37 = vand.u32 4294901760, %v11978_v36 }
 0x6ea   : > { %v11932_v39 = vpop.permute.xlu0 %11931 }
 0x6eb   : > { %v12063_v10 = vsub.f32 %v11978_v36, %v12062_v37  ;;  %v11954_v44 = vsel %vm11951_vm3, %v11950_v38, %v11932_v39 }
 0x6ec   : > { %v11958_v7 = vsel %vm11955_vm4, %v11954_v44, %v11944_v40  ;;  %v16035_v40 = vld [vmem:[%s16147_s15] sm:$0xff] }
 0x6ed   : > { %15246 = vmatmul.mubr.f32.gmra.mrb[30].mxu1 %v12063_v10  ;;  %v11981_v16 = vsel %vm296_vm1, %v11958_v7, 0  ;;  %v12064_v50 = vand.u32 4294901760, %v12063_v10 }
 0x6ee   : > { %15248 = vmatprep.mubr.msk.f32.mxu1 %vm16047_vm0, %v16048_v8  ;;  %v12072_v42 = vand.u32 4294901760, %v11981_v16 }
 0x6ef   : > { %v12065_v11 = vsub.f32 %v12063_v10, %v12064_v50 }
 0x6f0   : > { %v12073_v58 = vsub.f32 %v11981_v16, %v12072_v42 }
 0x6f1   : > { %v12066_v43 = vand.u32 4294901760, %v12065_v11 }
 0x6f2   : > { %15249 = vmatmul.mubr.f32.gmra.mrb[32].mxu1 %v12073_v58  ;;  %v12074_v46 = vand.u32 4294901760, %v12073_v58 }
 0x6f3   : > { %15212 = vmatmul.mubr.f32.gmra.mrb[28].mxu0 %v12066_v43  ;;  %15276 = vmatprep.mubr.msk.f32.mxu1 %vm16047_vm0, %v16048_v8 }
 0x6f4   : > { %15214 = vmatprep.mubr.msk.f32.mxu0 %vm16047_vm0, %v16048_v8  ;;  %v12075_v18 = vsub.f32 %v12073_v58, %v12074_v46 }
 0x6f6   : > { %15277 = vmatmul.mubr.f32.vlgmr.msra.gmra.mrb[34].mxu1 %v17218_v14  ;;  %v12076_v45 = vand.u32 4294901760, %v12075_v18 }
 0x6f7   : > { %15279 = vmatprep.mubr.msk.f32.mxu1 %vm16047_vm0, %v16048_v8 }
 0x6f8   : > { %15215 = vmatmul.mubr.f32.gmra.mrb[30].mxu0 %v12076_v45  ;;  %v16037_v45 = vld [vmem:[%s16147_s15 + $0x10] sm:$0xff] }
 0x6f9   : > { %15225 = vmatprep.mubr.msk.f32.mxu0 %vm16047_vm0, %v16048_v8 }
 0x6fa   : > { %15280 = vmatmul.mubr.f32.gmra.mrb[36].mxu1 %v12062_v37 }
 0x6fb   : > { %15282 = vmatprep.mubr.msk.f32.mxu1 %vm16047_vm0, %v16048_v8 }
 0x6fc   : > { %15226 = vmatmul.mubr.f32.vlgmr.msra.gmra.mrb[32].mxu0 %v17218_v14 }
 0x6fd   : > { %15228 = vmatprep.mubr.msk.f32.mxu0 %vm16047_vm0, %v16048_v8  ;;  %15562 = vmatpush3.bf16.msra.mxu0 %v17202_v60 }
 0x6fe   : > { %15283 = vmatmul.mubr.f32.gmra.mrb[38].mxu1 %v12072_v42  ;;  %15563 = vmatprep.subr.bf16.mxu0 %v16046_v3 }
 0x6ff   : > { %15310 = vmatprep.mubr.msk.f32.mxu1 %vm16047_vm0, %v16048_v8 }
 0x700   : > { %15229 = vmatmul.mubr.f32.gmra.mrb[34].mxu0 %v12062_v37 }
 0x701   : > { %15231 = vmatprep.mubr.msk.f32.mxu0 %vm16047_vm0, %v16048_v8  ;;  %15565 = vmatpush3.bf16.msra.mxu0 %v17206_v47 }
 0x702   : > { %15572 = vmatprep.subr.bf16.mxu0 %v16046_v3 }
 0x704   : > { %15232 = vmatmul.mubr.f32.gmra.mrb[36].mxu0 %v12072_v42 }
 0x705   : > { %15259 = vmatprep.mubr.msk.f32.mxu0 %vm16047_vm0, %v16048_v8 }
 0x708   : > { %15260 = vmatmul.mubr.f32.vlgmr.msra.gmra.mrb[38].mxu0 %v12054_v22 }
 0x709   : > { %15262 = vmatprep.mubr.msk.f32.mxu0 %vm16047_vm0, %v16048_v8  ;;  %15574 = vmatpush3.bf16.msra.mxu0 %v17202_v60 }
 0x70a   : > { %15575 = vmatprep.subr.bf16.mxu0 %v16046_v3 }
 0x70c   : > { %15263 = vmatmul.mubr.f32.gmra.mrb[40].mxu0 %v12064_v50 }
 0x70d   : > { %15265 = vmatprep.mubr.msk.f32.mxu0 %vm16047_vm0, %v16048_v8  ;;  %15577 = vmatpush3.bf16.msra.mxu0 %v17206_v47 }
 0x70e   : > { %15614 = vmatprep.subr.bf16.mxu0 %v16046_v3 }
 0x710   : > { %15266 = vmatmul.mubr.f32.gmra.mrb[42].mxu0 %v12074_v46 }
 0x711   : > { %15293 = vmatprep.mubr.msk.f32.mxu0 %vm16047_vm0, %v16048_v8 }
 0x714   : > { %15294 = vmatmul.mubr.f32.vlgmr.msra.gmra.mrb[44].mxu0 %v17218_v14 }
 0x715   : > { %15296 = vmatprep.mubr.msk.f32.mxu0 %vm16047_vm0, %v16048_v8 }
 0x718   : > { %15297 = vmatmul.mubr.f32.gmra.mrb[46].mxu0 %v12062_v37 }
 0x719   : > { %15299 = vmatprep.mubr.msk.f32.mxu0 %vm16047_vm0, %v16048_v8 }
 0x71c   : > { %15300 = vmatmul.mubr.f32.gmra.mrb[48].mxu0 %v12072_v42  ;;  %v16036_v42 = vld [vmem:[%s16147_s15 + $0x8] sm:$0xff] }
 0x71d   : > { %15412 = vmatprep.mubr.msk.f32.mxu0 %vm16047_vm0, %v16048_v8 }
 0x776   : > { %v12261_v29 = vpop.f32.mrb[28].mxu1 }
 0x777   : > { %v15244_v41 = vpop.f32.mrb[29].mxu1 }
 0x77c   : > { %v12058_v60 = vpop.f32.mrb[26].mxu0 }
 0x77d   : > { %v15210_v47 = vpop.f32.mrb[27].mxu0  ;;  %v12059_v25 = vadd.f32 %v13913_v17, %v12058_v60 }
 0x7c0   : > { %v12268_v48 = vpop.f32.mrb[30].mxu1 }
 0x7c1   : > { %v15247_v32 = vpop.f32.mrb[31].mxu1 }
 0x7c5   : > { %v12275_v49 = vpop.f32.mrb[32].mxu1 }
 0x7c6   : > { %v12068_v26 = vpop.f32.mrb[28].mxu0  ;;  %v15250_v53 = vpop.f32.mrb[33].mxu1 }
 0x7c7   : > { %v15213_v54 = vpop.f32.mrb[29].mxu0  ;;  %v12069_v51 = vadd.f32 %v13913_v17, %v12068_v26 }
 0x7c9   : > { %v12451_v55 = vpop.f32.mrb[34].mxu1 }
 0x7ca   : > { %v15278_v52 = vpop.f32.mrb[35].mxu1 }
 0x7cb   : > { %v12078_v13 = vpop.f32.mrb[30].mxu0 }
 0x7cc   : > { %v15216_v61 = vpop.f32.mrb[31].mxu0  ;;  %v12079_v20 = vadd.f32 %v13913_v17, %v12078_v13 }
 0x7cd   : > { %v12457_v62 = vpop.f32.mrb[36].mxu1 }
 0x7ce   : > { %v15281_v23 = vpop.f32.mrb[37].mxu1 }
 0x7cf   : > { %v12169_v4 = vpop.f32.mrb[32].mxu0  ;;  %v12611_v23 = vld [vmem:[%s17587_s4] sm:$0xff] }
 0x7d0   : > { %v12170_v5 = vadd.f32 %v12169_v4, %v12059_v25  ;;  %v15227_v6 = vpop.f32.mrb[33].mxu0  ;;  %v12612_v4 = vld [vmem:[%s17587_s4 + $0x8] sm:$0xff] }
 0x7d1   : > { %v12463_v9 = vpop.f32.mrb[38].mxu1  ;;  %v12632_v6 = vand.u32 4294901760, %v12612_v4 }
 0x7d2   : > { %v15284_v28 = vpop.f32.mrb[39].mxu1  ;;  %v12262_v14 = vadd.f32 %v12261_v29, %v12170_v5  ;;  %v12629_v5 = vand.u32 4294901760, %v12611_v23 }
 0x7d3   : > { %v12175_v15 = vpop.f32.mrb[34].mxu0 }
 0x7d4   : > { %v12176_v19 = vadd.f32 %v12175_v15, %v12069_v51  ;;  %v15230_v21 = vpop.f32.mrb[35].mxu0  ;;  %v12614_v51 = vld [vmem:[%s17587_s4 + $0x18] sm:$0xff]  ;;  %v17326_v15 = vpack.c.bf16 %v12632_v6, %v12629_v5 }
 0x7d5   : > { %v17330_v21 = vsub.f32 %v12612_v4, %v12632_v6 }
 0x7d6   : > { %v12269_v31 = vadd.f32 %v12268_v48, %v12176_v19  ;;  %v17328_v19 = vsub.f32 %v12611_v23, %v12629_v5  ;;  %15580 = vmatpush3.bf16.msra.mxu1 %v17326_v15 }
 0x7d7   : > { %v12181_v63 = vpop.f32.mrb[36].mxu0  ;;  %15581 = vmatprep.subr.bf16.mxu1 %v16046_v3 }
 0x7d8   : > { %v12182_v59 = vadd.f32 %v12181_v63, %v12079_v20  ;;  %v15233_v12 = vpop.f32.mrb[37].mxu0 }
 0x7d9   : > { %v12737_v12 = vand.u32 4294901760, %v17330_v21 }
 0x7da   : > { %v12276_v22 = vadd.f32 %v12275_v49, %v12182_v59  ;;  %v12730_v59 = vand.u32 4294901760, %v17328_v19 }
 0x7db   : > { %v12352_v1 = vpop.f32.mrb[38].mxu0 }
 0x7dc   : > { %v12353_v24 = vadd.f32 %v12352_v1, %v12262_v14  ;;  %v15261_v56 = vpop.f32.mrb[39].mxu0  ;;  %v12638_v14 = vand.u32 4294901760, %v12614_v51  ;;  %v12738_v1 = vsub.f32 %v17330_v21, %v12737_v12 }
 0x7de   : > { %v12452_v2 = vadd.f32 %v12451_v55, %v12353_v24  ;;  %v12739_v56 = vand.u32 4294901760, %v12738_v1  ;;  %v13205_v1 = vld [vmem:[%s17588_s5 + $0x18] sm:$0xff] }
 0x7df   : > { %v12360_v27 = vpop.f32.mrb[40].mxu0 }
 0x7e0   : > { %v12361_v30 = vadd.f32 %v12360_v27, %v12269_v31  ;;  %v15264_v33 = vpop.f32.mrb[41].mxu0  ;;  %v17334_v31 = vsub.f32 %v12614_v51, %v12638_v14 }
 0x7e2   : > { %v12458_v34 = vadd.f32 %v12457_v62, %v12361_v30  ;;  %v12751_v27 = vand.u32 4294901760, %v17334_v31 }
 0x7e3   : > { %v12368_v0 = vpop.f32.mrb[42].mxu0 }
 0x7e4   : > { %v12369_v35 = vadd.f32 %v12368_v0, %v12276_v22  ;;  %v15267_v57 = vpop.f32.mrb[43].mxu0  ;;  %v12731_v22 = vsub.f32 %v17328_v19, %v12730_v59 }
 0x7e6   : > { %v12464_v36 = vadd.f32 %v12463_v9, %v12369_v35  ;;  %v12613_v9 = vld [vmem:[%s17587_s4 + $0x10] sm:$0xff]  ;;  %v12732_v24 = vand.u32 4294901760, %v12731_v22 }
 0x7e7   : > { %v12538_v37 = vpop.f32.mrb[44].mxu0  ;;  %v12635_v28 = vand.u32 4294901760, %v12613_v9  ;;  %v13204_v22 = vld [vmem:[%s17588_s5 + $0x10] sm:$0xff] }
 0x7e8   : > { %v12539_v38 = vadd.f32 %v12538_v37, %v12452_v2  ;;  %v15295_v39 = vpop.f32.mrb[45].mxu0  ;;  %v15585_v30 = vpack.c.bf16 %v12739_v56, %v12732_v24  ;;  %v13226_v24 = vand.u32 4294901760, %v13204_v22  ;;  %v13229_v56 = vand.u32 4294901760, %v13205_v1 }
 0x7e9   : > { %v17332_v20 = vsub.f32 %v12613_v9, %v12635_v28  ;;  %v17337_v63 = vpack.c.bf16 %v12638_v14, %v12635_v28 }
 0x7ea   : > { %v12554_v10 = vadd.f32 %v16035_v40, %v12539_v38  ;;  %v17354_v38 = vpack.c.bf16 %v12737_v12, %v12730_v59 }
 0x7eb   : > { %v12544_v44 = vpop.f32.mrb[46].mxu0  ;;  %15583 = vmatpush3.bf16.msra.mxu1 %v17337_v63  ;;  %v12744_v2 = vand.u32 4294901760, %v17332_v20  ;;  %v15594_v37 = vpack.c.bf16 %v17334_v31, %v17332_v20 }
 0x7ec   : > { %v12545_v7 = vadd.f32 %v12544_v44, %v12458_v34  ;;  %v15298_v16 = vpop.f32.mrb[47].mxu0  ;;  %v12557_v50 = vsel %vm296_vm1, %v12554_v10, 0.0  ;;  %15584 = vmatprep.subr.bf16.mxu1 %v16046_v3  ;;  %v12752_v34 = vsub.f32 %v17334_v31, %v12751_v27 }
 0x7ed   : > { %12558 = vadd.xlane.f32.xlu0 %v12557_v50  ;;  %v12745_v33 = vsub.f32 %v17332_v20, %v12744_v2  ;;  %v17356_v39 = vpack.c.bf16 %v12751_v27, %v12744_v2  ;;  %v13203_v20 = vld [vmem:[%s17588_s5 + $0x8] sm:$0xff] }
 0x7ee   : > { %v12555_v11 = vadd.f32 %v16036_v42, %v12545_v7  ;;  %v12753_v35 = vand.u32 4294901760, %v12752_v34 }
 0x7ef   : > { %v12550_v58 = vpop.f32.mrb[48].mxu0  ;;  %v12746_v0 = vand.u32 4294901760, %v12745_v33 }
 0x7f0   : > { %v12551_v43 = vadd.f32 %v12550_v58, %v12464_v36  ;;  %v15301_v46 = vpop.f32.mrb[49].mxu0  ;;  %v12560_v18 = vsel %vm296_vm1, %v12555_v11, 0.0  ;;  %v15591_v36 = vpack.c.bf16 %v17330_v21, %v17328_v19 }
 0x7f1   : > { %12561 = vadd.xlane.f32.xlu1 %v12560_v18  ;;  %v15588_v57 = vpack.c.bf16 %v12753_v35, %v12746_v0  ;;  %v13914_v46 = vld [vmem:[%s17589_s6 + $0x1] ss:$0 sm:$0xff]  ;;  %v17468_v0 = vsub.f32 %v13204_v22, %v13226_v24  ;;  %v17470_v35 = vsub.f32 %v13205_v1, %v13229_v56 }
 0x7f2   : > { %v12556_v29 = vadd.f32 %v16037_v45, %v12551_v43  ;;  %v13915_v45 = vld [vmem:[%s17589_s6 + $0x2] ss:$0 sm:$0xff] }
 0x7f4   : > { %v12563_v41 = vsel %vm296_vm1, %v12556_v29, 0.0 }
 0x7f5   : > { %12564 = vadd.xlane.f32.xlu0 %v12563_v41 }
 0x87a   : > { %v12559_v60 = vpop.xlane.xlu0 %12558 }
 0x87b   : > { %v12567_v47 = vmul.f32 0.03125, %v12559_v60 }
 0x87d   : > { %v17299_v48 = vsub.f32 %v12554_v10, %v12567_v47 }
 0x87e   : > { %v12562_v32 = vpop.xlane.xlu1 %12561 }
 0x87f   : > { %v12568_v49 = vmul.f32 0.03125, %v12562_v32  ;;  %v12573_v26 = vmul.f32 %v17299_v48, %v17299_v48 }
 0x881   : > { %v17303_v53 = vsub.f32 %v12555_v11, %v12568_v49  ;;  %v12576_v54 = vsel %vm296_vm1, %v12573_v26, 0.0 }
 0x882   : > { %12577 = vadd.xlane.f32.xlu0 %v12576_v54  ;;  %v12565_v55 = vpop.xlane.xlu0 %12564 }
 0x883   : > { %v12569_v52 = vmul.f32 0.03125, %v12565_v55  ;;  %v12574_v17 = vmul.f32 %v17303_v53, %v17303_v53 }
 0x885   : > { %v17308_v13 = vsub.f32 %v12556_v29, %v12569_v52  ;;  %v12579_v61 = vsel %vm296_vm1, %v12574_v17, 0.0 }
 0x886   : > { %12580 = vadd.xlane.f32.xlu1 %v12579_v61 }
 0x887   : > { %v12575_v62 = vmul.f32 %v17308_v13, %v17308_v13 }
 0x889   : > { %v12582_v25 = vsel %vm296_vm1, %v12575_v62, 0.0 }
 0x88a   : > { %12583 = vadd.xlane.f32.xlu0 %v12582_v25 }
 0x90f   : > { %v12578_v40 = vpop.xlane.xlu0 %12577 }
 0x910   : > { %v12585_v10 = vmul.f32 0.03125, %v12578_v40  ;;  %v13342_v40 = vand.u32 4294901760, %v17470_v35 }
 0x912   : > { %v12588_v44 = vadd.f32 1e-05, %v12585_v10 }
 0x913   : > { %v12581_v7 = vpop.xlane.xlu1 %12580 }
 0x914   : > { %16023 = vrsqrt.f32 %v12588_v44  ;;  %v12586_v16 = vmul.f32 0.03125, %v12581_v7  ;;  %v13343_v7 = vsub.f32 %v17470_v35, %v13342_v40 }
 0x916   : > { %v12589_v50 = vadd.f32 1e-05, %v12586_v16 }
 0x917   : > { %v12584_v42 = vpop.xlane.xlu0 %12583 }
 0x918   : > { %16025 = vrsqrt.f32 %v12589_v50  ;;  %v12587_v11 = vmul.f32 0.03125, %v12584_v42  ;;  %v13344_v50 = vand.u32 4294901760, %v13343_v7 }
 0x91a   : > { %v12590_v58 = vadd.f32 1e-05, %v12587_v11 }
 0x91c   : > { %16027 = vrsqrt.f32 %v12590_v58  ;;  %v15630_v58 = vpack.c.bf16 %v17470_v35, %v17468_v0 }
 0x91e   : > { %v16024_v43 = vpop.eup %16023 }
 0x91f   : > { %v12594_v18 = vmul.f32 %v16024_v43, %v17299_v48 }
 0x921   : > { %v12601_v29 = vmul.f32 %v13914_v46, %v12594_v18  ;;  %v13916_v18 = vld [vmem:[%s17589_s6 + $0x3] ss:$0 sm:$0xff] }
 0x922   : > { %v16026_v41 = vpop.eup %16025 }
 0x923   : > { %v17365_v60 = vadd.f32 %v13915_v45, %v12601_v29  ;;  %v12595_v47 = vmul.f32 %v16026_v41, %v17303_v53 }
 0x925   : > { %v12620_v32 = vsel %vm296_vm1, %v17365_v60, 0  ;;  %v12602_v49 = vmul.f32 %v13914_v46, %v12595_v47 }
 0x926   : > { %v16028_v26 = vpop.eup %16027  ;;  %v17370_v54 = vand.u32 4294901760, %v12620_v32 }
 0x927   : > { %v12596_v55 = vmul.f32 %v16028_v26, %v17308_v13  ;;  %v17373_v48 = vadd.f32 %v13915_v45, %v12602_v49 }
 0x928   : > { %v12698_v52 = vsub.f32 %v12620_v32, %v17370_v54 }
 0x929   : > { %v12623_v17 = vsel %vm296_vm1, %v17373_v48, 0  ;;  %v12603_v61 = vmul.f32 %v13914_v46, %v12596_v55 }
 0x92a   : > { %v12699_v62 = vand.u32 4294901760, %v12698_v52  ;;  %v17378_v25 = vand.u32 4294901760, %v12623_v17 }
 0x92b   : > { %v17380_v53 = vadd.f32 %v13915_v45, %v12603_v61 }
 0x92c   : > { %v12700_v23 = vsub.f32 %v12698_v52, %v12699_v62  ;;  %v12708_v4 = vsub.f32 %v12623_v17, %v17378_v25 }
 0x92d   : > { %v12626_v5 = vsel %vm296_vm1, %v17380_v53, 0 }
 0x92e   : > { %v12701_v13 = vand.u32 4294901760, %v12700_v23  ;;  %v12709_v6 = vand.u32 4294901760, %v12708_v4  ;;  %v12717_v9 = vand.u32 4294901760, %v12626_v5 }
 0x930   : > { %15311 = vmatmul.mubr.f32.vlgmr.msra.gmra.mrb[40].mxu1 %v12701_v13  ;;  %v12710_v51 = vsub.f32 %v12708_v4, %v12709_v6  ;;  %v12718_v28 = vsub.f32 %v12626_v5, %v12717_v9 }
 0x931   : > { %15313 = vmatprep.mubr.msk.f32.mxu1 %vm16047_vm0, %v16048_v8  ;;  %15586 = vmatpush3.bf16.msra.mxu1 %v15585_v30  ;;  %v17463_v30 = vpack.c.bf16 %v13229_v56, %v13226_v24  ;;  %v13917_v24 = vld [vmem:[%s17589_s6 + $0x4] ss:$0 sm:$0xff] }
 0x932   : > { %v12711_v14 = vand.u32 4294901760, %v12710_v51  ;;  %v12719_v19 = vand.u32 4294901760, %v12718_v28  ;;  %15587 = vmatprep.subr.bf16.mxu1 %v16046_v3 }
 0x934   : > { %15314 = vmatmul.mubr.f32.gmra.mrb[42].mxu1 %v12711_v14  ;;  %v12720_v21 = vsub.f32 %v12718_v28, %v12719_v19 }
 0x935   : > { %15316 = vmatprep.mubr.msk.f32.mxu1 %vm16047_vm0, %v16048_v8  ;;  %15589 = vmatpush3.bf16.msra.mxu1 %v15588_v57 }
 0x936   : > { %v12721_v59 = vand.u32 4294901760, %v12720_v21  ;;  %15590 = vmatprep.subr.bf16.mxu1 %v16046_v3 }
 0x938   : > { %15317 = vmatmul.mubr.f32.gmra.mrb[44].mxu1 %v12721_v59 }
 0x939   : > { %15327 = vmatprep.mubr.msk.f32.mxu1 %vm16047_vm0, %v16048_v8 }
 0x93c   : > { %15328 = vmatmul.mubr.f32.vlgmr.msra.gmra.mrb[40].mxu1 %v17370_v54 }
 0x93d   : > { %15330 = vmatprep.mubr.msk.f32.mxu1 %vm16047_vm0, %v16048_v8  ;;  %15592 = vmatpush3.bf16.msra.mxu1 %v15591_v36 }
 0x93e   : > { %15593 = vmatprep.subr.bf16.mxu1 %v16046_v3 }
 0x940   : > { %15331 = vmatmul.mubr.f32.gmra.mrb[42].mxu1 %v17378_v25 }
 0x941   : > { %15333 = vmatprep.mubr.msk.f32.mxu1 %vm16047_vm0, %v16048_v8  ;;  %15595 = vmatpush3.bf16.msra.mxu1 %v15594_v37 }
 0x942   : > { %15596 = vmatprep.subr.bf16.mxu1 %v16046_v3 }
 0x944   : > { %15334 = vmatmul.mubr.f32.gmra.mrb[44].mxu1 %v12717_v9 }
 0x945   : > { %15344 = vmatprep.mubr.msk.f32.mxu1 %vm16047_vm0, %v16048_v8 }
 0x948   : > { %15345 = vmatmul.mubr.f32.vlgmr.msra.gmra.mrb[40].mxu1 %v12698_v52 }
 0x949   : > { %15347 = vmatprep.mubr.msk.f32.mxu1 %vm16047_vm0, %v16048_v8  ;;  %15598 = vmatpush3.bf16.msra.mxu1 %v17326_v15 }
 0x94a   : > { %15599 = vmatprep.subr.bf16.mxu1 %v16046_v3 }
 0x94c   : > { %15348 = vmatmul.mubr.f32.gmra.mrb[42].mxu1 %v12708_v4 }
 0x94d   : > { %15350 = vmatprep.mubr.msk.f32.mxu1 %vm16047_vm0, %v16048_v8  ;;  %15601 = vmatpush3.bf16.msra.mxu1 %v17337_v63 }
 0x94e   : > { %15602 = vmatprep.subr.bf16.mxu1 %v16046_v3 }
 0x950   : > { %15351 = vmatmul.mubr.f32.gmra.mrb[44].mxu1 %v12718_v28 }
 0x951   : > { %15361 = vmatprep.mubr.msk.f32.mxu1 %vm16047_vm0, %v16048_v8 }
 0x954   : > { %15362 = vmatmul.mubr.f32.vlgmr.msra.gmra.mrb[40].mxu1 %v12699_v62 }
 0x955   : > { %15364 = vmatprep.mubr.msk.f32.mxu1 %vm16047_vm0, %v16048_v8  ;;  %15604 = vmatpush3.bf16.msra.mxu1 %v17354_v38 }
 0x956   : > { %15605 = vmatprep.subr.bf16.mxu1 %v16046_v3 }
 0x958   : > { %15365 = vmatmul.mubr.f32.gmra.mrb[42].mxu1 %v12709_v6 }
 0x959   : > { %15367 = vmatprep.mubr.msk.f32.mxu1 %vm16047_vm0, %v16048_v8  ;;  %15607 = vmatpush3.bf16.msra.mxu1 %v17356_v39  ;;  %v13335_v39 = vand.u32 4294901760, %v17468_v0 }
 0x95a   : > { %15608 = vmatprep.subr.bf16.mxu1 %v16046_v3 }
 0x95b   : > { %v13336_v44 = vsub.f32 %v17468_v0, %v13335_v39  ;;  %v17485_v46 = vpack.c.bf16 %v13342_v40, %v13335_v39 }
 0x95c   : > { %15368 = vmatmul.mubr.f32.gmra.mrb[44].mxu1 %v12719_v19 }
 0x95d   : > { %15378 = vmatprep.mubr.msk.f32.mxu1 %vm16047_vm0, %v16048_v8  ;;  %v13337_v16 = vand.u32 4294901760, %v13336_v44 }
 0x95f   : > { %v15624_v42 = vpack.c.bf16 %v13344_v50, %v13337_v16 }
 0x960   : > { %15379 = vmatmul.mubr.f32.vlgmr.msra.gmra.mrb[40].mxu1 %v17370_v54 }
 0x961   : > { %15381 = vmatprep.mubr.msk.f32.mxu1 %vm16047_vm0, %v16048_v8  ;;  %15610 = vmatpush3.bf16.msra.mxu1 %v17326_v15  ;;  %v13202_v15 = vld [vmem:[%s17588_s5] sm:$0xff] }
 0x962   : > { %15611 = vmatprep.subr.bf16.mxu1 %v16046_v3  ;;  %v13220_v31 = vand.u32 4294901760, %v13202_v15 }
 0x964   : > { %15382 = vmatmul.mubr.f32.gmra.mrb[42].mxu1 %v17378_v25  ;;  %v17459_v2 = vsub.f32 %v13202_v15, %v13220_v31 }
 0x965   : > { %15384 = vmatprep.mubr.msk.f32.mxu1 %vm16047_vm0, %v16048_v8  ;;  %15613 = vmatpush3.bf16.msra.mxu1 %v17337_v63  ;;  %v13223_v63 = vand.u32 4294901760, %v13203_v20 }
 0x966   : > { %v13321_v33 = vand.u32 4294901760, %v17459_v2 }
 0x967   : > { %v17449_v12 = vpack.c.bf16 %v13223_v63, %v13220_v31  ;;  %v17461_v27 = vsub.f32 %v13203_v20, %v13223_v63 }
 0x968   : > { %15385 = vmatmul.mubr.f32.gmra.mrb[44].mxu1 %v12717_v9  ;;  %v13322_v57 = vsub.f32 %v17459_v2, %v13321_v33 }
 0x969   : > { %15395 = vmatprep.mubr.msk.f32.mxu1 %vm16047_vm0, %v16048_v8  ;;  %15616 = vmatpush3.bf16.msra.mxu0 %v17449_v12  ;;  %v13328_v34 = vand.u32 4294901760, %v17461_v27  ;;  %v15627_v11 = vpack.c.bf16 %v17461_v27, %v17459_v2 }
 0x96a   : > { %15617 = vmatprep.subr.bf16.mxu0 %v16046_v3  ;;  %v13323_v37 = vand.u32 4294901760, %v13322_v57 }
 0x96b   : > { %v13329_v36 = vsub.f32 %v17461_v27, %v13328_v34  ;;  %v17483_v43 = vpack.c.bf16 %v13328_v34, %v13321_v33 }
 0x96c   : > { %15396 = vmatmul.mubr.f32.vlgmr.msra.gmra.mrb[40].mxu1 %v17370_v54 }
 0x96d   : > { %15398 = vmatprep.mubr.msk.f32.mxu1 %vm16047_vm0, %v16048_v8  ;;  %15619 = vmatpush3.bf16.msra.mxu0 %v17463_v30  ;;  %v13330_v38 = vand.u32 4294901760, %v13329_v36 }
 0x96e   : > { %15620 = vmatprep.subr.bf16.mxu0 %v16046_v3 }
 0x96f   : > { %v15621_v10 = vpack.c.bf16 %v13330_v38, %v13323_v37 }
 0x970   : > { %15399 = vmatmul.mubr.f32.gmra.mrb[42].mxu1 %v17378_v25 }
 0x971   : > { %15401 = vmatprep.mubr.msk.f32.mxu1 %vm16047_vm0, %v16048_v8 }
 0x974   : > { %15402 = vmatmul.mubr.f32.gmra.mrb[44].mxu1 %v12717_v9 }
 0xa3f   : > { %v13183_v45 = vpop.f32.mrb[40].mxu1 }
 0xa40   : > { %v15653_v29 = vadd.f32 %v13916_v18, %v13183_v45  ;;  %v15397_v41 = vpop.f32.mrb[41].mxu1 }
 0xa42   : > { %v13199_v47 = vmax.f32 %v15653_v29, 0.0 }
 0xa43   : > { %v13189_v32 = vpop.f32.mrb[42].mxu1 }
 0xa44   : > { %v13211_v49 = vsel %vm296_vm1, %v13199_v47, 0  ;;  %v15654_v26 = vadd.f32 %v13916_v18, %v13189_v32  ;;  %v15400_v54 = vpop.f32.mrb[43].mxu1 }
 0xa45   : > { %v17491_v55 = vand.u32 4294901760, %v13211_v49 }
 0xa46   : > { %v13200_v52 = vmax.f32 %v15654_v26, 0.0 }
 0xa47   : > { %v13289_v17 = vsub.f32 %v13211_v49, %v17491_v55  ;;  %v13195_v61 = vpop.f32.mrb[44].mxu1 }
 0xa48   : > { %v13214_v62 = vsel %vm296_vm1, %v13200_v52, 0  ;;  %v15655_v25 = vadd.f32 %v13916_v18, %v13195_v61  ;;  %v15403_v23 = vpop.f32.mrb[45].mxu1 }
 0xa49   : > { %v13290_v4 = vand.u32 4294901760, %v13289_v17  ;;  %v17495_v5 = vand.u32 4294901760, %v13214_v62 }
 0xa4a   : > { %v13201_v13 = vmax.f32 %v15655_v25, 0.0 }
 0xa4b   : > { %v13291_v6 = vsub.f32 %v13289_v17, %v13290_v4  ;;  %v13299_v9 = vsub.f32 %v13214_v62, %v17495_v5 }
 0xa4c   : > { %v13217_v51 = vsel %vm296_vm1, %v13201_v13, 0 }
 0xa4d   : > { %v13292_v28 = vand.u32 4294901760, %v13291_v6  ;;  %v13308_v14 = vand.u32 4294901760, %v13217_v51  ;;  %v13300_v19 = vand.u32 4294901760, %v13299_v9 }
 0xa4f   : > { %v13309_v21 = vsub.f32 %v13217_v51, %v13308_v14  ;;  %15413 = vmatmul.mubr.f32.vlgmr.msra.gmra.mrb[50].mxu0 %v13292_v28  ;;  %v13301_v59 = vsub.f32 %v13299_v9, %v13300_v19 }
 0xa50   : > { %15415 = vmatprep.mubr.msk.f32.mxu0 %vm16047_vm0, %v16048_v8  ;;  %15622 = vmatpush3.bf16.msra.mxu0 %v15621_v10 }
 0xa51   : > { %v13302_v15 = vand.u32 4294901760, %v13301_v59  ;;  %v13310_v20 = vand.u32 4294901760, %v13309_v21  ;;  %15623 = vmatprep.subr.bf16.mxu0 %v16046_v3 }
 0xa53   : > { %15416 = vmatmul.mubr.f32.gmra.mrb[52].mxu0 %v13302_v15  ;;  %v13311_v31 = vsub.f32 %v13309_v21, %v13310_v20 }
 0xa54   : > { %15418 = vmatprep.mubr.msk.f32.mxu0 %vm16047_vm0, %v16048_v8  ;;  %15625 = vmatpush3.bf16.msra.mxu0 %v15624_v42 }
 0xa55   : > { %v13312_v63 = vand.u32 4294901760, %v13311_v31  ;;  %15626 = vmatprep.subr.bf16.mxu0 %v16046_v3 }
 0xa57   : > { %15419 = vmatmul.mubr.f32.gmra.mrb[54].mxu0 %v13312_v63 }
 0xa58   : > { %15429 = vmatprep.mubr.msk.f32.mxu0 %vm16047_vm0, %v16048_v8 }
 0xa5b   : > { %15430 = vmatmul.mubr.f32.vlgmr.msra.gmra.mrb[56].mxu0 %v17491_v55 }
 0xa5c   : > { %15432 = vmatprep.mubr.msk.f32.mxu0 %vm16047_vm0, %v16048_v8  ;;  %15628 = vmatpush3.bf16.msra.mxu0 %v15627_v11 }
 0xa5d   : > { %15629 = vmatprep.subr.bf16.mxu0 %v16046_v3 }
 0xa5f   : > { %15433 = vmatmul.mubr.f32.gmra.mrb[58].mxu0 %v17495_v5 }
 0xa60   : > { %15435 = vmatprep.mubr.msk.f32.mxu0 %vm16047_vm0, %v16048_v8  ;;  %15631 = vmatpush3.bf16.msra.mxu0 %v15630_v58 }
 0xa61   : > { %15632 = vmatprep.subr.bf16.mxu0 %v16046_v3 }
 0xa63   : > { %15436 = vmatmul.mubr.f32.gmra.mrb[60].mxu0 %v13308_v14 }
 0xa64   : > { %15446 = vmatprep.mubr.msk.f32.mxu0 %vm16047_vm0, %v16048_v8 }
 0xa67   : > { %15447 = vmatmul.mubr.f32.vlgmr.msra.gmra.mrb[62].mxu0 %v13289_v17 }
 0xa68   : > { %15449 = vmatprep.mubr.msk.f32.mxu0 %vm16047_vm0, %v16048_v8  ;;  %15634 = vmatpush3.bf16.msra.mxu0 %v17449_v12 }
 0xa69   : > { %15635 = vmatprep.subr.bf16.mxu0 %v16046_v3 }
 0xa6b   : > { %15450 = vmatmul.mubr.f32.gmra.mrb[64].mxu0 %v13299_v9 }
 0xa6c   : > { %15452 = vmatprep.mubr.msk.f32.mxu0 %vm16047_vm0, %v16048_v8  ;;  %15637 = vmatpush3.bf16.msra.mxu0 %v17463_v30 }
 0xa6d   : > { %15638 = vmatprep.subr.bf16.mxu0 %v16046_v3 }
 0xa6f   : > { %15453 = vmatmul.mubr.f32.gmra.mrb[66].mxu0 %v13309_v21 }
 0xa70   : > { %15463 = vmatprep.mubr.msk.f32.mxu0 %vm16047_vm0, %v16048_v8 }
 0xa73   : > { %15464 = vmatmul.mubr.f32.vlgmr.msra.gmra.mrb[68].mxu0 %v13290_v4 }
 0xa74   : > { %15466 = vmatprep.mubr.msk.f32.mxu0 %vm16047_vm0, %v16048_v8  ;;  %15640 = vmatpush3.bf16.msra.mxu0 %v17483_v43 }
 0xa75   : > { %15641 = vmatprep.subr.bf16.mxu0 %v16046_v3 }
 0xa77   : > { %15467 = vmatmul.mubr.f32.gmra.mrb[70].mxu0 %v13300_v19 }
 0xa78   : > { %15469 = vmatprep.mubr.msk.f32.mxu0 %vm16047_vm0, %v16048_v8  ;;  %15643 = vmatpush3.bf16.msra.mxu0 %v17485_v46 }
 0xa79   : > { %15644 = vmatprep.subr.bf16.mxu0 %v16046_v3 }
 0xa7b   : > { %15470 = vmatmul.mubr.f32.gmra.mrb[72].mxu0 %v13310_v20 }
 0xa7c   : > { %15480 = vmatprep.mubr.msk.f32.mxu0 %vm16047_vm0, %v16048_v8 }
 0xa7f   : > { %15481 = vmatmul.mubr.f32.vlgmr.msra.gmra.mrb[74].mxu0 %v17491_v55 }
 0xa80   : > { %15483 = vmatprep.mubr.msk.f32.mxu0 %vm16047_vm0, %v16048_v8  ;;  %15646 = vmatpush3.bf16.msra.mxu0 %v17449_v12 }
 0xa81   : > { %15647 = vmatprep.subr.bf16.mxu0 %v16046_v3 }
 0xa83   : > { %15484 = vmatmul.mubr.f32.gmra.mrb[76].mxu0 %v17495_v5 }
 0xa84   : > { %15486 = vmatprep.mubr.msk.f32.mxu0 %vm16047_vm0, %v16048_v8  ;;  %15649 = vmatpush3.bf16.msra.mxu0 %v17463_v30 }
 0xa87   : > { %15487 = vmatmul.mubr.f32.gmra.mrb[78].mxu0 %v13308_v14 }
 0xa88   : > { %15497 = vmatprep.mubr.msk.f32.mxu0 %vm16047_vm0, %v16048_v8 }
 0xa8b   : > { %15498 = vmatmul.mubr.f32.vlgmr.msra.gmra.mrb[80].mxu0 %v17491_v55 }
 0xa8c   : > { %15500 = vmatprep.mubr.msk.f32.mxu0 %vm16047_vm0, %v16048_v8 }
 0xa8f   : > { %15501 = vmatmul.mubr.f32.gmra.mrb[82].mxu0 %v17495_v5 }
 0xa90   : > { %15503 = vmatprep.mubr.msk.f32.mxu0 %vm16047_vm0, %v16048_v8 }
 0xa93   : > { %15504 = vmatmul.mubr.f32.gmra.mrb[84].mxu0 %v13308_v14 }
 0xb22   : > { %v13294_v3 = vpop.f32.mrb[50].mxu0 }
 0xb23   : > { %v15414_v12 = vpop.f32.mrb[51].mxu0  ;;  %v13295_v27 = vadd.f32 %v13917_v24, %v13294_v3 }
 0xb26   : > { %v13304_v22 = vpop.f32.mrb[52].mxu0 }
 0xb27   : > { %v15417_v1 = vpop.f32.mrb[53].mxu0  ;;  %v13305_v0 = vadd.f32 %v13917_v24, %v13304_v22 }
 0xb2a   : > { %v13314_v56 = vpop.f32.mrb[54].mxu0 }
 0xb2b   : > { %v15420_v2 = vpop.f32.mrb[55].mxu0  ;;  %v13315_v8 = vadd.f32 %v13917_v24, %v13314_v56 }
 0xb2e   : > { %v13405_v30 = vpop.f32.mrb[56].mxu0 }
 0xb2f   : > { %v13406_v33 = vadd.f32 %v13405_v30, %v13295_v27  ;;  %v15431_v34 = vpop.f32.mrb[57].mxu0 }
 0xb32   : > { %v13411_v35 = vpop.f32.mrb[58].mxu0 }
 0xb33   : > { %v13412_v57 = vadd.f32 %v13411_v35, %v13305_v0  ;;  %v15434_v36 = vpop.f32.mrb[59].mxu0 }
 0xb36   : > { %v13417_v37 = vpop.f32.mrb[60].mxu0 }
 0xb37   : > { %v13418_v38 = vadd.f32 %v13417_v37, %v13315_v8  ;;  %v15437_v39 = vpop.f32.mrb[61].mxu0 }
 0xb3a   : > { %v13497_v40 = vpop.f32.mrb[62].mxu0 }
 0xb3b   : > { %v13498_v10 = vadd.f32 %v13497_v40, %v13406_v33  ;;  %v15448_v44 = vpop.f32.mrb[63].mxu0 }
 0xb3e   : > { %v13504_v7 = vpop.f32.mrb[64].mxu0 }
 0xb3f   : > { %v13505_v16 = vadd.f32 %v13504_v7, %v13412_v57  ;;  %v15451_v50 = vpop.f32.mrb[65].mxu0  ;;  %v13918_v7 = vld [vmem:[%s17589_s6 + $0x5] ss:$0 sm:$0xff] }
 0xb40   : > { %v13919_v50 = vld [vmem:[%s17589_s6 + $0x6] ss:$0 sm:$0xff] }
 0xb42   : > { %v13511_v42 = vpop.f32.mrb[66].mxu0 }
 0xb43   : > { %v13512_v11 = vadd.f32 %v13511_v42, %v13418_v38  ;;  %v15454_v58 = vpop.f32.mrb[67].mxu0 }
 0xb46   : > { %v13588_v43 = vpop.f32.mrb[68].mxu0 }
 0xb47   : > { %v13589_v46 = vadd.f32 %v13588_v43, %v13498_v10  ;;  %v15465_v18 = vpop.f32.mrb[69].mxu0 }
 0xb4a   : > { %v13596_v45 = vpop.f32.mrb[70].mxu0 }
 0xb4b   : > { %v13597_v29 = vadd.f32 %v13596_v45, %v13505_v16  ;;  %v15468_v41 = vpop.f32.mrb[71].mxu0 }
 0xb4e   : > { %v13604_v47 = vpop.f32.mrb[72].mxu0 }
 0xb4f   : > { %v13605_v32 = vadd.f32 %v13604_v47, %v13512_v11  ;;  %v15471_v49 = vpop.f32.mrb[73].mxu0 }
 0xb52   : > { %v13687_v26 = vpop.f32.mrb[74].mxu0 }
 0xb53   : > { %v13688_v54 = vadd.f32 %v13687_v26, %v13589_v46  ;;  %v15482_v55 = vpop.f32.mrb[75].mxu0 }
 0xb56   : > { %v13693_v52 = vpop.f32.mrb[76].mxu0 }
 0xb57   : > { %v13694_v17 = vadd.f32 %v13693_v52, %v13597_v29  ;;  %v15485_v61 = vpop.f32.mrb[77].mxu0 }
 0xb5a   : > { %v13699_v62 = vpop.f32.mrb[78].mxu0 }
 0xb5b   : > { %v13700_v25 = vadd.f32 %v13699_v62, %v13605_v32  ;;  %v15488_v23 = vpop.f32.mrb[79].mxu0 }
 0xb5e   : > { %v13774_v4 = vpop.f32.mrb[80].mxu0 }
 0xb5f   : > { %v13775_v5 = vadd.f32 %v13774_v4, %v13688_v54  ;;  %v15499_v13 = vpop.f32.mrb[81].mxu0 }
 0xb61   : > { %v13790_v6 = vadd.f32 %v13775_v5, %v17365_v60 }
 0xb62   : > { %v13780_v9 = vpop.f32.mrb[82].mxu0 }
 0xb63   : > { %v13781_v51 = vadd.f32 %v13780_v9, %v13694_v17  ;;  %v15502_v28 = vpop.f32.mrb[83].mxu0  ;;  %v13793_v14 = vsel %vm296_vm1, %v13790_v6, 0.0 }
 0xb64   : > { %13794 = vadd.xlane.f32.xlu1 %v13793_v14 }
 0xb65   : > { %v13791_v19 = vadd.f32 %v13781_v51, %v17373_v48 }
 0xb66   : > { %v13786_v21 = vpop.f32.mrb[84].mxu0 }
 0xb67   : > { %v13787_v59 = vadd.f32 %v13786_v21, %v13700_v25  ;;  %v15505_v15 = vpop.f32.mrb[85].mxu0  ;;  %v13796_v20 = vsel %vm296_vm1, %v13791_v19, 0.0 }
 0xb68   : > { %13797 = vadd.xlane.f32.xlu0 %v13796_v20 }
 0xb69   : > { %v13792_v31 = vadd.f32 %v13787_v59, %v17380_v53 }
 0xb6b   : > { %v13799_v63 = vsel %vm296_vm1, %v13792_v31, 0.0 }
 0xb6c   : > { %13800 = vadd.xlane.f32.xlu1 %v13799_v63 }
 0xbf1   : > { %v13795_v60 = vpop.xlane.xlu1 %13794 }
 0xbf2   : > { %v13802_v3 = vmul.f32 0.03125, %v13795_v60 }
 0xbf4   : > { %v13805_v12 = vsub.f32 %v13790_v6, %v13802_v3 }
 0xbf5   : > { %v13798_v22 = vpop.xlane.xlu0 %13797 }
 0xbf6   : > { %v13803_v1 = vmul.f32 0.03125, %v13798_v22  ;;  %v13808_v24 = vmul.f32 %v13805_v12, %v13805_v12 }
 0xbf8   : > { %v13806_v56 = vsub.f32 %v13791_v19, %v13803_v1  ;;  %v13811_v48 = vsel %vm296_vm1, %v13808_v24, 0.0 }
 0xbf9   : > { %13812 = vadd.xlane.f32.xlu0 %v13811_v48  ;;  %v13801_v2 = vpop.xlane.xlu1 %13800 }
 0xbfa   : > { %v13804_v27 = vmul.f32 0.03125, %v13801_v2  ;;  %v13809_v30 = vmul.f32 %v13806_v56, %v13806_v56 }
 0xbfc   : > { %v13807_v33 = vsub.f32 %v13792_v31, %v13804_v27  ;;  %v13814_v34 = vsel %vm296_vm1, %v13809_v30, 0.0 }
 0xbfd   : > { %13815 = vadd.xlane.f32.xlu1 %v13814_v34 }
 0xbfe   : > { %v13810_v53 = vmul.f32 %v13807_v33, %v13807_v33 }
 0xc00   : > { %v13817_v0 = vsel %vm296_vm1, %v13810_v53, 0.0 }
 0xc01   : > { %13818 = vadd.xlane.f32.xlu0 %v13817_v0 }
 0xc86   : > { %v13813_v35 = vpop.xlane.xlu0 %13812 }
 0xc87   : > { %v13820_v57 = vmul.f32 0.03125, %v13813_v35 }
 0xc89   : > { %v13823_v36 = vadd.f32 1e-05, %v13820_v57 }
 0xc8a   : > { %v13816_v8 = vpop.xlane.xlu1 %13815 }
 0xc8b   : > { %16029 = vrsqrt.f32 %v13823_v36  ;;  %v13821_v37 = vmul.f32 0.03125, %v13816_v8 }
 0xc8d   : > { %v13824_v38 = vadd.f32 1e-05, %v13821_v37 }
 0xc8e   : > { %v13819_v39 = vpop.xlane.xlu0 %13818 }
 0xc8f   : > { %16031 = vrsqrt.f32 %v13824_v38  ;;  %v13822_v40 = vmul.f32 0.03125, %v13819_v39 }
 0xc91   : > { %v13825_v10 = vadd.f32 1e-05, %v13822_v40 }
 0xc93   : > { %16033 = vrsqrt.f32 %v13825_v10 }
 0xc95   : > { %v16030_v44 = vpop.eup %16029 }
 0xc96   : > { %v13829_v16 = vmul.f32 %v16030_v44, %v13805_v12 }
 0xc98   : > { %v13836_v42 = vmul.f32 %v13918_v7, %v13829_v16 }
 0xc99   : > { %v16032_v11 = vpop.eup %16031 }
 0xc9a   : > { %v13843_v58 = vadd.f32 %v13919_v50, %v13836_v42  ;;  %v13830_v43 = vmul.f32 %v16032_v11, %v13806_v56 }
 0xc9c   : > { %13846 = vst.msk [vmem:[%s280_s27] sm:$0xff] %vm296_vm1, %v13843_v58  ;;  %v13837_v46 = vmul.f32 %v13918_v7, %v13830_v43 }
 0xc9d   : > { %v16034_v18 = vpop.eup %16033 }
 0xc9e   : > { %v13844_v45 = vadd.f32 %v13919_v50, %v13837_v46  ;;  %v13831_v29 = vmul.f32 %v16034_v18, %v13807_v33 }
 0xca0   : > { %13847 = vst.msk [vmem:[%s280_s27 + $0x8] sm:$0xff] %vm296_vm1, %v13844_v45  ;;  %v13838_v41 = vmul.f32 %v13918_v7, %v13831_v29 }
 0xca2   : > { %v13845_v47 = vadd.f32 %v13919_v50, %v13838_v41 }
 0xca4   : > { %13848 = vst.msk [vmem:[%s280_s27 + $0x10] sm:$0xff] %vm296_vm1, %v13845_v47 }
 0xca5 PF: > { %s17_s24 = sadd.s32 1, %s16044_s24  }
 0xca6   : > { %p14_p4 = scmp.ge.s32.totalorder %s17_s24, 4  }
 0xca8   :  { %16 = sbr.rel (!%p14_p4) target bundleno = 1 (0x1), region = 78 }

</bundles_post_ra>
